<compile_context>
chip_gen: v7x
topology: tpu7x:2x2x1
jax: 0.10.0
libtpu: 0.0.40
codegen_flags: <defaults>
</compile_context>

<pallas_src>
import functools
import math

import jax
import jax.numpy as jnp
from jax.experimental import pallas as pl
from jax.experimental.pallas import tpu as pltpu


# ----------------------------------------------------------------------------
# helpers
# ----------------------------------------------------------------------------
def _nbytes(shape, dtype):
    return math.prod(shape) * jnp.dtype(dtype).itemsize


def _vmem_limit_bytes(*entries):
    """entries: (shape, dtype, multiplicity). Footprint-derived VMEM limit."""
    need = sum(m * _nbytes(s, d) for (s, d, m) in entries)
    # 2x for double-buffering slack + compiler-internal headroom.
    return int(min(max(2 * need + (4 << 20), 16 << 20), 100 << 20))


def _pad_cout(W, cout):
    """Smallest cout' >= cout with (W*cout') % 128 == 0 (lane-dense stores),
    but only if the padding is modest."""
    g = 128 // math.gcd(W, 128)
    cpad = ((cout + g - 1) // g) * g
    if cpad <= 2 * cout or (cpad - cout) <= 8:
        return cpad
    return cout


def _fold_band(w, W):
    """Fold the kW taps of a 'same'-padded conv into a banded weight.

    w: (kT, kH, kW, Cin, Cout) f32 -> (kT, kH, W*Cin, W*Cout) f32 with
    band[s*Cin+c, d*Cout+o] = sum_kw w[.., kw, c, o] * [s == d + kw - pw]
    (out-of-range source positions contribute zero -> no W padding needed).
    """
    kT, kH, kW, Cin, Cout = w.shape
    pw = kW // 2
    sel = (jnp.arange(W)[None, :, None]
           == (jnp.arange(W)[None, None, :]
               + jnp.arange(kW)[:, None, None] - pw)).astype(jnp.float32)
    wb = jnp.einsum('thkco,ksd->thscdo', w.astype(jnp.float32), sel)
    return wb.reshape(kT, kH, W * Cin, W * Cout)


# ----------------------------------------------------------------------------
# generic Conv3d('same') + PReLU kernel (banded over W, lane-dense output)
# ----------------------------------------------------------------------------
def _make_conv3d_prelu_kernel(kT, kH, T, H, W, Cin, CoutP, Tp, Hp, cdtype):
    pt, ph = kT // 2, kH // 2
    WK, WN = W * Cin, W * CoutP

    def kernel(x_ref, wb_ref, b_ref, alpha_ref, o_ref, xs_ref):
        # x_ref : (T, H, W*Cin)            cdtype (batch squeezed)
        # wb_ref: (kT, kH, W*Cin, W*CoutP) cdtype banded weight
        # b_ref : (1, W*CoutP)             f32 bias tiled along W
        # alpha_ref: (1, 1)                f32 (SMEM) shared PReLU slope
        # o_ref : (T*H, W*CoutP)           lane-dense output slab
        # xs_ref: (Tp, Hp, W*Cin)          cdtype scratch ('same'-padded copy)

        # Zero ONLY the halo slices; interior is fully overwritten every step.
        if pt > 0:
            xs_ref[0:pt] = jnp.zeros((pt, Hp, WK), cdtype)
            xs_ref[pt + T:Tp] = jnp.zeros((pt, Hp, WK), cdtype)
        if ph > 0:
            xs_ref[pt:pt + T, 0:ph] = jnp.zeros((T, ph, WK), cdtype)
            xs_ref[pt:pt + T, ph + H:Hp] = jnp.zeros((T, ph, WK), cdtype)
        # Lane-aligned interior copy (W boundary folded into the band weight).
        xs_ref[pt:pt + T, ph:ph + H, :] = x_ref[...]

        acc = jnp.zeros((T * H, WN), jnp.float32)
        for kt in range(kT):          # <= 3 taps
            for kh in range(kH):      # <= 3 taps
                xs = xs_ref[kt:kt + T, kh:kh + H, :].reshape(T * H, WK)
                acc = acc + jnp.dot(xs, wb_ref[kt, kh],
                                    preferred_element_type=jnp.float32)
        acc = acc + b_ref[...]
        alpha = alpha_ref[0, 0]
        acc = jnp.where(acc >= 0.0, acc, alpha * acc)
        o_ref[...] = acc.astype(o_ref.dtype)

    return kernel


def conv3d_prelu_banded(x, layer, cout, out_dtype=jnp.bfloat16):
    """x: (N, T, H, W, Cin); layer: {'w': banded weight, 'b': tiled bias,
    'a': (1,1) alpha}.  Returns (N, T, H, W, cout) in out_dtype."""
    wband, b_tiled, alpha = layer["w"], layer["b"], layer["a"]
    N, T, H, W, Cin = x.shape
    kT, kH, K, NP = wband.shape
    assert K == W * Cin
    coutp = NP // W
    cdtype = wband.dtype
    pt, ph = kT // 2, kH // 2
    Tp, Hp = T + 2 * pt, H + 2 * ph

    x_flat = x.reshape(N, T, H, W * Cin).astype(cdtype)
    kernel = _make_conv3d_prelu_kernel(kT, kH, T, H, W, Cin, coutp, Tp, Hp,
                                       cdtype)
    vmem = _vmem_limit_bytes(
        ((T, H, W * Cin), cdtype, 2),
        (wband.shape, cdtype, 1),
        (b_tiled.shape, jnp.float32, 1),
        ((T * H, NP), out_dtype, 2),
        ((Tp, Hp, W * Cin), cdtype, 1),
    )

    # TODO(synk): at production VFI resolutions add H (and output-W/K) tiling
    #             with halos so the band weight / scratch stay under v7x's
    #             64 MiB VMEM, both TensorCores get work at N=1, and the
    #             per-matmul K/N match the MXU depth (128 on v5e, 256 on v6e/v7x).
    out = pl.pallas_call(
        kernel,
        out_shape=jax.ShapeDtypeStruct((N, T * H, W * coutp), out_dtype),
        grid=(N,),
        in_specs=[
            pl.BlockSpec((pl.Squeezed(), T, H, W * Cin),
                         lambda n: (n, 0, 0, 0)),
            pl.BlockSpec((kT, kH, W * Cin, W * coutp),
                         lambda n: (0, 0, 0, 0)),
            pl.BlockSpec((1, W * coutp), lambda n: (0, 0)),
            pl.BlockSpec(memory_space=pltpu.MemorySpace.SMEM),
        ],
        out_specs=pl.BlockSpec((pl.Squeezed(), T * H, W * coutp),
                               lambda n: (n, 0, 0)),
        scratch_shapes=[pltpu.VMEM((Tp, Hp, W * Cin), cdtype)],
        compiler_params=pltpu.CompilerParams(
            dimension_semantics=("parallel",),
            vmem_limit_bytes=vmem),
    )(x_flat, wband, b_tiled, alpha)

    out = out.reshape(N, T, H, W, coutp)
    if coutp != cout:
        out = out[..., :cout]
    return out


# ----------------------------------------------------------------------------
# fused backbone block: (1,3,3) conv+PReLU -> (3,1,1) conv+PReLU -> residual
# ----------------------------------------------------------------------------
def _make_backbone_block_kernel(T, H, WC):
    Hp, Tp = H + 2, T + 2

    def kernel(x_ref, w1_ref, b1_ref, a1_ref, w2_ref, b2_ref, a2_ref,
               o_ref, xs_ref, ys_ref):
        # ---- spatial (1,3,3) conv + PReLU ----
        xs_ref[:, 0:1] = jnp.zeros((T, 1, WC), jnp.bfloat16)
        xs_ref[:, 1 + H:Hp] = jnp.zeros((T, 1, WC), jnp.bfloat16)
        xs_ref[:, 1:1 + H, :] = x_ref[...]
        acc = jnp.zeros((T * H, WC), jnp.float32)
        for kh in range(3):
            xs = xs_ref[:, kh:kh + H, :].reshape(T * H, WC)
            acc = acc + jnp.dot(xs, w1_ref[kh],
                                preferred_element_type=jnp.float32)
        acc = acc + b1_ref[...]
        a1 = a1_ref[0, 0]
        y1 = jnp.where(acc >= 0.0, acc, a1 * acc).astype(jnp.bfloat16)

        # ---- temporal (3,1,1) conv + PReLU ----
        ys_ref[0:1] = jnp.zeros((1, H, WC), jnp.bfloat16)
        ys_ref[1 + T:Tp] = jnp.zeros((1, H, WC), jnp.bfloat16)
        ys_ref[1:1 + T] = y1.reshape(T, H, WC)
        acc2 = jnp.zeros((T * H, WC), jnp.float32)
        for kt in range(3):
            ys = ys_ref[kt:kt + T].reshape(T * H, WC)
            acc2 = acc2 + jnp.dot(ys, w2_ref[kt],
                                  preferred_element_type=jnp.float32)
        acc2 = acc2 + b2_ref[...]
        a2 = a2_ref[0, 0]
        y2 = jnp.where(acc2 >= 0.0, acc2, a2 * acc2)

        # ---- residual add (fused; no extra HBM round-trip) ----
        xres = x_ref[...].reshape(T * H, WC).astype(jnp.float32)
        o_ref[...] = (xres + y2).astype(o_ref.dtype)

    return kernel


def backbone_block(x, blk):
    """x: (N, T, H, W, C) bf16-ish. One fused pallas_call per residual block."""
    N, T, H, W, C = x.shape
    WC = W * C
    x_flat = x.reshape(N, T, H, WC).astype(jnp.bfloat16)
    kernel = _make_backbone_block_kernel(T, H, WC)
    vmem = _vmem_limit_bytes(
        ((T, H, WC), jnp.bfloat16, 2),
        ((3, WC, WC), jnp.bfloat16, 2),
        ((1, WC), jnp.float32, 2),
        ((T * H, WC), jnp.bfloat16, 2),
        ((T, H + 2, WC), jnp.bfloat16, 1),
        ((T + 2, H, WC), jnp.bfloat16, 1),
    )
    out = pl.pallas_call(
        kernel,
        out_shape=jax.ShapeDtypeStruct((N, T * H, WC), jnp.bfloat16),
        grid=(N,),
        in_specs=[
            pl.BlockSpec((pl.Squeezed(), T, H, WC), lambda n: (n, 0, 0, 0)),
            pl.BlockSpec((3, WC, WC), lambda n: (0, 0, 0)),
            pl.BlockSpec((1, WC), lambda n: (0, 0)),
            pl.BlockSpec(memory_space=pltpu.MemorySpace.SMEM),
            pl.BlockSpec((3, WC, WC), lambda n: (0, 0, 0)),
            pl.BlockSpec((1, WC), lambda n: (0, 0)),
            pl.BlockSpec(memory_space=pltpu.MemorySpace.SMEM),
        ],
        out_specs=pl.BlockSpec((pl.Squeezed(), T * H, WC),
                               lambda n: (n, 0, 0)),
        scratch_shapes=[pltpu.VMEM((T, H + 2, WC), jnp.bfloat16),
                        pltpu.VMEM((T + 2, H, WC), jnp.bfloat16)],
        compiler_params=pltpu.CompilerParams(
            dimension_semantics=("parallel",),
            vmem_limit_bytes=vmem),
    )(x_flat, blk["w1"], blk["b1"], blk["a1"],
      blk["w2"], blk["b2"], blk["a2"])
    return out.reshape(N, T, H, W, C)


# ----------------------------------------------------------------------------
# fused "fuse" stage: prelu(conv3(bb)) + prelu(conv3(feats)) in one kernel
# ----------------------------------------------------------------------------
def _make_fuse_block_kernel(T, H, W, Cin, CoutP, Tp, Hp):
    WK, WN = W * Cin, W * CoutP

    def kernel(bb_ref, ft_ref, wo_ref, bo_ref, ao_ref,
               wi_ref, bi_ref, ai_ref, o_ref, xs_ref):
        # Zero the halos once; both convs fully overwrite the interior.
        xs_ref[0:1] = jnp.zeros((1, Hp, WK), jnp.bfloat16)
        xs_ref[1 + T:Tp] = jnp.zeros((1, Hp, WK), jnp.bfloat16)
        xs_ref[1:1 + T, 0:1] = jnp.zeros((T, 1, WK), jnp.bfloat16)
        xs_ref[1:1 + T, 1 + H:Hp] = jnp.zeros((T, 1, WK), jnp.bfloat16)

        def conv(x, w_ref, b_ref, a_ref):
            xs_ref[1:1 + T, 1:1 + H, :] = x
            acc = jnp.zeros((T * H, WN), jnp.float32)
            for kt in range(3):
                for kh in range(3):
                    xs = xs_ref[kt:kt + T, kh:kh + H, :].reshape(T * H, WK)
                    acc = acc + jnp.dot(xs, w_ref[kt, kh],
                                        preferred_element_type=jnp.float32)
            acc = acc + b_ref[...]
            a = a_ref[0, 0]
            return jnp.where(acc >= 0.0, acc, a * acc)

        yo = conv(bb_ref[...], wo_ref, bo_ref, ao_ref)   # fuse_channel_out(bb)
        yi = conv(ft_ref[...], wi_ref, bi_ref, ai_ref)   # fuse_channel_in(feats)
        o_ref[...] = (yo + yi).astype(o_ref.dtype)

    return kernel


def fuse_block(bb, feats, layer_out, layer_in, cout):
    N, T, H, W, Cin = bb.shape
    wo, bo, ao = layer_out["w"], layer_out["b"], layer_out["a"]
    wi, bi, ai = layer_in["w"], layer_in["b"], layer_in["a"]
    coutp = wo.shape[-1] // W
    Tp, Hp = T + 2, H + 2
    WK, WN = W * Cin, W * coutp

    bb_flat = bb.reshape(N, T, H, WK).astype(jnp.bfloat16)
    ft_flat = feats.reshape(N, T, H, WK).astype(jnp.bfloat16)
    kernel = _make_fuse_block_kernel(T, H, W, Cin, coutp, Tp, Hp)
    vmem = _vmem_limit_bytes(
        ((T, H, WK), jnp.bfloat16, 4),
        ((3, 3, WK, WN), jnp.bfloat16, 2),
        ((1, WN), jnp.float32, 2),
        ((T * H, WN), jnp.bfloat16, 2),
        ((Tp, Hp, WK), jnp.bfloat16, 1),
    )
    out = pl.pallas_call(
        kernel,
        out_shape=jax.ShapeDtypeStruct((N, T * H, WN), jnp.bfloat16),
        grid=(N,),
        in_specs=[
            pl.BlockSpec((pl.Squeezed(), T, H, WK), lambda n: (n, 0, 0, 0)),
            pl.BlockSpec((pl.Squeezed(), T, H, WK), lambda n: (n, 0, 0, 0)),
            pl.BlockSpec((3, 3, WK, WN), lambda n: (0, 0, 0, 0)),
            pl.BlockSpec((1, WN), lambda n: (0, 0)),
            pl.BlockSpec(memory_space=pltpu.MemorySpace.SMEM),
            pl.BlockSpec((3, 3, WK, WN), lambda n: (0, 0, 0, 0)),
            pl.BlockSpec((1, WN), lambda n: (0, 0)),
            pl.BlockSpec(memory_space=pltpu.MemorySpace.SMEM),
        ],
        out_specs=pl.BlockSpec((pl.Squeezed(), T * H, WN),
                               lambda n: (n, 0, 0)),
        scratch_shapes=[pltpu.VMEM((Tp, Hp, WK), jnp.bfloat16)],
        compiler_params=pltpu.CompilerParams(
            dimension_semantics=("parallel",),
            vmem_limit_bytes=vmem),
    )(bb_flat, ft_flat, wo, bo, ao, wi, bi, ai)

    out = out.reshape(N, T, H, W, coutp)
    if coutp != cout:
        out = out[..., :cout]
    return out


# ----------------------------------------------------------------------------
# Space-time pixel (un)shuffle (r=1, s=2) -- pure layout glue (XLA transpose)
# ----------------------------------------------------------------------------
def space_time_pixel_unshuffle(x, s=2):
    # (N, T, H, W, C) -> (N, T, H//s, W//s, C*s*s), channel order (C, sh, sw)
    # TODO(synk): verify (C, sh, sw) ordering matches the original STPS/UNSTPS.
    N, T, H, W, C = x.shape
    x = x.reshape(N, T, H // s, s, W // s, s, C)
    x = jnp.transpose(x, (0, 1, 2, 4, 6, 3, 5))
    return x.reshape(N, T, H // s, W // s, C * s * s)


def space_time_pixel_shuffle(x, s=2):
    # exact inverse of space_time_pixel_unshuffle
    N, T, H, W, Cs = x.shape
    C = Cs // (s * s)
    x = x.reshape(N, T, H, W, C, s, s)
    x = jnp.transpose(x, (0, 1, 2, 5, 3, 6, 4))
    return x.reshape(N, T, H * s, W * s, C)


# ----------------------------------------------------------------------------
# Deterministic parameter init (no checkpoint loading)
# ----------------------------------------------------------------------------
def _conv_params(key, kT, kH, kW, cin, cout, alpha_init=0.25):
    kw_key, kb_key = jax.random.split(key)
    fan_in = kT * kH * kW * cin
    w = jax.random.normal(kw_key, (kT, kH, kW, cin, cout),
                          jnp.float32) / jnp.sqrt(float(fan_in))
    b = jax.random.normal(kb_key, (1, cout), jnp.float32) * 0.01
    a = jnp.full((1, 1), alpha_init, jnp.float32)   # nn.PReLU() default 0.25
    return {"w": w, "b": b, "a": a}


def init_strev_up_params(key, opt):
    mid, fuse, in_c = opt["mid_channels"], opt["fuse_channels"], opt["in_channels"]
    nres = opt["three_D_res_num"]
    keys = jax.random.split(key, 5 + 2 * nres)
    params = {"first": _conv_params(keys[0], 3, 3, 3, in_c, mid // 4),
              "backbone": []}
    for i in range(nres):
        params["backbone"].append({
            "s": _conv_params(keys[1 + 2 * i], 1, 3, 3, mid, mid),
            "t": _conv_params(keys[2 + 2 * i], 3, 1, 1, mid, mid),
        })
    params["fuse_in"] = _conv_params(keys[1 + 2 * nres], 3, 3, 3, mid, fuse * 4)
    params["fuse_out"] = _conv_params(keys[2 + 2 * nres], 3, 3, 3, mid, fuse * 4)
    params["head1"] = _conv_params(keys[3 + 2 * nres], 3, 3, 3, fuse, fuse)
    # final conv of the head is linear (alpha = 1.0 makes PReLU an identity)
    params["head_last"] = _conv_params(keys[4 + 2 * nres], 3, 3, 3, fuse, 3,
                                       alpha_init=1.0)
    return params


# ----------------------------------------------------------------------------
# One-time weight preparation (band fold + bias tiling hoisted off the forward)
# ----------------------------------------------------------------------------
def _prep_conv(p, W, compute_dtype):
    w, b, a = p["w"], p["b"], p["a"]
    kT, kH, kW, Cin, Cout = w.shape
    coutp = _pad_cout(W, Cout)
    if coutp != Cout:   # zero-pad Cout so the output slab is a multiple of 128 lanes
        w = jnp.pad(w, ((0, 0),) * 4 + ((0, coutp - Cout),))
        b = jnp.pad(b, ((0, 0), (0, coutp - Cout)))
    wband = _fold_band(w, W).astype(compute_dtype)       # (kT,kH,W*Cin,W*coutp)
    b_tiled = jnp.tile(b.astype(jnp.float32), (1, W))    # (1, W*coutp)
    return {"w": wband, "b": b_tiled, "a": a.astype(jnp.float32)}


def _prep_backbone_block(blk, W):
    C = blk["s"]["w"].shape[3]
    WC = W * C
    w1 = _fold_band(blk["s"]["w"], W).astype(jnp.bfloat16).reshape(3, WC, WC)
    w2 = _fold_band(blk["t"]["w"], W).astype(jnp.bfloat16).reshape(3, WC, WC)
    return {"w1": w1,
            "b1": jnp.tile(blk["s"]["b"].astype(jnp.float32), (1, W)),
            "a1": blk["s"]["a"].astype(jnp.float32),
            "w2": w2,
            "b2": jnp.tile(blk["t"]["b"].astype(jnp.float32), (1, W)),
            "a2": blk["t"]["a"].astype(jnp.float32)}


def prepare_strev_up_params(params, in_spatial, target_size):
    """Runs once (outside the jitted forward): folds every conv's kW taps into
    a banded weight for its stage's W and tiles the biases."""
    _, W = in_spatial
    W1 = W // 2
    _, tW = target_size
    prep = {
        "first": _prep_conv(params["first"], W, jnp.float32),
        "backbone": [_prep_backbone_block(blk, W1) for blk in params["backbone"]],
        "fuse_out": _prep_conv(params["fuse_out"], W1, jnp.bfloat16),
        "fuse_in": _prep_conv(params["fuse_in"], W1, jnp.bfloat16),
        "head1": _prep_conv(params["head1"], W, jnp.bfloat16),
        "head_last": _prep_conv(params["head_last"], tW, jnp.float32),
    }
    return prep


# ----------------------------------------------------------------------------
# STREV_up forward
# ----------------------------------------------------------------------------
def make_strev_up_forward(opt):
    mid = opt["mid_channels"]
    fuse = opt["fuse_channels"]

    @functools.partial(jax.jit, static_argnames=("target_size",))
    def forward(prepared, imgs, *, target_size):
        """imgs: (N, C, T, H, W) PyTorch NCDHW. Returns (N, 3, T, tH, tW) f32."""
        x = jnp.transpose(imgs, (0, 2, 3, 4, 1)).astype(jnp.float32)   # NTHWC

        # first_block: Conv3d(in, mid//4, 3) + PReLU  (f32 MXU for PSNR)
        feats = conv3d_prelu_banded(x, prepared["first"], cout=mid // 4)

        # UNSTPS(r=1, s=2)
        feats = space_time_pixel_unshuffle(feats, s=2)

        # dense3d_backbone: stack of D2DTInput residual blocks (fused kernels)
        # TODO(synk): D2DTInput source not provided; assumed residual block of
        #             (1,3,3) conv + PReLU followed by (3,1,1) conv + PReLU.
        bb = feats
        for blk in prepared["backbone"]:
            bb = backbone_block(bb, blk)

        # fuse_channel_out(backbone) + fuse_channel_in(feats), add fused in-kernel
        feats = fuse_block(bb, feats, prepared["fuse_out"], prepared["fuse_in"],
                           cout=fuse * 4)

        # STPS(r=1, s=2)
        feats = space_time_pixel_shuffle(feats, s=2)

        # head = ModuleNet3D(in_channel=fuse_channels)
        # TODO(synk): ModuleNet3D source not provided; assumed conv+PReLU,
        #             bilinear spatial resize to target_size, then linear conv -> 3.
        h = conv3d_prelu_banded(feats, prepared["head1"], cout=fuse)
        N, T, H, W, C = h.shape
        tH, tW = target_size
        h = jax.image.resize(h.astype(jnp.float32), (N, T, tH, tW, C),
                             method="bilinear")
        out = conv3d_prelu_banded(h, prepared["head_last"], cout=3,
                                  out_dtype=jnp.float32)   # alpha=1 -> linear

        return jnp.transpose(out, (0, 4, 1, 2, 3)).astype(jnp.float32)  # NCDHW

    return forward


# ----------------------------------------------------------------------------
if __name__ == "__main__":
    opt = {
        "in_channels": 3,
        "mid_channels": 16,     # mid_channels // 4 = 4 channels after first block
        "fuse_channels": 8,     # fuse_channels * 4 = 32 before STPS
        "three_D_res_num": 2,
    }
    key = jax.random.PRNGKey(0)
    pkey, xkey = jax.random.split(key)
    params = init_strev_up_params(pkey, opt)

    N, C, T, H, W = 2, opt["in_channels"], 4, 16, 16
    target_size = (32, 32)      # spatial target for the head's upsampling

    prepared = prepare_strev_up_params(params, (H, W), target_size)
    forward = make_strev_up_forward(opt)

    imgs = jax.random.normal(xkey, (N, C, T, H, W), jnp.float32)
    out = forward(prepared, imgs, target_size=target_size)
    out = jax.block_until_ready(out)

    assert out.shape == (N, 3, T, target_size[0], target_size[1]), out.shape
    assert bool(jnp.all(jnp.isfinite(out)))
    print("KERNEL_OK")
</pallas_src>

<mosaic_0001>
module attributes {stable_mosaic.version = 11 : i64} {
  func.func @kernel(%arg0: i32, %arg1: memref<1x4x16x48xf32, #tpu.memory_space<vmem>>, %arg2: memref<3x3x48x128xf32, #tpu.memory_space<vmem>>, %arg3: memref<1x128xf32, #tpu.memory_space<vmem>>, %arg4: memref<1x1xf32, #tpu.memory_space<smem>>, %arg5: memref<1x64x128xbf16, #tpu.memory_space<vmem>>, %arg6: memref<6x18x48xf32, #tpu.memory_space<vmem>>) attributes {dimension_semantics = [#tpu.dimension_semantics<parallel>], iteration_bounds = array<i64: 2>, scalar_prefetch = 0 : i64, scratch_operands = 1 : i64, tpu.core_type = #tpu.core_type<tc>, window_params = [{transform_indices = @transform_0, window_bounds = array<i64: 1, 4, 16, 48>}, {pipeline_mode = #tpu.pipeline_mode<synchronous>, transform_indices = @transform_1, window_bounds = array<i64: 3, 3, 48, 128>}, {pipeline_mode = #tpu.pipeline_mode<synchronous>, transform_indices = @transform_2, window_bounds = array<i64: 1, 128>}, {transform_indices = @transform_3, window_bounds = array<i64: 1, 1>}, {transform_indices = @transform_4, window_bounds = array<i64: 1, 64, 128>}]} {
    %cst = arith.constant 0.000000e+00 : f32
    %0 = vector.broadcast %cst : f32 to vector<1x18x48xf32>
    %c0 = arith.constant 0 : index
    %c0_0 = arith.constant 0 : index
    %c0_1 = arith.constant 0 : index
    %1 = vector.load %arg6[%c0, %c0_0, %c0_1] : memref<6x18x48xf32, #tpu.memory_space<vmem>>, vector<1x18x48xf32>
    tpu.vector_store %arg6[%c0, %c0_0, %c0_1], %0 {strides = array<i32>} : memref<6x18x48xf32, #tpu.memory_space<vmem>>, vector<1x18x48xf32>,
    %cst_2 = arith.constant 0.000000e+00 : f32
    %2 = vector.broadcast %cst_2 : f32 to vector<1x18x48xf32>
    %c5 = arith.constant 5 : index
    %c0_3 = arith.constant 0 : index
    %c0_4 = arith.constant 0 : index
    %3 = vector.load %arg6[%c5, %c0_3, %c0_4] : memref<6x18x48xf32, #tpu.memory_space<vmem>>, vector<1x18x48xf32>
    tpu.vector_store %arg6[%c5, %c0_3, %c0_4], %2 {strides = array<i32>} : memref<6x18x48xf32, #tpu.memory_space<vmem>>, vector<1x18x48xf32>,
    %cst_5 = arith.constant 0.000000e+00 : f32
    %4 = vector.broadcast %cst_5 : f32 to vector<4x1x48xf32>
    %c1 = arith.constant 1 : index
    %c0_6 = arith.constant 0 : index
    %c0_7 = arith.constant 0 : index
    %5 = vector.load %arg6[%c1, %c0_6, %c0_7] : memref<6x18x48xf32, #tpu.memory_space<vmem>>, vector<4x1x48xf32>
    tpu.vector_store %arg6[%c1, %c0_6, %c0_7], %4 {strides = array<i32>} : memref<6x18x48xf32, #tpu.memory_space<vmem>>, vector<4x1x48xf32>,
    %cst_8 = arith.constant 0.000000e+00 : f32
    %6 = vector.broadcast %cst_8 : f32 to vector<4x1x48xf32>
    %c1_9 = arith.constant 1 : index
    %c17 = arith.constant 17 : index
    %c0_10 = arith.constant 0 : index
    %7 = vector.load %arg6[%c1_9, %c17, %c0_10] : memref<6x18x48xf32, #tpu.memory_space<vmem>>, vector<4x1x48xf32>
    tpu.vector_store %arg6[%c1_9, %c17, %c0_10], %6 {strides = array<i32>} : memref<6x18x48xf32, #tpu.memory_space<vmem>>, vector<4x1x48xf32>,
    %c0_11 = arith.constant 0 : index
    %c0_12 = arith.constant 0 : index
    %c0_13 = arith.constant 0 : index
    %c0_14 = arith.constant 0 : index
    %8 = vector.load %arg1[%c0_11, %c0_12, %c0_13, %c0_14] : memref<1x4x16x48xf32, #tpu.memory_space<vmem>>, vector<1x4x16x48xf32>
    %9 = vector.shape_cast %8 : vector<1x4x16x48xf32> to vector<4x16x48xf32>
    %c1_15 = arith.constant 1 : index
    %c1_16 = arith.constant 1 : index
    %c0_17 = arith.constant 0 : index
    %10 = vector.load %arg6[%c1_15, %c1_16, %c0_17] : memref<6x18x48xf32, #tpu.memory_space<vmem>>, vector<4x16x48xf32>
    tpu.vector_store %arg6[%c1_15, %c1_16, %c0_17], %9 {strides = array<i32>} : memref<6x18x48xf32, #tpu.memory_space<vmem>>, vector<4x16x48xf32>,
    %cst_18 = arith.constant 0.000000e+00 : f32
    %11 = vector.broadcast %cst_18 : f32 to vector<64x128xf32>
    %c0_19 = arith.constant 0 : index
    %c0_20 = arith.constant 0 : index
    %c0_21 = arith.constant 0 : index
    %12 = vector.load %arg6[%c0_19, %c0_20, %c0_21] : memref<6x18x48xf32, #tpu.memory_space<vmem>>, vector<4x16x48xf32>
    %13 = vector.shape_cast %12 : vector<4x16x48xf32> to vector<64x48xf32>
    %c0_22 = arith.constant 0 : index
    %c0_23 = arith.constant 0 : index
    %c0_24 = arith.constant 0 : index
    %c0_25 = arith.constant 0 : index
    %14 = vector.load %arg2[%c0_22, %c0_23, %c0_24, %c0_25] : memref<3x3x48x128xf32, #tpu.memory_space<vmem>>, vector<1x1x48x128xf32>
    %15 = vector.shape_cast %14 : vector<1x1x48x128xf32> to vector<48x128xf32>
    %cst_26 = arith.constant dense<0.000000e+00> : vector<64x128xf32>
    %16 = tpu.matmul %13, %15, %cst_26 {dimension_numbers = #tpu.dot_dimension_numbers<[1], [0], [0], [1], [0, 0, 1, 1], [], []>} : vector<64x48xf32>, vector<48x128xf32>, vector<64x128xf32> -> vector<64x128xf32>
    %17 = arith.addf %11, %16 : vector<64x128xf32>
    %c0_27 = arith.constant 0 : index
    %c1_28 = arith.constant 1 : index
    %c0_29 = arith.constant 0 : index
    %18 = vector.load %arg6[%c0_27, %c1_28, %c0_29] : memref<6x18x48xf32, #tpu.memory_space<vmem>>, vector<4x16x48xf32>
    %19 = vector.shape_cast %18 : vector<4x16x48xf32> to vector<64x48xf32>
    %c0_30 = arith.constant 0 : index
    %c1_31 = arith.constant 1 : index
    %c0_32 = arith.constant 0 : index
    %c0_33 = arith.constant 0 : index
    %20 = vector.load %arg2[%c0_30, %c1_31, %c0_32, %c0_33] : memref<3x3x48x128xf32, #tpu.memory_space<vmem>>, vector<1x1x48x128xf32>
    %21 = vector.shape_cast %20 : vector<1x1x48x128xf32> to vector<48x128xf32>
    %cst_34 = arith.constant dense<0.000000e+00> : vector<64x128xf32>
    %22 = tpu.matmul %19, %21, %cst_34 {dimension_numbers = #tpu.dot_dimension_numbers<[1], [0], [0], [1], [0, 0, 1, 1], [], []>} : vector<64x48xf32>, vector<48x128xf32>, vector<64x128xf32> -> vector<64x128xf32>
    %23 = arith.addf %17, %22 : vector<64x128xf32>
    %c0_35 = arith.constant 0 : index
    %c2 = arith.constant 2 : index
    %c0_36 = arith.constant 0 : index
    %24 = vector.load %arg6[%c0_35, %c2, %c0_36] : memref<6x18x48xf32, #tpu.memory_space<vmem>>, vector<4x16x48xf32>
    %25 = vector.shape_cast %24 : vector<4x16x48xf32> to vector<64x48xf32>
    %c0_37 = arith.constant 0 : index
    %c2_38 = arith.constant 2 : index
    %c0_39 = arith.constant 0 : index
    %c0_40 = arith.constant 0 : index
    %26 = vector.load %arg2[%c0_37, %c2_38, %c0_39, %c0_40] : memref<3x3x48x128xf32, #tpu.memory_space<vmem>>, vector<1x1x48x128xf32>
    %27 = vector.shape_cast %26 : vector<1x1x48x128xf32> to vector<48x128xf32>
    %cst_41 = arith.constant dense<0.000000e+00> : vector<64x128xf32>
    %28 = tpu.matmul %25, %27, %cst_41 {dimension_numbers = #tpu.dot_dimension_numbers<[1], [0], [0], [1], [0, 0, 1, 1], [], []>} : vector<64x48xf32>, vector<48x128xf32>, vector<64x128xf32> -> vector<64x128xf32>
    %29 = arith.addf %23, %28 : vector<64x128xf32>
    %c1_42 = arith.constant 1 : index
    %c0_43 = arith.constant 0 : index
    %c0_44 = arith.constant 0 : index
    %30 = vector.load %arg6[%c1_42, %c0_43, %c0_44] : memref<6x18x48xf32, #tpu.memory_space<vmem>>, vector<4x16x48xf32>
    %31 = vector.shape_cast %30 : vector<4x16x48xf32> to vector<64x48xf32>
    %c1_45 = arith.constant 1 : index
    %c0_46 = arith.constant 0 : index
    %c0_47 = arith.constant 0 : index
    %c0_48 = arith.constant 0 : index
    %32 = vector.load %arg2[%c1_45, %c0_46, %c0_47, %c0_48] : memref<3x3x48x128xf32, #tpu.memory_space<vmem>>, vector<1x1x48x128xf32>
    %33 = vector.shape_cast %32 : vector<1x1x48x128xf32> to vector<48x128xf32>
    %cst_49 = arith.constant dense<0.000000e+00> : vector<64x128xf32>
    %34 = tpu.matmul %31, %33, %cst_49 {dimension_numbers = #tpu.dot_dimension_numbers<[1], [0], [0], [1], [0, 0, 1, 1], [], []>} : vector<64x48xf32>, vector<48x128xf32>, vector<64x128xf32> -> vector<64x128xf32>
    %35 = arith.addf %29, %34 : vector<64x128xf32>
    %c1_50 = arith.constant 1 : index
    %c1_51 = arith.constant 1 : index
    %c0_52 = arith.constant 0 : index
    %36 = vector.load %arg6[%c1_50, %c1_51, %c0_52] : memref<6x18x48xf32, #tpu.memory_space<vmem>>, vector<4x16x48xf32>
    %37 = vector.shape_cast %36 : vector<4x16x48xf32> to vector<64x48xf32>
    %c1_53 = arith.constant 1 : index
    %c1_54 = arith.constant 1 : index
    %c0_55 = arith.constant 0 : index
    %c0_56 = arith.constant 0 : index
    %38 = vector.load %arg2[%c1_53, %c1_54, %c0_55, %c0_56] : memref<3x3x48x128xf32, #tpu.memory_space<vmem>>, vector<1x1x48x128xf32>
    %39 = vector.shape_cast %38 : vector<1x1x48x128xf32> to vector<48x128xf32>
    %cst_57 = arith.constant dense<0.000000e+00> : vector<64x128xf32>
    %40 = tpu.matmul %37, %39, %cst_57 {dimension_numbers = #tpu.dot_dimension_numbers<[1], [0], [0], [1], [0, 0, 1, 1], [], []>} : vector<64x48xf32>, vector<48x128xf32>, vector<64x128xf32> -> vector<64x128xf32>
    %41 = arith.addf %35, %40 : vector<64x128xf32>
    %c1_58 = arith.constant 1 : index
    %c2_59 = arith.constant 2 : index
    %c0_60 = arith.constant 0 : index
    %42 = vector.load %arg6[%c1_58, %c2_59, %c0_60] : memref<6x18x48xf32, #tpu.memory_space<vmem>>, vector<4x16x48xf32>
    %43 = vector.shape_cast %42 : vector<4x16x48xf32> to vector<64x48xf32>
    %c1_61 = arith.constant 1 : index
    %c2_62 = arith.constant 2 : index
    %c0_63 = arith.constant 0 : index
    %c0_64 = arith.constant 0 : index
    %44 = vector.load %arg2[%c1_61, %c2_62, %c0_63, %c0_64] : memref<3x3x48x128xf32, #tpu.memory_space<vmem>>, vector<1x1x48x128xf32>
    %45 = vector.shape_cast %44 : vector<1x1x48x128xf32> to vector<48x128xf32>
    %cst_65 = arith.constant dense<0.000000e+00> : vector<64x128xf32>
    %46 = tpu.matmul %43, %45, %cst_65 {dimension_numbers = #tpu.dot_dimension_numbers<[1], [0], [0], [1], [0, 0, 1, 1], [], []>} : vector<64x48xf32>, vector<48x128xf32>, vector<64x128xf32> -> vector<64x128xf32>
    %47 = arith.addf %41, %46 : vector<64x128xf32>
    %c2_66 = arith.constant 2 : index
    %c0_67 = arith.constant 0 : index
    %c0_68 = arith.constant 0 : index
    %48 = vector.load %arg6[%c2_66, %c0_67, %c0_68] : memref<6x18x48xf32, #tpu.memory_space<vmem>>, vector<4x16x48xf32>
    %49 = vector.shape_cast %48 : vector<4x16x48xf32> to vector<64x48xf32>
    %c2_69 = arith.constant 2 : index
    %c0_70 = arith.constant 0 : index
    %c0_71 = arith.constant 0 : index
    %c0_72 = arith.constant 0 : index
    %50 = vector.load %arg2[%c2_69, %c0_70, %c0_71, %c0_72] : memref<3x3x48x128xf32, #tpu.memory_space<vmem>>, vector<1x1x48x128xf32>
    %51 = vector.shape_cast %50 : vector<1x1x48x128xf32> to vector<48x128xf32>
    %cst_73 = arith.constant dense<0.000000e+00> : vector<64x128xf32>
    %52 = tpu.matmul %49, %51, %cst_73 {dimension_numbers = #tpu.dot_dimension_numbers<[1], [0], [0], [1], [0, 0, 1, 1], [], []>} : vector<64x48xf32>, vector<48x128xf32>, vector<64x128xf32> -> vector<64x128xf32>
    %53 = arith.addf %47, %52 : vector<64x128xf32>
    %c2_74 = arith.constant 2 : index
    %c1_75 = arith.constant 1 : index
    %c0_76 = arith.constant 0 : index
    %54 = vector.load %arg6[%c2_74, %c1_75, %c0_76] : memref<6x18x48xf32, #tpu.memory_space<vmem>>, vector<4x16x48xf32>
    %55 = vector.shape_cast %54 : vector<4x16x48xf32> to vector<64x48xf32>
    %c2_77 = arith.constant 2 : index
    %c1_78 = arith.constant 1 : index
    %c0_79 = arith.constant 0 : index
    %c0_80 = arith.constant 0 : index
    %56 = vector.load %arg2[%c2_77, %c1_78, %c0_79, %c0_80] : memref<3x3x48x128xf32, #tpu.memory_space<vmem>>, vector<1x1x48x128xf32>
    %57 = vector.shape_cast %56 : vector<1x1x48x128xf32> to vector<48x128xf32>
    %cst_81 = arith.constant dense<0.000000e+00> : vector<64x128xf32>
    %58 = tpu.matmul %55, %57, %cst_81 {dimension_numbers = #tpu.dot_dimension_numbers<[1], [0], [0], [1], [0, 0, 1, 1], [], []>} : vector<64x48xf32>, vector<48x128xf32>, vector<64x128xf32> -> vector<64x128xf32>
    %59 = arith.addf %53, %58 : vector<64x128xf32>
    %c2_82 = arith.constant 2 : index
    %c2_83 = arith.constant 2 : index
    %c0_84 = arith.constant 0 : index
    %60 = vector.load %arg6[%c2_82, %c2_83, %c0_84] : memref<6x18x48xf32, #tpu.memory_space<vmem>>, vector<4x16x48xf32>
    %61 = vector.shape_cast %60 : vector<4x16x48xf32> to vector<64x48xf32>
    %c2_85 = arith.constant 2 : index
    %c2_86 = arith.constant 2 : index
    %c0_87 = arith.constant 0 : index
    %c0_88 = arith.constant 0 : index
    %62 = vector.load %arg2[%c2_85, %c2_86, %c0_87, %c0_88] : memref<3x3x48x128xf32, #tpu.memory_space<vmem>>, vector<1x1x48x128xf32>
    %63 = vector.shape_cast %62 : vector<1x1x48x128xf32> to vector<48x128xf32>
    %cst_89 = arith.constant dense<0.000000e+00> : vector<64x128xf32>
    %64 = tpu.matmul %61, %63, %cst_89 {dimension_numbers = #tpu.dot_dimension_numbers<[1], [0], [0], [1], [0, 0, 1, 1], [], []>} : vector<64x48xf32>, vector<48x128xf32>, vector<64x128xf32> -> vector<64x128xf32>
    %65 = arith.addf %59, %64 : vector<64x128xf32>
    %c0_90 = arith.constant 0 : index
    %c0_91 = arith.constant 0 : index
    %66 = vector.load %arg3[%c0_90, %c0_91] : memref<1x128xf32, #tpu.memory_space<vmem>>, vector<1x128xf32>
    %67 = vector.broadcast %66 : vector<1x128xf32> to vector<64x128xf32>
    %68 = arith.addf %65, %67 : vector<64x128xf32>
    %c0_92 = arith.constant 0 : index
    %c0_93 = arith.constant 0 : index
    %69 = memref.load %arg4[%c0_92, %c0_93] : memref<1x1xf32, #tpu.memory_space<smem>>
    %cst_94 = arith.constant 0.000000e+00 : f32
    %70 = vector.broadcast %cst_94 : f32 to vector<64x128xf32>
    %71 = arith.cmpf oge, %68, %70 : vector<64x128xf32>
    %72 = vector.broadcast %69 : f32 to vector<64x128xf32>
    %73 = arith.mulf %72, %68 : vector<64x128xf32>
    %74 = arith.select %71, %68, %73 : vector<64x128xi1>, vector<64x128xf32>
    %75 = arith.truncf %74 : vector<64x128xf32> to vector<64x128xbf16>
    %c0_95 = arith.constant 0 : index
    %c0_96 = arith.constant 0 : index
    %c0_97 = arith.constant 0 : index
    %76 = vector.load %arg5[%c0_95, %c0_96, %c0_97] : memref<1x64x128xbf16, #tpu.memory_space<vmem>>, vector<1x64x128xbf16>
    %77 = vector.shape_cast %76 : vector<1x64x128xbf16> to vector<64x128xbf16>
    %78 = vector.shape_cast %75 : vector<64x128xbf16> to vector<1x64x128xbf16>
    tpu.vector_store %arg5[%c0_95, %c0_96, %c0_97], %78 {strides = array<i32>} : memref<1x64x128xbf16, #tpu.memory_space<vmem>>, vector<1x64x128xbf16>,
    return
  }
  func.func @transform_0(%arg0: i32) -> (i32, i32, i32, i32) {
    %c0_i32 = arith.constant 0 : i32
    %c0_i32_0 = arith.constant 0 : i32
    %c0_i32_1 = arith.constant 0 : i32
    %c0_i32_2 = arith.constant 0 : i32
    return %arg0, %c0_i32, %c0_i32_0, %c0_i32_1 : i32, i32, i32, i32
  }
  func.func @transform_1(%arg0: i32) -> (i32, i32, i32, i32) {
    %c0_i32 = arith.constant 0 : i32
    %c0_i32_0 = arith.constant 0 : i32
    %c0_i32_1 = arith.constant 0 : i32
    %c0_i32_2 = arith.constant 0 : i32
    %c0_i32_3 = arith.constant 0 : i32
    return %c0_i32, %c0_i32_0, %c0_i32_1, %c0_i32_2 : i32, i32, i32, i32
  }
  func.func @transform_2(%arg0: i32) -> (i32, i32) {
    %c0_i32 = arith.constant 0 : i32
    %c0_i32_0 = arith.constant 0 : i32
    %c0_i32_1 = arith.constant 0 : i32
    return %c0_i32, %c0_i32_0 : i32, i32
  }
  func.func @transform_3(%arg0: i32) -> (i32, i32) {
    %c0_i32 = arith.constant 0 : i32
    %c0_i32_0 = arith.constant 0 : i32
    %c0_i32_1 = arith.constant 0 : i32
    return %c0_i32, %c0_i32_0 : i32, i32
  }
  func.func @transform_4(%arg0: i32) -> (i32, i32, i32) {
    %c0_i32 = arith.constant 0 : i32
    %c0_i32_0 = arith.constant 0 : i32
    %c0_i32_1 = arith.constant 0 : i32
    return %arg0, %c0_i32, %c0_i32_0 : i32, i32, i32
  }
}

module attributes {stable_mosaic.version = 11 : i64} {
  func.func @kernel(%arg0: i32, %arg1: memref<1x4x8x128xbf16, #tpu.memory_space<vmem>>, %arg2: memref<3x128x128xbf16, #tpu.memory_space<vmem>>, %arg3: memref<1x128xf32, #tpu.memory_space<vmem>>, %arg4: memref<1x1xf32, #tpu.memory_space<smem>>, %arg5: memref<3x128x128xbf16, #tpu.memory_space<vmem>>, %arg6: memref<1x128xf32, #tpu.memory_space<vmem>>, %arg7: memref<1x1xf32, #tpu.memory_space<smem>>, %arg8: memref<1x32x128xbf16, #tpu.memory_space<vmem>>, %arg9: memref<4x10x128xbf16, #tpu.memory_space<vmem>>, %arg10: memref<6x8x128xbf16, #tpu.memory_space<vmem>>) attributes {dimension_semantics = [#tpu.dimension_semantics<parallel>], iteration_bounds = array<i64: 2>, scalar_prefetch = 0 : i64, scratch_operands = 2 : i64, tpu.core_type = #tpu.core_type<tc>, window_params = [{transform_indices = @transform_0, window_bounds = array<i64: 1, 4, 8, 128>}, {pipeline_mode = #tpu.pipeline_mode<synchronous>, transform_indices = @transform_1, window_bounds = array<i64: 3, 128, 128>}, {pipeline_mode = #tpu.pipeline_mode<synchronous>, transform_indices = @transform_2, window_bounds = array<i64: 1, 128>}, {transform_indices = @transform_3, window_bounds = array<i64: 1, 1>}, {pipeline_mode = #tpu.pipeline_mode<synchronous>, transform_indices = @transform_4, window_bounds = array<i64: 3, 128, 128>}, {pipeline_mode = #tpu.pipeline_mode<synchronous>, transform_indices = @transform_5, window_bounds = array<i64: 1, 128>}, {transform_indices = @transform_6, window_bounds = array<i64: 1, 1>}, {transform_indices = @transform_7, window_bounds = array<i64: 1, 32, 128>}]} {
    %cst = arith.constant 0.000000e+00 : bf16
    %0 = vector.broadcast %cst : bf16 to vector<4x1x128xbf16>
    %c0 = arith.constant 0 : index
    %c0_0 = arith.constant 0 : index
    %c0_1 = arith.constant 0 : index
    %1 = vector.load %arg9[%c0, %c0_0, %c0_1] : memref<4x10x128xbf16, #tpu.memory_space<vmem>>, vector<4x1x128xbf16>
    tpu.vector_store %arg9[%c0, %c0_0, %c0_1], %0 {strides = array<i32>} : memref<4x10x128xbf16, #tpu.memory_space<vmem>>, vector<4x1x128xbf16>,
    %cst_2 = arith.constant 0.000000e+00 : bf16
    %2 = vector.broadcast %cst_2 : bf16 to vector<4x1x128xbf16>
    %c0_3 = arith.constant 0 : index
    %c9 = arith.constant 9 : index
    %c0_4 = arith.constant 0 : index
    %3 = vector.load %arg9[%c0_3, %c9, %c0_4] : memref<4x10x128xbf16, #tpu.memory_space<vmem>>, vector<4x1x128xbf16>
    tpu.vector_store %arg9[%c0_3, %c9, %c0_4], %2 {strides = array<i32>} : memref<4x10x128xbf16, #tpu.memory_space<vmem>>, vector<4x1x128xbf16>,
    %c0_5 = arith.constant 0 : index
    %c0_6 = arith.constant 0 : index
    %c0_7 = arith.constant 0 : index
    %c0_8 = arith.constant 0 : index
    %4 = vector.load %arg1[%c0_5, %c0_6, %c0_7, %c0_8] : memref<1x4x8x128xbf16, #tpu.memory_space<vmem>>, vector<1x4x8x128xbf16>
    %5 = vector.shape_cast %4 : vector<1x4x8x128xbf16> to vector<4x8x128xbf16>
    %c0_9 = arith.constant 0 : index
    %c1 = arith.constant 1 : index
    %c0_10 = arith.constant 0 : index
    %6 = vector.load %arg9[%c0_9, %c1, %c0_10] : memref<4x10x128xbf16, #tpu.memory_space<vmem>>, vector<4x8x128xbf16>
    tpu.vector_store %arg9[%c0_9, %c1, %c0_10], %5 {strides = array<i32>} : memref<4x10x128xbf16, #tpu.memory_space<vmem>>, vector<4x8x128xbf16>,
    %cst_11 = arith.constant 0.000000e+00 : f32
    %7 = vector.broadcast %cst_11 : f32 to vector<32x128xf32>
    %c0_12 = arith.constant 0 : index
    %c0_13 = arith.constant 0 : index
    %c0_14 = arith.constant 0 : index
    %8 = vector.load %arg9[%c0_12, %c0_13, %c0_14] : memref<4x10x128xbf16, #tpu.memory_space<vmem>>, vector<4x8x128xbf16>
    %9 = vector.shape_cast %8 : vector<4x8x128xbf16> to vector<32x128xbf16>
    %c0_15 = arith.constant 0 : index
    %c0_16 = arith.constant 0 : index
    %c0_17 = arith.constant 0 : index
    %10 = vector.load %arg2[%c0_15, %c0_16, %c0_17] : memref<3x128x128xbf16, #tpu.memory_space<vmem>>, vector<1x128x128xbf16>
    %11 = vector.shape_cast %10 : vector<1x128x128xbf16> to vector<128x128xbf16>
    %cst_18 = arith.constant dense<0.000000e+00> : vector<32x128xf32>
    %12 = tpu.matmul %9, %11, %cst_18 {dimension_numbers = #tpu.dot_dimension_numbers<[1], [0], [0], [1], [0, 0, 1, 1], [], []>} : vector<32x128xbf16>, vector<128x128xbf16>, vector<32x128xf32> -> vector<32x128xf32>
    %13 = arith.addf %7, %12 : vector<32x128xf32>
    %c0_19 = arith.constant 0 : index
    %c1_20 = arith.constant 1 : index
    %c0_21 = arith.constant 0 : index
    %14 = vector.load %arg9[%c0_19, %c1_20, %c0_21] : memref<4x10x128xbf16, #tpu.memory_space<vmem>>, vector<4x8x128xbf16>
    %15 = vector.shape_cast %14 : vector<4x8x128xbf16> to vector<32x128xbf16>
    %c1_22 = arith.constant 1 : index
    %c0_23 = arith.constant 0 : index
    %c0_24 = arith.constant 0 : index
    %16 = vector.load %arg2[%c1_22, %c0_23, %c0_24] : memref<3x128x128xbf16, #tpu.memory_space<vmem>>, vector<1x128x128xbf16>
    %17 = vector.shape_cast %16 : vector<1x128x128xbf16> to vector<128x128xbf16>
    %cst_25 = arith.constant dense<0.000000e+00> : vector<32x128xf32>
    %18 = tpu.matmul %15, %17, %cst_25 {dimension_numbers = #tpu.dot_dimension_numbers<[1], [0], [0], [1], [0, 0, 1, 1], [], []>} : vector<32x128xbf16>, vector<128x128xbf16>, vector<32x128xf32> -> vector<32x128xf32>
    %19 = arith.addf %13, %18 : vector<32x128xf32>
    %c0_26 = arith.constant 0 : index
    %c2 = arith.constant 2 : index
    %c0_27 = arith.constant 0 : index
    %20 = vector.load %arg9[%c0_26, %c2, %c0_27] : memref<4x10x128xbf16, #tpu.memory_space<vmem>>, vector<4x8x128xbf16>
    %21 = vector.shape_cast %20 : vector<4x8x128xbf16> to vector<32x128xbf16>
    %c2_28 = arith.constant 2 : index
    %c0_29 = arith.constant 0 : index
    %c0_30 = arith.constant 0 : index
    %22 = vector.load %arg2[%c2_28, %c0_29, %c0_30] : memref<3x128x128xbf16, #tpu.memory_space<vmem>>, vector<1x128x128xbf16>
    %23 = vector.shape_cast %22 : vector<1x128x128xbf16> to vector<128x128xbf16>
    %cst_31 = arith.constant dense<0.000000e+00> : vector<32x128xf32>
    %24 = tpu.matmul %21, %23, %cst_31 {dimension_numbers = #tpu.dot_dimension_numbers<[1], [0], [0], [1], [0, 0, 1, 1], [], []>} : vector<32x128xbf16>, vector<128x128xbf16>, vector<32x128xf32> -> vector<32x128xf32>
    %25 = arith.addf %19, %24 : vector<32x128xf32>
    %c0_32 = arith.constant 0 : index
    %c0_33 = arith.constant 0 : index
    %26 = vector.load %arg3[%c0_32, %c0_33] : memref<1x128xf32, #tpu.memory_space<vmem>>, vector<1x128xf32>
    %27 = vector.broadcast %26 : vector<1x128xf32> to vector<32x128xf32>
    %28 = arith.addf %25, %27 : vector<32x128xf32>
    %c0_34 = arith.constant 0 : index
    %c0_35 = arith.constant 0 : index
    %29 = memref.load %arg4[%c0_34, %c0_35] : memref<1x1xf32, #tpu.memory_space<smem>>
    %cst_36 = arith.constant 0.000000e+00 : f32
    %30 = vector.broadcast %cst_36 : f32 to vector<32x128xf32>
    %31 = arith.cmpf oge, %28, %30 : vector<32x128xf32>
    %32 = vector.broadcast %29 : f32 to vector<32x128xf32>
    %33 = arith.mulf %32, %28 : vector<32x128xf32>
    %34 = arith.select %31, %28, %33 : vector<32x128xi1>, vector<32x128xf32>
    %35 = arith.truncf %34 : vector<32x128xf32> to vector<32x128xbf16>
    %cst_37 = arith.constant 0.000000e+00 : bf16
    %36 = vector.broadcast %cst_37 : bf16 to vector<1x8x128xbf16>
    %c0_38 = arith.constant 0 : index
    %c0_39 = arith.constant 0 : index
    %c0_40 = arith.constant 0 : index
    %37 = vector.load %arg10[%c0_38, %c0_39, %c0_40] : memref<6x8x128xbf16, #tpu.memory_space<vmem>>, vector<1x8x128xbf16>
    tpu.vector_store %arg10[%c0_38, %c0_39, %c0_40], %36 {strides = array<i32>} : memref<6x8x128xbf16, #tpu.memory_space<vmem>>, vector<1x8x128xbf16>,
    %cst_41 = arith.constant 0.000000e+00 : bf16
    %38 = vector.broadcast %cst_41 : bf16 to vector<1x8x128xbf16>
    %c5 = arith.constant 5 : index
    %c0_42 = arith.constant 0 : index
    %c0_43 = arith.constant 0 : index
    %39 = vector.load %arg10[%c5, %c0_42, %c0_43] : memref<6x8x128xbf16, #tpu.memory_space<vmem>>, vector<1x8x128xbf16>
    tpu.vector_store %arg10[%c5, %c0_42, %c0_43], %38 {strides = array<i32>} : memref<6x8x128xbf16, #tpu.memory_space<vmem>>, vector<1x8x128xbf16>,
    %40 = vector.shape_cast %35 : vector<32x128xbf16> to vector<4x8x128xbf16>
    %c1_44 = arith.constant 1 : index
    %c0_45 = arith.constant 0 : index
    %c0_46 = arith.constant 0 : index
    %41 = vector.load %arg10[%c1_44, %c0_45, %c0_46] : memref<6x8x128xbf16, #tpu.memory_space<vmem>>, vector<4x8x128xbf16>
    tpu.vector_store %arg10[%c1_44, %c0_45, %c0_46], %40 {strides = array<i32>} : memref<6x8x128xbf16, #tpu.memory_space<vmem>>, vector<4x8x128xbf16>,
    %cst_47 = arith.constant 0.000000e+00 : f32
    %42 = vector.broadcast %cst_47 : f32 to vector<32x128xf32>
    %c0_48 = arith.constant 0 : index
    %c0_49 = arith.constant 0 : index
    %c0_50 = arith.constant 0 : index
    %43 = vector.load %arg10[%c0_48, %c0_49, %c0_50] : memref<6x8x128xbf16, #tpu.memory_space<vmem>>, vector<4x8x128xbf16>
    %44 = vector.shape_cast %43 : vector<4x8x128xbf16> to vector<32x128xbf16>
    %c0_51 = arith.constant 0 : index
    %c0_52 = arith.constant 0 : index
    %c0_53 = arith.constant 0 : index
    %45 = vector.load %arg5[%c0_51, %c0_52, %c0_53] : memref<3x128x128xbf16, #tpu.memory_space<vmem>>, vector<1x128x128xbf16>
    %46 = vector.shape_cast %45 : vector<1x128x128xbf16> to vector<128x128xbf16>
    %cst_54 = arith.constant dense<0.000000e+00> : vector<32x128xf32>
    %47 = tpu.matmul %44, %46, %cst_54 {dimension_numbers = #tpu.dot_dimension_numbers<[1], [0], [0], [1], [0, 0, 1, 1], [], []>} : vector<32x128xbf16>, vector<128x128xbf16>, vector<32x128xf32> -> vector<32x128xf32>
    %48 = arith.addf %42, %47 : vector<32x128xf32>
    %c1_55 = arith.constant 1 : index
    %c0_56 = arith.constant 0 : index
    %c0_57 = arith.constant 0 : index
    %49 = vector.load %arg10[%c1_55, %c0_56, %c0_57] : memref<6x8x128xbf16, #tpu.memory_space<vmem>>, vector<4x8x128xbf16>
    %50 = vector.shape_cast %49 : vector<4x8x128xbf16> to vector<32x128xbf16>
    %c1_58 = arith.constant 1 : index
    %c0_59 = arith.constant 0 : index
    %c0_60 = arith.constant 0 : index
    %51 = vector.load %arg5[%c1_58, %c0_59, %c0_60] : memref<3x128x128xbf16, #tpu.memory_space<vmem>>, vector<1x128x128xbf16>
    %52 = vector.shape_cast %51 : vector<1x128x128xbf16> to vector<128x128xbf16>
    %cst_61 = arith.constant dense<0.000000e+00> : vector<32x128xf32>
    %53 = tpu.matmul %50, %52, %cst_61 {dimension_numbers = #tpu.dot_dimension_numbers<[1], [0], [0], [1], [0, 0, 1, 1], [], []>} : vector<32x128xbf16>, vector<128x128xbf16>, vector<32x128xf32> -> vector<32x128xf32>
    %54 = arith.addf %48, %53 : vector<32x128xf32>
    %c2_62 = arith.constant 2 : index
    %c0_63 = arith.constant 0 : index
    %c0_64 = arith.constant 0 : index
    %55 = vector.load %arg10[%c2_62, %c0_63, %c0_64] : memref<6x8x128xbf16, #tpu.memory_space<vmem>>, vector<4x8x128xbf16>
    %56 = vector.shape_cast %55 : vector<4x8x128xbf16> to vector<32x128xbf16>
    %c2_65 = arith.constant 2 : index
    %c0_66 = arith.constant 0 : index
    %c0_67 = arith.constant 0 : index
    %57 = vector.load %arg5[%c2_65, %c0_66, %c0_67] : memref<3x128x128xbf16, #tpu.memory_space<vmem>>, vector<1x128x128xbf16>
    %58 = vector.shape_cast %57 : vector<1x128x128xbf16> to vector<128x128xbf16>
    %cst_68 = arith.constant dense<0.000000e+00> : vector<32x128xf32>
    %59 = tpu.matmul %56, %58, %cst_68 {dimension_numbers = #tpu.dot_dimension_numbers<[1], [0], [0], [1], [0, 0, 1, 1], [], []>} : vector<32x128xbf16>, vector<128x128xbf16>, vector<32x128xf32> -> vector<32x128xf32>
    %60 = arith.addf %54, %59 : vector<32x128xf32>
    %c0_69 = arith.constant 0 : index
    %c0_70 = arith.constant 0 : index
    %61 = vector.load %arg6[%c0_69, %c0_70] : memref<1x128xf32, #tpu.memory_space<vmem>>, vector<1x128xf32>
    %62 = vector.broadcast %61 : vector<1x128xf32> to vector<32x128xf32>
    %63 = arith.addf %60, %62 : vector<32x128xf32>
    %c0_71 = arith.constant 0 : index
    %c0_72 = arith.constant 0 : index
    %64 = memref.load %arg7[%c0_71, %c0_72] : memref<1x1xf32, #tpu.memory_space<smem>>
    %cst_73 = arith.constant 0.000000e+00 : f32
    %65 = vector.broadcast %cst_73 : f32 to vector<32x128xf32>
    %66 = arith.cmpf oge, %63, %65 : vector<32x128xf32>
    %67 = vector.broadcast %64 : f32 to vector<32x128xf32>
    %68 = arith.mulf %67, %63 : vector<32x128xf32>
    %69 = arith.select %66, %63, %68 : vector<32x128xi1>, vector<32x128xf32>
    %c0_74 = arith.constant 0 : index
    %c0_75 = arith.constant 0 : index
    %c0_76 = arith.constant 0 : index
    %c0_77 = arith.constant 0 : index
    %70 = vector.load %arg1[%c0_74, %c0_75, %c0_76, %c0_77] : memref<1x4x8x128xbf16, #tpu.memory_space<vmem>>, vector<1x4x8x128xbf16>
    %71 = vector.shape_cast %70 : vector<1x4x8x128xbf16> to vector<4x8x128xbf16>
    %72 = vector.shape_cast %71 : vector<4x8x128xbf16> to vector<32x128xbf16>
    %73 = arith.extf %72 : vector<32x128xbf16> to vector<32x128xf32>
    %74 = arith.addf %73, %69 : vector<32x128xf32>
    %75 = arith.truncf %74 : vector<32x128xf32> to vector<32x128xbf16>
    %c0_78 = arith.constant 0 : index
    %c0_79 = arith.constant 0 : index
    %c0_80 = arith.constant 0 : index
    %76 = vector.load %arg8[%c0_78, %c0_79, %c0_80] : memref<1x32x128xbf16, #tpu.memory_space<vmem>>, vector<1x32x128xbf16>
    %77 = vector.shape_cast %76 : vector<1x32x128xbf16> to vector<32x128xbf16>
    %78 = vector.shape_cast %75 : vector<32x128xbf16> to vector<1x32x128xbf16>
    tpu.vector_store %arg8[%c0_78, %c0_79, %c0_80], %78 {strides = array<i32>} : memref<1x32x128xbf16, #tpu.memory_space<vmem>>, vector<1x32x128xbf16>,
    return
  }
  func.func @transform_0(%arg0: i32) -> (i32, i32, i32, i32) {
    %c0_i32 = arith.constant 0 : i32
    %c0_i32_0 = arith.constant 0 : i32
    %c0_i32_1 = arith.constant 0 : i32
    %c0_i32_2 = arith.constant 0 : i32
    return %arg0, %c0_i32, %c0_i32_0, %c0_i32_1 : i32, i32, i32, i32
  }
  func.func @transform_1(%arg0: i32) -> (i32, i32, i32) {
    %c0_i32 = arith.constant 0 : i32
    %c0_i32_0 = arith.constant 0 : i32
    %c0_i32_1 = arith.constant 0 : i32
    %c0_i32_2 = arith.constant 0 : i32
    return %c0_i32, %c0_i32_0, %c0_i32_1 : i32, i32, i32
  }
  func.func @transform_2(%arg0: i32) -> (i32, i32) {
    %c0_i32 = arith.constant 0 : i32
    %c0_i32_0 = arith.constant 0 : i32
    %c0_i32_1 = arith.constant 0 : i32
    return %c0_i32, %c0_i32_0 : i32, i32
  }
  func.func @transform_3(%arg0: i32) -> (i32, i32) {
    %c0_i32 = arith.constant 0 : i32
    %c0_i32_0 = arith.constant 0 : i32
    %c0_i32_1 = arith.constant 0 : i32
    return %c0_i32, %c0_i32_0 : i32, i32
  }
  func.func @transform_4(%arg0: i32) -> (i32, i32, i32) {
    %c0_i32 = arith.constant 0 : i32
    %c0_i32_0 = arith.constant 0 : i32
    %c0_i32_1 = arith.constant 0 : i32
    %c0_i32_2 = arith.constant 0 : i32
    return %c0_i32, %c0_i32_0, %c0_i32_1 : i32, i32, i32
  }
  func.func @transform_5(%arg0: i32) -> (i32, i32) {
    %c0_i32 = arith.constant 0 : i32
    %c0_i32_0 = arith.constant 0 : i32
    %c0_i32_1 = arith.constant 0 : i32
    return %c0_i32, %c0_i32_0 : i32, i32
  }
  func.func @transform_6(%arg0: i32) -> (i32, i32) {
    %c0_i32 = arith.constant 0 : i32
    %c0_i32_0 = arith.constant 0 : i32
    %c0_i32_1 = arith.constant 0 : i32
    return %c0_i32, %c0_i32_0 : i32, i32
  }
  func.func @transform_7(%arg0: i32) -> (i32, i32, i32) {
    %c0_i32 = arith.constant 0 : i32
    %c0_i32_0 = arith.constant 0 : i32
    %c0_i32_1 = arith.constant 0 : i32
    return %arg0, %c0_i32, %c0_i32_0 : i32, i32, i32
  }
}

module attributes {stable_mosaic.version = 11 : i64} {
  func.func @kernel(%arg0: i32, %arg1: memref<1x4x8x128xbf16, #tpu.memory_space<vmem>>, %arg2: memref<1x4x8x128xbf16, #tpu.memory_space<vmem>>, %arg3: memref<3x3x128x256xbf16, #tpu.memory_space<vmem>>, %arg4: memref<1x256xf32, #tpu.memory_space<vmem>>, %arg5: memref<1x1xf32, #tpu.memory_space<smem>>, %arg6: memref<3x3x128x256xbf16, #tpu.memory_space<vmem>>, %arg7: memref<1x256xf32, #tpu.memory_space<vmem>>, %arg8: memref<1x1xf32, #tpu.memory_space<smem>>, %arg9: memref<1x32x256xbf16, #tpu.memory_space<vmem>>, %arg10: memref<6x10x128xbf16, #tpu.memory_space<vmem>>) attributes {dimension_semantics = [#tpu.dimension_semantics<parallel>], iteration_bounds = array<i64: 2>, scalar_prefetch = 0 : i64, scratch_operands = 1 : i64, tpu.core_type = #tpu.core_type<tc>, window_params = [{transform_indices = @transform_0, window_bounds = array<i64: 1, 4, 8, 128>}, {transform_indices = @transform_1, window_bounds = array<i64: 1, 4, 8, 128>}, {pipeline_mode = #tpu.pipeline_mode<synchronous>, transform_indices = @transform_2, window_bounds = array<i64: 3, 3, 128, 256>}, {pipeline_mode = #tpu.pipeline_mode<synchronous>, transform_indices = @transform_3, window_bounds = array<i64: 1, 256>}, {transform_indices = @transform_4, window_bounds = array<i64: 1, 1>}, {pipeline_mode = #tpu.pipeline_mode<synchronous>, transform_indices = @transform_5, window_bounds = array<i64: 3, 3, 128, 256>}, {pipeline_mode = #tpu.pipeline_mode<synchronous>, transform_indices = @transform_6, window_bounds = array<i64: 1, 256>}, {transform_indices = @transform_7, window_bounds = array<i64: 1, 1>}, {transform_indices = @transform_8, window_bounds = array<i64: 1, 32, 256>}]} {
    %cst = arith.constant 0.000000e+00 : bf16
    %0 = vector.broadcast %cst : bf16 to vector<1x10x128xbf16>
    %c0 = arith.constant 0 : index
    %c0_0 = arith.constant 0 : index
    %c0_1 = arith.constant 0 : index
    %1 = vector.load %arg10[%c0, %c0_0, %c0_1] : memref<6x10x128xbf16, #tpu.memory_space<vmem>>, vector<1x10x128xbf16>
    tpu.vector_store %arg10[%c0, %c0_0, %c0_1], %0 {strides = array<i32>} : memref<6x10x128xbf16, #tpu.memory_space<vmem>>, vector<1x10x128xbf16>,
    %cst_2 = arith.constant 0.000000e+00 : bf16
    %2 = vector.broadcast %cst_2 : bf16 to vector<1x10x128xbf16>
    %c5 = arith.constant 5 : index
    %c0_3 = arith.constant 0 : index
    %c0_4 = arith.constant 0 : index
    %3 = vector.load %arg10[%c5, %c0_3, %c0_4] : memref<6x10x128xbf16, #tpu.memory_space<vmem>>, vector<1x10x128xbf16>
    tpu.vector_store %arg10[%c5, %c0_3, %c0_4], %2 {strides = array<i32>} : memref<6x10x128xbf16, #tpu.memory_space<vmem>>, vector<1x10x128xbf16>,
    %cst_5 = arith.constant 0.000000e+00 : bf16
    %4 = vector.broadcast %cst_5 : bf16 to vector<4x1x128xbf16>
    %c1 = arith.constant 1 : index
    %c0_6 = arith.constant 0 : index
    %c0_7 = arith.constant 0 : index
    %5 = vector.load %arg10[%c1, %c0_6, %c0_7] : memref<6x10x128xbf16, #tpu.memory_space<vmem>>, vector<4x1x128xbf16>
    tpu.vector_store %arg10[%c1, %c0_6, %c0_7], %4 {strides = array<i32>} : memref<6x10x128xbf16, #tpu.memory_space<vmem>>, vector<4x1x128xbf16>,
    %cst_8 = arith.constant 0.000000e+00 : bf16
    %6 = vector.broadcast %cst_8 : bf16 to vector<4x1x128xbf16>
    %c1_9 = arith.constant 1 : index
    %c9 = arith.constant 9 : index
    %c0_10 = arith.constant 0 : index
    %7 = vector.load %arg10[%c1_9, %c9, %c0_10] : memref<6x10x128xbf16, #tpu.memory_space<vmem>>, vector<4x1x128xbf16>
    tpu.vector_store %arg10[%c1_9, %c9, %c0_10], %6 {strides = array<i32>} : memref<6x10x128xbf16, #tpu.memory_space<vmem>>, vector<4x1x128xbf16>,
    %c0_11 = arith.constant 0 : index
    %c0_12 = arith.constant 0 : index
    %c0_13 = arith.constant 0 : index
    %c0_14 = arith.constant 0 : index
    %8 = vector.load %arg1[%c0_11, %c0_12, %c0_13, %c0_14] : memref<1x4x8x128xbf16, #tpu.memory_space<vmem>>, vector<1x4x8x128xbf16>
    %9 = vector.shape_cast %8 : vector<1x4x8x128xbf16> to vector<4x8x128xbf16>
    %c1_15 = arith.constant 1 : index
    %c1_16 = arith.constant 1 : index
    %c0_17 = arith.constant 0 : index
    %10 = vector.load %arg10[%c1_15, %c1_16, %c0_17] : memref<6x10x128xbf16, #tpu.memory_space<vmem>>, vector<4x8x128xbf16>
    tpu.vector_store %arg10[%c1_15, %c1_16, %c0_17], %9 {strides = array<i32>} : memref<6x10x128xbf16, #tpu.memory_space<vmem>>, vector<4x8x128xbf16>,
    %cst_18 = arith.constant 0.000000e+00 : f32
    %11 = vector.broadcast %cst_18 : f32 to vector<32x256xf32>
    %c0_19 = arith.constant 0 : index
    %c0_20 = arith.constant 0 : index
    %c0_21 = arith.constant 0 : index
    %12 = vector.load %arg10[%c0_19, %c0_20, %c0_21] : memref<6x10x128xbf16, #tpu.memory_space<vmem>>, vector<4x8x128xbf16>
    %13 = vector.shape_cast %12 : vector<4x8x128xbf16> to vector<32x128xbf16>
    %c0_22 = arith.constant 0 : index
    %c0_23 = arith.constant 0 : index
    %c0_24 = arith.constant 0 : index
    %c0_25 = arith.constant 0 : index
    %14 = vector.load %arg3[%c0_22, %c0_23, %c0_24, %c0_25] : memref<3x3x128x256xbf16, #tpu.memory_space<vmem>>, vector<1x1x128x256xbf16>
    %15 = vector.shape_cast %14 : vector<1x1x128x256xbf16> to vector<128x256xbf16>
    %cst_26 = arith.constant dense<0.000000e+00> : vector<32x256xf32>
    %16 = tpu.matmul %13, %15, %cst_26 {dimension_numbers = #tpu.dot_dimension_numbers<[1], [0], [0], [1], [0, 0, 1, 1], [], []>} : vector<32x128xbf16>, vector<128x256xbf16>, vector<32x256xf32> -> vector<32x256xf32>
    %17 = arith.addf %11, %16 : vector<32x256xf32>
    %c0_27 = arith.constant 0 : index
    %c1_28 = arith.constant 1 : index
    %c0_29 = arith.constant 0 : index
    %18 = vector.load %arg10[%c0_27, %c1_28, %c0_29] : memref<6x10x128xbf16, #tpu.memory_space<vmem>>, vector<4x8x128xbf16>
    %19 = vector.shape_cast %18 : vector<4x8x128xbf16> to vector<32x128xbf16>
    %c0_30 = arith.constant 0 : index
    %c1_31 = arith.constant 1 : index
    %c0_32 = arith.constant 0 : index
    %c0_33 = arith.constant 0 : index
    %20 = vector.load %arg3[%c0_30, %c1_31, %c0_32, %c0_33] : memref<3x3x128x256xbf16, #tpu.memory_space<vmem>>, vector<1x1x128x256xbf16>
    %21 = vector.shape_cast %20 : vector<1x1x128x256xbf16> to vector<128x256xbf16>
    %cst_34 = arith.constant dense<0.000000e+00> : vector<32x256xf32>
    %22 = tpu.matmul %19, %21, %cst_34 {dimension_numbers = #tpu.dot_dimension_numbers<[1], [0], [0], [1], [0, 0, 1, 1], [], []>} : vector<32x128xbf16>, vector<128x256xbf16>, vector<32x256xf32> -> vector<32x256xf32>
    %23 = arith.addf %17, %22 : vector<32x256xf32>
    %c0_35 = arith.constant 0 : index
    %c2 = arith.constant 2 : index
    %c0_36 = arith.constant 0 : index
    %24 = vector.load %arg10[%c0_35, %c2, %c0_36] : memref<6x10x128xbf16, #tpu.memory_space<vmem>>, vector<4x8x128xbf16>
    %25 = vector.shape_cast %24 : vector<4x8x128xbf16> to vector<32x128xbf16>
    %c0_37 = arith.constant 0 : index
    %c2_38 = arith.constant 2 : index
    %c0_39 = arith.constant 0 : index
    %c0_40 = arith.constant 0 : index
    %26 = vector.load %arg3[%c0_37, %c2_38, %c0_39, %c0_40] : memref<3x3x128x256xbf16, #tpu.memory_space<vmem>>, vector<1x1x128x256xbf16>
    %27 = vector.shape_cast %26 : vector<1x1x128x256xbf16> to vector<128x256xbf16>
    %cst_41 = arith.constant dense<0.000000e+00> : vector<32x256xf32>
    %28 = tpu.matmul %25, %27, %cst_41 {dimension_numbers = #tpu.dot_dimension_numbers<[1], [0], [0], [1], [0, 0, 1, 1], [], []>} : vector<32x128xbf16>, vector<128x256xbf16>, vector<32x256xf32> -> vector<32x256xf32>
    %29 = arith.addf %23, %28 : vector<32x256xf32>
    %c1_42 = arith.constant 1 : index
    %c0_43 = arith.constant 0 : index
    %c0_44 = arith.constant 0 : index
    %30 = vector.load %arg10[%c1_42, %c0_43, %c0_44] : memref<6x10x128xbf16, #tpu.memory_space<vmem>>, vector<4x8x128xbf16>
    %31 = vector.shape_cast %30 : vector<4x8x128xbf16> to vector<32x128xbf16>
    %c1_45 = arith.constant 1 : index
    %c0_46 = arith.constant 0 : index
    %c0_47 = arith.constant 0 : index
    %c0_48 = arith.constant 0 : index
    %32 = vector.load %arg3[%c1_45, %c0_46, %c0_47, %c0_48] : memref<3x3x128x256xbf16, #tpu.memory_space<vmem>>, vector<1x1x128x256xbf16>
    %33 = vector.shape_cast %32 : vector<1x1x128x256xbf16> to vector<128x256xbf16>
    %cst_49 = arith.constant dense<0.000000e+00> : vector<32x256xf32>
    %34 = tpu.matmul %31, %33, %cst_49 {dimension_numbers = #tpu.dot_dimension_numbers<[1], [0], [0], [1], [0, 0, 1, 1], [], []>} : vector<32x128xbf16>, vector<128x256xbf16>, vector<32x256xf32> -> vector<32x256xf32>
    %35 = arith.addf %29, %34 : vector<32x256xf32>
    %c1_50 = arith.constant 1 : index
    %c1_51 = arith.constant 1 : index
    %c0_52 = arith.constant 0 : index
    %36 = vector.load %arg10[%c1_50, %c1_51, %c0_52] : memref<6x10x128xbf16, #tpu.memory_space<vmem>>, vector<4x8x128xbf16>
    %37 = vector.shape_cast %36 : vector<4x8x128xbf16> to vector<32x128xbf16>
    %c1_53 = arith.constant 1 : index
    %c1_54 = arith.constant 1 : index
    %c0_55 = arith.constant 0 : index
    %c0_56 = arith.constant 0 : index
    %38 = vector.load %arg3[%c1_53, %c1_54, %c0_55, %c0_56] : memref<3x3x128x256xbf16, #tpu.memory_space<vmem>>, vector<1x1x128x256xbf16>
    %39 = vector.shape_cast %38 : vector<1x1x128x256xbf16> to vector<128x256xbf16>
    %cst_57 = arith.constant dense<0.000000e+00> : vector<32x256xf32>
    %40 = tpu.matmul %37, %39, %cst_57 {dimension_numbers = #tpu.dot_dimension_numbers<[1], [0], [0], [1], [0, 0, 1, 1], [], []>} : vector<32x128xbf16>, vector<128x256xbf16>, vector<32x256xf32> -> vector<32x256xf32>
    %41 = arith.addf %35, %40 : vector<32x256xf32>
    %c1_58 = arith.constant 1 : index
    %c2_59 = arith.constant 2 : index
    %c0_60 = arith.constant 0 : index
    %42 = vector.load %arg10[%c1_58, %c2_59, %c0_60] : memref<6x10x128xbf16, #tpu.memory_space<vmem>>, vector<4x8x128xbf16>
    %43 = vector.shape_cast %42 : vector<4x8x128xbf16> to vector<32x128xbf16>
    %c1_61 = arith.constant 1 : index
    %c2_62 = arith.constant 2 : index
    %c0_63 = arith.constant 0 : index
    %c0_64 = arith.constant 0 : index
    %44 = vector.load %arg3[%c1_61, %c2_62, %c0_63, %c0_64] : memref<3x3x128x256xbf16, #tpu.memory_space<vmem>>, vector<1x1x128x256xbf16>
    %45 = vector.shape_cast %44 : vector<1x1x128x256xbf16> to vector<128x256xbf16>
    %cst_65 = arith.constant dense<0.000000e+00> : vector<32x256xf32>
    %46 = tpu.matmul %43, %45, %cst_65 {dimension_numbers = #tpu.dot_dimension_numbers<[1], [0], [0], [1], [0, 0, 1, 1], [], []>} : vector<32x128xbf16>, vector<128x256xbf16>, vector<32x256xf32> -> vector<32x256xf32>
    %47 = arith.addf %41, %46 : vector<32x256xf32>
    %c2_66 = arith.constant 2 : index
    %c0_67 = arith.constant 0 : index
    %c0_68 = arith.constant 0 : index
    %48 = vector.load %arg10[%c2_66, %c0_67, %c0_68] : memref<6x10x128xbf16, #tpu.memory_space<vmem>>, vector<4x8x128xbf16>
    %49 = vector.shape_cast %48 : vector<4x8x128xbf16> to vector<32x128xbf16>
    %c2_69 = arith.constant 2 : index
    %c0_70 = arith.constant 0 : index
    %c0_71 = arith.constant 0 : index
    %c0_72 = arith.constant 0 : index
    %50 = vector.load %arg3[%c2_69, %c0_70, %c0_71, %c0_72] : memref<3x3x128x256xbf16, #tpu.memory_space<vmem>>, vector<1x1x128x256xbf16>
    %51 = vector.shape_cast %50 : vector<1x1x128x256xbf16> to vector<128x256xbf16>
    %cst_73 = arith.constant dense<0.000000e+00> : vector<32x256xf32>
    %52 = tpu.matmul %49, %51, %cst_73 {dimension_numbers = #tpu.dot_dimension_numbers<[1], [0], [0], [1], [0, 0, 1, 1], [], []>} : vector<32x128xbf16>, vector<128x256xbf16>, vector<32x256xf32> -> vector<32x256xf32>
    %53 = arith.addf %47, %52 : vector<32x256xf32>
    %c2_74 = arith.constant 2 : index
    %c1_75 = arith.constant 1 : index
    %c0_76 = arith.constant 0 : index
    %54 = vector.load %arg10[%c2_74, %c1_75, %c0_76] : memref<6x10x128xbf16, #tpu.memory_space<vmem>>, vector<4x8x128xbf16>
    %55 = vector.shape_cast %54 : vector<4x8x128xbf16> to vector<32x128xbf16>
    %c2_77 = arith.constant 2 : index
    %c1_78 = arith.constant 1 : index
    %c0_79 = arith.constant 0 : index
    %c0_80 = arith.constant 0 : index
    %56 = vector.load %arg3[%c2_77, %c1_78, %c0_79, %c0_80] : memref<3x3x128x256xbf16, #tpu.memory_space<vmem>>, vector<1x1x128x256xbf16>
    %57 = vector.shape_cast %56 : vector<1x1x128x256xbf16> to vector<128x256xbf16>
    %cst_81 = arith.constant dense<0.000000e+00> : vector<32x256xf32>
    %58 = tpu.matmul %55, %57, %cst_81 {dimension_numbers = #tpu.dot_dimension_numbers<[1], [0], [0], [1], [0, 0, 1, 1], [], []>} : vector<32x128xbf16>, vector<128x256xbf16>, vector<32x256xf32> -> vector<32x256xf32>
    %59 = arith.addf %53, %58 : vector<32x256xf32>
    %c2_82 = arith.constant 2 : index
    %c2_83 = arith.constant 2 : index
    %c0_84 = arith.constant 0 : index
    %60 = vector.load %arg10[%c2_82, %c2_83, %c0_84] : memref<6x10x128xbf16, #tpu.memory_space<vmem>>, vector<4x8x128xbf16>
    %61 = vector.shape_cast %60 : vector<4x8x128xbf16> to vector<32x128xbf16>
    %c2_85 = arith.constant 2 : index
    %c2_86 = arith.constant 2 : index
    %c0_87 = arith.constant 0 : index
    %c0_88 = arith.constant 0 : index
    %62 = vector.load %arg3[%c2_85, %c2_86, %c0_87, %c0_88] : memref<3x3x128x256xbf16, #tpu.memory_space<vmem>>, vector<1x1x128x256xbf16>
    %63 = vector.shape_cast %62 : vector<1x1x128x256xbf16> to vector<128x256xbf16>
    %cst_89 = arith.constant dense<0.000000e+00> : vector<32x256xf32>
    %64 = tpu.matmul %61, %63, %cst_89 {dimension_numbers = #tpu.dot_dimension_numbers<[1], [0], [0], [1], [0, 0, 1, 1], [], []>} : vector<32x128xbf16>, vector<128x256xbf16>, vector<32x256xf32> -> vector<32x256xf32>
    %65 = arith.addf %59, %64 : vector<32x256xf32>
    %c0_90 = arith.constant 0 : index
    %c0_91 = arith.constant 0 : index
    %66 = vector.load %arg4[%c0_90, %c0_91] : memref<1x256xf32, #tpu.memory_space<vmem>>, vector<1x256xf32>
    %67 = vector.broadcast %66 : vector<1x256xf32> to vector<32x256xf32>
    %68 = arith.addf %65, %67 : vector<32x256xf32>
    %c0_92 = arith.constant 0 : index
    %c0_93 = arith.constant 0 : index
    %69 = memref.load %arg5[%c0_92, %c0_93] : memref<1x1xf32, #tpu.memory_space<smem>>
    %cst_94 = arith.constant 0.000000e+00 : f32
    %70 = vector.broadcast %cst_94 : f32 to vector<32x256xf32>
    %71 = arith.cmpf oge, %68, %70 : vector<32x256xf32>
    %72 = vector.broadcast %69 : f32 to vector<32x256xf32>
    %73 = arith.mulf %72, %68 : vector<32x256xf32>
    %74 = arith.select %71, %68, %73 : vector<32x256xi1>, vector<32x256xf32>
    %c0_95 = arith.constant 0 : index
    %c0_96 = arith.constant 0 : index
    %c0_97 = arith.constant 0 : index
    %c0_98 = arith.constant 0 : index
    %75 = vector.load %arg2[%c0_95, %c0_96, %c0_97, %c0_98] : memref<1x4x8x128xbf16, #tpu.memory_space<vmem>>, vector<1x4x8x128xbf16>
    %76 = vector.shape_cast %75 : vector<1x4x8x128xbf16> to vector<4x8x128xbf16>
    %c1_99 = arith.constant 1 : index
    %c1_100 = arith.constant 1 : index
    %c0_101 = arith.constant 0 : index
    %77 = vector.load %arg10[%c1_99, %c1_100, %c0_101] : memref<6x10x128xbf16, #tpu.memory_space<vmem>>, vector<4x8x128xbf16>
    tpu.vector_store %arg10[%c1_99, %c1_100, %c0_101], %76 {strides = array<i32>} : memref<6x10x128xbf16, #tpu.memory_space<vmem>>, vector<4x8x128xbf16>,
    %cst_102 = arith.constant 0.000000e+00 : f32
    %78 = vector.broadcast %cst_102 : f32 to vector<32x256xf32>
    %c0_103 = arith.constant 0 : index
    %c0_104 = arith.constant 0 : index
    %c0_105 = arith.constant 0 : index
    %79 = vector.load %arg10[%c0_103, %c0_104, %c0_105] : memref<6x10x128xbf16, #tpu.memory_space<vmem>>, vector<4x8x128xbf16>
    %80 = vector.shape_cast %79 : vector<4x8x128xbf16> to vector<32x128xbf16>
    %c0_106 = arith.constant 0 : index
    %c0_107 = arith.constant 0 : index
    %c0_108 = arith.constant 0 : index
    %c0_109 = arith.constant 0 : index
    %81 = vector.load %arg6[%c0_106, %c0_107, %c0_108, %c0_109] : memref<3x3x128x256xbf16, #tpu.memory_space<vmem>>, vector<1x1x128x256xbf16>
    %82 = vector.shape_cast %81 : vector<1x1x128x256xbf16> to vector<128x256xbf16>
    %cst_110 = arith.constant dense<0.000000e+00> : vector<32x256xf32>
    %83 = tpu.matmul %80, %82, %cst_110 {dimension_numbers = #tpu.dot_dimension_numbers<[1], [0], [0], [1], [0, 0, 1, 1], [], []>} : vector<32x128xbf16>, vector<128x256xbf16>, vector<32x256xf32> -> vector<32x256xf32>
    %84 = arith.addf %78, %83 : vector<32x256xf32>
    %c0_111 = arith.constant 0 : index
    %c1_112 = arith.constant 1 : index
    %c0_113 = arith.constant 0 : index
    %85 = vector.load %arg10[%c0_111, %c1_112, %c0_113] : memref<6x10x128xbf16, #tpu.memory_space<vmem>>, vector<4x8x128xbf16>
    %86 = vector.shape_cast %85 : vector<4x8x128xbf16> to vector<32x128xbf16>
    %c0_114 = arith.constant 0 : index
    %c1_115 = arith.constant 1 : index
    %c0_116 = arith.constant 0 : index
    %c0_117 = arith.constant 0 : index
    %87 = vector.load %arg6[%c0_114, %c1_115, %c0_116, %c0_117] : memref<3x3x128x256xbf16, #tpu.memory_space<vmem>>, vector<1x1x128x256xbf16>
    %88 = vector.shape_cast %87 : vector<1x1x128x256xbf16> to vector<128x256xbf16>
    %cst_118 = arith.constant dense<0.000000e+00> : vector<32x256xf32>
    %89 = tpu.matmul %86, %88, %cst_118 {dimension_numbers = #tpu.dot_dimension_numbers<[1], [0], [0], [1], [0, 0, 1, 1], [], []>} : vector<32x128xbf16>, vector<128x256xbf16>, vector<32x256xf32> -> vector<32x256xf32>
    %90 = arith.addf %84, %89 : vector<32x256xf32>
    %c0_119 = arith.constant 0 : index
    %c2_120 = arith.constant 2 : index
    %c0_121 = arith.constant 0 : index
    %91 = vector.load %arg10[%c0_119, %c2_120, %c0_121] : memref<6x10x128xbf16, #tpu.memory_space<vmem>>, vector<4x8x128xbf16>
    %92 = vector.shape_cast %91 : vector<4x8x128xbf16> to vector<32x128xbf16>
    %c0_122 = arith.constant 0 : index
    %c2_123 = arith.constant 2 : index
    %c0_124 = arith.constant 0 : index
    %c0_125 = arith.constant 0 : index
    %93 = vector.load %arg6[%c0_122, %c2_123, %c0_124, %c0_125] : memref<3x3x128x256xbf16, #tpu.memory_space<vmem>>, vector<1x1x128x256xbf16>
    %94 = vector.shape_cast %93 : vector<1x1x128x256xbf16> to vector<128x256xbf16>
    %cst_126 = arith.constant dense<0.000000e+00> : vector<32x256xf32>
    %95 = tpu.matmul %92, %94, %cst_126 {dimension_numbers = #tpu.dot_dimension_numbers<[1], [0], [0], [1], [0, 0, 1, 1], [], []>} : vector<32x128xbf16>, vector<128x256xbf16>, vector<32x256xf32> -> vector<32x256xf32>
    %96 = arith.addf %90, %95 : vector<32x256xf32>
    %c1_127 = arith.constant 1 : index
    %c0_128 = arith.constant 0 : index
    %c0_129 = arith.constant 0 : index
    %97 = vector.load %arg10[%c1_127, %c0_128, %c0_129] : memref<6x10x128xbf16, #tpu.memory_space<vmem>>, vector<4x8x128xbf16>
    %98 = vector.shape_cast %97 : vector<4x8x128xbf16> to vector<32x128xbf16>
    %c1_130 = arith.constant 1 : index
    %c0_131 = arith.constant 0 : index
    %c0_132 = arith.constant 0 : index
    %c0_133 = arith.constant 0 : index
    %99 = vector.load %arg6[%c1_130, %c0_131, %c0_132, %c0_133] : memref<3x3x128x256xbf16, #tpu.memory_space<vmem>>, vector<1x1x128x256xbf16>
    %100 = vector.shape_cast %99 : vector<1x1x128x256xbf16> to vector<128x256xbf16>
    %cst_134 = arith.constant dense<0.000000e+00> : vector<32x256xf32>
    %101 = tpu.matmul %98, %100, %cst_134 {dimension_numbers = #tpu.dot_dimension_numbers<[1], [0], [0], [1], [0, 0, 1, 1], [], []>} : vector<32x128xbf16>, vector<128x256xbf16>, vector<32x256xf32> -> vector<32x256xf32>
    %102 = arith.addf %96, %101 : vector<32x256xf32>
    %c1_135 = arith.constant 1 : index
    %c1_136 = arith.constant 1 : index
    %c0_137 = arith.constant 0 : index
    %103 = vector.load %arg10[%c1_135, %c1_136, %c0_137] : memref<6x10x128xbf16, #tpu.memory_space<vmem>>, vector<4x8x128xbf16>
    %104 = vector.shape_cast %103 : vector<4x8x128xbf16> to vector<32x128xbf16>
    %c1_138 = arith.constant 1 : index
    %c1_139 = arith.constant 1 : index
    %c0_140 = arith.constant 0 : index
    %c0_141 = arith.constant 0 : index
    %105 = vector.load %arg6[%c1_138, %c1_139, %c0_140, %c0_141] : memref<3x3x128x256xbf16, #tpu.memory_space<vmem>>, vector<1x1x128x256xbf16>
    %106 = vector.shape_cast %105 : vector<1x1x128x256xbf16> to vector<128x256xbf16>
    %cst_142 = arith.constant dense<0.000000e+00> : vector<32x256xf32>
    %107 = tpu.matmul %104, %106, %cst_142 {dimension_numbers = #tpu.dot_dimension_numbers<[1], [0], [0], [1], [0, 0, 1, 1], [], []>} : vector<32x128xbf16>, vector<128x256xbf16>, vector<32x256xf32> -> vector<32x256xf32>
    %108 = arith.addf %102, %107 : vector<32x256xf32>
    %c1_143 = arith.constant 1 : index
    %c2_144 = arith.constant 2 : index
    %c0_145 = arith.constant 0 : index
    %109 = vector.load %arg10[%c1_143, %c2_144, %c0_145] : memref<6x10x128xbf16, #tpu.memory_space<vmem>>, vector<4x8x128xbf16>
    %110 = vector.shape_cast %109 : vector<4x8x128xbf16> to vector<32x128xbf16>
    %c1_146 = arith.constant 1 : index
    %c2_147 = arith.constant 2 : index
    %c0_148 = arith.constant 0 : index
    %c0_149 = arith.constant 0 : index
    %111 = vector.load %arg6[%c1_146, %c2_147, %c0_148, %c0_149] : memref<3x3x128x256xbf16, #tpu.memory_space<vmem>>, vector<1x1x128x256xbf16>
    %112 = vector.shape_cast %111 : vector<1x1x128x256xbf16> to vector<128x256xbf16>
    %cst_150 = arith.constant dense<0.000000e+00> : vector<32x256xf32>
    %113 = tpu.matmul %110, %112, %cst_150 {dimension_numbers = #tpu.dot_dimension_numbers<[1], [0], [0], [1], [0, 0, 1, 1], [], []>} : vector<32x128xbf16>, vector<128x256xbf16>, vector<32x256xf32> -> vector<32x256xf32>
    %114 = arith.addf %108, %113 : vector<32x256xf32>
    %c2_151 = arith.constant 2 : index
    %c0_152 = arith.constant 0 : index
    %c0_153 = arith.constant 0 : index
    %115 = vector.load %arg10[%c2_151, %c0_152, %c0_153] : memref<6x10x128xbf16, #tpu.memory_space<vmem>>, vector<4x8x128xbf16>
    %116 = vector.shape_cast %115 : vector<4x8x128xbf16> to vector<32x128xbf16>
    %c2_154 = arith.constant 2 : index
    %c0_155 = arith.constant 0 : index
    %c0_156 = arith.constant 0 : index
    %c0_157 = arith.constant 0 : index
    %117 = vector.load %arg6[%c2_154, %c0_155, %c0_156, %c0_157] : memref<3x3x128x256xbf16, #tpu.memory_space<vmem>>, vector<1x1x128x256xbf16>
    %118 = vector.shape_cast %117 : vector<1x1x128x256xbf16> to vector<128x256xbf16>
    %cst_158 = arith.constant dense<0.000000e+00> : vector<32x256xf32>
    %119 = tpu.matmul %116, %118, %cst_158 {dimension_numbers = #tpu.dot_dimension_numbers<[1], [0], [0], [1], [0, 0, 1, 1], [], []>} : vector<32x128xbf16>, vector<128x256xbf16>, vector<32x256xf32> -> vector<32x256xf32>
    %120 = arith.addf %114, %119 : vector<32x256xf32>
    %c2_159 = arith.constant 2 : index
    %c1_160 = arith.constant 1 : index
    %c0_161 = arith.constant 0 : index
    %121 = vector.load %arg10[%c2_159, %c1_160, %c0_161] : memref<6x10x128xbf16, #tpu.memory_space<vmem>>, vector<4x8x128xbf16>
    %122 = vector.shape_cast %121 : vector<4x8x128xbf16> to vector<32x128xbf16>
    %c2_162 = arith.constant 2 : index
    %c1_163 = arith.constant 1 : index
    %c0_164 = arith.constant 0 : index
    %c0_165 = arith.constant 0 : index
    %123 = vector.load %arg6[%c2_162, %c1_163, %c0_164, %c0_165] : memref<3x3x128x256xbf16, #tpu.memory_space<vmem>>, vector<1x1x128x256xbf16>
    %124 = vector.shape_cast %123 : vector<1x1x128x256xbf16> to vector<128x256xbf16>
    %cst_166 = arith.constant dense<0.000000e+00> : vector<32x256xf32>
    %125 = tpu.matmul %122, %124, %cst_166 {dimension_numbers = #tpu.dot_dimension_numbers<[1], [0], [0], [1], [0, 0, 1, 1], [], []>} : vector<32x128xbf16>, vector<128x256xbf16>, vector<32x256xf32> -> vector<32x256xf32>
    %126 = arith.addf %120, %125 : vector<32x256xf32>
    %c2_167 = arith.constant 2 : index
    %c2_168 = arith.constant 2 : index
    %c0_169 = arith.constant 0 : index
    %127 = vector.load %arg10[%c2_167, %c2_168, %c0_169] : memref<6x10x128xbf16, #tpu.memory_space<vmem>>, vector<4x8x128xbf16>
    %128 = vector.shape_cast %127 : vector<4x8x128xbf16> to vector<32x128xbf16>
    %c2_170 = arith.constant 2 : index
    %c2_171 = arith.constant 2 : index
    %c0_172 = arith.constant 0 : index
    %c0_173 = arith.constant 0 : index
    %129 = vector.load %arg6[%c2_170, %c2_171, %c0_172, %c0_173] : memref<3x3x128x256xbf16, #tpu.memory_space<vmem>>, vector<1x1x128x256xbf16>
    %130 = vector.shape_cast %129 : vector<1x1x128x256xbf16> to vector<128x256xbf16>
    %cst_174 = arith.constant dense<0.000000e+00> : vector<32x256xf32>
    %131 = tpu.matmul %128, %130, %cst_174 {dimension_numbers = #tpu.dot_dimension_numbers<[1], [0], [0], [1], [0, 0, 1, 1], [], []>} : vector<32x128xbf16>, vector<128x256xbf16>, vector<32x256xf32> -> vector<32x256xf32>
    %132 = arith.addf %126, %131 : vector<32x256xf32>
    %c0_175 = arith.constant 0 : index
    %c0_176 = arith.constant 0 : index
    %133 = vector.load %arg7[%c0_175, %c0_176] : memref<1x256xf32, #tpu.memory_space<vmem>>, vector<1x256xf32>
    %134 = vector.broadcast %133 : vector<1x256xf32> to vector<32x256xf32>
    %135 = arith.addf %132, %134 : vector<32x256xf32>
    %c0_177 = arith.constant 0 : index
    %c0_178 = arith.constant 0 : index
    %136 = memref.load %arg8[%c0_177, %c0_178] : memref<1x1xf32, #tpu.memory_space<smem>>
    %cst_179 = arith.constant 0.000000e+00 : f32
    %137 = vector.broadcast %cst_179 : f32 to vector<32x256xf32>
    %138 = arith.cmpf oge, %135, %137 : vector<32x256xf32>
    %139 = vector.broadcast %136 : f32 to vector<32x256xf32>
    %140 = arith.mulf %139, %135 : vector<32x256xf32>
    %141 = arith.select %138, %135, %140 : vector<32x256xi1>, vector<32x256xf32>
    %142 = arith.addf %74, %141 : vector<32x256xf32>
    %143 = arith.truncf %142 : vector<32x256xf32> to vector<32x256xbf16>
    %c0_180 = arith.constant 0 : index
    %c0_181 = arith.constant 0 : index
    %c0_182 = arith.constant 0 : index
    %144 = vector.load %arg9[%c0_180, %c0_181, %c0_182] : memref<1x32x256xbf16, #tpu.memory_space<vmem>>, vector<1x32x256xbf16>
    %145 = vector.shape_cast %144 : vector<1x32x256xbf16> to vector<32x256xbf16>
    %146 = vector.shape_cast %143 : vector<32x256xbf16> to vector<1x32x256xbf16>
    tpu.vector_store %arg9[%c0_180, %c0_181, %c0_182], %146 {strides = array<i32>} : memref<1x32x256xbf16, #tpu.memory_space<vmem>>, vector<1x32x256xbf16>,
    return
  }
  func.func @transform_0(%arg0: i32) -> (i32, i32, i32, i32) {
    %c0_i32 = arith.constant 0 : i32
    %c0_i32_0 = arith.constant 0 : i32
    %c0_i32_1 = arith.constant 0 : i32
    %c0_i32_2 = arith.constant 0 : i32
    return %arg0, %c0_i32, %c0_i32_0, %c0_i32_1 : i32, i32, i32, i32
  }
  func.func @transform_1(%arg0: i32) -> (i32, i32, i32, i32) {
    %c0_i32 = arith.constant 0 : i32
    %c0_i32_0 = arith.constant 0 : i32
    %c0_i32_1 = arith.constant 0 : i32
    %c0_i32_2 = arith.constant 0 : i32
    return %arg0, %c0_i32, %c0_i32_0, %c0_i32_1 : i32, i32, i32, i32
  }
  func.func @transform_2(%arg0: i32) -> (i32, i32, i32, i32) {
    %c0_i32 = arith.constant 0 : i32
    %c0_i32_0 = arith.constant 0 : i32
    %c0_i32_1 = arith.constant 0 : i32
    %c0_i32_2 = arith.constant 0 : i32
    %c0_i32_3 = arith.constant 0 : i32
    return %c0_i32, %c0_i32_0, %c0_i32_1, %c0_i32_2 : i32, i32, i32, i32
  }
  func.func @transform_3(%arg0: i32) -> (i32, i32) {
    %c0_i32 = arith.constant 0 : i32
    %c0_i32_0 = arith.constant 0 : i32
    %c0_i32_1 = arith.constant 0 : i32
    return %c0_i32, %c0_i32_0 : i32, i32
  }
  func.func @transform_4(%arg0: i32) -> (i32, i32) {
    %c0_i32 = arith.constant 0 : i32
    %c0_i32_0 = arith.constant 0 : i32
    %c0_i32_1 = arith.constant 0 : i32
    return %c0_i32, %c0_i32_0 : i32, i32
  }
  func.func @transform_5(%arg0: i32) -> (i32, i32, i32, i32) {
    %c0_i32 = arith.constant 0 : i32
    %c0_i32_0 = arith.constant 0 : i32
    %c0_i32_1 = arith.constant 0 : i32
    %c0_i32_2 = arith.constant 0 : i32
    %c0_i32_3 = arith.constant 0 : i32
    return %c0_i32, %c0_i32_0, %c0_i32_1, %c0_i32_2 : i32, i32, i32, i32
  }
  func.func @transform_6(%arg0: i32) -> (i32, i32) {
    %c0_i32 = arith.constant 0 : i32
    %c0_i32_0 = arith.constant 0 : i32
    %c0_i32_1 = arith.constant 0 : i32
    return %c0_i32, %c0_i32_0 : i32, i32
  }
  func.func @transform_7(%arg0: i32) -> (i32, i32) {
    %c0_i32 = arith.constant 0 : i32
    %c0_i32_0 = arith.constant 0 : i32
    %c0_i32_1 = arith.constant 0 : i32
    return %c0_i32, %c0_i32_0 : i32, i32
  }
  func.func @transform_8(%arg0: i32) -> (i32, i32, i32) {
    %c0_i32 = arith.constant 0 : i32
    %c0_i32_0 = arith.constant 0 : i32
    %c0_i32_1 = arith.constant 0 : i32
    return %arg0, %c0_i32, %c0_i32_0 : i32, i32, i32
  }
}

module attributes {stable_mosaic.version = 11 : i64} {
  func.func @kernel(%arg0: i32, %arg1: memref<1x4x16x128xbf16, #tpu.memory_space<vmem>>, %arg2: memref<3x3x128x128xbf16, #tpu.memory_space<vmem>>, %arg3: memref<1x128xf32, #tpu.memory_space<vmem>>, %arg4: memref<1x1xf32, #tpu.memory_space<smem>>, %arg5: memref<1x64x128xbf16, #tpu.memory_space<vmem>>, %arg6: memref<6x18x128xbf16, #tpu.memory_space<vmem>>) attributes {dimension_semantics = [#tpu.dimension_semantics<parallel>], iteration_bounds = array<i64: 2>, scalar_prefetch = 0 : i64, scratch_operands = 1 : i64, tpu.core_type = #tpu.core_type<tc>, window_params = [{transform_indices = @transform_0, window_bounds = array<i64: 1, 4, 16, 128>}, {pipeline_mode = #tpu.pipeline_mode<synchronous>, transform_indices = @transform_1, window_bounds = array<i64: 3, 3, 128, 128>}, {pipeline_mode = #tpu.pipeline_mode<synchronous>, transform_indices = @transform_2, window_bounds = array<i64: 1, 128>}, {transform_indices = @transform_3, window_bounds = array<i64: 1, 1>}, {transform_indices = @transform_4, window_bounds = array<i64: 1, 64, 128>}]} {
    %cst = arith.constant 0.000000e+00 : bf16
    %0 = vector.broadcast %cst : bf16 to vector<1x18x128xbf16>
    %c0 = arith.constant 0 : index
    %c0_0 = arith.constant 0 : index
    %c0_1 = arith.constant 0 : index
    %1 = vector.load %arg6[%c0, %c0_0, %c0_1] : memref<6x18x128xbf16, #tpu.memory_space<vmem>>, vector<1x18x128xbf16>
    tpu.vector_store %arg6[%c0, %c0_0, %c0_1], %0 {strides = array<i32>} : memref<6x18x128xbf16, #tpu.memory_space<vmem>>, vector<1x18x128xbf16>,
    %cst_2 = arith.constant 0.000000e+00 : bf16
    %2 = vector.broadcast %cst_2 : bf16 to vector<1x18x128xbf16>
    %c5 = arith.constant 5 : index
    %c0_3 = arith.constant 0 : index
    %c0_4 = arith.constant 0 : index
    %3 = vector.load %arg6[%c5, %c0_3, %c0_4] : memref<6x18x128xbf16, #tpu.memory_space<vmem>>, vector<1x18x128xbf16>
    tpu.vector_store %arg6[%c5, %c0_3, %c0_4], %2 {strides = array<i32>} : memref<6x18x128xbf16, #tpu.memory_space<vmem>>, vector<1x18x128xbf16>,
    %cst_5 = arith.constant 0.000000e+00 : bf16
    %4 = vector.broadcast %cst_5 : bf16 to vector<4x1x128xbf16>
    %c1 = arith.constant 1 : index
    %c0_6 = arith.constant 0 : index
    %c0_7 = arith.constant 0 : index
    %5 = vector.load %arg6[%c1, %c0_6, %c0_7] : memref<6x18x128xbf16, #tpu.memory_space<vmem>>, vector<4x1x128xbf16>
    tpu.vector_store %arg6[%c1, %c0_6, %c0_7], %4 {strides = array<i32>} : memref<6x18x128xbf16, #tpu.memory_space<vmem>>, vector<4x1x128xbf16>,
    %cst_8 = arith.constant 0.000000e+00 : bf16
    %6 = vector.broadcast %cst_8 : bf16 to vector<4x1x128xbf16>
    %c1_9 = arith.constant 1 : index
    %c17 = arith.constant 17 : index
    %c0_10 = arith.constant 0 : index
    %7 = vector.load %arg6[%c1_9, %c17, %c0_10] : memref<6x18x128xbf16, #tpu.memory_space<vmem>>, vector<4x1x128xbf16>
    tpu.vector_store %arg6[%c1_9, %c17, %c0_10], %6 {strides = array<i32>} : memref<6x18x128xbf16, #tpu.memory_space<vmem>>, vector<4x1x128xbf16>,
    %c0_11 = arith.constant 0 : index
    %c0_12 = arith.constant 0 : index
    %c0_13 = arith.constant 0 : index
    %c0_14 = arith.constant 0 : index
    %8 = vector.load %arg1[%c0_11, %c0_12, %c0_13, %c0_14] : memref<1x4x16x128xbf16, #tpu.memory_space<vmem>>, vector<1x4x16x128xbf16>
    %9 = vector.shape_cast %8 : vector<1x4x16x128xbf16> to vector<4x16x128xbf16>
    %c1_15 = arith.constant 1 : index
    %c1_16 = arith.constant 1 : index
    %c0_17 = arith.constant 0 : index
    %10 = vector.load %arg6[%c1_15, %c1_16, %c0_17] : memref<6x18x128xbf16, #tpu.memory_space<vmem>>, vector<4x16x128xbf16>
    tpu.vector_store %arg6[%c1_15, %c1_16, %c0_17], %9 {strides = array<i32>} : memref<6x18x128xbf16, #tpu.memory_space<vmem>>, vector<4x16x128xbf16>,
    %cst_18 = arith.constant 0.000000e+00 : f32
    %11 = vector.broadcast %cst_18 : f32 to vector<64x128xf32>
    %c0_19 = arith.constant 0 : index
    %c0_20 = arith.constant 0 : index
    %c0_21 = arith.constant 0 : index
    %12 = vector.load %arg6[%c0_19, %c0_20, %c0_21] : memref<6x18x128xbf16, #tpu.memory_space<vmem>>, vector<4x16x128xbf16>
    %13 = vector.shape_cast %12 : vector<4x16x128xbf16> to vector<64x128xbf16>
    %c0_22 = arith.constant 0 : index
    %c0_23 = arith.constant 0 : index
    %c0_24 = arith.constant 0 : index
    %c0_25 = arith.constant 0 : index
    %14 = vector.load %arg2[%c0_22, %c0_23, %c0_24, %c0_25] : memref<3x3x128x128xbf16, #tpu.memory_space<vmem>>, vector<1x1x128x128xbf16>
    %15 = vector.shape_cast %14 : vector<1x1x128x128xbf16> to vector<128x128xbf16>
    %cst_26 = arith.constant dense<0.000000e+00> : vector<64x128xf32>
    %16 = tpu.matmul %13, %15, %cst_26 {dimension_numbers = #tpu.dot_dimension_numbers<[1], [0], [0], [1], [0, 0, 1, 1], [], []>} : vector<64x128xbf16>, vector<128x128xbf16>, vector<64x128xf32> -> vector<64x128xf32>
    %17 = arith.addf %11, %16 : vector<64x128xf32>
    %c0_27 = arith.constant 0 : index
    %c1_28 = arith.constant 1 : index
    %c0_29 = arith.constant 0 : index
    %18 = vector.load %arg6[%c0_27, %c1_28, %c0_29] : memref<6x18x128xbf16, #tpu.memory_space<vmem>>, vector<4x16x128xbf16>
    %19 = vector.shape_cast %18 : vector<4x16x128xbf16> to vector<64x128xbf16>
    %c0_30 = arith.constant 0 : index
    %c1_31 = arith.constant 1 : index
    %c0_32 = arith.constant 0 : index
    %c0_33 = arith.constant 0 : index
    %20 = vector.load %arg2[%c0_30, %c1_31, %c0_32, %c0_33] : memref<3x3x128x128xbf16, #tpu.memory_space<vmem>>, vector<1x1x128x128xbf16>
    %21 = vector.shape_cast %20 : vector<1x1x128x128xbf16> to vector<128x128xbf16>
    %cst_34 = arith.constant dense<0.000000e+00> : vector<64x128xf32>
    %22 = tpu.matmul %19, %21, %cst_34 {dimension_numbers = #tpu.dot_dimension_numbers<[1], [0], [0], [1], [0, 0, 1, 1], [], []>} : vector<64x128xbf16>, vector<128x128xbf16>, vector<64x128xf32> -> vector<64x128xf32>
    %23 = arith.addf %17, %22 : vector<64x128xf32>
    %c0_35 = arith.constant 0 : index
    %c2 = arith.constant 2 : index
    %c0_36 = arith.constant 0 : index
    %24 = vector.load %arg6[%c0_35, %c2, %c0_36] : memref<6x18x128xbf16, #tpu.memory_space<vmem>>, vector<4x16x128xbf16>
    %25 = vector.shape_cast %24 : vector<4x16x128xbf16> to vector<64x128xbf16>
    %c0_37 = arith.constant 0 : index
    %c2_38 = arith.constant 2 : index
    %c0_39 = arith.constant 0 : index
    %c0_40 = arith.constant 0 : index
    %26 = vector.load %arg2[%c0_37, %c2_38, %c0_39, %c0_40] : memref<3x3x128x128xbf16, #tpu.memory_space<vmem>>, vector<1x1x128x128xbf16>
    %27 = vector.shape_cast %26 : vector<1x1x128x128xbf16> to vector<128x128xbf16>
    %cst_41 = arith.constant dense<0.000000e+00> : vector<64x128xf32>
    %28 = tpu.matmul %25, %27, %cst_41 {dimension_numbers = #tpu.dot_dimension_numbers<[1], [0], [0], [1], [0, 0, 1, 1], [], []>} : vector<64x128xbf16>, vector<128x128xbf16>, vector<64x128xf32> -> vector<64x128xf32>
    %29 = arith.addf %23, %28 : vector<64x128xf32>
    %c1_42 = arith.constant 1 : index
    %c0_43 = arith.constant 0 : index
    %c0_44 = arith.constant 0 : index
    %30 = vector.load %arg6[%c1_42, %c0_43, %c0_44] : memref<6x18x128xbf16, #tpu.memory_space<vmem>>, vector<4x16x128xbf16>
    %31 = vector.shape_cast %30 : vector<4x16x128xbf16> to vector<64x128xbf16>
    %c1_45 = arith.constant 1 : index
    %c0_46 = arith.constant 0 : index
    %c0_47 = arith.constant 0 : index
    %c0_48 = arith.constant 0 : index
    %32 = vector.load %arg2[%c1_45, %c0_46, %c0_47, %c0_48] : memref<3x3x128x128xbf16, #tpu.memory_space<vmem>>, vector<1x1x128x128xbf16>
    %33 = vector.shape_cast %32 : vector<1x1x128x128xbf16> to vector<128x128xbf16>
    %cst_49 = arith.constant dense<0.000000e+00> : vector<64x128xf32>
    %34 = tpu.matmul %31, %33, %cst_49 {dimension_numbers = #tpu.dot_dimension_numbers<[1], [0], [0], [1], [0, 0, 1, 1], [], []>} : vector<64x128xbf16>, vector<128x128xbf16>, vector<64x128xf32> -> vector<64x128xf32>
    %35 = arith.addf %29, %34 : vector<64x128xf32>
    %c1_50 = arith.constant 1 : index
    %c1_51 = arith.constant 1 : index
    %c0_52 = arith.constant 0 : index
    %36 = vector.load %arg6[%c1_50, %c1_51, %c0_52] : memref<6x18x128xbf16, #tpu.memory_space<vmem>>, vector<4x16x128xbf16>
    %37 = vector.shape_cast %36 : vector<4x16x128xbf16> to vector<64x128xbf16>
    %c1_53 = arith.constant 1 : index
    %c1_54 = arith.constant 1 : index
    %c0_55 = arith.constant 0 : index
    %c0_56 = arith.constant 0 : index
    %38 = vector.load %arg2[%c1_53, %c1_54, %c0_55, %c0_56] : memref<3x3x128x128xbf16, #tpu.memory_space<vmem>>, vector<1x1x128x128xbf16>
    %39 = vector.shape_cast %38 : vector<1x1x128x128xbf16> to vector<128x128xbf16>
    %cst_57 = arith.constant dense<0.000000e+00> : vector<64x128xf32>
    %40 = tpu.matmul %37, %39, %cst_57 {dimension_numbers = #tpu.dot_dimension_numbers<[1], [0], [0], [1], [0, 0, 1, 1], [], []>} : vector<64x128xbf16>, vector<128x128xbf16>, vector<64x128xf32> -> vector<64x128xf32>
    %41 = arith.addf %35, %40 : vector<64x128xf32>
    %c1_58 = arith.constant 1 : index
    %c2_59 = arith.constant 2 : index
    %c0_60 = arith.constant 0 : index
    %42 = vector.load %arg6[%c1_58, %c2_59, %c0_60] : memref<6x18x128xbf16, #tpu.memory_space<vmem>>, vector<4x16x128xbf16>
    %43 = vector.shape_cast %42 : vector<4x16x128xbf16> to vector<64x128xbf16>
    %c1_61 = arith.constant 1 : index
    %c2_62 = arith.constant 2 : index
    %c0_63 = arith.constant 0 : index
    %c0_64 = arith.constant 0 : index
    %44 = vector.load %arg2[%c1_61, %c2_62, %c0_63, %c0_64] : memref<3x3x128x128xbf16, #tpu.memory_space<vmem>>, vector<1x1x128x128xbf16>
    %45 = vector.shape_cast %44 : vector<1x1x128x128xbf16> to vector<128x128xbf16>
    %cst_65 = arith.constant dense<0.000000e+00> : vector<64x128xf32>
    %46 = tpu.matmul %43, %45, %cst_65 {dimension_numbers = #tpu.dot_dimension_numbers<[1], [0], [0], [1], [0, 0, 1, 1], [], []>} : vector<64x128xbf16>, vector<128x128xbf16>, vector<64x128xf32> -> vector<64x128xf32>
    %47 = arith.addf %41, %46 : vector<64x128xf32>
    %c2_66 = arith.constant 2 : index
    %c0_67 = arith.constant 0 : index
    %c0_68 = arith.constant 0 : index
    %48 = vector.load %arg6[%c2_66, %c0_67, %c0_68] : memref<6x18x128xbf16, #tpu.memory_space<vmem>>, vector<4x16x128xbf16>
    %49 = vector.shape_cast %48 : vector<4x16x128xbf16> to vector<64x128xbf16>
    %c2_69 = arith.constant 2 : index
    %c0_70 = arith.constant 0 : index
    %c0_71 = arith.constant 0 : index
    %c0_72 = arith.constant 0 : index
    %50 = vector.load %arg2[%c2_69, %c0_70, %c0_71, %c0_72] : memref<3x3x128x128xbf16, #tpu.memory_space<vmem>>, vector<1x1x128x128xbf16>
    %51 = vector.shape_cast %50 : vector<1x1x128x128xbf16> to vector<128x128xbf16>
    %cst_73 = arith.constant dense<0.000000e+00> : vector<64x128xf32>
    %52 = tpu.matmul %49, %51, %cst_73 {dimension_numbers = #tpu.dot_dimension_numbers<[1], [0], [0], [1], [0, 0, 1, 1], [], []>} : vector<64x128xbf16>, vector<128x128xbf16>, vector<64x128xf32> -> vector<64x128xf32>
    %53 = arith.addf %47, %52 : vector<64x128xf32>
    %c2_74 = arith.constant 2 : index
    %c1_75 = arith.constant 1 : index
    %c0_76 = arith.constant 0 : index
    %54 = vector.load %arg6[%c2_74, %c1_75, %c0_76] : memref<6x18x128xbf16, #tpu.memory_space<vmem>>, vector<4x16x128xbf16>
    %55 = vector.shape_cast %54 : vector<4x16x128xbf16> to vector<64x128xbf16>
    %c2_77 = arith.constant 2 : index
    %c1_78 = arith.constant 1 : index
    %c0_79 = arith.constant 0 : index
    %c0_80 = arith.constant 0 : index
    %56 = vector.load %arg2[%c2_77, %c1_78, %c0_79, %c0_80] : memref<3x3x128x128xbf16, #tpu.memory_space<vmem>>, vector<1x1x128x128xbf16>
    %57 = vector.shape_cast %56 : vector<1x1x128x128xbf16> to vector<128x128xbf16>
    %cst_81 = arith.constant dense<0.000000e+00> : vector<64x128xf32>
    %58 = tpu.matmul %55, %57, %cst_81 {dimension_numbers = #tpu.dot_dimension_numbers<[1], [0], [0], [1], [0, 0, 1, 1], [], []>} : vector<64x128xbf16>, vector<128x128xbf16>, vector<64x128xf32> -> vector<64x128xf32>
    %59 = arith.addf %53, %58 : vector<64x128xf32>
    %c2_82 = arith.constant 2 : index
    %c2_83 = arith.constant 2 : index
    %c0_84 = arith.constant 0 : index
    %60 = vector.load %arg6[%c2_82, %c2_83, %c0_84] : memref<6x18x128xbf16, #tpu.memory_space<vmem>>, vector<4x16x128xbf16>
    %61 = vector.shape_cast %60 : vector<4x16x128xbf16> to vector<64x128xbf16>
    %c2_85 = arith.constant 2 : index
    %c2_86 = arith.constant 2 : index
    %c0_87 = arith.constant 0 : index
    %c0_88 = arith.constant 0 : index
    %62 = vector.load %arg2[%c2_85, %c2_86, %c0_87, %c0_88] : memref<3x3x128x128xbf16, #tpu.memory_space<vmem>>, vector<1x1x128x128xbf16>
    %63 = vector.shape_cast %62 : vector<1x1x128x128xbf16> to vector<128x128xbf16>
    %cst_89 = arith.constant dense<0.000000e+00> : vector<64x128xf32>
    %64 = tpu.matmul %61, %63, %cst_89 {dimension_numbers = #tpu.dot_dimension_numbers<[1], [0], [0], [1], [0, 0, 1, 1], [], []>} : vector<64x128xbf16>, vector<128x128xbf16>, vector<64x128xf32> -> vector<64x128xf32>
    %65 = arith.addf %59, %64 : vector<64x128xf32>
    %c0_90 = arith.constant 0 : index
    %c0_91 = arith.constant 0 : index
    %66 = vector.load %arg3[%c0_90, %c0_91] : memref<1x128xf32, #tpu.memory_space<vmem>>, vector<1x128xf32>
    %67 = vector.broadcast %66 : vector<1x128xf32> to vector<64x128xf32>
    %68 = arith.addf %65, %67 : vector<64x128xf32>
    %c0_92 = arith.constant 0 : index
    %c0_93 = arith.constant 0 : index
    %69 = memref.load %arg4[%c0_92, %c0_93] : memref<1x1xf32, #tpu.memory_space<smem>>
    %cst_94 = arith.constant 0.000000e+00 : f32
    %70 = vector.broadcast %cst_94 : f32 to vector<64x128xf32>
    %71 = arith.cmpf oge, %68, %70 : vector<64x128xf32>
    %72 = vector.broadcast %69 : f32 to vector<64x128xf32>
    %73 = arith.mulf %72, %68 : vector<64x128xf32>
    %74 = arith.select %71, %68, %73 : vector<64x128xi1>, vector<64x128xf32>
    %75 = arith.truncf %74 : vector<64x128xf32> to vector<64x128xbf16>
    %c0_95 = arith.constant 0 : index
    %c0_96 = arith.constant 0 : index
    %c0_97 = arith.constant 0 : index
    %76 = vector.load %arg5[%c0_95, %c0_96, %c0_97] : memref<1x64x128xbf16, #tpu.memory_space<vmem>>, vector<1x64x128xbf16>
    %77 = vector.shape_cast %76 : vector<1x64x128xbf16> to vector<64x128xbf16>
    %78 = vector.shape_cast %75 : vector<64x128xbf16> to vector<1x64x128xbf16>
    tpu.vector_store %arg5[%c0_95, %c0_96, %c0_97], %78 {strides = array<i32>} : memref<1x64x128xbf16, #tpu.memory_space<vmem>>, vector<1x64x128xbf16>,
    return
  }
  func.func @transform_0(%arg0: i32) -> (i32, i32, i32, i32) {
    %c0_i32 = arith.constant 0 : i32
    %c0_i32_0 = arith.constant 0 : i32
    %c0_i32_1 = arith.constant 0 : i32
    %c0_i32_2 = arith.constant 0 : i32
    return %arg0, %c0_i32, %c0_i32_0, %c0_i32_1 : i32, i32, i32, i32
  }
  func.func @transform_1(%arg0: i32) -> (i32, i32, i32, i32) {
    %c0_i32 = arith.constant 0 : i32
    %c0_i32_0 = arith.constant 0 : i32
    %c0_i32_1 = arith.constant 0 : i32
    %c0_i32_2 = arith.constant 0 : i32
    %c0_i32_3 = arith.constant 0 : i32
    return %c0_i32, %c0_i32_0, %c0_i32_1, %c0_i32_2 : i32, i32, i32, i32
  }
  func.func @transform_2(%arg0: i32) -> (i32, i32) {
    %c0_i32 = arith.constant 0 : i32
    %c0_i32_0 = arith.constant 0 : i32
    %c0_i32_1 = arith.constant 0 : i32
    return %c0_i32, %c0_i32_0 : i32, i32
  }
  func.func @transform_3(%arg0: i32) -> (i32, i32) {
    %c0_i32 = arith.constant 0 : i32
    %c0_i32_0 = arith.constant 0 : i32
    %c0_i32_1 = arith.constant 0 : i32
    return %c0_i32, %c0_i32_0 : i32, i32
  }
  func.func @transform_4(%arg0: i32) -> (i32, i32, i32) {
    %c0_i32 = arith.constant 0 : i32
    %c0_i32_0 = arith.constant 0 : i32
    %c0_i32_1 = arith.constant 0 : i32
    return %arg0, %c0_i32, %c0_i32_0 : i32, i32, i32
  }
}

module attributes {stable_mosaic.version = 11 : i64} {
  func.func @kernel(%arg0: i32, %arg1: memref<1x4x32x256xf32, #tpu.memory_space<vmem>>, %arg2: memref<3x3x256x128xf32, #tpu.memory_space<vmem>>, %arg3: memref<1x128xf32, #tpu.memory_space<vmem>>, %arg4: memref<1x1xf32, #tpu.memory_space<smem>>, %arg5: memref<1x128x128xf32, #tpu.memory_space<vmem>>, %arg6: memref<6x34x256xf32, #tpu.memory_space<vmem>>) attributes {dimension_semantics = [#tpu.dimension_semantics<parallel>], iteration_bounds = array<i64: 2>, scalar_prefetch = 0 : i64, scratch_operands = 1 : i64, tpu.core_type = #tpu.core_type<tc>, window_params = [{transform_indices = @transform_0, window_bounds = array<i64: 1, 4, 32, 256>}, {pipeline_mode = #tpu.pipeline_mode<synchronous>, transform_indices = @transform_1, window_bounds = array<i64: 3, 3, 256, 128>}, {pipeline_mode = #tpu.pipeline_mode<synchronous>, transform_indices = @transform_2, window_bounds = array<i64: 1, 128>}, {transform_indices = @transform_3, window_bounds = array<i64: 1, 1>}, {transform_indices = @transform_4, window_bounds = array<i64: 1, 128, 128>}]} {
    %cst = arith.constant 0.000000e+00 : f32
    %0 = vector.broadcast %cst : f32 to vector<1x34x256xf32>
    %c0 = arith.constant 0 : index
    %c0_0 = arith.constant 0 : index
    %c0_1 = arith.constant 0 : index
    %1 = vector.load %arg6[%c0, %c0_0, %c0_1] : memref<6x34x256xf32, #tpu.memory_space<vmem>>, vector<1x34x256xf32>
    tpu.vector_store %arg6[%c0, %c0_0, %c0_1], %0 {strides = array<i32>} : memref<6x34x256xf32, #tpu.memory_space<vmem>>, vector<1x34x256xf32>,
    %cst_2 = arith.constant 0.000000e+00 : f32
    %2 = vector.broadcast %cst_2 : f32 to vector<1x34x256xf32>
    %c5 = arith.constant 5 : index
    %c0_3 = arith.constant 0 : index
    %c0_4 = arith.constant 0 : index
    %3 = vector.load %arg6[%c5, %c0_3, %c0_4] : memref<6x34x256xf32, #tpu.memory_space<vmem>>, vector<1x34x256xf32>
    tpu.vector_store %arg6[%c5, %c0_3, %c0_4], %2 {strides = array<i32>} : memref<6x34x256xf32, #tpu.memory_space<vmem>>, vector<1x34x256xf32>,
    %cst_5 = arith.constant 0.000000e+00 : f32
    %4 = vector.broadcast %cst_5 : f32 to vector<4x1x256xf32>
    %c1 = arith.constant 1 : index
    %c0_6 = arith.constant 0 : index
    %c0_7 = arith.constant 0 : index
    %5 = vector.load %arg6[%c1, %c0_6, %c0_7] : memref<6x34x256xf32, #tpu.memory_space<vmem>>, vector<4x1x256xf32>
    tpu.vector_store %arg6[%c1, %c0_6, %c0_7], %4 {strides = array<i32>} : memref<6x34x256xf32, #tpu.memory_space<vmem>>, vector<4x1x256xf32>,
    %cst_8 = arith.constant 0.000000e+00 : f32
    %6 = vector.broadcast %cst_8 : f32 to vector<4x1x256xf32>
    %c1_9 = arith.constant 1 : index
    %c33 = arith.constant 33 : index
    %c0_10 = arith.constant 0 : index
    %7 = vector.load %arg6[%c1_9, %c33, %c0_10] : memref<6x34x256xf32, #tpu.memory_space<vmem>>, vector<4x1x256xf32>
    tpu.vector_store %arg6[%c1_9, %c33, %c0_10], %6 {strides = array<i32>} : memref<6x34x256xf32, #tpu.memory_space<vmem>>, vector<4x1x256xf32>,
    %c0_11 = arith.constant 0 : index
    %c0_12 = arith.constant 0 : index
    %c0_13 = arith.constant 0 : index
    %c0_14 = arith.constant 0 : index
    %8 = vector.load %arg1[%c0_11, %c0_12, %c0_13, %c0_14] : memref<1x4x32x256xf32, #tpu.memory_space<vmem>>, vector<1x4x32x256xf32>
    %9 = vector.shape_cast %8 : vector<1x4x32x256xf32> to vector<4x32x256xf32>
    %c1_15 = arith.constant 1 : index
    %c1_16 = arith.constant 1 : index
    %c0_17 = arith.constant 0 : index
    %10 = vector.load %arg6[%c1_15, %c1_16, %c0_17] : memref<6x34x256xf32, #tpu.memory_space<vmem>>, vector<4x32x256xf32>
    tpu.vector_store %arg6[%c1_15, %c1_16, %c0_17], %9 {strides = array<i32>} : memref<6x34x256xf32, #tpu.memory_space<vmem>>, vector<4x32x256xf32>,
    %cst_18 = arith.constant 0.000000e+00 : f32
    %11 = vector.broadcast %cst_18 : f32 to vector<128x128xf32>
    %c0_19 = arith.constant 0 : index
    %c0_20 = arith.constant 0 : index
    %c0_21 = arith.constant 0 : index
    %12 = vector.load %arg6[%c0_19, %c0_20, %c0_21] : memref<6x34x256xf32, #tpu.memory_space<vmem>>, vector<4x32x256xf32>
    %13 = vector.shape_cast %12 : vector<4x32x256xf32> to vector<128x256xf32>
    %c0_22 = arith.constant 0 : index
    %c0_23 = arith.constant 0 : index
    %c0_24 = arith.constant 0 : index
    %c0_25 = arith.constant 0 : index
    %14 = vector.load %arg2[%c0_22, %c0_23, %c0_24, %c0_25] : memref<3x3x256x128xf32, #tpu.memory_space<vmem>>, vector<1x1x256x128xf32>
    %15 = vector.shape_cast %14 : vector<1x1x256x128xf32> to vector<256x128xf32>
    %cst_26 = arith.constant dense<0.000000e+00> : vector<128x128xf32>
    %16 = tpu.matmul %13, %15, %cst_26 {dimension_numbers = #tpu.dot_dimension_numbers<[1], [0], [0], [1], [0, 0, 1, 1], [], []>} : vector<128x256xf32>, vector<256x128xf32>, vector<128x128xf32> -> vector<128x128xf32>
    %17 = arith.addf %11, %16 : vector<128x128xf32>
    %c0_27 = arith.constant 0 : index
    %c1_28 = arith.constant 1 : index
    %c0_29 = arith.constant 0 : index
    %18 = vector.load %arg6[%c0_27, %c1_28, %c0_29] : memref<6x34x256xf32, #tpu.memory_space<vmem>>, vector<4x32x256xf32>
    %19 = vector.shape_cast %18 : vector<4x32x256xf32> to vector<128x256xf32>
    %c0_30 = arith.constant 0 : index
    %c1_31 = arith.constant 1 : index
    %c0_32 = arith.constant 0 : index
    %c0_33 = arith.constant 0 : index
    %20 = vector.load %arg2[%c0_30, %c1_31, %c0_32, %c0_33] : memref<3x3x256x128xf32, #tpu.memory_space<vmem>>, vector<1x1x256x128xf32>
    %21 = vector.shape_cast %20 : vector<1x1x256x128xf32> to vector<256x128xf32>
    %cst_34 = arith.constant dense<0.000000e+00> : vector<128x128xf32>
    %22 = tpu.matmul %19, %21, %cst_34 {dimension_numbers = #tpu.dot_dimension_numbers<[1], [0], [0], [1], [0, 0, 1, 1], [], []>} : vector<128x256xf32>, vector<256x128xf32>, vector<128x128xf32> -> vector<128x128xf32>
    %23 = arith.addf %17, %22 : vector<128x128xf32>
    %c0_35 = arith.constant 0 : index
    %c2 = arith.constant 2 : index
    %c0_36 = arith.constant 0 : index
    %24 = vector.load %arg6[%c0_35, %c2, %c0_36] : memref<6x34x256xf32, #tpu.memory_space<vmem>>, vector<4x32x256xf32>
    %25 = vector.shape_cast %24 : vector<4x32x256xf32> to vector<128x256xf32>
    %c0_37 = arith.constant 0 : index
    %c2_38 = arith.constant 2 : index
    %c0_39 = arith.constant 0 : index
    %c0_40 = arith.constant 0 : index
    %26 = vector.load %arg2[%c0_37, %c2_38, %c0_39, %c0_40] : memref<3x3x256x128xf32, #tpu.memory_space<vmem>>, vector<1x1x256x128xf32>
    %27 = vector.shape_cast %26 : vector<1x1x256x128xf32> to vector<256x128xf32>
    %cst_41 = arith.constant dense<0.000000e+00> : vector<128x128xf32>
    %28 = tpu.matmul %25, %27, %cst_41 {dimension_numbers = #tpu.dot_dimension_numbers<[1], [0], [0], [1], [0, 0, 1, 1], [], []>} : vector<128x256xf32>, vector<256x128xf32>, vector<128x128xf32> -> vector<128x128xf32>
    %29 = arith.addf %23, %28 : vector<128x128xf32>
    %c1_42 = arith.constant 1 : index
    %c0_43 = arith.constant 0 : index
    %c0_44 = arith.constant 0 : index
    %30 = vector.load %arg6[%c1_42, %c0_43, %c0_44] : memref<6x34x256xf32, #tpu.memory_space<vmem>>, vector<4x32x256xf32>
    %31 = vector.shape_cast %30 : vector<4x32x256xf32> to vector<128x256xf32>
    %c1_45 = arith.constant 1 : index
    %c0_46 = arith.constant 0 : index
    %c0_47 = arith.constant 0 : index
    %c0_48 = arith.constant 0 : index
    %32 = vector.load %arg2[%c1_45, %c0_46, %c0_47, %c0_48] : memref<3x3x256x128xf32, #tpu.memory_space<vmem>>, vector<1x1x256x128xf32>
    %33 = vector.shape_cast %32 : vector<1x1x256x128xf32> to vector<256x128xf32>
    %cst_49 = arith.constant dense<0.000000e+00> : vector<128x128xf32>
    %34 = tpu.matmul %31, %33, %cst_49 {dimension_numbers = #tpu.dot_dimension_numbers<[1], [0], [0], [1], [0, 0, 1, 1], [], []>} : vector<128x256xf32>, vector<256x128xf32>, vector<128x128xf32> -> vector<128x128xf32>
    %35 = arith.addf %29, %34 : vector<128x128xf32>
    %c1_50 = arith.constant 1 : index
    %c1_51 = arith.constant 1 : index
    %c0_52 = arith.constant 0 : index
    %36 = vector.load %arg6[%c1_50, %c1_51, %c0_52] : memref<6x34x256xf32, #tpu.memory_space<vmem>>, vector<4x32x256xf32>
    %37 = vector.shape_cast %36 : vector<4x32x256xf32> to vector<128x256xf32>
    %c1_53 = arith.constant 1 : index
    %c1_54 = arith.constant 1 : index
    %c0_55 = arith.constant 0 : index
    %c0_56 = arith.constant 0 : index
    %38 = vector.load %arg2[%c1_53, %c1_54, %c0_55, %c0_56] : memref<3x3x256x128xf32, #tpu.memory_space<vmem>>, vector<1x1x256x128xf32>
    %39 = vector.shape_cast %38 : vector<1x1x256x128xf32> to vector<256x128xf32>
    %cst_57 = arith.constant dense<0.000000e+00> : vector<128x128xf32>
    %40 = tpu.matmul %37, %39, %cst_57 {dimension_numbers = #tpu.dot_dimension_numbers<[1], [0], [0], [1], [0, 0, 1, 1], [], []>} : vector<128x256xf32>, vector<256x128xf32>, vector<128x128xf32> -> vector<128x128xf32>
    %41 = arith.addf %35, %40 : vector<128x128xf32>
    %c1_58 = arith.constant 1 : index
    %c2_59 = arith.constant 2 : index
    %c0_60 = arith.constant 0 : index
    %42 = vector.load %arg6[%c1_58, %c2_59, %c0_60] : memref<6x34x256xf32, #tpu.memory_space<vmem>>, vector<4x32x256xf32>
    %43 = vector.shape_cast %42 : vector<4x32x256xf32> to vector<128x256xf32>
    %c1_61 = arith.constant 1 : index
    %c2_62 = arith.constant 2 : index
    %c0_63 = arith.constant 0 : index
    %c0_64 = arith.constant 0 : index
    %44 = vector.load %arg2[%c1_61, %c2_62, %c0_63, %c0_64] : memref<3x3x256x128xf32, #tpu.memory_space<vmem>>, vector<1x1x256x128xf32>
    %45 = vector.shape_cast %44 : vector<1x1x256x128xf32> to vector<256x128xf32>
    %cst_65 = arith.constant dense<0.000000e+00> : vector<128x128xf32>
    %46 = tpu.matmul %43, %45, %cst_65 {dimension_numbers = #tpu.dot_dimension_numbers<[1], [0], [0], [1], [0, 0, 1, 1], [], []>} : vector<128x256xf32>, vector<256x128xf32>, vector<128x128xf32> -> vector<128x128xf32>
    %47 = arith.addf %41, %46 : vector<128x128xf32>
    %c2_66 = arith.constant 2 : index
    %c0_67 = arith.constant 0 : index
    %c0_68 = arith.constant 0 : index
    %48 = vector.load %arg6[%c2_66, %c0_67, %c0_68] : memref<6x34x256xf32, #tpu.memory_space<vmem>>, vector<4x32x256xf32>
    %49 = vector.shape_cast %48 : vector<4x32x256xf32> to vector<128x256xf32>
    %c2_69 = arith.constant 2 : index
    %c0_70 = arith.constant 0 : index
    %c0_71 = arith.constant 0 : index
    %c0_72 = arith.constant 0 : index
    %50 = vector.load %arg2[%c2_69, %c0_70, %c0_71, %c0_72] : memref<3x3x256x128xf32, #tpu.memory_space<vmem>>, vector<1x1x256x128xf32>
    %51 = vector.shape_cast %50 : vector<1x1x256x128xf32> to vector<256x128xf32>
    %cst_73 = arith.constant dense<0.000000e+00> : vector<128x128xf32>
    %52 = tpu.matmul %49, %51, %cst_73 {dimension_numbers = #tpu.dot_dimension_numbers<[1], [0], [0], [1], [0, 0, 1, 1], [], []>} : vector<128x256xf32>, vector<256x128xf32>, vector<128x128xf32> -> vector<128x128xf32>
    %53 = arith.addf %47, %52 : vector<128x128xf32>
    %c2_74 = arith.constant 2 : index
    %c1_75 = arith.constant 1 : index
    %c0_76 = arith.constant 0 : index
    %54 = vector.load %arg6[%c2_74, %c1_75, %c0_76] : memref<6x34x256xf32, #tpu.memory_space<vmem>>, vector<4x32x256xf32>
    %55 = vector.shape_cast %54 : vector<4x32x256xf32> to vector<128x256xf32>
    %c2_77 = arith.constant 2 : index
    %c1_78 = arith.constant 1 : index
    %c0_79 = arith.constant 0 : index
    %c0_80 = arith.constant 0 : index
    %56 = vector.load %arg2[%c2_77, %c1_78, %c0_79, %c0_80] : memref<3x3x256x128xf32, #tpu.memory_space<vmem>>, vector<1x1x256x128xf32>
    %57 = vector.shape_cast %56 : vector<1x1x256x128xf32> to vector<256x128xf32>
    %cst_81 = arith.constant dense<0.000000e+00> : vector<128x128xf32>
    %58 = tpu.matmul %55, %57, %cst_81 {dimension_numbers = #tpu.dot_dimension_numbers<[1], [0], [0], [1], [0, 0, 1, 1], [], []>} : vector<128x256xf32>, vector<256x128xf32>, vector<128x128xf32> -> vector<128x128xf32>
    %59 = arith.addf %53, %58 : vector<128x128xf32>
    %c2_82 = arith.constant 2 : index
    %c2_83 = arith.constant 2 : index
    %c0_84 = arith.constant 0 : index
    %60 = vector.load %arg6[%c2_82, %c2_83, %c0_84] : memref<6x34x256xf32, #tpu.memory_space<vmem>>, vector<4x32x256xf32>
    %61 = vector.shape_cast %60 : vector<4x32x256xf32> to vector<128x256xf32>
    %c2_85 = arith.constant 2 : index
    %c2_86 = arith.constant 2 : index
    %c0_87 = arith.constant 0 : index
    %c0_88 = arith.constant 0 : index
    %62 = vector.load %arg2[%c2_85, %c2_86, %c0_87, %c0_88] : memref<3x3x256x128xf32, #tpu.memory_space<vmem>>, vector<1x1x256x128xf32>
    %63 = vector.shape_cast %62 : vector<1x1x256x128xf32> to vector<256x128xf32>
    %cst_89 = arith.constant dense<0.000000e+00> : vector<128x128xf32>
    %64 = tpu.matmul %61, %63, %cst_89 {dimension_numbers = #tpu.dot_dimension_numbers<[1], [0], [0], [1], [0, 0, 1, 1], [], []>} : vector<128x256xf32>, vector<256x128xf32>, vector<128x128xf32> -> vector<128x128xf32>
    %65 = arith.addf %59, %64 : vector<128x128xf32>
    %c0_90 = arith.constant 0 : index
    %c0_91 = arith.constant 0 : index
    %66 = vector.load %arg3[%c0_90, %c0_91] : memref<1x128xf32, #tpu.memory_space<vmem>>, vector<1x128xf32>
    %67 = vector.broadcast %66 : vector<1x128xf32> to vector<128x128xf32>
    %68 = arith.addf %65, %67 : vector<128x128xf32>
    %c0_92 = arith.constant 0 : index
    %c0_93 = arith.constant 0 : index
    %69 = memref.load %arg4[%c0_92, %c0_93] : memref<1x1xf32, #tpu.memory_space<smem>>
    %cst_94 = arith.constant 0.000000e+00 : f32
    %70 = vector.broadcast %cst_94 : f32 to vector<128x128xf32>
    %71 = arith.cmpf oge, %68, %70 : vector<128x128xf32>
    %72 = vector.broadcast %69 : f32 to vector<128x128xf32>
    %73 = arith.mulf %72, %68 : vector<128x128xf32>
    %74 = arith.select %71, %68, %73 : vector<128x128xi1>, vector<128x128xf32>
    %c0_95 = arith.constant 0 : index
    %c0_96 = arith.constant 0 : index
    %c0_97 = arith.constant 0 : index
    %75 = vector.load %arg5[%c0_95, %c0_96, %c0_97] : memref<1x128x128xf32, #tpu.memory_space<vmem>>, vector<1x128x128xf32>
    %76 = vector.shape_cast %75 : vector<1x128x128xf32> to vector<128x128xf32>
    %77 = vector.shape_cast %74 : vector<128x128xf32> to vector<1x128x128xf32>
    tpu.vector_store %arg5[%c0_95, %c0_96, %c0_97], %77 {strides = array<i32>} : memref<1x128x128xf32, #tpu.memory_space<vmem>>, vector<1x128x128xf32>,
    return
  }
  func.func @transform_0(%arg0: i32) -> (i32, i32, i32, i32) {
    %c0_i32 = arith.constant 0 : i32
    %c0_i32_0 = arith.constant 0 : i32
    %c0_i32_1 = arith.constant 0 : i32
    %c0_i32_2 = arith.constant 0 : i32
    return %arg0, %c0_i32, %c0_i32_0, %c0_i32_1 : i32, i32, i32, i32
  }
  func.func @transform_1(%arg0: i32) -> (i32, i32, i32, i32) {
    %c0_i32 = arith.constant 0 : i32
    %c0_i32_0 = arith.constant 0 : i32
    %c0_i32_1 = arith.constant 0 : i32
    %c0_i32_2 = arith.constant 0 : i32
    %c0_i32_3 = arith.constant 0 : i32
    return %c0_i32, %c0_i32_0, %c0_i32_1, %c0_i32_2 : i32, i32, i32, i32
  }
  func.func @transform_2(%arg0: i32) -> (i32, i32) {
    %c0_i32 = arith.constant 0 : i32
    %c0_i32_0 = arith.constant 0 : i32
    %c0_i32_1 = arith.constant 0 : i32
    return %c0_i32, %c0_i32_0 : i32, i32
  }
  func.func @transform_3(%arg0: i32) -> (i32, i32) {
    %c0_i32 = arith.constant 0 : i32
    %c0_i32_0 = arith.constant 0 : i32
    %c0_i32_1 = arith.constant 0 : i32
    return %c0_i32, %c0_i32_0 : i32, i32
  }
  func.func @transform_4(%arg0: i32) -> (i32, i32, i32) {
    %c0_i32 = arith.constant 0 : i32
    %c0_i32_0 = arith.constant 0 : i32
    %c0_i32_1 = arith.constant 0 : i32
    return %arg0, %c0_i32, %c0_i32_0 : i32, i32, i32
  }
}

</mosaic_0001>

<bundles_post_ra>
// kernel: forward.6
= control target key start
LH: loop header
LB: loop body
LE: loop exit
PB: predicated region body
PF: predicated region fallthrough
CT: control target
= control target key end

     0   :  { %s2842_s0 = inlined_call_operand.vmem [shape: f32[2,4,16,48], index: 0, kind: input, shape index: {}]   ;;  %s2843_s1 = inlined_call_operand.hbm [shape: f32[3,3,48,128], index: 1, kind: input, shape index: {}]   ;;  %s2844_s2 = inlined_call_operand.hbm [shape: f32[1,128], index: 2, kind: input, shape index: {}]   ;;  %s2845_s3 = inlined_call_operand.<no memory space> [shape: f32[1,1], index: 3, kind: input, shape index: {}]   ;;  %s2846_s4 = inlined_call_operand.vmem [shape: bf16[2,64,128], index: 4, kind: output, shape index: {}]  }
   0x1   :  { %9 = sst [smem:[#allocation3]] %s2845_s3 }
   0x2   :  { %10 = vsyncpa [#allocation5], 0 }
   0x3   :  { %11 = vsyncpa [#allocation7], 0  ;;  %s2558_s17 = smov 0  }
   0x4 LB: > { %s2564_s18 = sadd.s32 4294967295, %s2523_s17   ;;  %p1774_p0 = scmp.ge.s32.totalorder %s2523_s17, 1  ;;  %s2523_s17 = sphi %s2558_s17, %s17_s17  }
   0x5   : > { %p137_p1 = scmp.lt.s32.totalorder %s2523_s17, 3  ;;  %s2525_s19 = smov [#allocation4]  }
   0x6   : > { %s149_s3 = sshll.u32 %s2525_s19, 4  ;;  %p2847_p3 = scmp.eq.s32.totalorder %s2564_s18, 0  ;;  %s150_s3 = int_to_ptr.vmem [resolvable:$true] %s149_s3 }
   0x7   : > { %p2568_p2 = pnand %p1774_p0, %p137_p1  ;;  %s2526_s21 = smov [#allocation6]  }
   0x8   : > { %s163_s22 = sshll.u32 %s2526_s21, 4  ;;  %s2453_s26 = scalar_lea.hbm %s2843_s1, 6912  ;;  %s2581_s22 = int_to_ptr.vmem [resolvable:$true] %s163_s22 }
   0x9   : > { %s2849_s20 = scalar_select %p2568_p2, 1, 0 }
   0xa   : > { %p2429_p4 = pneg %p2568_p2  ;;  %p2454_p6 = scmp.ne.s32.totalorder %s2843_s1, %s2453_s26 }
   0xb   : > { %p2460_p10 = scmp.lt.u32.totalorder %s2453_s26, %s2843_s1 }
   0xc   : > { %p2577_p5 = pnand %p2847_p3, %p2429_p4 }
   0xe   : > { %p2455_p7 = pneg %p2577_p5 }
  0x10   : > { %p2456_p8 = pnand %p2455_p7, %p2454_p6 }
  0x12   : > { %p2457_p9 = pneg %p2456_p8 }
  0x14   : > { %p2462_p11 = pnand %p2460_p10, %p2457_p9 }
  0x16   : > { %2465 = shalt.err (!%p2462_p11)
}
  0x17   : > { %s2466_s5 = scalar_lea.vmem %s150_s3, 6912  ;;  %p2474_p1 = scmp.lt.s32.totalorder %s150_s3, %s150_s3 }
  0x18   : > { %p2467_p12 = scmp.ne.s32.totalorder %s150_s3, %s2466_s5  ;;  %p2475_p4 = scmp.lt.s32.totalorder %s2466_s5, %s2466_s5 }
  0x1a   : > { %p2469_p13 = pnand %p2467_p12, %p2455_p7  ;;  %p2476_p3 = por %p2475_p4, %p2474_p1 }
  0x1c   : > { %p2470_p0 = pneg %p2469_p13 }
  0x1e   : > { %p2477_p2 = pnand %p2476_p3, %p2470_p0 }
  0x20   : > { %2480 = shalt.err (!%p2477_p2)
}
  0x21   : > { %s2527_s6 = smov 128   ;;  %s2528_s7 = smov 8  }
  0x22   : > { %2432 = dma.hbm_to_vmem [thread:$0]  (!%p2577_p5), %s2843_s1, 6912, %s150_s3, [#allocation5], %s2527_s6, %s2527_s6, %s2528_s7  }
  0x23   : > { %s2481_s12 = scalar_lea.hbm %s2844_s2, 16 }
  0x24   : > { %p2482_p6 = scmp.ne.s32.totalorder %s2844_s2, %s2481_s12  ;;  %p2488_p8 = scmp.lt.u32.totalorder %s2481_s12, %s2844_s2 }
  0x26   : > { %p2484_p2 = pnand %p2482_p6, %p2455_p7 }
  0x28   : > { %p2485_p3 = pneg %p2484_p2 }
  0x2a   : > { %p2490_p9 = pnand %p2488_p8, %p2485_p3 }
  0x2c   : > { %2493 = shalt.err (!%p2490_p9)
}
  0x2d   : > { %s2494_s19 = scalar_lea.vmem %s2581_s22, 16  ;;  %s2501_s3 = scalar_lea.vmem %s2581_s22, 32 }
  0x2e   : > { %p2495_p10 = scmp.ne.s32.totalorder %s2581_s22, %s2494_s19  ;;  %p2502_p13 = scmp.lt.s32.totalorder %s2581_s22, %s2581_s22 }
  0x2f   : > { %p2503_p0 = scmp.lt.s32.totalorder %s2501_s3, %s2494_s19 }
  0x30   : > { %p2497_p11 = pnand %p2495_p10, %p2455_p7 }
  0x31   : > { %p2504_p1 = por %p2503_p0, %p2502_p13 }
  0x32   : > { %p2498_p12 = pneg %p2497_p11 }
  0x34   : > { %p2505_p4 = pnand %p2504_p1, %p2498_p12 }
  0x36   : > { %2508 = shalt.err (!%p2505_p4)
}
  0x37   : > { %2435 = dma.hbm_to_vmem [thread:$0]  (!%p2577_p5), %s2844_s2, 16, %s2581_s22, [#allocation7]  }
  0x38   : > { %p2851_p6 = scmp.ne.s32.totalorder %s2849_s20, 0 }
  0x39   : > { %p2852_p7 = scmp.eq.s32.totalorder (!%p2851_p6), %s2564_s18, 0 }
  0x3a   : > { %187 = sbr.rel (%p2851_p6) target bundleno = 380 (0x17c), region = 36 }
  0x41   : > { %2514 = dma.done.wait (%p2852_p7), [#allocation5], 6912   ;;  %p2853_p2 = pmov %p2852_p7 }
  0x43   : > { %2516 = vsyncadd (%p2853_p2), [#allocation5], 4294960384  ;;  %p2854_p3 = pmov %p2853_p2 }
  0x44   : > { %p2855_p8 = pmov %p2853_p2 }
  0x45   : > { %2518 = dma.done.wait (%p2854_p3), [#allocation7], 16  }
  0x46   : > { %2520 = vsyncadd (%p2855_p8), [#allocation7], 4294967280  ;;  %vm227_vm0 = vcmask 392192   ;;  %p217_p9 = scmp.lt.s32.totalorder %s2564_s18, 1  ;;  %vm230_vm1 = vcmask 386048   ;;  %v2529_v0 = vmov 0.0  }
  0x47   : > { %228 = vst.msk [vmem:[#allocation2] sm:$0xff] %vm227_vm0, %v2529_v0  ;;  %229 = vst.msk [vmem:[#allocation2 + $0x8] sm:$0xff] %vm227_vm0, %v2529_v0  ;;  %vm237_vm2 = vcmask 385024   ;;  %v285_v1 = vld [vmem:[#allocation4 + $0x30] sm:$0xff]  ;;  %v286_v2 = vld [vmem:[#allocation4 + $0x38] sm:$0xff]  ;;  %s1629_s26 = sld [smem:[#allocation3]] }
  0x48   : > { %233 = vst.msk [vmem:[#allocation2 + $0x78] sm:$0xff] %vm227_vm0, %v2529_v0  ;;  %234 = vst.msk [vmem:[#allocation2 + $0x80] sm:$0xff] %vm227_vm0, %v2529_v0  ;;  %s2857_s18 = smov (!%p217_p9, %s2564_s18), 1  ;;  %v862_v3 = vld [vmem:[#allocation4 + $0xc0] sm:$0xff]  ;;  %v2243_v4 = vpack.c.bf16 %v286_v2, %v285_v1  ;;  %v863_v5 = vld [vmem:[#allocation4 + $0xc8] sm:$0xff] }
  0x49   : > { %231 = vst.msk [vmem:[#allocation2 + $0x10] sm:$0x3] %vm230_vm1, %v2529_v0  ;;  %235 = vst.msk [vmem:[#allocation2 + $0x88] sm:$0x3] %vm230_vm1, %v2529_v0  ;;  %s1868_s20 = sshll.u32 %s2857_s18, 6  ;;  %v287_v6 = vld [vmem:[#allocation4 + $0x40] sm:$0xff]  ;;  %v2291_v8 = vpack.c.bf16 %v863_v5, %v862_v3 }
  0x4a   : > { %242 = vst.msk [vmem:[#allocation2 + $0x29] sm:$0x1] %vm237_vm2, %v2529_v0  ;;  %238 = vst.msk [vmem:[#allocation2 + $0x18] sm:$0x1] %vm237_vm2, %v2529_v0  ;;  %v288_v7 = vld [vmem:[#allocation4 + $0x48] sm:$0xff]  ;;  %s2653_s25 = scalar_lea.vmem %s2842_s0, %s1868_s20  ;;  %v864_v10 = vld [vmem:[#allocation4 + $0xd0] sm:$0xff]  ;;  %2244 = vmatprep.subr.bf16.mxu1 %v2243_v4 }
  0x4b   : > { %239 = vst.msk [vmem:[#allocation2 + $0x30] sm:$0x1] %vm237_vm2, %v2529_v0  ;;  %240 = vst.msk [vmem:[#allocation2 + $0x48] sm:$0x1] %vm237_vm2, %v2529_v0  ;;  %v2247_v9 = vpack.c.bf16 %v288_v7, %v287_v6  ;;  %v865_v11 = vld [vmem:[#allocation4 + $0xd8] sm:$0xff]  ;;  %v289_v12 = vld [vmem:[#allocation4 + $0x50] sm:$0xff]  ;;  %2292 = vmatprep.subr.bf16.mxu0 %v2291_v8  ;;  %2246 = vmatpush3.bf16.msra.mxu1 %v2243_v4 }
  0x4c   : > { %241 = vst.msk [vmem:[#allocation2 + $0x60] sm:$0x1] %vm237_vm2, %v2529_v0  ;;  %243 = vst.msk [vmem:[#allocation2 + $0x41] sm:$0x1] %vm237_vm2, %v2529_v0  ;;  %v2295_v13 = vpack.c.bf16 %v865_v11, %v864_v10  ;;  %v290_v14 = vld [vmem:[#allocation4 + $0x58] sm:$0xff]  ;;  %v866_v15 = vld [vmem:[#allocation4 + $0xe0] sm:$0xff]  ;;  %2294 = vmatpush3.bf16.msra.mxu0 %v2291_v8 }
  0x4d   : > { %244 = vst.msk [vmem:[#allocation2 + $0x59] sm:$0x1] %vm237_vm2, %v2529_v0  ;;  %245 = vst.msk [vmem:[#allocation2 + $0x71] sm:$0x1] %vm237_vm2, %v2529_v0  ;;  %v867_v16 = vld [vmem:[#allocation4 + $0xe8] sm:$0xff]  ;;  %v246_v18 = vld [vmem:[%s2653_s25] sm:$0xff]  ;;  %2248 = vmatprep.subr.bf16.mxu1 %v2247_v9  ;;  %v2251_v19 = vpack.c.bf16 %v290_v14, %v289_v12 }
  0x4e   : > { %v276_v17 = vld [vmem:[#allocation2 + $0x1] sm:$0xff]  ;;  %254 = vst.msk [vmem:[#allocation2 + $0x19] sm:$0xff] %vm227_vm0, %v246_v18  ;;  %2296 = vmatprep.subr.bf16.mxu0 %v2295_v13  ;;  %v2299_v21 = vpack.c.bf16 %v867_v16, %v866_v15  ;;  %v270_v22 = vld [vmem:[#allocation4] sm:$0xff]  ;;  %v271_v23 = vld [vmem:[#allocation4 + $0x8] sm:$0xff]  ;;  %s1869_s27 = sshll.u32 %s2857_s18, 5 }
  0x4f   : > { %v247_v20 = vld [vmem:[%s2653_s25 + $0x8] sm:$0xff]  ;;  %2039 = vmatprep.mubr.msk.f32.mxu1 %vm227_vm0, %v276_v17  ;;  %v248_v24 = vld [vmem:[%s2653_s25 + $0x10] sm:$0xff]  ;;  %v1014_v25 = vld [vmem:[#allocation4 + $0xf0] sm:$0xff]  ;;  %2250 = vmatpush3.bf16.msra.mxu1 %v2247_v9  ;;  %v2255_v31 = vpack.c.bf16 %v271_v23, %v270_v22  ;;  %s226_s30 = scalar_lea.vmem %s2846_s4, %s1869_s27 }
  0x50   : > { %255 = vst.msk [vmem:[#allocation2 + $0x21] sm:$0xff] %vm227_vm0, %v247_v20  ;;  %v1015_v26 = vld [vmem:[#allocation4 + $0xf8] sm:$0xff]  ;;  %256 = vst.msk [vmem:[#allocation2 + $0x31] sm:$0xff] %vm227_vm0, %v248_v24  ;;  %v249_v27 = vld [vmem:[%s2653_s25 + $0x18] sm:$0xff]  ;;  %2298 = vmatpush3.bf16.msra.mxu0 %v2295_v13  ;;  %2252 = vmatprep.subr.bf16.mxu1 %v2251_v19 }
  0x51   : > { %257 = vst.msk [vmem:[#allocation2 + $0x39] sm:$0xff] %vm227_vm0, %v249_v27  ;;  %v250_v28 = vld [vmem:[%s2653_s25 + $0x20] sm:$0xff]  ;;  %v251_v29 = vld [vmem:[%s2653_s25 + $0x28] sm:$0xff]  ;;  %2300 = vmatprep.subr.bf16.mxu0 %v2299_v21  ;;  %v2303_v32 = vpack.c.bf16 %v1015_v26, %v1014_v25  ;;  %v252_v33 = vld [vmem:[%s2653_s25 + $0x30] sm:$0xff] }
  0x52   : > { %258 = vst.msk [vmem:[#allocation2 + $0x49] sm:$0xff] %vm227_vm0, %v250_v28  ;;  %v277_v30 = vld [vmem:[#allocation2 + $0x9] sm:$0xff]  ;;  %259 = vst.msk [vmem:[#allocation2 + $0x51] sm:$0xff] %vm227_vm0, %v251_v29  ;;  %v272_v34 = vld [vmem:[#allocation4 + $0x10] sm:$0xff] }
  0x53   : > { %v273_v35 = vld [vmem:[#allocation4 + $0x18] sm:$0xff]  ;;  %260 = vst.msk [vmem:[#allocation2 + $0x61] sm:$0xff] %vm227_vm0, %v252_v33  ;;  %v253_v36 = vld [vmem:[%s2653_s25 + $0x38] sm:$0xff]  ;;  %2254 = vmatpush3.bf16.msra.mxu1 %v2251_v19  ;;  %v1016_v38 = vld [vmem:[#allocation4 + $0x100] sm:$0xff] }
  0x54   : > { %v1017_v39 = vld [vmem:[#allocation4 + $0x108] sm:$0xff]  ;;  %261 = vst.msk [vmem:[#allocation2 + $0x69] sm:$0xff] %vm227_vm0, %v253_v36  ;;  %2302 = vmatpush3.bf16.msra.mxu0 %v2299_v21  ;;  %2256 = vmatprep.subr.bf16.mxu1 %v2255_v31  ;;  %v2259_v41 = vpack.c.bf16 %v273_v35, %v272_v34  ;;  %v274_v44 = vld [vmem:[#allocation4 + $0x20] sm:$0xff]  ;;  %v1018_v46 = vld [vmem:[#allocation4 + $0x110] sm:$0xff] }
  0x55   : > { %v853_v37 = vld [vmem:[#allocation2 + $0x19] sm:$0xff]  ;;  %2304 = vmatprep.subr.bf16.mxu0 %v2303_v32  ;;  %v2307_v43 = vpack.c.bf16 %v1017_v39, %v1016_v38  ;;  %v1019_v47 = vld [vmem:[#allocation4 + $0x118] sm:$0xff]  ;;  %v558_v52 = vld [vmem:[#allocation4 + $0x60] sm:$0xff] }
  0x56   : > { %2135 = vmatprep.mubr.msk.f32.mxu0 %vm227_vm0, %v853_v37  ;;  %2040 = vmatmul.mubr.msk.f32.vlgmr.msra.gmra.mrb[0].mxu1 %vm227_vm0, %v277_v30  ;;  %v275_v45 = vld [vmem:[#allocation4 + $0x28] sm:$0xff]  ;;  %v2311_v51 = vpack.c.bf16 %v1019_v47, %v1018_v46  ;;  %v1167_v54 = vld [vmem:[#allocation4 + $0x120] sm:$0xff]  ;;  %v262_v61 = vld [vmem:[#allocation2] sm:$0xff] }
  0x57   : > { %v854_v40 = vld [vmem:[#allocation2 + $0x21] sm:$0xff]  ;;  %v2674_v42 = vld [vmem:[#allocation2 + $0x31] sm:$0xff]  ;;  %2258 = vmatpush3.bf16.msra.mxu1 %v2255_v31  ;;  %2042 = vmatprep.mubr.msk.f32.mxu1 %vm227_vm0, %v853_v37  ;;  %v2263_v50 = vpack.c.bf16 %v275_v45, %v274_v44 }
  0x58   : > { %2136 = vmatmul.mubr.msk.f32.vlgmr.msra.gmra.mrb[0].mxu0 %vm227_vm0, %v854_v40  ;;  %v2678_v48 = vld [vmem:[#allocation2 + $0x39] sm:$0xff]  ;;  %2260 = vmatprep.subr.bf16.mxu1 %v2259_v41  ;;  %v561_v0 = vld [vmem:[#allocation4 + $0x78] sm:$0xff]  ;;  %v562_v9 = vld [vmem:[#allocation4 + $0x80] sm:$0xff] }
  0x59   : > { %2306 = vmatpush3.bf16.msra.mxu0 %v2303_v32  ;;  %2138 = vmatprep.mubr.msk.f32.mxu0 %vm227_vm0, %v2674_v42  ;;  %v2682_v49 = vld [vmem:[#allocation2 + $0x49] sm:$0xff]  ;;  %v559_v53 = vld [vmem:[#allocation4 + $0x68] sm:$0xff]  ;;  %v560_v63 = vld [vmem:[#allocation4 + $0x70] sm:$0xff] }
  0x5a   : > { %2043 = vmatmul.mubr.msk.f32.gmra.mrb[2].mxu1 %vm227_vm0, %v854_v40  ;;  %2308 = vmatprep.subr.bf16.mxu0 %v2307_v43  ;;  %v1168_v55 = vld [vmem:[#allocation4 + $0x128] sm:$0xff]  ;;  %v2693_v57 = vld [vmem:[#allocation2 + $0x61] sm:$0xff]  ;;  %v2267_v58 = vpack.c.bf16 %v559_v53, %v558_v52  ;;  %v2271_v6 = vpack.c.bf16 %v561_v0, %v560_v63  ;;  %v1171_v12 = vld [vmem:[#allocation4 + $0x140] sm:$0xff] }
  0x5b   : > { %2045 = vmatprep.mubr.msk.f32.mxu1 %vm227_vm0, %v2674_v42  ;;  %2262 = vmatpush3.bf16.msra.mxu1 %v2259_v41  ;;  %v2691_v56 = vld [vmem:[#allocation2 + $0x51] sm:$0xff]  ;;  %v2315_v59 = vpack.c.bf16 %v1168_v55, %v1167_v54  ;;  %v2703_v60 = vld [vmem:[#allocation2 + $0x69] sm:$0xff]  ;;  %v2705_v62 = vld [vmem:[#allocation2 + $0x1a] sm:$0xff] }
  0x5c   : > { %2139 = vmatmul.mubr.msk.f32.gmra.mrb[2].mxu0 %vm227_vm0, %v2678_v48  ;;  %2264 = vmatprep.subr.bf16.mxu1 %v2263_v50  ;;  %v263_v1 = vld [vmem:[#allocation2 + $0x8] sm:$0xff]  ;;  %v1169_v2 = vld [vmem:[#allocation4 + $0x130] sm:$0xff]  ;;  %v2716_v5 = vld [vmem:[#allocation2 + $0x18] sm:$0xff] }
  0x5d   : > { %2141 = vmatprep.mubr.msk.f32.mxu0 %vm227_vm0, %v2682_v49  ;;  %2310 = vmatpush3.bf16.msra.mxu0 %v2307_v43  ;;  %v1170_v3 = vld [vmem:[#allocation4 + $0x138] sm:$0xff]  ;;  %v2719_v7 = vld [vmem:[#allocation2 + $0x32] sm:$0xff]  ;;  %v2723_v11 = vld [vmem:[#allocation2 + $0x20] sm:$0xff] }
  0x5e   : > { %2046 = vmatmul.mubr.msk.f32.gmra.mrb[4].mxu1 %vm227_vm0, %v2678_v48  ;;  %2312 = vmatprep.subr.bf16.mxu0 %v2311_v51  ;;  %v2714_v4 = vld [vmem:[#allocation2 + $0x22] sm:$0xff]  ;;  %v2319_v8 = vpack.c.bf16 %v1170_v3, %v1169_v2  ;;  %v563_v10 = vld [vmem:[#allocation4 + $0x88] sm:$0xff]  ;;  %v2729_v15 = vld [vmem:[#allocation2 + $0x30] sm:$0xff] }
  0x5f   : > { %2048 = vmatprep.mubr.msk.f32.mxu1 %vm227_vm0, %v2682_v49  ;;  %2266 = vmatpush3.bf16.msra.mxu1 %v2263_v50  ;;  %v1172_v13 = vld [vmem:[#allocation4 + $0x148] sm:$0xff]  ;;  %v2733_v16 = vld [vmem:[#allocation2 + $0x4a] sm:$0xff]  ;;  %v2275_v17 = vpack.c.bf16 %v563_v10, %v562_v9  ;;  %v710_v19 = vld [vmem:[#allocation4 + $0x90] sm:$0xff] }
  0x60   : > { %2142 = vmatmul.mubr.msk.f32.gmra.mrb[4].mxu0 %vm227_vm0, %v2691_v56  ;;  %2268 = vmatprep.subr.bf16.mxu1 %v2267_v58  ;;  %v2727_v14 = vld [vmem:[#allocation2 + $0x3a] sm:$0xff]  ;;  %v2323_v18 = vpack.c.bf16 %v1172_v13, %v1171_v12  ;;  %v711_v20 = vld [vmem:[#allocation4 + $0x98] sm:$0xff]  ;;  %v2745_v24 = vld [vmem:[#allocation2 + $0x52] sm:$0xff] }
  0x61   : > { %2144 = vmatprep.mubr.msk.f32.mxu0 %vm227_vm0, %v2693_v57  ;;  %2314 = vmatpush3.bf16.msra.mxu0 %v2311_v51  ;;  %v2741_v21 = vld [vmem:[#allocation2 + $0x38] sm:$0xff]  ;;  %v1319_v22 = vld [vmem:[#allocation4 + $0x150] sm:$0xff]  ;;  %v1320_v23 = vld [vmem:[#allocation4 + $0x158] sm:$0xff]  ;;  %v2279_v27 = vpack.c.bf16 %v711_v20, %v710_v19  ;;  %v1638_v20 = vstv %s1629_s26 }
  0x62   : > { %2049 = vmatmul.mubr.msk.f32.gmra.mrb[6].mxu1 %vm227_vm0, %v2691_v56  ;;  %2316 = vmatprep.subr.bf16.mxu0 %v2315_v59  ;;  %v2747_v25 = vld [vmem:[#allocation2 + $0x48] sm:$0xff]  ;;  %v2327_v28 = vpack.c.bf16 %v1320_v23, %v1319_v22  ;;  %v2757_v29 = vld [vmem:[#allocation2 + $0x50] sm:$0xff]  ;;  %v713_v33 = vld [vmem:[#allocation4 + $0xa8] sm:$0xff] }
  0x63   : > { %2063 = vmatprep.mubr.msk.f32.mxu1 %vm227_vm0, %v262_v61  ;;  %v2749_v26 = vld [vmem:[#allocation2 + $0x62] sm:$0xff]  ;;  %v2761_v30 = vld [vmem:[#allocation2 + $0x6a] sm:$0xff]  ;;  %v1322_v36 = vld [vmem:[#allocation4 + $0x168] sm:$0xff] }
  0x64   : > { %2145 = vmatmul.mubr.msk.f32.gmra.mrb[6].mxu0 %vm227_vm0, %v2703_v60  ;;  %v549_v31 = vld [vmem:[#allocation2 + $0x2] sm:$0xff]  ;;  %v712_v32 = vld [vmem:[#allocation4 + $0xa0] sm:$0xff]  ;;  %v1472_v50 = vld [vmem:[#allocation4 + $0x188] sm:$0xff] }
  0x65   : > { %2159 = vmatprep.mubr.msk.f32.mxu0 %vm227_vm0, %v2705_v62  ;;  %v550_v34 = vld [vmem:[#allocation2 + $0xa] sm:$0xff]  ;;  %v2283_v37 = vpack.c.bf16 %v713_v33, %v712_v32  ;;  %v714_v39 = vld [vmem:[#allocation4 + $0xb0] sm:$0xff]  ;;  %v1164_v52 = vld [vmem:[#allocation2 + $0x78] sm:$0xff] }
  0x66   : > { %2064 = vmatmul.mubr.msk.f32.vlgmr.msra.gmra.mrb[0].mxu1 %vm227_vm0, %v263_v1  ;;  %v1321_v35 = vld [vmem:[#allocation4 + $0x160] sm:$0xff]  ;;  %v715_v40 = vld [vmem:[#allocation4 + $0xb8] sm:$0xff]  ;;  %v1323_v41 = vld [vmem:[#allocation4 + $0x170] sm:$0xff] }
  0x67   : > { %2270 = vmatpush3.bf16.msra.mxu1 %v2267_v58  ;;  %2066 = vmatprep.mubr.msk.f32.mxu1 %vm227_vm0, %v2716_v5  ;;  %v2331_v38 = vpack.c.bf16 %v1322_v36, %v1321_v35  ;;  %v1324_v43 = vld [vmem:[#allocation4 + $0x178] sm:$0xff]  ;;  %v1162_v44 = vld [vmem:[#allocation2 + $0x60] sm:$0xff]  ;;  %v2287_v45 = vpack.c.bf16 %v715_v40, %v714_v39  ;;  %v1471_v47 = vld [vmem:[#allocation4 + $0x180] sm:$0xff] }
  0x68   : > { %2160 = vmatmul.mubr.msk.f32.vlgmr.msra.gmra.mrb[0].mxu0 %vm227_vm0, %v2714_v4  ;;  %2272 = vmatprep.subr.bf16.mxu1 %v2271_v6  ;;  %v2335_v46 = vpack.c.bf16 %v1324_v43, %v1323_v41  ;;  %v1163_v51 = vld [vmem:[#allocation2 + $0x68] sm:$0xff]  ;;  %v2339_v53 = vpack.c.bf16 %v1472_v50, %v1471_v47  ;;  %v1165_v54 = vld [vmem:[#allocation2 + $0x80] sm:$0xff]  ;;  %v1475_v61 = vld [vmem:[#allocation4 + $0x1a0] sm:$0xff] }
  0x69   : > { %2318 = vmatpush3.bf16.msra.mxu0 %v2315_v59  ;;  %2162 = vmatprep.mubr.msk.f32.mxu0 %vm227_vm0, %v2719_v7  ;;  %v1473_v55 = vld [vmem:[#allocation4 + $0x190] sm:$0xff]  ;;  %v1474_v58 = vld [vmem:[#allocation4 + $0x198] sm:$0xff] }
  0x6a   : > { %2067 = vmatmul.mubr.msk.f32.gmra.mrb[2].mxu1 %vm227_vm0, %v2723_v11  ;;  %2320 = vmatprep.subr.bf16.mxu0 %v2319_v8  ;;  %v2343_v59 = vpack.c.bf16 %v1474_v58, %v1473_v55 }
  0x6b   : > { %2069 = vmatprep.mubr.msk.f32.mxu1 %vm227_vm0, %v2729_v15  ;;  %2274 = vmatpush3.bf16.msra.mxu1 %v2271_v6 }
  0x6c   : > { %2163 = vmatmul.mubr.msk.f32.gmra.mrb[2].mxu0 %vm227_vm0, %v2727_v14  ;;  %2276 = vmatprep.subr.bf16.mxu1 %v2275_v17 }
  0x6d   : > { %2165 = vmatprep.mubr.msk.f32.mxu0 %vm227_vm0, %v2733_v16  ;;  %2322 = vmatpush3.bf16.msra.mxu0 %v2319_v8 }
  0x6e   : > { %2070 = vmatmul.mubr.msk.f32.gmra.mrb[4].mxu1 %vm227_vm0, %v2741_v21  ;;  %2324 = vmatprep.subr.bf16.mxu0 %v2323_v18 }
  0x6f   : > { %2072 = vmatprep.mubr.msk.f32.mxu1 %vm227_vm0, %v2747_v25  ;;  %2278 = vmatpush3.bf16.msra.mxu1 %v2275_v17 }
  0x70   : > { %2166 = vmatmul.mubr.msk.f32.gmra.mrb[4].mxu0 %vm227_vm0, %v2745_v24  ;;  %2280 = vmatprep.subr.bf16.mxu1 %v2279_v27 }
  0x71   : > { %2168 = vmatprep.mubr.msk.f32.mxu0 %vm227_vm0, %v2749_v26  ;;  %2326 = vmatpush3.bf16.msra.mxu0 %v2323_v18 }
  0x72   : > { %2073 = vmatmul.mubr.msk.f32.gmra.mrb[6].mxu1 %vm227_vm0, %v2757_v29  ;;  %2328 = vmatprep.subr.bf16.mxu0 %v2327_v28 }
  0x73   : > { %2087 = vmatprep.mubr.msk.f32.mxu1 %vm227_vm0, %v549_v31 }
  0x74   : > { %2169 = vmatmul.mubr.msk.f32.gmra.mrb[6].mxu0 %vm227_vm0, %v2761_v30 }
  0x75   : > { %2183 = vmatprep.mubr.msk.f32.mxu0 %vm227_vm0, %v2729_v15 }
  0x76   : > { %2088 = vmatmul.mubr.msk.f32.vlgmr.msra.gmra.mrb[0].mxu1 %vm227_vm0, %v550_v34 }
  0x77   : > { %2282 = vmatpush3.bf16.msra.mxu1 %v2279_v27  ;;  %2090 = vmatprep.mubr.msk.f32.mxu1 %vm227_vm0, %v2705_v62  ;;  %v1476_v62 = vld [vmem:[#allocation4 + $0x1a8] sm:$0xff] }
  0x78   : > { %2184 = vmatmul.mubr.msk.f32.vlgmr.msra.gmra.mrb[0].mxu0 %vm227_vm0, %v2741_v21  ;;  %2284 = vmatprep.subr.bf16.mxu1 %v2283_v37  ;;  %v2347_v63 = vpack.c.bf16 %v1476_v62, %v1475_v61 }
  0x79   : > { %2330 = vmatpush3.bf16.msra.mxu0 %v2327_v28  ;;  %2186 = vmatprep.mubr.msk.f32.mxu0 %vm227_vm0, %v2747_v25 }
  0x7a   : > { %2091 = vmatmul.mubr.msk.f32.gmra.mrb[2].mxu1 %vm227_vm0, %v2714_v4  ;;  %2332 = vmatprep.subr.bf16.mxu0 %v2331_v38 }
  0x7b   : > { %2093 = vmatprep.mubr.msk.f32.mxu1 %vm227_vm0, %v2719_v7  ;;  %2286 = vmatpush3.bf16.msra.mxu1 %v2283_v37 }
  0x7c   : > { %2187 = vmatmul.mubr.msk.f32.gmra.mrb[2].mxu0 %vm227_vm0, %v2757_v29  ;;  %2288 = vmatprep.subr.bf16.mxu1 %v2287_v45 }
  0x7d   : > { %2189 = vmatprep.mubr.msk.f32.mxu0 %vm227_vm0, %v1162_v44  ;;  %2334 = vmatpush3.bf16.msra.mxu0 %v2331_v38 }
  0x7e   : > { %2094 = vmatmul.mubr.msk.f32.gmra.mrb[4].mxu1 %vm227_vm0, %v2727_v14  ;;  %2336 = vmatprep.subr.bf16.mxu0 %v2335_v46 }
  0x7f   : > { %2096 = vmatprep.mubr.msk.f32.mxu1 %vm227_vm0, %v2733_v16  ;;  %2290 = vmatpush3.bf16.msra.mxu1 %v2287_v45 }
  0x80   : > { %2190 = vmatmul.mubr.msk.f32.gmra.mrb[4].mxu0 %vm227_vm0, %v1163_v51  ;;  %2351 = vmatprep.subr.bf16.mxu1 %v2339_v53 }
  0x81   : > { %2192 = vmatprep.mubr.msk.f32.mxu0 %vm227_vm0, %v1164_v52  ;;  %2338 = vmatpush3.bf16.msra.mxu0 %v2335_v46 }
  0x82   : > { %2097 = vmatmul.mubr.msk.f32.gmra.mrb[6].mxu1 %vm227_vm0, %v2745_v24  ;;  %2340 = vmatprep.subr.bf16.mxu0 %v2339_v53 }
  0x83   : > { %2111 = vmatprep.mubr.msk.f32.mxu1 %vm227_vm0, %v2716_v5 }
  0x84   : > { %2193 = vmatmul.mubr.msk.f32.gmra.mrb[6].mxu0 %vm227_vm0, %v1165_v54 }
  0x85   : > { %2207 = vmatprep.mubr.msk.f32.mxu0 %vm227_vm0, %v2674_v42  ;;  %v1316_v42 = vld [vmem:[#allocation2 + $0x79] sm:$0xff] }
  0x86   : > { %2112 = vmatmul.mubr.msk.f32.vlgmr.msra.gmra.mrb[0].mxu1 %vm227_vm0, %v2723_v11 }
  0x87   : > { %2354 = vmatpush3.bf16.msra.mxu1 %v2339_v53  ;;  %2114 = vmatprep.mubr.msk.f32.mxu1 %vm227_vm0, %v2729_v15 }
  0x88   : > { %2208 = vmatmul.mubr.msk.f32.vlgmr.msra.gmra.mrb[0].mxu0 %vm227_vm0, %v2678_v48  ;;  %2352 = vmatprep.subr.bf16.mxu1 %v2343_v59  ;;  %v1317_v48 = vld [vmem:[#allocation2 + $0x81] sm:$0xff] }
  0x89   : > { %2342 = vmatpush3.bf16.msra.mxu0 %v2339_v53  ;;  %2210 = vmatprep.mubr.msk.f32.mxu0 %vm227_vm0, %v2682_v49  ;;  %v1468_v49 = vld [vmem:[#allocation2 + $0x7a] sm:$0xff] }
  0x8a   : > { %2344 = vmatprep.subr.bf16.mxu0 %v2343_v59  ;;  %2115 = vmatmul.mubr.msk.f32.gmra.mrb[2].mxu1 %vm227_vm0, %v2741_v21 }
  0x8b   : > { %2117 = vmatprep.mubr.msk.f32.mxu1 %vm227_vm0, %v2747_v25  ;;  %2355 = vmatpush3.bf16.msra.mxu1 %v2343_v59 }
  0x8c   : > { %2211 = vmatmul.mubr.msk.f32.gmra.mrb[2].mxu0 %vm227_vm0, %v2691_v56  ;;  %2353 = vmatprep.subr.bf16.mxu1 %v2347_v63  ;;  %v1469_v56 = vld [vmem:[#allocation2 + $0x82] sm:$0xff] }
  0x8d   : > { %2213 = vmatprep.mubr.msk.f32.mxu0 %vm227_vm0, %v2693_v57  ;;  %2346 = vmatpush3.bf16.msra.mxu0 %v2343_v59 }
  0x8e   : > { %2348 = vmatprep.subr.bf16.mxu0 %v2347_v63  ;;  %2118 = vmatmul.mubr.msk.f32.gmra.mrb[4].mxu1 %vm227_vm0, %v2757_v29 }
  0x8f   : > { %2120 = vmatprep.mubr.msk.f32.mxu1 %vm227_vm0, %v1162_v44  ;;  %2356 = vmatpush3.bf16.msra.mxu1 %v2347_v63 }
  0x90   : > { %2214 = vmatmul.mubr.msk.f32.gmra.mrb[4].mxu0 %vm227_vm0, %v2703_v60 }
  0x91   : > { %2216 = vmatprep.mubr.msk.f32.mxu0 %vm227_vm0, %v1316_v42  ;;  %2350 = vmatpush3.bf16.msra.mxu0 %v2347_v63 }
  0x92   : > { %2121 = vmatmul.mubr.msk.f32.gmra.mrb[6].mxu1 %vm227_vm0, %v1163_v51 }
  0x93   : > { %2237 = vmatprep.mubr.msk.f32.mxu1 %vm227_vm0, %v2749_v26 }
  0x94   : > { %2217 = vmatmul.mubr.msk.f32.gmra.mrb[6].mxu0 %vm227_vm0, %v1317_v48 }
  0x95   : > { %2231 = vmatprep.mubr.msk.f32.mxu0 %vm227_vm0, %v2719_v7 }
  0x96   : > { %2238 = vmatmul.mubr.msk.f32.vlgmr.msra.gmra.mrb[8].mxu1 %vm227_vm0, %v2761_v30 }
  0x97   : > { %2240 = vmatprep.mubr.msk.f32.mxu1 %vm227_vm0, %v1468_v49 }
  0x98   : > { %2232 = vmatmul.mubr.msk.f32.vlgmr.msra.gmra.mrb[0].mxu0 %vm227_vm0, %v2727_v14  ;;  %v1857_v14 = vld [vmem:[#allocation6] ss:$0 sm:$0xff] }
  0x99   : > { %2234 = vmatprep.mubr.msk.f32.mxu0 %vm227_vm0, %v2733_v16 }
  0x9a   : > { %2241 = vmatmul.mubr.msk.f32.gmra.mrb[10].mxu1 %vm227_vm0, %v1469_v56 }
  0x9c   : > { %2235 = vmatmul.mubr.msk.f32.gmra.mrb[2].mxu0 %vm227_vm0, %v2745_v24 }
 0x159   : > { %v2113_v57 = vpop.f32.mrb[0].mxu1 }
 0x15a   : > { %v806_v60 = vpop.f32.mrb[1].mxu1 }
 0x15d   : > { %v2116_v0 = vpop.f32.mrb[2].mxu1 }
 0x15e   : > { %v816_v1 = vpop.f32.mrb[3].mxu1 }
 0x161   : > { %v2119_v2 = vpop.f32.mrb[4].mxu1 }
 0x162   : > { %v826_v4 = vpop.f32.mrb[5].mxu1 }
 0x163   : > { %v2215_v3 = vpop.f32.mrb[4].mxu0 }
 0x164   : > { %v2361_v5 = vadd.f32 %v2215_v3, %v2119_v2  ;;  %v1435_v6 = vpop.f32.mrb[5].mxu0 }
 0x165   : > { %v2363_v7 = vadd.f32 %v1435_v6, %v826_v4  ;;  %v2122_v8 = vpop.f32.mrb[6].mxu1 }
 0x166   : > { %v836_v10 = vpop.f32.mrb[7].mxu1 }
 0x167   : > { %v2218_v9 = vpop.f32.mrb[6].mxu0 }
 0x168   : > { %v2365_v11 = vadd.f32 %v2218_v9, %v2122_v8  ;;  %v1445_v12 = vpop.f32.mrb[7].mxu0 }
 0x169   : > { %v2367_v13 = vadd.f32 %v1445_v12, %v836_v10  ;;  %v2239_v15 = vpop.f32.mrb[8].mxu1 }
 0x16a   : > { %v2362_v17 = vadd.f32 %v2361_v5, %v2239_v15  ;;  %v1587_v18 = vpop.f32.mrb[9].mxu1 }
 0x16b   : > { %v2233_v16 = vpop.f32.mrb[0].mxu0  ;;  %v2364_v22 = vadd.f32 %v2363_v7, %v1587_v18 }
 0x16c   : > { %v2357_v19 = vadd.f32 %v2233_v16, %v2113_v57  ;;  %v1567_v21 = vpop.f32.mrb[1].mxu0  ;;  %v1626_v23 = vadd.f32 %v2362_v17, %v1857_v14 }
 0x16d   : > { %v2358_v24 = vadd.f32 %v1567_v21, %v806_v60  ;;  %v1625_v26 = vadd.f32 %v2364_v22, %v1857_v14  ;;  %v2242_v27 = vpop.f32.mrb[10].mxu1 }
 0x16e   : > { %v1622_v25 = vadd.f32 %v2357_v19, %v1857_v14  ;;  %vm1635_vm3 = vcmp.ge.f32.partialorder %v1626_v23, 0.0  ;;  %v1644_v28 = vmul.f32 %v1638_v20, %v1626_v23  ;;  %v2366_v31 = vadd.f32 %v2365_v11, %v2242_v27  ;;  %v1597_v32 = vpop.f32.mrb[11].mxu1 }
 0x16f   : > { %v1621_v29 = vadd.f32 %v2358_v24, %v1857_v14  ;;  %v2236_v30 = vpop.f32.mrb[2].mxu0  ;;  %vm1634_vm5 = vcmp.ge.f32.partialorder %v1625_v26, 0.0  ;;  %v1643_v34 = vmul.f32 %v1638_v20, %v1625_v26  ;;  %v2368_v47 = vadd.f32 %v2367_v13, %v1597_v32 }
 0x170   : > { %vm1631_vm4 = vcmp.ge.f32.partialorder %v1622_v25, 0.0  ;;  %v1640_v33 = vmul.f32 %v1638_v20, %v1622_v25  ;;  %v1577_v35 = vpop.f32.mrb[3].mxu0  ;;  %v1652_v36 = vsel %vm1635_vm3, %v1626_v23, %v1644_v28  ;;  %v2359_v38 = vadd.f32 %v2236_v30, %v2116_v0 }
 0x171   : > { %vm1630_vm6 = vcmp.ge.f32.partialorder %v1621_v29, 0.0  ;;  %v1639_v37 = vmul.f32 %v1638_v20, %v1621_v29  ;;  %v1651_v40 = vsel %vm1634_vm5, %v1625_v26, %v1643_v34  ;;  %v1628_v41 = vadd.f32 %v2366_v31, %v1857_v14 }
 0x172   : > { %v1648_v39 = vsel %vm1631_vm4, %v1622_v25, %v1640_v33  ;;  %v2360_v43 = vadd.f32 %v1577_v35, %v816_v1  ;;  %v1891_v45 = vpack.c.bf16 %v1652_v36, %v1651_v40  ;;  %v1624_v46 = vadd.f32 %v2359_v38, %v1857_v14 }
 0x173   : > { %v1647_v44 = vsel %vm1630_vm6, %v1621_v29, %v1639_v37  ;;  %vm1637_vm7 = vcmp.ge.f32.partialorder %v1628_v41, 0.0  ;;  %v1646_v51 = vmul.f32 %v1638_v20, %v1628_v41  ;;  %v1627_v54 = vadd.f32 %v2368_v47, %v1857_v14 }
 0x174   : > { %v1881_v50 = vpack.c.bf16 %v1648_v39, %v1647_v44  ;;  %v1623_v52 = vadd.f32 %v2360_v43, %v1857_v14  ;;  %1899 = vst [vmem:[%s226_s30 + $0x10] sm:$0xff] %v1891_v45   ;;  %vm1633_vm8 = vcmp.ge.f32.partialorder %v1624_v46, 0.0  ;;  %v1642_v53 = vmul.f32 %v1638_v20, %v1624_v46 }
 0x175   : > { %v1654_v59 = vsel %vm1637_vm7, %v1628_v41, %v1646_v51  ;;  %vm1636_vm10 = vcmp.ge.f32.partialorder %v1627_v54, 0.0  ;;  %v1645_v61 = vmul.f32 %v1638_v20, %v1627_v54 }
 0x176   : > { %1882 = vst [vmem:[%s226_s30] sm:$0xff] %v1881_v50   ;;  %vm1632_vm9 = vcmp.ge.f32.partialorder %v1623_v52, 0.0  ;;  %v1641_v55 = vmul.f32 %v1638_v20, %v1623_v52  ;;  %v1650_v58 = vsel %vm1633_vm8, %v1624_v46, %v1642_v53 }
 0x177   : > { %v1653_v42 = vsel %vm1636_vm10, %v1627_v54, %v1645_v61 }
 0x178   : > { %v1649_v62 = vsel %vm1632_vm9, %v1623_v52, %v1641_v55  ;;  %v1896_v48 = vpack.c.bf16 %v1654_v59, %v1653_v42 }
 0x179   : > { %v1886_v63 = vpack.c.bf16 %v1650_v58, %v1649_v62 }
 0x17a   : > { %1900 = vst [vmem:[%s226_s30 + $0x18] sm:$0xff] %v1896_v48  }
 0x17b   : > { %1898 = vst [vmem:[%s226_s30 + $0x8] sm:$0xff] %v1886_v63  }
 0x17c PF: > { %s17_s17 = sadd.s32 1, %s2523_s17  }
 0x17d   : > { %p14_p5 = scmp.ge.s32.totalorder %s17_s17, 4  }
 0x17f   :  { %16 = sbr.rel (!%p14_p5) target bundleno = 4 (0x4), region = 86 }
 0x186   :  { %1716 = vsyncpa [#allocation5], 1 }
 0x187   :  { %1718 = vsyncpa [#allocation5 + $0x1], 1 }
 0x188   :  { %1719 = vsyncpa [#allocation7], 1 }

// kernel: forward.7
= control target key start
LH: loop header
LB: loop body
LE: loop exit
PB: predicated region body
PF: predicated region fallthrough
CT: control target
= control target key end

     0   :  { %s1908_s28 = smov 0   ;;  %s2195_s0 = inlined_call_operand.vmem [shape: bf16[2,4,8,128], index: 0, kind: input, shape index: {}]   ;;  %s2196_s1 = inlined_call_operand.vmem [shape: bf16[3,128,128], index: 1, kind: input, shape index: {}]   ;;  %s2197_s2 = inlined_call_operand.vmem [shape: f32[1,128], index: 2, kind: input, shape index: {}]   ;;  %s2198_s3 = inlined_call_operand.<no memory space> [shape: f32[1,1], index: 3, kind: input, shape index: {}]   ;;  %s2199_s4 = inlined_call_operand.vmem [shape: bf16[3,128,128], index: 4, kind: input, shape index: {}]   ;;  %s2200_s5 = inlined_call_operand.vmem [shape: f32[1,128], index: 5, kind: input, shape index: {}]   ;;  %s2201_s6 = inlined_call_operand.<no memory space> [shape: f32[1,1], index: 6, kind: input, shape index: {}]   ;;  %s2202_s7 = inlined_call_operand.vmem [shape: bf16[2,32,128], index: 7, kind: output, shape index: {}]  }
   0x1   :  { %12 = sst [smem:[#allocation4]] %s2198_s3 }
   0x2   :  { %13 = sst [smem:[#allocation5]] %s2201_s6 }
   0x3 LB: > { %s1407_s29 = sadd.s32 4294967295, %s1859_s28   ;;  %p1411_p0 = scmp.ge.s32.totalorder %s1859_s28, 1  ;;  %s1859_s28 = sphi %s1908_s28, %s19_s28  }
   0x4   : > { %p239_p1 = scmp.lt.s32.totalorder %s1859_s28, 3 }
   0x6   : > { %p240_p2 = pnand %p1411_p0, %p239_p1 }
   0x7   : > { %v1797_v0 = vld [vmem:[%s2196_s1 + $0x40] sm:$0xff] (!%p240_p2)   ;;  %p271_p3 = scmp.lt.s32.totalorder (!%p240_p2), %s1407_s29, 1  ;;  %v1798_v1 = vld [vmem:[%s2196_s1 + $0x48] sm:$0xff] (!%p240_p2)   ;;  %v1799_v2 = vld [vmem:[%s2196_s1 + $0x50] sm:$0xff] (!%p240_p2)   ;;  %vm282_vm0 = vcmask (!%p240_p2), 1040384   ;;  %vm355_vm5 = vcmask (!%p240_p2), 1043456  }
   0x8   : > { %243 = sbr.rel (%p240_p2) target bundleno = 634 (0x27a), region = 48  ;;  %1652 = vmatprep.subr.bf16.mxu0 (!%p240_p2), %v1797_v0  ;;  %v1800_v3 = vld [vmem:[%s2196_s1 + $0x58] sm:$0xff] (!%p240_p2)   ;;  %vm283_vm1 = vsmask.f32 (!%p240_p2), 256  ;;  %v285_v4 = vld [vmem:[#allocation2] sm:$0x1] (!%p240_p2) }
   0x9   : > { %1653 = vmatpush3.bf16.msra.mxu0 (!%p240_p2), %v1797_v0  ;;  %v288_v5 = vld [vmem:[#allocation2 + $0x8] sm:$0x1] (!%p240_p2)  ;;  %vm1938_vm2 = vmand (!%p240_p2), %vm282_vm0, %vm283_vm1  ;;  %vm297_vm3 = vsmask.f32 (!%p240_p2), 7938  ;;  %v299_v7 = vld [vmem:[#allocation2 + $0x4] sm:$0x1] (!%p240_p2) }
   0xa   : > { %1654 = vmatprep.subr.bf16.mxu0 (!%p240_p2), %v1798_v1  ;;  %v302_v8 = vld [vmem:[#allocation2 + $0xc] sm:$0x1] (!%p240_p2)  ;;  %v286_v9 = vsel (!%p240_p2), %vm1938_vm2, 0, %v285_v4  ;;  %v289_v10 = vsel (!%p240_p2), %vm1938_vm2, 0, %v288_v5  ;;  %vm1947_vm4 = vmand (!%p240_p2), %vm282_vm0, %vm297_vm3  ;;  %v1801_v18 = vld [vmem:[%s2196_s1 + $0x60] sm:$0xff] (!%p240_p2)   ;;  %vm707_vm10 = vcmask (!%p240_p2), 1042432  }
   0xb   : > { %287 = vst [vmem:[#allocation2] sm:$0x1] (!%p240_p2), %v286_v9  ;;  %290 = vst [vmem:[#allocation2 + $0x8] sm:$0x1] (!%p240_p2), %v289_v10  ;;  %v300_v14 = vsel (!%p240_p2), %vm1947_vm4, 0, %v299_v7  ;;  %v303_v15 = vsel (!%p240_p2), %vm1947_vm4, 0, %v302_v8 }
   0xc   : > { %301 = vst [vmem:[#allocation2 + $0x4] sm:$0x1] (!%p240_p2), %v300_v14  ;;  %304 = vst [vmem:[#allocation2 + $0xc] sm:$0x1] (!%p240_p2), %v303_v15  ;;  %v291_v23 = vld [vmem:[#allocation2 + $0x10] sm:$0x1] (!%p240_p2) }
   0xd   : > { %1655 = vmatpush3.bf16.msra.mxu0 (!%p240_p2), %v1798_v1  ;;  %v294_v24 = vld [vmem:[#allocation2 + $0x18] sm:$0x1] (!%p240_p2)  ;;  %v1802_v25 = vld [vmem:[%s2196_s1 + $0x68] sm:$0xff] (!%p240_p2)   ;;  %v292_v28 = vsel (!%p240_p2), %vm1938_vm2, 0, %v291_v23  ;;  %v305_v30 = vld [vmem:[#allocation2 + $0x14] sm:$0x1] (!%p240_p2) }
   0xe   : > { %1656 = vmatprep.subr.bf16.mxu0 (!%p240_p2), %v1799_v2  ;;  %v295_v29 = vsel (!%p240_p2), %vm1938_vm2, 0, %v294_v24  ;;  %vm1968_vm6 = vmand (!%p240_p2), %vm355_vm5, %vm297_vm3  ;;  %293 = vst [vmem:[#allocation2 + $0x10] sm:$0x1] (!%p240_p2), %v292_v28  ;;  %v306_v34 = vsel (!%p240_p2), %vm1947_vm4, 0, %v305_v30  ;;  %v308_v35 = vld [vmem:[#allocation2 + $0x1c] sm:$0x1] (!%p240_p2) }
   0xf   : > { %s2214_s29 = smov (!%p271_p3, %s1407_s29), 1  ;;  %296 = vst [vmem:[#allocation2 + $0x18] sm:$0x1] %v295_v29  ;;  %307 = vst [vmem:[#allocation2 + $0x14] sm:$0x1] %v306_v34  ;;  %v309_v37 = vsel %vm1947_vm4, 0, %v308_v35 }
  0x10   : > { %s1556_s11 = sshll.u32 %s2214_s29, 4  ;;  %310 = vst [vmem:[#allocation2 + $0x1c] sm:$0x1] %v309_v37  ;;  %v1803_v50 = vld [vmem:[%s2196_s1 + $0x70] sm:$0xff]   ;;  %v1804_v56 = vld [vmem:[%s2196_s1 + $0x78] sm:$0xff]   ;;  %vm708_vm11 = vcmask 1046532  }
  0x11   : > { %s1936_s16 = scalar_lea.vmem %s2195_s0, %s1556_s11  ;;  %1657 = vmatpush3.bf16.msra.mxu0 %v1799_v2  ;;  %v2001_v2 = vld [vmem:[%s2196_s1] sm:$0xff]   ;;  %vm405_vm7 = vsmask.f32 3328  ;;  %vm406_vm8 = vsmask.f32 7440  ;;  %vm2042_vm12 = vmor %vm707_vm10, %vm708_vm11  ;;  %v1820_v23 = vld [vmem:[%s2196_s1 + $0xa8] sm:$0xff]   ;;  %s280_s3 = scalar_lea.vmem %s2202_s7, %s1556_s11 }
  0x12   : > { %v311_v12 = vld [vmem:[%s1936_s16] sm:$0xf]  ;;  %v312_v13 = vld [vmem:[%s1936_s16 + $0x4] sm:$0xf]  ;;  %1658 = vmatprep.subr.bf16.mxu0 %v1800_v3  ;;  %v313_v36 = vld [vmem:[%s1936_s16 + $0x8] sm:$0xf] }
  0x13   : > { %v316_v16 = vshrl.u32 %v311_v12, 16  ;;  %v319_v17 = vshll.u32 %v311_v12, 16  ;;  %v324_v19 = vshrl.u32 %v312_v13, 16  ;;  %v327_v20 = vshll.u32 %v312_v13, 16  ;;  %v314_v38 = vld [vmem:[%s1936_s16 + $0xc] sm:$0xf]  ;;  %vm2024_vm9 = vmor %vm405_vm7, %vm406_vm8 }
  0x14   : > { %v332_v39 = vshrl.u32 %v313_v36, 16  ;;  %v335_v40 = vshll.u32 %v313_v36, 16  ;;  %v357_v41 = vld [vmem:[#allocation2] sm:$0xf]  ;;  %v363_v42 = vld [vmem:[#allocation2 + $0x8] sm:$0xf] }
  0x15   : > { %v318_v21 = vrot.slane %v316_v16, 7  ;;  %v326_v22 = vrot.slane %v324_v19, 7  ;;  %1659 = vmatpush3.bf16.msra.mxu0 %v1800_v3  ;;  %v340_v43 = vshrl.u32 %v314_v38, 16  ;;  %v343_v44 = vshll.u32 %v314_v38, 16  ;;  %v360_v46 = vld [vmem:[#allocation2 + $0x4] sm:$0x1] }
  0x16   : > { %1660 = vmatprep.subr.bf16.mxu0 %v1801_v18  ;;  %v366_v48 = vld [vmem:[#allocation2 + $0xc] sm:$0x1]  ;;  %v334_v49 = vrot.slane %v332_v39, 7  ;;  %v369_v59 = vld [vmem:[#allocation2 + $0x10] sm:$0xf]  ;;  %s863_s10 = sld [smem:[#allocation4]] }
  0x17   : > { %v321_v26 = vor.u32 %v319_v17, %v318_v21  ;;  %v322_v27 = vrot.slane %v318_v21, 4  ;;  %v329_v31 = vor.u32 %v327_v20, %v326_v22  ;;  %v330_v32 = vrot.slane %v326_v22, 4  ;;  %v375_v60 = vld [vmem:[#allocation2 + $0x18] sm:$0xf]  ;;  %v372_v62 = vld [vmem:[#allocation2 + $0x14] sm:$0x1] }
  0x18   : > { %v342_v53 = vrot.slane %v340_v43, 7  ;;  %v337_v54 = vor.u32 %v335_v40, %v334_v49  ;;  %v338_v55 = vrot.slane %v334_v49, 4  ;;  %v378_v1 = vld [vmem:[#allocation2 + $0x1c] sm:$0x1]  ;;  %s1306_s24 = sld [smem:[#allocation5]] }
  0x19   : > { %1661 = vmatpush3.bf16.msra.mxu0 %v1801_v18  ;;  %v358_v45 = vsel %vm1968_vm6, %v321_v26, %v357_v41  ;;  %v364_v47 = vsel %vm1968_vm6, %v329_v31, %v363_v42  ;;  %v361_v51 = vsel %vm1938_vm2, %v322_v27, %v360_v46  ;;  %v367_v52 = vsel %vm1938_vm2, %v330_v32, %v366_v48 }
  0x1a   : > { %1662 = vmatprep.subr.bf16.mxu0 %v1802_v25  ;;  %359 = vst [vmem:[#allocation2] sm:$0xf] %v358_v45  ;;  %365 = vst [vmem:[#allocation2 + $0x8] sm:$0xf] %v364_v47  ;;  %v345_v57 = vor.u32 %v343_v44, %v342_v53  ;;  %v346_v58 = vrot.slane %v342_v53, 4  ;;  %v370_v61 = vsel %vm1968_vm6, %v337_v54, %v369_v59 }
  0x1b   : > { %362 = vst [vmem:[#allocation2 + $0x4] sm:$0x1] %v361_v51  ;;  %368 = vst [vmem:[#allocation2 + $0xc] sm:$0x1] %v367_v52  ;;  %v373_v0 = vsel %vm1938_vm2, %v338_v55, %v372_v62  ;;  %v1823_v55 = vld [vmem:[%s2199_s4 + $0x40] sm:$0xff]   ;;  %v1807_v62 = vld [vmem:[%s2196_s1 + $0x10] sm:$0xff]  }
  0x1c   : > { %v376_v63 = vsel %vm1968_vm6, %v345_v57, %v375_v60  ;;  %371 = vst [vmem:[#allocation2 + $0x10] sm:$0xf] %v370_v61  ;;  %374 = vst [vmem:[#allocation2 + $0x14] sm:$0x1] %v373_v0  ;;  %v379_v3 = vsel %vm1938_vm2, %v346_v58, %v378_v1  ;;  %v1806_v57 = vld [vmem:[%s2196_s1 + $0x8] sm:$0xff]   ;;  %1712 = vmatprep.subr.bf16.mxu1 %v1823_v55  ;;  %v1825_v1 = vld [vmem:[%s2199_s4 + $0x50] sm:$0xff]  }
  0x1d   : > { %1663 = vmatpush3.bf16.msra.mxu0 %v1802_v25  ;;  %377 = vst [vmem:[#allocation2 + $0x18] sm:$0xf] %v376_v63  ;;  %380 = vst [vmem:[#allocation2 + $0x1c] sm:$0x1] %v379_v3  ;;  %v1824_v61 = vld [vmem:[%s2199_s4 + $0x48] sm:$0xff]   ;;  %1713 = vmatpush3.bf16.msra.mxu1 %v1823_v55 }
  0x1e   : > { %1664 = vmatprep.subr.bf16.mxu0 %v1803_v50  ;;  %1714 = vmatprep.subr.bf16.mxu1 %v1824_v61 }
  0x21   : > { %1665 = vmatpush3.bf16.msra.mxu0 %v1803_v50  ;;  %v2005_v4 = vld [vmem:[#allocation2] sm:$0xf]  ;;  %v2007_v5 = vld [vmem:[#allocation2 + $0x8] sm:$0xf]  ;;  %1715 = vmatpush3.bf16.msra.mxu1 %v1824_v61 }
  0x22   : > { %1666 = vmatprep.subr.bf16.mxu0 %v1804_v56  ;;  %v2009_v7 = vld [vmem:[#allocation2 + $0x4] sm:$0x1]  ;;  %v2011_v8 = vld [vmem:[#allocation2 + $0xc] sm:$0x1]  ;;  %v409_v9 = vshrl.u32 %v2005_v4, 16  ;;  %v412_v10 = vshll.u32 %v2005_v4, 16  ;;  %v1442_v52 = vcombine.low %v2005_v4, %v2007_v5  ;;  %1716 = vmatprep.subr.bf16.mxu1 %v1825_v1 }
  0x23   : > { %v418_v11 = vshll.u32 %v2009_v7, 16  ;;  %v423_v6 = vshrl.u32 %v2007_v5, 16  ;;  %v426_v12 = vshll.u32 %v2007_v5, 16  ;;  %v432_v13 = vshll.u32 %v2011_v8, 16  ;;  %v2020_v21 = vld [vmem:[#allocation2 + $0x10] sm:$0xf] }
  0x24   : > { %v411_v14 = vrot.slane %v409_v9, 4  ;;  %v414_v15 = vrot.slane %v412_v10, 5  ;;  %v2022_v22 = vld [vmem:[#allocation2 + $0x18] sm:$0xf]  ;;  %v403_v25 = vld [vmem:[#allocation2 + $0x14] sm:$0x1] }
  0x25   : > { %1667 = vmatpush3.bf16.msra.mxu0 %v1804_v56  ;;  %v420_v16 = vrot.slane %v418_v11, 5  ;;  %v425_v17 = vrot.slane %v423_v6, 4  ;;  %v428_v18 = vrot.slane %v426_v12, 5  ;;  %v434_v19 = vrot.slane %v432_v13, 5  ;;  %v404_v30 = vld [vmem:[#allocation2 + $0x1c] sm:$0x1]  ;;  %1717 = vmatpush3.bf16.msra.mxu1 %v1825_v1 }
  0x26   : > { %v415_v20 = vor.u32 %v414_v15, %v411_v14  ;;  %1672 = vmatprep.subr.bf16.mxu0 %v2001_v2  ;;  %v437_v26 = vshrl.u32 %v2020_v21, 16  ;;  %v440_v27 = vshll.u32 %v2020_v21, 16  ;;  %v451_v28 = vshrl.u32 %v2022_v22, 16  ;;  %v697_v54 = vld [vmem:[#allocation2 + $0x10] sm:$0xe]  ;;  %v1808_v4 = vld [vmem:[%s2196_s1 + $0x18] sm:$0xff]  }
  0x27   : > { %v429_v24 = vor.u32 %v428_v18, %v425_v17  ;;  %v446_v31 = vshll.u32 %v403_v25, 16  ;;  %v454_v32 = vshll.u32 %v2022_v22, 16  ;;  %v460_v39 = vshll.u32 %v404_v30, 16  ;;  %v698_v58 = vld [vmem:[#allocation2 + $0x18] sm:$0xe]  ;;  %v1810_v5 = vld [vmem:[%s2196_s1 + $0x28] sm:$0xff]  }
  0x28   : > { %v416_v29 = vrot.slane %v415_v20, 4  ;;  %v439_v34 = vrot.slane %v437_v26, 4  ;;  %v442_v35 = vrot.slane %v440_v27, 5  ;;  %v453_v36 = vrot.slane %v451_v28, 4  ;;  %v1811_v9 = vld [vmem:[%s2196_s1 + $0x30] sm:$0xff]   ;;  %v1812_v13 = vld [vmem:[%s2196_s1 + $0x38] sm:$0xff]  }
  0x29   : > { %v430_v33 = vrot.slane %v429_v24, 4  ;;  %v456_v38 = vrot.slane %v454_v32, 5  ;;  %v448_v42 = vrot.slane %v446_v31, 5  ;;  %v462_v45 = vrot.slane %v460_v39, 5  ;;  %v695_v10 = vld [vmem:[#allocation2] sm:$0xe] }
  0x2a   : > { %v421_v37 = vsel %vm2024_vm9, %v416_v29, %v420_v16  ;;  %v443_v41 = vor.u32 %v442_v35, %v439_v34  ;;  %v720_v49 = vrot.slane %v403_v25, 5  ;;  %v724_v51 = vrot.slane %v404_v30, 5  ;;  %v696_v11 = vld [vmem:[#allocation2 + $0x8] sm:$0xe]  ;;  %v1814_v16 = vld [vmem:[%s2196_s1 + $0x80] sm:$0xff]   ;;  %v1817_v20 = vld [vmem:[%s2196_s1 + $0x90] sm:$0xff]  }
  0x2b   : > { %v435_v40 = vsel %vm2024_vm9, %v430_v33, %v434_v19  ;;  %v457_v44 = vor.u32 %v456_v38, %v453_v36  ;;  %v1454_v59 = vrot.slane %v697_v54, 9  ;;  %v1455_v60 = vrot.slane %v698_v58, 9  ;;  %v1816_v19 = vld [vmem:[%s2196_s1 + $0x88] sm:$0xff]   ;;  %v1821_v24 = vld [vmem:[%s2196_s1 + $0xb0] sm:$0xff]   ;;  %v1822_v25 = vld [vmem:[%s2196_s1 + $0xb8] sm:$0xff]  }
  0x2c   : > { %v1432_v43 = vcombine.low %v421_v37, %v435_v40  ;;  %v444_v46 = vrot.slane %v443_v41, 4  ;;  %v712_v6 = vrot.slane %v2009_v7, 5  ;;  %v716_v12 = vrot.slane %v2011_v8, 5  ;;  %v1826_v26 = vld [vmem:[%s2199_s4 + $0x58] sm:$0xff]   ;;  %v1827_v27 = vld [vmem:[%s2199_s4 + $0x60] sm:$0xff]   ;;  %v1828_v28 = vld [vmem:[%s2199_s4 + $0x68] sm:$0xff]  }
  0x2d   : > { %v458_v47 = vrot.slane %v457_v44, 4  ;;  %v2060_v63 = vsel %vm2042_vm12, %v1454_v59, %v720_v49  ;;  %v725_v0 = vsel %vm2042_vm12, %v1455_v60, %v724_v51  ;;  %v1452_v14 = vrot.slane %v695_v10, 9  ;;  %1718 = vmatprep.subr.bf16.mxu1 %v1826_v26  ;;  %v1829_v29 = vld [vmem:[%s2199_s4 + $0x70] sm:$0xff]   ;;  %v1830_v31 = vld [vmem:[%s2199_s4 + $0x78] sm:$0xff]   ;;  %v1832_v32 = vld [vmem:[%s2199_s4] sm:$0xff]  }
  0x2e   : > { %1668 = vmatprep.mubr.bf16.mxu0 %v1432_v43  ;;  %v449_v48 = vsel %vm2024_vm9, %v444_v46, %v448_v42  ;;  %v1473_v3 = vcombine.low %v2060_v63, %v725_v0  ;;  %v1453_v15 = vrot.slane %v696_v11, 9  ;;  %v1443_v8 = vcombine.low %v2020_v21, %v2022_v22  ;;  %v1818_v21 = vld [vmem:[%s2196_s1 + $0x98] sm:$0xff]   ;;  %v1819_v22 = vld [vmem:[%s2196_s1 + $0xa0] sm:$0xff]   ;;  %1719 = vmatpush3.bf16.msra.mxu1 %v1826_v26  ;;  %v1835_v54 = vld [vmem:[%s2199_s4 + $0x8] sm:$0xff]  }
  0x2f   : > { %v463_v50 = vsel %vm2024_vm9, %v458_v47, %v462_v45  ;;  %v713_v17 = vsel %vm2042_vm12, %v1452_v14, %v712_v6  ;;  %1720 = vmatprep.subr.bf16.mxu1 %v1827_v27  ;;  %v1861_v30 = vmov 0   ;;  %v1482_v33 = vld [vmem:[%s2197_s2] ss:$0 sm:$0xff]  ;;  %v868_v36 = vstv %s863_s10  ;;  %v1836_v58 = vld [vmem:[%s2199_s4 + $0x10] sm:$0xff]   ;;  %v1837_v59 = vld [vmem:[%s2199_s4 + $0x18] sm:$0xff]  }
  0x30   : > { %v1433_v56 = vcombine.low %v449_v48, %v463_v50  ;;  %v717_v7 = vsel %vm2042_vm12, %v1453_v15, %v716_v12  ;;  %879 = vst [vmem:[#allocation3] sm:$0xf] %v1861_v30  ;;  %881 = vst [vmem:[#allocation3 + $0x14] sm:$0xf] %v1861_v30  ;;  %v1838_v60 = vld [vmem:[%s2199_s4 + $0x20] sm:$0xff]   ;;  %v1839_v61 = vld [vmem:[%s2199_s4 + $0x28] sm:$0xff]  }
  0x31   : > { %v1472_v18 = vcombine.low %v713_v17, %v717_v7  ;;  %v1841_v63 = vld [vmem:[%s2199_s4 + $0x38] sm:$0xff]   ;;  %v1843_v0 = vld [vmem:[%s2199_s4 + $0x80] sm:$0xff]   ;;  %v1849_v10 = vld [vmem:[%s2199_s4 + $0xa8] sm:$0xff]  }
  0x32   : > { %1669 = vmatmul.mubr.bf16.vlgmr.msra.gmra.mrb[0].mxu0 %v1433_v56  ;;  %1721 = vmatpush3.bf16.msra.mxu1 %v1827_v27  ;;  %v1850_v11 = vld [vmem:[%s2199_s4 + $0xb0] sm:$0xff]   ;;  %v1851_v6 = vld [vmem:[%s2199_s4 + $0xb8] sm:$0xff]   ;;  %v1590_v14 = vld [vmem:[%s1936_s16 + $0x8] sm:$0xff]  }
  0x33   : > { %1673 = vmatpush3.bf16.msra.mxu0 %v2001_v2  ;;  %1688 = vmatprep.mubr.bf16.mxu0 %v1442_v52  ;;  %v1809_v2 = vld [vmem:[%s2196_s1 + $0x20] sm:$0xff]   ;;  %v1578_v26 = vunpack.c.h.bf16 %v1590_v14 }
  0x34   : > { %1674 = vmatprep.subr.bf16.mxu0 %v1806_v57  ;;  %1722 = vmatprep.subr.bf16.mxu1 %v1828_v28  ;;  %v1572_v17 = vld [vmem:[%s1936_s16] sm:$0xff]  }
  0x35   : > { %v1574_v30 = vunpack.c.h.bf16 %v1572_v17 }
  0x36   : > { %1723 = vmatpush3.bf16.msra.mxu1 %v1828_v28 }
  0x37   : > { %1675 = vmatpush3.bf16.msra.mxu0 %v1806_v57  ;;  %1724 = vmatprep.subr.bf16.mxu1 %v1829_v29 }
  0x38   : > { %1676 = vmatprep.subr.bf16.mxu0 %v1807_v62 }
  0x3a   : > { %1725 = vmatpush3.bf16.msra.mxu1 %v1829_v29 }
  0x3b   : > { %1677 = vmatpush3.bf16.msra.mxu0 %v1807_v62  ;;  %1726 = vmatprep.subr.bf16.mxu1 %v1830_v31  ;;  %v1840_v62 = vld [vmem:[%s2199_s4 + $0x30] sm:$0xff]  }
  0x3c   : > { %1678 = vmatprep.subr.bf16.mxu0 %v1808_v4 }
  0x3e   : > { %1727 = vmatpush3.bf16.msra.mxu1 %v1830_v31 }
  0x3f   : > { %1679 = vmatpush3.bf16.msra.mxu0 %v1808_v4  ;;  %1732 = vmatprep.subr.bf16.mxu1 %v1832_v32 }
  0x40   : > { %1680 = vmatprep.subr.bf16.mxu0 %v1809_v2 }
  0x43   : > { %1681 = vmatpush3.bf16.msra.mxu0 %v1809_v2  ;;  %v1846_v2 = vld [vmem:[%s2199_s4 + $0x90] sm:$0xff]  }
  0x44   : > { %1682 = vmatprep.subr.bf16.mxu0 %v1810_v5 }
  0x47   : > { %1683 = vmatpush3.bf16.msra.mxu0 %v1810_v5  ;;  %v1847_v5 = vld [vmem:[%s2199_s4 + $0x98] sm:$0xff]  }
  0x48   : > { %1684 = vmatprep.subr.bf16.mxu0 %v1811_v9 }
  0x4b   : > { %1685 = vmatpush3.bf16.msra.mxu0 %v1811_v9  ;;  %v1848_v9 = vld [vmem:[%s2199_s4 + $0xa0] sm:$0xff]  }
  0x4c   : > { %1686 = vmatprep.subr.bf16.mxu0 %v1812_v13 }
  0x4f   : > { %1687 = vmatpush3.bf16.msra.mxu0 %v1812_v13  ;;  %v1549_v13 = vld [vmem:[%s2200_s5] ss:$0 sm:$0xff] }
  0x50   : > { %1692 = vmatprep.subr.bf16.mxu0 %v1814_v16 }
  0x52   : > { %1689 = vmatmul.mubr.bf16.vlgmr.msra.gmra.mrb[0].mxu0 %v1443_v8 }
  0x53   : > { %1693 = vmatpush3.bf16.msra.mxu0 %v1814_v16  ;;  %1708 = vmatprep.mubr.bf16.mxu0 %v1472_v18  ;;  %v1311_v16 = vstv %s1306_s24  ;;  %v1577_v18 = vunpack.c.l.bf16 %v1590_v14 }
  0x54   : > { %1694 = vmatprep.subr.bf16.mxu0 %v1816_v19 }
  0x57   : > { %1695 = vmatpush3.bf16.msra.mxu0 %v1816_v19 }
  0x58   : > { %1696 = vmatprep.subr.bf16.mxu0 %v1817_v20 }
  0x5b   : > { %1697 = vmatpush3.bf16.msra.mxu0 %v1817_v20 }
  0x5c   : > { %1698 = vmatprep.subr.bf16.mxu0 %v1818_v21 }
  0x5f   : > { %1699 = vmatpush3.bf16.msra.mxu0 %v1818_v21 }
  0x60   : > { %1700 = vmatprep.subr.bf16.mxu0 %v1819_v22 }
  0x63   : > { %1701 = vmatpush3.bf16.msra.mxu0 %v1819_v22  ;;  %v1573_v22 = vunpack.c.l.bf16 %v1572_v17 }
  0x64   : > { %1702 = vmatprep.subr.bf16.mxu0 %v1820_v23 }
  0x67   : > { %1703 = vmatpush3.bf16.msra.mxu0 %v1820_v23 }
  0x68   : > { %1704 = vmatprep.subr.bf16.mxu0 %v1821_v24 }
  0x6b   : > { %1705 = vmatpush3.bf16.msra.mxu0 %v1821_v24 }
  0x6c   : > { %1706 = vmatprep.subr.bf16.mxu0 %v1822_v25 }
  0x6f   : > { %1707 = vmatpush3.bf16.msra.mxu0 %v1822_v25 }
  0x72   : > { %1709 = vmatmul.mubr.bf16.vlgmr.msra.gmra.mrb[0].mxu0 %v1473_v3  ;;  %v1845_v3 = vld [vmem:[%s2199_s4 + $0x88] sm:$0xff]  }
 0x145   : > { %v1710_v34 = vpop.f32.mrb[0].mxu0 }
 0x146   : > { %v861_v35 = vadd.f32 %v1710_v34, %v1482_v33  ;;  %v833_v37 = vpop.f32.mrb[1].mxu0 }
 0x147   : > { %v859_v38 = vadd.f32 %v1482_v33, %v833_v37  ;;  %v1711_v39 = vpop.f32.mrb[2].mxu0 }
 0x148   : > { %v862_v40 = vadd.f32 %v1711_v39, %v1482_v33  ;;  %v836_v41 = vpop.f32.mrb[3].mxu0  ;;  %v871_v42 = vmul.f32 %v868_v36, %v861_v35  ;;  %vm866_vm14 = vcmp.ge.f32.partialorder %v861_v35, 0.0 }
 0x149   : > { %vm864_vm13 = vcmp.ge.f32.partialorder %v859_v38, 0.0  ;;  %v869_v43 = vmul.f32 %v868_v36, %v859_v38  ;;  %v860_v44 = vadd.f32 %v1482_v33, %v836_v41 }
 0x14a   : > { %vm867_vm15 = vcmp.ge.f32.partialorder %v862_v40, 0.0  ;;  %v872_v45 = vmul.f32 %v868_v36, %v862_v40  ;;  %v875_v50 = vsel %vm866_vm14, %v861_v35, %v871_v42 }
 0x14b   : > { %v873_v46 = vsel %vm864_vm13, %v859_v38, %v869_v43  ;;  %vm865_vm0 = vcmp.ge.f32.partialorder %v860_v44, 0.0  ;;  %v870_v47 = vmul.f32 %v868_v36, %v860_v44 }
 0x14c   : > { %v1558_v48 = vpack.c.bf16 %v873_v46, %v873_v46  ;;  %v876_v49 = vsel %vm867_vm15, %v862_v40, %v872_v45 }
 0x14d   : > { %v1561_v51 = vpack.c.bf16 %v876_v49, %v876_v49  ;;  %v874_v52 = vsel %vm865_vm0, %v860_v44, %v870_v47 }
 0x14e   : > { %897 = vst [vmem:[#allocation3 + $0x4] sm:$0xf] %v1558_v48  ;;  %v1569_v53 = vpack.c.bf16 %v875_v50, %v874_v52 }
 0x14f   : > { %900 = vst [vmem:[#allocation3 + $0x10] sm:$0xf] %v1561_v51 }
 0x150   : > { %1589 = vst [vmem:[#allocation3 + $0x8] sm:$0xff] %v1569_v53  }
 0x155   : > { %v1834_v57 = vld [vmem:[#allocation3] sm:$0xff]  }
 0x156   : > { %v1852_v12 = vld [vmem:[#allocation3 + $0x10] sm:$0xff]  }
 0x157   : > { %v1831_v55 = vld [vmem:[#allocation3 + $0x4] sm:$0xff]   ;;  %v1833_v56 = vld [vmem:[#allocation3 + $0xc] sm:$0xff]  }
 0x158   : > { %1728 = vmatprep.mubr.bf16.mxu1 %v1831_v55  ;;  %v1842_v1 = vld [vmem:[#allocation3 + $0x8] sm:$0xff]  }
 0x159   : > { %1729 = vmatmul.mubr.bf16.vlgmr.msra.gmra.mrb[0].mxu1 %v1833_v56  ;;  %v1844_v4 = vld [vmem:[#allocation3 + $0x8] sm:$0xff]  }
 0x15a   : > { %1733 = vmatpush3.bf16.msra.mxu1 %v1832_v32  ;;  %1748 = vmatprep.mubr.bf16.mxu1 %v1834_v57 }
 0x15b   : > { %1734 = vmatprep.subr.bf16.mxu1 %v1835_v54 }
 0x15e   : > { %1735 = vmatpush3.bf16.msra.mxu1 %v1835_v54 }
 0x15f   : > { %1736 = vmatprep.subr.bf16.mxu1 %v1836_v58 }
 0x162   : > { %1737 = vmatpush3.bf16.msra.mxu1 %v1836_v58 }
 0x163   : > { %1738 = vmatprep.subr.bf16.mxu1 %v1837_v59 }
 0x166   : > { %1739 = vmatpush3.bf16.msra.mxu1 %v1837_v59 }
 0x167   : > { %1740 = vmatprep.subr.bf16.mxu1 %v1838_v60 }
 0x16a   : > { %1741 = vmatpush3.bf16.msra.mxu1 %v1838_v60 }
 0x16b   : > { %1742 = vmatprep.subr.bf16.mxu1 %v1839_v61 }
 0x16e   : > { %1743 = vmatpush3.bf16.msra.mxu1 %v1839_v61 }
 0x16f   : > { %1744 = vmatprep.subr.bf16.mxu1 %v1840_v62 }
 0x172   : > { %1745 = vmatpush3.bf16.msra.mxu1 %v1840_v62 }
 0x173   : > { %1746 = vmatprep.subr.bf16.mxu1 %v1841_v63 }
 0x176   : > { %1747 = vmatpush3.bf16.msra.mxu1 %v1841_v63 }
 0x177   : > { %1752 = vmatprep.subr.bf16.mxu1 %v1843_v0 }
 0x179   : > { %1749 = vmatmul.mubr.bf16.vlgmr.msra.gmra.mrb[0].mxu1 %v1842_v1 }
 0x17a   : > { %1753 = vmatpush3.bf16.msra.mxu1 %v1843_v0  ;;  %1768 = vmatprep.mubr.bf16.mxu1 %v1844_v4 }
 0x17b   : > { %1754 = vmatprep.subr.bf16.mxu1 %v1845_v3 }
 0x17e   : > { %1755 = vmatpush3.bf16.msra.mxu1 %v1845_v3 }
 0x17f   : > { %1756 = vmatprep.subr.bf16.mxu1 %v1846_v2 }
 0x182   : > { %1757 = vmatpush3.bf16.msra.mxu1 %v1846_v2 }
 0x183   : > { %1758 = vmatprep.subr.bf16.mxu1 %v1847_v5 }
 0x186   : > { %1759 = vmatpush3.bf16.msra.mxu1 %v1847_v5 }
 0x187   : > { %1760 = vmatprep.subr.bf16.mxu1 %v1848_v9 }
 0x18a   : > { %1761 = vmatpush3.bf16.msra.mxu1 %v1848_v9 }
 0x18b   : > { %1762 = vmatprep.subr.bf16.mxu1 %v1849_v10 }
 0x18e   : > { %1763 = vmatpush3.bf16.msra.mxu1 %v1849_v10 }
 0x18f   : > { %1764 = vmatprep.subr.bf16.mxu1 %v1850_v11 }
 0x192   : > { %1765 = vmatpush3.bf16.msra.mxu1 %v1850_v11 }
 0x193   : > { %1766 = vmatprep.subr.bf16.mxu1 %v1851_v6 }
 0x196   : > { %1767 = vmatpush3.bf16.msra.mxu1 %v1851_v6 }
 0x199   : > { %1769 = vmatmul.mubr.bf16.vlgmr.msra.gmra.mrb[0].mxu1 %v1852_v12 }
 0x26c   : > { %v1770_v15 = vpop.f32.mrb[0].mxu1 }
 0x26d   : > { %v1304_v7 = vadd.f32 %v1770_v15, %v1549_v13  ;;  %v1276_v8 = vpop.f32.mrb[1].mxu1 }
 0x26e   : > { %v1302_v19 = vadd.f32 %v1549_v13, %v1276_v8  ;;  %v1771_v20 = vpop.f32.mrb[2].mxu1 }
 0x26f   : > { %vm1309_vm1 = vcmp.ge.f32.partialorder %v1304_v7, 0.0  ;;  %v1314_v21 = vmul.f32 %v1311_v16, %v1304_v7  ;;  %v1305_v23 = vadd.f32 %v1771_v20, %v1549_v13  ;;  %v1279_v24 = vpop.f32.mrb[3].mxu1 }
 0x270   : > { %vm1307_vm2 = vcmp.ge.f32.partialorder %v1302_v19, 0.0  ;;  %v1312_v25 = vmul.f32 %v1311_v16, %v1302_v19  ;;  %v1303_v27 = vadd.f32 %v1549_v13, %v1279_v24 }
 0x271   : > { %v1318_v28 = vsel %vm1309_vm1, %v1304_v7, %v1314_v21  ;;  %vm1310_vm3 = vcmp.ge.f32.partialorder %v1305_v23, 0.0  ;;  %v1315_v29 = vmul.f32 %v1311_v16, %v1305_v23 }
 0x272   : > { %v1316_v31 = vsel %vm1307_vm2, %v1302_v19, %v1312_v25  ;;  %vm1308_vm4 = vcmp.ge.f32.partialorder %v1303_v27, 0.0  ;;  %v1313_v32 = vmul.f32 %v1311_v16, %v1303_v27  ;;  %v1330_v34 = vadd.f32 %v1577_v18, %v1318_v28 }
 0x273   : > { %v1319_v33 = vsel %vm1310_vm3, %v1305_v23, %v1315_v29  ;;  %v1328_v37 = vadd.f32 %v1573_v22, %v1316_v31 }
 0x274   : > { %v1331_v35 = vadd.f32 %v1578_v26, %v1319_v33  ;;  %v1317_v36 = vsel %vm1308_vm4, %v1303_v27, %v1313_v32 }
 0x275   : > { %v1329_v38 = vadd.f32 %v1574_v30, %v1317_v36 }
 0x276   : > { %v1587_v39 = vpack.c.bf16 %v1331_v35, %v1330_v34 }
 0x277   : > { %v1582_v40 = vpack.c.bf16 %v1329_v38, %v1328_v37 }
 0x278   : > { %1591 = vst [vmem:[%s280_s3 + $0x8] sm:$0xff] %v1587_v39  }
 0x279   : > { %1583 = vst [vmem:[%s280_s3] sm:$0xff] %v1582_v40  }
 0x27a PF: > { %s19_s28 = sadd.s32 1, %s1859_s28  }
 0x27b   : > { %p16_p4 = scmp.ge.s32.totalorder %s19_s28, 4  }
 0x27d   :  { %18 = sbr.rel (!%p16_p4) target bundleno = 3 (0x3), region = 85 }

// kernel: forward.9
= control target key start
LH: loop header
LB: loop body
LE: loop exit
PB: predicated region body
PF: predicated region fallthrough
CT: control target
= control target key end

     0   :  { %s5512_s9 = smov 0   ;;  %s6974_s0 = inlined_call_operand.vmem [shape: bf16[2,4,8,128], index: 0, kind: input, shape index: {}]   ;;  %s6975_s1 = inlined_call_operand.vmem [shape: bf16[2,4,8,128], index: 1, kind: input, shape index: {}]   ;;  %s6976_s2 = inlined_call_operand.vmem [shape: bf16[3,3,128,256], index: 2, kind: input, shape index: {}]   ;;  %s6977_s3 = inlined_call_operand.vmem [shape: f32[1,256], index: 3, kind: input, shape index: {}]   ;;  %s6978_s4 = inlined_call_operand.<no memory space> [shape: f32[1,1], index: 4, kind: input, shape index: {}]   ;;  %s6979_s5 = inlined_call_operand.vmem [shape: bf16[3,3,128,256], index: 5, kind: input, shape index: {}]   ;;  %s6980_s6 = inlined_call_operand.vmem [shape: f32[1,256], index: 6, kind: input, shape index: {}]   ;;  %s6981_s7 = inlined_call_operand.<no memory space> [shape: f32[1,1], index: 7, kind: input, shape index: {}]   ;;  %s6982_s8 = inlined_call_operand.vmem [shape: bf16[2,32,256], index: 8, kind: output, shape index: {}]  }
   0x1   :  { %13 = sst [smem:[#allocation3]] %s6978_s4 }
   0x2   :  { %14 = sst [smem:[#allocation4]] %s6981_s7 }
   0x3 LB: > { %s4249_s10 = sadd.s32 4294967295, %s5458_s9   ;;  %p4253_p0 = scmp.ge.s32.totalorder %s5458_s9, 1  ;;  %s5458_s9 = sphi %s5512_s9, %s20_s9  }
   0x4   : > { %p274_p1 = scmp.lt.s32.totalorder %s5458_s9, 3 }
   0x6   : > { %p275_p2 = pnand %p4253_p0, %p274_p1 }
   0x8   : > { %278 = sbr.rel (%p275_p2) target bundleno = 566 (0x236), region = 52 }
   0xf   : > { %v5014_v0 = vld [vmem:[%s6976_s2 + $0x84] ss:$8 sps:$4 sm:$0xff]   ;;  %v5016_v1 = vld [vmem:[%s6976_s2 + $0x80] ss:$8 sps:$4 sm:$0xff]   ;;  %v5460_v2 = vmov 0   ;;  %p313_p3 = scmp.lt.s32.totalorder %s4249_s10, 1 }
  0x10   : > { %654 = vmatprep.mubr.bf16.mxu0 %v5460_v2  ;;  %329 = vst [vmem:[#allocation2] sm:$0xf] %v5460_v2  ;;  %330 = vst [vmem:[#allocation2 + $0x4] sm:$0x1] %v5460_v2  ;;  %2544 = vmatprep.mubr.bf16.mxu1 %v5460_v2  ;;  %v5017_v3 = vld [vmem:[%s6976_s2 + $0x94] ss:$8 sps:$4 sm:$0xff]  }
  0x11   : > { %332 = vst [vmem:[#allocation2 + $0x28] sm:$0xf] %v5460_v2  ;;  %333 = vst [vmem:[#allocation2 + $0x2c] sm:$0x1] %v5460_v2  ;;  %622 = vmatprep.subr.bf16.mxu0 %v5014_v0  ;;  %v5019_v4 = vld [vmem:[%s6976_s2 + $0x90] ss:$8 sps:$4 sm:$0xff]  }
  0x12   : > { %623 = vmatpush1.bf16.msra.mxu0 %v5016_v1  ;;  %v5020_v5 = vld [vmem:[%s6979_s5 + $0x84] ss:$8 sps:$4 sm:$0xff]   ;;  %v5022_v6 = vld [vmem:[%s6979_s5 + $0x80] ss:$8 sps:$4 sm:$0xff]   ;;  %v5026_v8 = vld [vmem:[%s6979_s5 + $0x94] ss:$8 sps:$4 sm:$0xff]  }
  0x13   : > { %624 = vmatprep.subr.bf16.mxu0 %v5017_v3  ;;  %v5023_v7 = vld [vmem:[%s6976_s2 + $0xa4] ss:$8 sps:$4 sm:$0xff]   ;;  %2512 = vmatprep.subr.bf16.mxu1 %v5020_v5  ;;  %v5028_v9 = vld [vmem:[%s6979_s5 + $0x90] ss:$8 sps:$4 sm:$0xff]   ;;  %v5025_v10 = vld [vmem:[%s6976_s2 + $0xa0] ss:$8 sps:$4 sm:$0xff]  }
  0x14   : > { %2513 = vmatpush1.bf16.msra.mxu1 %v5022_v6  ;;  %v5029_v11 = vld [vmem:[%s6976_s2 + $0xb4] ss:$8 sps:$4 sm:$0xff]   ;;  %v5032_v12 = vld [vmem:[%s6979_s5 + $0xa4] ss:$8 sps:$4 sm:$0xff]   ;;  %v5034_v13 = vld [vmem:[%s6979_s5 + $0xa0] ss:$8 sps:$4 sm:$0xff]  }
  0x15   : > { %2514 = vmatprep.subr.bf16.mxu1 %v5026_v8  ;;  %v5031_v14 = vld [vmem:[%s6976_s2 + $0xb0] ss:$8 sps:$4 sm:$0xff]   ;;  %v5038_v15 = vld [vmem:[%s6979_s5 + $0xb4] ss:$8 sps:$4 sm:$0xff]   ;;  %v5035_v16 = vld [vmem:[%s6976_s2 + $0xc4] ss:$8 sps:$4 sm:$0xff]  }
  0x16   : > { %625 = vmatpush1.bf16.msra.mxu0 %v5019_v4  ;;  %s7000_s10 = smov (!%p313_p3, %s4249_s10), 1  ;;  %v5040_v17 = vld [vmem:[%s6979_s5 + $0xb0] ss:$8 sps:$4 sm:$0xff]   ;;  %v5037_v18 = vld [vmem:[%s6976_s2 + $0xc0] ss:$8 sps:$4 sm:$0xff]   ;;  %vm335_vm2 = vcmask 1040384  }
  0x17   : > { %626 = vmatprep.subr.bf16.mxu0 %v5023_v7  ;;  %v5044_v19 = vld [vmem:[%s6979_s5 + $0xc4] ss:$8 sps:$4 sm:$0xff]   ;;  %v5041_v20 = vld [vmem:[%s6976_s2 + $0xd4] ss:$8 sps:$4 sm:$0xff]   ;;  %s4870_s27 = sshll.u32 %s7000_s10, 4  ;;  %vm408_vm5 = vcmask 1043456  }
  0x18   : > { %2515 = vmatpush1.bf16.msra.mxu1 %v5028_v9  ;;  %vm336_vm0 = vsmask.f32 256  ;;  %vm350_vm1 = vsmask.f32 7938  ;;  %v5043_v21 = vld [vmem:[%s6976_s2 + $0xd0] ss:$8 sps:$4 sm:$0xff]   ;;  %s5608_s16 = scalar_lea.vmem %s6974_s0, %s4870_s27  ;;  %s5635_s25 = scalar_lea.vmem %s6975_s1, %s4870_s27 }
  0x19   : > { %2516 = vmatprep.subr.bf16.mxu1 %v5032_v12  ;;  %v5046_v22 = vld [vmem:[%s6979_s5 + $0xc0] ss:$8 sps:$4 sm:$0xff]   ;;  %v5047_v23 = vld [vmem:[%s6976_s2 + $0xe4] ss:$8 sps:$4 sm:$0xff]   ;;  %v5050_v24 = vld [vmem:[%s6979_s5 + $0xd4] ss:$8 sps:$4 sm:$0xff]  }
  0x1a   : > { %627 = vmatpush1.bf16.msra.mxu0 %v5025_v10  ;;  %v5052_v25 = vld [vmem:[%s6979_s5 + $0xd0] ss:$8 sps:$4 sm:$0xff]   ;;  %v5049_v26 = vld [vmem:[%s6976_s2 + $0xe0] ss:$8 sps:$4 sm:$0xff]   ;;  %v5056_v27 = vld [vmem:[%s6979_s5 + $0xe4] ss:$8 sps:$4 sm:$0xff]  }
  0x1b   : > { %628 = vmatprep.subr.bf16.mxu0 %v5029_v11  ;;  %vm5620_vm3 = vmand %vm335_vm2, %vm336_vm0  ;;  %v338_v29 = vld [vmem:[#allocation2 + $0x8] sm:$0x1]  ;;  %v352_v32 = vld [vmem:[#allocation2 + $0xc] sm:$0x1]  ;;  %vm458_vm7 = vsmask.f32 3328 }
  0x1c   : > { %2517 = vmatpush1.bf16.msra.mxu1 %v5034_v13  ;;  %v339_v30 = vsel %vm5620_vm3, 0, %v338_v29  ;;  %vm5627_vm4 = vmand %vm335_vm2, %vm350_vm1  ;;  %v364_v33 = vld [vmem:[%s5608_s16] sm:$0xf]  ;;  %v5053_v38 = vld [vmem:[%s6976_s2 + $0xf4] ss:$8 sps:$4 sm:$0xff]   ;;  %vm832_vm8 = vcmask 1042432  }
  0x1d   : > { %2518 = vmatprep.subr.bf16.mxu1 %v5038_v15  ;;  %340 = vst [vmem:[#allocation2 + $0x8] sm:$0x1] %v339_v30  ;;  %v353_v34 = vsel %vm5627_vm4, 0, %v352_v32  ;;  %v369_v35 = vshrl.u32 %v364_v33, 16  ;;  %v372_v36 = vshll.u32 %v364_v33, 16  ;;  %vm5660_vm6 = vmand %vm408_vm5, %vm350_vm1  ;;  %vm833_vm9 = vcmask 1046532  }
  0x1e   : > { %629 = vmatpush1.bf16.msra.mxu0 %v5031_v14  ;;  %v5639_v37 = vld [vmem:[#allocation2] sm:$0xf]  ;;  %354 = vst [vmem:[#allocation2 + $0xc] sm:$0x1] %v353_v34  ;;  %v5055_v44 = vld [vmem:[%s6976_s2 + $0xf0] ss:$8 sps:$4 sm:$0xff]   ;;  %vm5709_vm12 = vmor %vm832_vm8, %vm833_vm9 }
  0x1f   : > { %630 = vmatprep.subr.bf16.mxu0 %v5035_v16  ;;  %v5058_v39 = vld [vmem:[%s6979_s5 + $0xe0] ss:$8 sps:$4 sm:$0xff]   ;;  %v371_v40 = vrot.slane %v369_v35, 7  ;;  %v462_v41 = vshrl.u32 %v5639_v37, 16  ;;  %v465_v42 = vshll.u32 %v5639_v37, 16  ;;  %s4120_s17 = sld [smem:[#allocation4]] }
  0x20   : > { %2519 = vmatpush1.bf16.msra.mxu1 %v5040_v17  ;;  %v2260_v43 = vld [vmem:[%s5635_s25] sm:$0xf]  ;;  %v5062_v46 = vld [vmem:[%s6979_s5 + $0xf4] ss:$8 sps:$4 sm:$0xff]   ;;  %v5061_v47 = vld [vmem:[%s6976_s2 + $0x4] ss:$8 sps:$4 sm:$0xff]  }
  0x21   : > { %2520 = vmatprep.subr.bf16.mxu1 %v5044_v19  ;;  %v374_v45 = vor.u32 %v372_v36, %v371_v40  ;;  %v375_v48 = vrot.slane %v371_v40, 4  ;;  %v5664_v50 = vld [vmem:[#allocation2 + $0x4] sm:$0x1]  ;;  %v464_v51 = vrot.slane %v462_v41, 4  ;;  %v2265_v52 = vshrl.u32 %v2260_v43, 16  ;;  %s4872_s20 = sshll.u32 %s7000_s10, 5 }
  0x22   : > { %631 = vmatpush1.bf16.msra.mxu0 %v5037_v18  ;;  %v467_v54 = vrot.slane %v465_v42, 5  ;;  %v5064_v55 = vld [vmem:[%s6979_s5 + $0xf0] ss:$8 sps:$4 sm:$0xff]   ;;  %v5070_v58 = vld [vmem:[%s6979_s5 + $0x4] ss:$8 sps:$4 sm:$0xff]   ;;  %v471_v60 = vshll.u32 %v5664_v50, 16  ;;  %s6955_s10 = scalar_lea.vmem %s6982_s8, %s4872_s20 }
  0x23   : > { %632 = vmatprep.subr.bf16.mxu0 %v5041_v20  ;;  %v2267_v61 = vrot.slane %v2265_v52, 7  ;;  %v2268_v62 = vshll.u32 %v2260_v43, 16  ;;  %v5677_v0 = vld [vmem:[#allocation2] sm:$0xf]  ;;  %vm459_vm10 = vsmask.f32 7440 }
  0x24   : > { %2521 = vmatpush1.bf16.msra.mxu1 %v5046_v22  ;;  %v410_v53 = vld [vmem:[#allocation2 + $0x8] sm:$0xf]  ;;  %v468_v63 = vor.u32 %v467_v54, %v464_v51  ;;  %v473_v1 = vrot.slane %v471_v60, 5  ;;  %v5679_v6 = vld [vmem:[#allocation2 + $0x4] sm:$0x1]  ;;  %v2352_v7 = vshrl.u32 %v5677_v0, 16  ;;  %vm5693_vm11 = vmor %vm458_vm7, %vm459_vm10 }
  0x25   : > { %2522 = vmatprep.subr.bf16.mxu1 %v5050_v24  ;;  %v411_v56 = vsel %vm5660_vm6, %v374_v45, %v410_v53  ;;  %v413_v57 = vld [vmem:[#allocation2 + $0xc] sm:$0x1]  ;;  %v2270_v3 = vor.u32 %v2268_v62, %v2267_v61  ;;  %v2271_v4 = vrot.slane %v2267_v61, 4  ;;  %v2355_v8 = vshll.u32 %v5677_v0, 16  ;;  %v5059_v35 = vld [vmem:[%s6976_s2] ss:$8 sps:$4 sm:$0xff]  }
  0x26   : > { %633 = vmatpush1.bf16.msra.mxu0 %v5043_v21  ;;  %412 = vst [vmem:[#allocation2 + $0x8] sm:$0xf] %v411_v56  ;;  %v414_v59 = vsel %vm5620_vm3, %v375_v48, %v413_v57  ;;  %v469_v5 = vrot.slane %v468_v63, 4  ;;  %v5067_v40 = vld [vmem:[%s6976_s2 + $0x14] ss:$8 sps:$4 sm:$0xff]  }
  0x27   : > { %634 = vmatprep.subr.bf16.mxu0 %v5047_v23  ;;  %415 = vst [vmem:[#allocation2 + $0xc] sm:$0x1] %v414_v59  ;;  %v2357_v33 = vrot.slane %v2355_v8, 5  ;;  %v341_v42 = vld [vmem:[#allocation2 + $0x10] sm:$0x1] }
  0x28   : > { %2523 = vmatpush1.bf16.msra.mxu1 %v5052_v25  ;;  %v474_v36 = vsel %vm5693_vm11, %v469_v5, %v473_v1  ;;  %v342_v45 = vsel %vm5620_vm3, 0, %v341_v42  ;;  %v358_v54 = vld [vmem:[#allocation2 + $0x1c] sm:$0x1]  ;;  %v366_v60 = vld [vmem:[%s5608_s16 + $0x8] sm:$0xf] }
  0x29   : > { %2524 = vmatprep.subr.bf16.mxu1 %v5056_v27  ;;  %v2361_v27 = vshll.u32 %v5679_v6, 16  ;;  %343 = vst [vmem:[#allocation2 + $0x10] sm:$0x1] %v342_v45  ;;  %v359_v57 = vsel %vm5627_vm4, 0, %v358_v54  ;;  %v5065_v63 = vld [vmem:[%s6976_s2 + $0x10] ss:$8 sps:$4 sm:$0xff]  }
  0x2a   : > { %635 = vmatpush1.bf16.msra.mxu0 %v5049_v26  ;;  %v2354_v26 = vrot.slane %v2352_v7, 4  ;;  %360 = vst [vmem:[#allocation2 + $0x1c] sm:$0x1] %v359_v57  ;;  %v5073_v7 = vld [vmem:[%s6976_s2 + $0x24] ss:$8 sps:$4 sm:$0xff]  }
  0x2b   : > { %636 = vmatprep.subr.bf16.mxu0 %v5053_v38  ;;  %v2363_v41 = vrot.slane %v2361_v27, 5  ;;  %v5772_v42 = vld [vmem:[%s5635_s25 + $0x8] sm:$0xf]  ;;  %v5074_v54 = vld [vmem:[%s6979_s5 + $0x10] ss:$8 sps:$4 sm:$0xff]  }
  0x2c   : > { %2525 = vmatpush1.bf16.msra.mxu1 %v5058_v39  ;;  %v5080_v57 = vld [vmem:[%s6979_s5 + $0x20] ss:$8 sps:$4 sm:$0xff]   ;;  %v5224_v49 = vld [vmem:[%s6976_s2 + $0x230] ss:$8 sps:$4 sm:$0xff]   ;;  %v5253_v28 = vld [vmem:[%s6979_s5 + $0x264] ss:$8 sps:$4 sm:$0xff]  }
  0x2d   : > { %2526 = vmatprep.subr.bf16.mxu1 %v5062_v46  ;;  %v5683_v9 = vld [vmem:[#allocation2 + $0x8] sm:$0xf]  ;;  %v344_v46 = vld [vmem:[#allocation2 + $0x18] sm:$0x1]  ;;  %v5445_v16 = vld [vmem:[%s6976_s2 + $0x474] ss:$8 sps:$4 sm:$0xff]  }
  0x2e   : > { %637 = vmatpush1.bf16.msra.mxu0 %v5055_v44  ;;  %v821_v10 = vld [vmem:[#allocation2 + $0x8] sm:$0xe]  ;;  %v455_v12 = vld [vmem:[#allocation2 + $0xc] sm:$0x1]  ;;  %v476_v13 = vshrl.u32 %v5683_v9, 16  ;;  %v479_v14 = vshll.u32 %v5683_v9, 16  ;;  %v2358_v44 = vor.u32 %v2357_v33, %v2354_v26 }
  0x2f   : > { %767 = vmatprep.subr.bf16.mxu0 %v5061_v47  ;;  %v5685_v11 = vld [vmem:[#allocation2 + $0x8] sm:$0xf]  ;;  %v485_v17 = vshll.u32 %v455_v12, 16  ;;  %v841_v18 = vrot.slane %v455_v12, 5  ;;  %v5697_v19 = vld [vmem:[#allocation2 + $0xc] sm:$0x1] }
  0x30   : > { %2527 = vmatpush1.bf16.msra.mxu1 %v5064_v55  ;;  %v5689_v15 = vld [vmem:[#allocation2 + $0x8] sm:$0xf]  ;;  %v478_v22 = vrot.slane %v476_v13, 4  ;;  %v481_v23 = vrot.slane %v479_v14, 5  ;;  %v2306_v24 = vld [vmem:[#allocation2 + $0xc] sm:$0x1] }
  0x31   : > { %2657 = vmatprep.subr.bf16.mxu1 %v5070_v58  ;;  %v5699_v20 = vld [vmem:[#allocation2 + $0x8] sm:$0xe]  ;;  %v2304_v21 = vsel %vm5660_vm6, %v2270_v3, %v5689_v15  ;;  %v2307_v25 = vsel %vm5620_vm3, %v2271_v4, %v2306_v24  ;;  %v487_v32 = vrot.slane %v485_v17, 5  ;;  %v4313_v34 = vrot.slane %v821_v10, 9  ;;  %v355_v47 = vld [vmem:[#allocation2 + $0x14] sm:$0x1] }
  0x32   : > { %2305 = vst [vmem:[#allocation2 + $0x8] sm:$0xf] %v2304_v21  ;;  %v482_v30 = vor.u32 %v481_v23, %v478_v22  ;;  %2308 = vst [vmem:[#allocation2 + $0xc] sm:$0x1] %v2307_v25  ;;  %v345_v52 = vsel %vm5620_vm3, 0, %v344_v46  ;;  %v356_v53 = vsel %vm5627_vm4, 0, %v355_v47 }
  0x33   : > { %v5720_v39 = vsel %vm5709_vm12, %v4313_v34, %v841_v18  ;;  %346 = vst [vmem:[#allocation2 + $0x18] sm:$0x1] %v345_v52  ;;  %357 = vst [vmem:[#allocation2 + $0x14] sm:$0x1] %v356_v53  ;;  %v365_v58 = vld [vmem:[%s5608_s16 + $0x4] sm:$0xf] }
  0x34   : > { %v483_v38 = vrot.slane %v482_v30, 4  ;;  %v377_v61 = vshrl.u32 %v365_v58, 16  ;;  %v380_v62 = vshll.u32 %v365_v58, 16  ;;  %v2359_v1 = vrot.slane %v2358_v44, 4  ;;  %v5071_v17 = vld [vmem:[%s6976_s2 + $0x20] ss:$8 sps:$4 sm:$0xff]  }
  0x35   : > { %v385_v10 = vshrl.u32 %v366_v60, 16  ;;  %v388_v12 = vshll.u32 %v366_v60, 16  ;;  %v5079_v18 = vld [vmem:[%s6976_s2 + $0x34] ss:$8 sps:$4 sm:$0xff]   ;;  %v5068_v24 = vld [vmem:[%s6979_s5] ss:$8 sps:$4 sm:$0xff]  }
  0x36   : > { %v488_v43 = vsel %vm5693_vm11, %v483_v38, %v487_v32  ;;  %v379_v8 = vrot.slane %v377_v61, 7  ;;  %v2364_v25 = vsel %vm5693_vm11, %v2359_v1, %v2363_v41  ;;  %v416_v27 = vld [vmem:[#allocation2 + $0x10] sm:$0xf]  ;;  %v5763_v30 = vld [vmem:[%s5635_s25 + $0x4] sm:$0xf]  ;;  %v2281_v53 = vshrl.u32 %v5772_v42, 16 }
  0x37   : > { %v4276_v48 = vcombine.low %v474_v36, %v488_v43  ;;  %v387_v23 = vrot.slane %v385_v10, 7  ;;  %v425_v41 = vld [vmem:[#allocation2 + $0x1c] sm:$0x1]  ;;  %v5077_v47 = vld [vmem:[%s6976_s2 + $0x30] ss:$8 sps:$4 sm:$0xff]   ;;  %v2276_v61 = vshll.u32 %v5763_v30, 16 }
  0x38   : > { %v382_v21 = vor.u32 %v380_v62, %v379_v8  ;;  %v383_v22 = vrot.slane %v379_v8, 4  ;;  %v5076_v44 = vld [vmem:[%s6979_s5 + $0x14] ss:$8 sps:$4 sm:$0xff]   ;;  %v5085_v52 = vld [vmem:[%s6976_s2 + $0x44] ss:$8 sps:$4 sm:$0xff]  }
  0x39   : > { %v5729_v51 = vld [vmem:[#allocation2 + $0x8] sm:$0xf]  ;;  %655 = vmatmul.mubr.bf16.vlgmr.msra.gmra.mrb[0].mxu0 %v4276_v48  ;;  %v5740_v59 = vld [vmem:[#allocation2 + $0xc] sm:$0x1]  ;;  %v390_v32 = vor.u32 %v388_v12, %v387_v23  ;;  %v391_v33 = vrot.slane %v387_v23, 4  ;;  %v2273_v48 = vshrl.u32 %v5763_v30, 16 }
  0x3a   : > { %v2366_v55 = vshrl.u32 %v5729_v51, 16  ;;  %v2369_v56 = vshll.u32 %v5729_v51, 16  ;;  %768 = vmatpush1.bf16.msra.mxu0 %v5059_v35  ;;  %v2375_v5 = vshll.u32 %v5740_v59, 16  ;;  %664 = vmatprep.mubr.bf16.mxu0 %v5460_v2  ;;  %v417_v34 = vsel %vm5660_vm6, %v382_v21, %v416_v27  ;;  %v419_v35 = vld [vmem:[#allocation2 + $0x14] sm:$0x1] }
  0x3b   : > { %769 = vmatprep.subr.bf16.mxu0 %v5067_v40  ;;  %v422_v36 = vld [vmem:[#allocation2 + $0x18] sm:$0xf]  ;;  %418 = vst [vmem:[#allocation2 + $0x10] sm:$0xf] %v417_v34  ;;  %v420_v40 = vsel %vm5620_vm3, %v383_v22, %v419_v35  ;;  %v426_v46 = vsel %vm5620_vm3, %v391_v33, %v425_v41  ;;  %v5091_v58 = vld [vmem:[%s6976_s2 + $0x54] ss:$8 sps:$4 sm:$0xff]  }
  0x3c   : > { %v2368_v3 = vrot.slane %v2366_v55, 4  ;;  %v2371_v4 = vrot.slane %v2369_v56, 5  ;;  %v2377_v14 = vrot.slane %v2375_v5, 5  ;;  %421 = vst [vmem:[#allocation2 + $0x14] sm:$0x1] %v420_v40  ;;  %v423_v45 = vsel %vm5660_vm6, %v390_v32, %v422_v36 }
  0x3d   : > { %424 = vst [vmem:[#allocation2 + $0x18] sm:$0xf] %v423_v45  ;;  %427 = vst [vmem:[#allocation2 + $0x1c] sm:$0x1] %v426_v46  ;;  %v5082_v55 = vld [vmem:[%s6979_s5 + $0x24] ss:$8 sps:$4 sm:$0xff]  }
  0x3e   : > { %v2372_v13 = vor.u32 %v2371_v4, %v2368_v3  ;;  %770 = vmatpush1.bf16.msra.mxu0 %v5065_v63  ;;  %v5083_v56 = vld [vmem:[%s6976_s2 + $0x40] ss:$8 sps:$4 sm:$0xff]   ;;  %v5805_v60 = vrot.slane %v2273_v48, 7  ;;  %v5088_v62 = vld [vmem:[%s6979_s5 + $0x34] ss:$8 sps:$4 sm:$0xff]   ;;  %v5815_v3 = vrot.slane %v2281_v53, 7 }
  0x3f   : > { %771 = vmatprep.subr.bf16.mxu0 %v5073_v7  ;;  %v1200_v4 = vshrl.u32 %v5689_v15, 16  ;;  %v1203_v12 = vshll.u32 %v5689_v15, 16  ;;  %v5089_v21 = vld [vmem:[%s6976_s2 + $0x50] ss:$8 sps:$4 sm:$0xff]   ;;  %v2284_v32 = vshll.u32 %v5772_v42, 16 }
  0x40   : > { %v2373_v26 = vrot.slane %v2372_v13, 4  ;;  %v2279_v30 = vrot.slane %v5805_v60, 4  ;;  %v2287_v33 = vrot.slane %v5815_v3, 4  ;;  %v5095_v34 = vld [vmem:[%s6976_s2 + $0x60] ss:$8 sps:$4 sm:$0xff]  }
  0x41   : > { %v1205_v45 = vrot.slane %v1203_v12, 5  ;;  %v5092_v42 = vld [vmem:[%s6979_s5 + $0x40] ss:$8 sps:$4 sm:$0xff]   ;;  %v5221_v31 = vld [vmem:[%s6979_s5 + $0x210] ss:$8 sps:$4 sm:$0xff]  }
  0x42   : > { %v2378_v38 = vsel %vm5693_vm11, %v2373_v26, %v2377_v14  ;;  %772 = vmatpush1.bf16.msra.mxu0 %v5071_v17  ;;  %v5811_v63 = vld [vmem:[#allocation2 + $0x10] sm:$0xf]  ;;  %v5097_v26 = vld [vmem:[%s6976_s2 + $0x64] ss:$8 sps:$4 sm:$0xff]  }
  0x43   : > { %v4578_v43 = vcombine.low %v2364_v25, %v2378_v38  ;;  %773 = vmatprep.subr.bf16.mxu0 %v5079_v18  ;;  %v5813_v1 = vld [vmem:[#allocation2 + $0x10] sm:$0xf]  ;;  %v5818_v5 = vld [vmem:[#allocation2 + $0x14] sm:$0x1]  ;;  %v490_v7 = vshrl.u32 %v5811_v63, 16  ;;  %v493_v8 = vshll.u32 %v5811_v63, 16 }
  0x44   : > { %v5825_v13 = vld [vmem:[#allocation2 + $0x18] sm:$0xf]  ;;  %v5827_v14 = vld [vmem:[#allocation2 + $0x1c] sm:$0x1]  ;;  %v499_v17 = vshll.u32 %v5818_v5, 16 }
  0x45   : > { %2545 = vmatmul.mubr.bf16.vlgmr.msra.gmra.mrb[0].mxu1 %v4578_v43  ;;  %v5086_v18 = vld [vmem:[%s6979_s5 + $0x30] ss:$8 sps:$4 sm:$0xff]   ;;  %v492_v22 = vrot.slane %v490_v7, 4  ;;  %v495_v23 = vrot.slane %v493_v8, 5  ;;  %v504_v15 = vshrl.u32 %v5825_v13, 16  ;;  %v513_v27 = vshll.u32 %v5827_v14, 16 }
  0x46   : > { %2658 = vmatpush1.bf16.msra.mxu1 %v5068_v24  ;;  %2554 = vmatprep.mubr.bf16.mxu1 %v5460_v2  ;;  %v507_v24 = vshll.u32 %v5825_v13, 16  ;;  %v5094_v25 = vld [vmem:[%s6979_s5 + $0x44] ss:$8 sps:$4 sm:$0xff]   ;;  %v501_v36 = vrot.slane %v499_v17, 5  ;;  %v5103_v43 = vld [vmem:[%s6976_s2 + $0x74] ss:$8 sps:$4 sm:$0xff]  }
  0x47   : > { %2659 = vmatprep.subr.bf16.mxu1 %v5076_v44  ;;  %774 = vmatpush1.bf16.msra.mxu0 %v5077_v47  ;;  %v496_v35 = vor.u32 %v495_v23, %v492_v22  ;;  %v506_v38 = vrot.slane %v504_v15, 4  ;;  %v515_v41 = vrot.slane %v513_v27, 5  ;;  %v1202_v44 = vrot.slane %v1200_v4, 4  ;;  %v5857_v48 = vld [vmem:[#allocation2 + $0x10] sm:$0xe] }
  0x48   : > { %775 = vmatprep.subr.bf16.mxu0 %v5085_v52  ;;  %v509_v40 = vrot.slane %v507_v24, 5  ;;  %v5859_v52 = vld [vmem:[#allocation2 + $0x10] sm:$0xf]  ;;  %v5861_v53 = vld [vmem:[#allocation2 + $0x14] sm:$0x1] }
  0x49   : > { %v497_v46 = vrot.slane %v496_v35, 4  ;;  %v5874_v4 = vld [vmem:[#allocation2 + $0x1c] sm:$0x1]  ;;  %v5876_v7 = vld [vmem:[#allocation2 + $0x18] sm:$0xe] }
  0x4a   : > { %2660 = vmatpush1.bf16.msra.mxu1 %v5074_v54  ;;  %v510_v47 = vor.u32 %v509_v40, %v506_v38  ;;  %v5863_v54 = vld [vmem:[#allocation2 + $0x10] sm:$0xe]  ;;  %v5878_v8 = vld [vmem:[#allocation2 + $0x18] sm:$0xf]  ;;  %v5882_v17 = vld [vmem:[#allocation2 + $0x14] sm:$0x1]  ;;  %v1206_v40 = vor.u32 %v1205_v45, %v1202_v44 }
  0x4b   : > { %2661 = vmatprep.subr.bf16.mxu1 %v5082_v55  ;;  %776 = vmatpush1.bf16.msra.mxu0 %v5083_v56  ;;  %v5865_v55 = vld [vmem:[#allocation2 + $0x10] sm:$0xf]  ;;  %v2278_v56 = vor.u32 %v2276_v61, %v5805_v60  ;;  %v2286_v60 = vor.u32 %v2284_v32, %v5815_v3  ;;  %v5100_v61 = vld [vmem:[%s6979_s5 + $0x54] ss:$8 sps:$4 sm:$0xff]   ;;  %v502_v22 = vsel %vm5693_vm11, %v497_v46, %v501_v36  ;;  %v2315_v36 = vld [vmem:[#allocation2 + $0x18] sm:$0xf] }
  0x4c   : > { %777 = vmatprep.subr.bf16.mxu0 %v5091_v58  ;;  %v5870_v58 = vld [vmem:[#allocation2 + $0x18] sm:$0xf]  ;;  %v5880_v12 = vld [vmem:[#allocation2 + $0x10] sm:$0xf]  ;;  %v511_v23 = vrot.slane %v510_v47, 4 }
  0x4d   : > { %v5892_v15 = vld [vmem:[#allocation2 + $0x1c] sm:$0x1]  ;;  %v5894_v24 = vld [vmem:[#allocation2 + $0x10] sm:$0xe]  ;;  %v2312_v35 = vld [vmem:[#allocation2 + $0x14] sm:$0x1]  ;;  %v2316_v47 = vsel %vm5660_vm6, %v2286_v60, %v2315_v36 }
  0x4e   : > { %2662 = vmatpush1.bf16.msra.mxu1 %v5080_v57  ;;  %v5868_v57 = vld [vmem:[#allocation2 + $0x18] sm:$0xe]  ;;  %6993 = vst [vmem:[#allocation5_spill] sm:$0xff] %v5894_v24  ;;  %v2309_v27 = vld [vmem:[#allocation2 + $0x10] sm:$0xf]  ;;  %v516_v3 = vsel %vm5693_vm11, %v511_v23, %v515_v41 }
  0x4f   : > { %2663 = vmatprep.subr.bf16.mxu1 %v5088_v62  ;;  %778 = vmatpush1.bf16.msra.mxu0 %v5089_v21  ;;  %v5872_v62 = vld [vmem:[#allocation2 + $0x18] sm:$0xf]  ;;  %v2310_v32 = vsel %vm5660_vm6, %v2278_v56, %v2309_v27  ;;  %v2318_v38 = vld [vmem:[#allocation2 + $0x1c] sm:$0x1]  ;;  %v4277_v46 = vcombine.low %v502_v22, %v516_v3  ;;  %v5104_v45 = vld [vmem:[%s6979_s5 + $0x60] ss:$8 sps:$4 sm:$0xff]  }
  0x50   : > { %779 = vmatprep.subr.bf16.mxu0 %v5097_v26  ;;  %v5884_v21 = vld [vmem:[#allocation2 + $0x18] sm:$0xf]  ;;  %v2319_v41 = vsel %vm5620_vm3, %v2287_v33, %v2318_v38  ;;  %2311 = vst [vmem:[#allocation2 + $0x10] sm:$0xf] %v2310_v32  ;;  %v5106_v33 = vld [vmem:[%s6979_s5 + $0x64] ss:$8 sps:$4 sm:$0xff]  }
  0x51   : > { %v5896_v26 = vld [vmem:[#allocation2 + $0x18] sm:$0xe]  ;;  %2320 = vst [vmem:[#allocation2 + $0x1c] sm:$0x1] %v2319_v41  ;;  %665 = vmatmul.mubr.bf16.gmra.mrb[4].mxu0 %v4277_v46  ;;  %v5107_v56 = vld [vmem:[%s6976_s2 + $0x100] ss:$8 sps:$4 sm:$0xff]  }
  0x52   : > { %2664 = vmatpush1.bf16.msra.mxu1 %v5086_v18  ;;  %6994 = vst [vmem:[#allocation6_spill] sm:$0xff] %v5896_v26  ;;  %v2313_v18 = vsel %vm5620_vm3, %v2279_v30, %v2312_v35  ;;  %v5109_v30 = vld [vmem:[%s6976_s2 + $0x104] ss:$8 sps:$4 sm:$0xff]   ;;  %2317 = vst [vmem:[#allocation2 + $0x18] sm:$0xf] %v2316_v47  ;;  %799 = vmatprep.mubr.bf16.mxu0 %v5460_v2  ;;  %v1214_v3 = vshrl.u32 %v5859_v52, 16  ;;  %v4295_v26 = vcombine.low %v5811_v63, %v5825_v13 }
  0x53   : > { %2665 = vmatprep.subr.bf16.mxu1 %v5094_v25  ;;  %780 = vmatpush1.bf16.msra.mxu0 %v5095_v34  ;;  %v5101_v25 = vld [vmem:[%s6976_s2 + $0x70] ss:$8 sps:$4 sm:$0xff]   ;;  %2314 = vst [vmem:[#allocation2 + $0x14] sm:$0x1] %v2313_v18  ;;  %v1209_v34 = vshll.u32 %v5697_v19, 16  ;;  %v1217_v32 = vshll.u32 %v5859_v52, 16 }
  0x54   : > { %781 = vmatprep.subr.bf16.mxu0 %v5103_v43  ;;  %v5098_v44 = vld [vmem:[%s6979_s5 + $0x50] ss:$8 sps:$4 sm:$0xff]   ;;  %v5922_v43 = vrot.slane %v1206_v40, 4  ;;  %v5112_v60 = vld [vmem:[%s6979_s5 + $0x74] ss:$8 sps:$4 sm:$0xff]  }
  0x55   : > { %v5115_v22 = vld [vmem:[%s6976_s2 + $0x114] ss:$8 sps:$4 sm:$0xff]   ;;  %v5110_v52 = vld [vmem:[%s6979_s5 + $0x70] ss:$8 sps:$4 sm:$0xff]   ;;  %v1219_v10 = vrot.slane %v1217_v32, 5 }
  0x56   : > { %2666 = vmatpush1.bf16.msra.mxu1 %v5092_v42  ;;  %v5927_v42 = vrot.slane %v1209_v34, 5 }
  0x57   : > { %2667 = vmatprep.subr.bf16.mxu1 %v5100_v61  ;;  %782 = vmatpush1.bf16.msra.mxu0 %v5101_v25  ;;  %v4294_v61 = vcombine.low %v5639_v37, %v5683_v9  ;;  %v5944_v27 = vld [vmem:[#allocation2 + $0x10] sm:$0xf] }
  0x58   : > { %956 = vmatprep.subr.bf16.mxu0 %v5109_v30  ;;  %v5952_v37 = vld [vmem:[#allocation2 + $0x1c] sm:$0x1]  ;;  %v2380_v9 = vshrl.u32 %v5944_v27, 16  ;;  %v2383_v36 = vshll.u32 %v5944_v27, 16  ;;  %v5118_v30 = vld [vmem:[%s6979_s5 + $0x104] ss:$8 sps:$4 sm:$0xff]  }
  0x59   : > { %v5950_v18 = vld [vmem:[#allocation2 + $0x18] sm:$0xf]  ;;  %v2403_v46 = vshll.u32 %v5952_v37, 16 }
  0x5a   : > { %2668 = vmatpush1.bf16.msra.mxu1 %v5098_v44  ;;  %v5946_v35 = vld [vmem:[#allocation2 + $0x14] sm:$0x1]  ;;  %v2394_v25 = vshrl.u32 %v5950_v18, 16  ;;  %v2397_v40 = vshll.u32 %v5950_v18, 16  ;;  %v2382_v47 = vrot.slane %v2380_v9, 4  ;;  %v2385_v41 = vrot.slane %v2383_v36, 5  ;;  %800 = vmatmul.mubr.bf16.vlgmr.msra.gmra.mrb[0].mxu0 %v4294_v61 }
  0x5b   : > { %2669 = vmatprep.subr.bf16.mxu1 %v5106_v33  ;;  %v2389_v38 = vshll.u32 %v5946_v35, 16  ;;  %957 = vmatpush1.bf16.msra.mxu0 %v5107_v56  ;;  %v5113_v33 = vld [vmem:[%s6976_s2 + $0x110] ss:$8 sps:$4 sm:$0xff]   ;;  %v1228_v36 = vshrl.u32 %v5872_v62, 16  ;;  %v1216_v56 = vrot.slane %v1214_v3, 4 }
  0x5c   : > { %v2396_v34 = vrot.slane %v2394_v25, 4  ;;  %v2399_v44 = vrot.slane %v2397_v40, 5  ;;  %809 = vmatprep.mubr.bf16.mxu0 %v5460_v2  ;;  %v2386_v9 = vor.u32 %v2385_v41, %v2382_v47  ;;  %958 = vmatprep.subr.bf16.mxu0 %v5115_v22  ;;  %v2405_v40 = vrot.slane %v2403_v46, 5  ;;  %v5120_v22 = vld [vmem:[%s6976_s2 + $0x120] ss:$8 sps:$4 sm:$0xff]  }
  0x5d   : > { %v2391_v61 = vrot.slane %v2389_v38, 5  ;;  %v1220_v38 = vor.u32 %v1219_v10, %v1216_v56  ;;  %v837_v47 = vrot.slane %v5664_v50, 5  ;;  %v5128_v3 = vld [vmem:[%s6976_s2 + $0x134] ss:$8 sps:$4 sm:$0xff]   ;;  %v1231_v41 = vshll.u32 %v5872_v62, 16 }
  0x5e   : > { %2670 = vmatpush1.bf16.msra.mxu1 %v5104_v45  ;;  %v5122_v45 = vld [vmem:[%s6976_s2 + $0x124] ss:$8 sps:$4 sm:$0xff]   ;;  %v2400_v25 = vor.u32 %v2399_v44, %v2396_v34  ;;  %v2387_v23 = vrot.slane %v2386_v9, 4  ;;  %v820_v10 = vld [vmem:[#allocation2] sm:$0xe] }
  0x5f   : > { %2671 = vmatprep.subr.bf16.mxu1 %v5112_v60  ;;  %v1223_v60 = vshll.u32 %v5861_v53, 16  ;;  %959 = vmatpush1.bf16.msra.mxu0 %v5113_v33  ;;  %v1221_v13 = vrot.slane %v1220_v38, 4  ;;  %v5126_v50 = vld [vmem:[%s6976_s2 + $0x130] ss:$8 sps:$4 sm:$0xff]   ;;  %v1233_v44 = vrot.slane %v1231_v41, 5  ;;  %v1237_v33 = vshll.u32 %v5874_v4, 16 }
  0x60   : > { %v2401_v24 = vrot.slane %v2400_v25, 4  ;;  %v2392_v46 = vsel %vm5693_vm11, %v2387_v23, %v2391_v61  ;;  %960 = vmatprep.subr.bf16.mxu0 %v5122_v45  ;;  %v4312_v23 = vrot.slane %v820_v10, 9  ;;  %v5134_v62 = vld [vmem:[%s6976_s2 + $0x144] ss:$8 sps:$4 sm:$0xff]   ;;  %v2724_v45 = vrot.slane %v5679_v6, 5 }
  0x61   : > { %v1225_v32 = vrot.slane %v1223_v60, 5  ;;  %v2728_v60 = vrot.slane %v5740_v59, 5  ;;  %v4418_v6 = vrot.slane %v5699_v20, 9  ;;  %v2710_v25 = vld [vmem:[#allocation2] sm:$0xe] }
  0x62   : > { %2672 = vmatpush1.bf16.msra.mxu1 %v5110_v52  ;;  %v2406_v63 = vsel %vm5693_vm11, %v2401_v24, %v2405_v40  ;;  %v1230_v52 = vrot.slane %v1228_v36, 4  ;;  %810 = vmatmul.mubr.bf16.gmra.mrb[4].mxu0 %v4295_v26  ;;  %v6995_v24 = vsel %vm5693_vm11, %v5922_v43, %v5927_v42  ;;  %v6010_v9 = vsel %vm5709_vm12, %v4312_v23, %v837_v47  ;;  %v5132_v36 = vld [vmem:[%s6976_s2 + $0x140] ss:$8 sps:$4 sm:$0xff]   ;;  %v5140_v59 = vld [vmem:[%s6976_s2 + $0x154] ss:$8 sps:$4 sm:$0xff]  }
  0x63   : > { %2843 = vmatprep.subr.bf16.mxu1 %v5118_v30  ;;  %v4579_v30 = vcombine.low %v2392_v46, %v2406_v63  ;;  %961 = vmatpush1.bf16.msra.mxu0 %v5120_v22  ;;  %v1226_v34 = vsel %vm5693_vm11, %v1221_v13, %v1225_v32  ;;  %v4332_v43 = vcombine.low %v6010_v9, %v5720_v39  ;;  %v6018_v42 = vrot.slane %v1237_v33, 5  ;;  %v2711_v40 = vld [vmem:[#allocation2 + $0x8] sm:$0xe]  ;;  %v5150_v33 = vld [vmem:[%s6976_s2 + $0x170] ss:$8 sps:$4 sm:$0xff]  }
  0x64   : > { %988 = vmatprep.mubr.bf16.mxu0 %v5460_v2  ;;  %962 = vmatprep.subr.bf16.mxu0 %v5128_v3  ;;  %v6003_v26 = vcombine.low %v6995_v24, %v1226_v34  ;;  %v1234_v61 = vor.u32 %v1233_v44, %v1230_v52  ;;  %v4596_v22 = vcombine.low %v5677_v0, %v5729_v51  ;;  %v4614_v38 = vrot.slane %v2710_v25, 9  ;;  %v5116_v46 = vld [vmem:[%s6979_s5 + $0x100] ss:$8 sps:$4 sm:$0xff]   ;;  %v5125_v0 = vld [vmem:[%s6979_s5 + $0x114] ss:$8 sps:$4 sm:$0xff]  }
  0x65   : > { %2555 = vmatmul.mubr.bf16.gmra.mrb[4].mxu1 %v4579_v30  ;;  %v4615_v47 = vrot.slane %v2711_v40, 9  ;;  %v1435_v3 = vrot.slane %v5697_v19, 5  ;;  %v4419_v63 = vrot.slane %v5863_v54, 9  ;;  %v1439_v13 = vrot.slane %v5861_v53, 5  ;;  %v5138_v19 = vld [vmem:[%s6976_s2 + $0x150] ss:$8 sps:$4 sm:$0xff]  }
  0x66   : > { %2689 = vmatprep.mubr.bf16.mxu1 %v5460_v2  ;;  %v6021_v56 = vrot.slane %v1234_v61, 4  ;;  %v6041_v51 = vsel %vm5709_vm12, %v4614_v38, %v2724_v45  ;;  %v5146_v54 = vld [vmem:[%s6976_s2 + $0x164] ss:$8 sps:$4 sm:$0xff]   ;;  %v5123_v30 = vld [vmem:[%s6979_s5 + $0x110] ss:$8 sps:$4 sm:$0xff]   ;;  %v4597_v44 = vcombine.low %v5944_v27, %v5950_v18  ;;  %v849_v25 = vrot.slane %v5827_v14, 5 }
  0x67   : > { %963 = vmatpush1.bf16.msra.mxu0 %v5126_v50  ;;  %v6045_v32 = vsel %vm5709_vm12, %v4615_v47, %v2728_v60  ;;  %v6056_v41 = vsel %vm5709_vm12, %v4418_v6, %v1435_v3  ;;  %v6063_v53 = vsel %vm5709_vm12, %v4419_v63, %v1439_v13  ;;  %v5131_v50 = vld [vmem:[%s6979_s5 + $0x124] ss:$8 sps:$4 sm:$0xff]   ;;  %v5144_v23 = vld [vmem:[%s6976_s2 + $0x160] ss:$8 sps:$4 sm:$0xff]   ;;  %v5152_v34 = vld [vmem:[%s6976_s2 + $0x174] ss:$8 sps:$4 sm:$0xff]  }
  0x68   : > { %964 = vmatprep.subr.bf16.mxu0 %v5134_v62  ;;  %v1240_v20 = vsel %vm5693_vm11, %v6021_v56, %v6018_v42  ;;  %v4634_v52 = vcombine.low %v6041_v51, %v6045_v32  ;;  %v4438_v10 = vcombine.low %v6056_v41, %v6063_v53  ;;  %v5129_v62 = vld [vmem:[%s6979_s5 + $0x120] ss:$8 sps:$4 sm:$0xff]   ;;  %v5137_v24 = vld [vmem:[%s6979_s5 + $0x134] ss:$8 sps:$4 sm:$0xff]   ;;  %v5159_v27 = vld [vmem:[%s6976_s2 + $0x184] ss:$8 sps:$4 sm:$0xff]  }
  0x69   : > { %v5135_v18 = vld [vmem:[%s6979_s5 + $0x130] ss:$8 sps:$4 sm:$0xff]   ;;  %v5143_v45 = vld [vmem:[%s6979_s5 + $0x144] ss:$8 sps:$4 sm:$0xff]   ;;  %v5157_v61 = vld [vmem:[%s6976_s2 + $0x180] ss:$8 sps:$4 sm:$0xff]  }
  0x6a   : > { %v4314_v60 = vrot.slane %v5857_v48, 9  ;;  %v4315_v6 = vrot.slane %v5868_v57, 9  ;;  %v5165_v40 = vld [vmem:[%s6976_s2 + $0x194] ss:$8 sps:$4 sm:$0xff]   ;;  %v5163_v14 = vld [vmem:[%s6976_s2 + $0x190] ss:$8 sps:$4 sm:$0xff]  }
  0x6b   : > { %965 = vmatpush1.bf16.msra.mxu0 %v5132_v36  ;;  %v845_v36 = vrot.slane %v5818_v5, 5  ;;  %v5149_v48 = vld [vmem:[%s6979_s5 + $0x154] ss:$8 sps:$4 sm:$0xff]   ;;  %v4420_v5 = vrot.slane %v5876_v7, 9  ;;  %v1443_v38 = vrot.slane %v5874_v4, 5 }
  0x6c   : > { %966 = vmatprep.subr.bf16.mxu0 %v5140_v59  ;;  %v850_v59 = vsel %vm5709_vm12, %v4315_v6, %v849_v25  ;;  %v5171_v39 = vld [vmem:[%s6976_s2 + $0x1a4] ss:$8 sps:$4 sm:$0xff]   ;;  %v5147_v7 = vld [vmem:[%s6979_s5 + $0x150] ss:$8 sps:$4 sm:$0xff]   ;;  %v5169_v47 = vld [vmem:[%s6976_s2 + $0x1a0] ss:$8 sps:$4 sm:$0xff]  }
  0x6d   : > { %2690 = vmatmul.mubr.bf16.vlgmr.msra.gmra.mrb[0].mxu1 %v4596_v22  ;;  %v5141_v22 = vld [vmem:[%s6979_s5 + $0x140] ss:$8 sps:$4 sm:$0xff]   ;;  %v846_v57 = vsel %vm5709_vm12, %v4314_v60, %v845_v36  ;;  %v6138_v9 = vsel %vm5709_vm12, %v4420_v5, %v1443_v38  ;;  %v5160_v63 = vld [vmem:[%s6979_s5 + $0x170] ss:$8 sps:$4 sm:$0xff]   ;;  %v5195_v36 = vld [vmem:[%s6976_s2 + $0x1e4] ss:$8 sps:$4 sm:$0xff]  }
  0x6e   : > { %2844 = vmatpush1.bf16.msra.mxu1 %v5116_v46  ;;  %2699 = vmatprep.mubr.bf16.mxu1 %v5460_v2  ;;  %v4333_v4 = vcombine.low %v846_v57, %v850_v59  ;;  %v5177_v46 = vld [vmem:[%s6976_s2 + $0x1b4] ss:$8 sps:$4 sm:$0xff]   ;;  %v5153_v3 = vld [vmem:[%s6979_s5 + $0x160] ss:$8 sps:$4 sm:$0xff]   ;;  %v5175_v13 = vld [vmem:[%s6976_s2 + $0x1b0] ss:$8 sps:$4 sm:$0xff]  }
  0x6f   : > { %2845 = vmatprep.subr.bf16.mxu1 %v5125_v0  ;;  %967 = vmatpush1.bf16.msra.mxu0 %v5138_v19  ;;  %v5162_v0 = vld [vmem:[%s6979_s5 + $0x174] ss:$8 sps:$4 sm:$0xff]   ;;  %v5183_v19 = vld [vmem:[%s6976_s2 + $0x1c4] ss:$8 sps:$4 sm:$0xff]   ;;  %v347_v60 = vld [vmem:[#allocation2 + $0x20] sm:$0x1] }
  0x70   : > { %968 = vmatprep.subr.bf16.mxu0 %v5146_v54  ;;  %v4472_v54 = vcombine.low %v5865_v55, %v5878_v8  ;;  %v5180_v32 = vld [vmem:[%s6979_s5 + $0x1a4] ss:$8 sps:$4 sm:$0xff]   ;;  %v5193_v5 = vld [vmem:[%s6976_s2 + $0x1e0] ss:$8 sps:$4 sm:$0xff]   ;;  %v5260_v42 = vld [vmem:[%s6979_s5 + $0x274] ss:$8 sps:$4 sm:$0xff]  }
  0x71   : > { %v5178_v38 = vld [vmem:[%s6979_s5 + $0x1a0] ss:$8 sps:$4 sm:$0xff]   ;;  %v5317_v41 = vld [vmem:[%s6976_s2 + $0x324] ss:$8 sps:$4 sm:$0xff]  }
  0x72   : > { %2846 = vmatpush1.bf16.msra.mxu1 %v5123_v30  ;;  %v5168_v30 = vld [vmem:[%s6979_s5 + $0x184] ss:$8 sps:$4 sm:$0xff]  }
  0x73   : > { %2847 = vmatprep.subr.bf16.mxu1 %v5131_v50  ;;  %969 = vmatpush1.bf16.msra.mxu0 %v5144_v23  ;;  %v2712_v50 = vld [vmem:[#allocation2 + $0x10] sm:$0xe]  ;;  %v2713_v23 = vld [vmem:[#allocation2 + $0x18] sm:$0xe]  ;;  %v5302_v53 = vld [vmem:[%s6979_s5 + $0x2e4] ss:$8 sps:$4 sm:$0xff]  }
  0x74   : > { %970 = vmatprep.subr.bf16.mxu0 %v5152_v34  ;;  %v5181_v34 = vld [vmem:[%s6976_s2 + $0x1c0] ss:$8 sps:$4 sm:$0xff]   ;;  %v5350_v55 = vld [vmem:[%s6979_s5 + $0x364] ss:$8 sps:$4 sm:$0xff]  }
  0x75   : > { %2700 = vmatmul.mubr.bf16.gmra.mrb[4].mxu1 %v4597_v44  ;;  %v5189_v44 = vld [vmem:[%s6976_s2 + $0x1d4] ss:$8 sps:$4 sm:$0xff]  }
  0x76   : > { %2848 = vmatpush1.bf16.msra.mxu1 %v5129_v62  ;;  %2875 = vmatprep.mubr.bf16.mxu1 %v5460_v2  ;;  %v2732_v62 = vrot.slane %v5946_v35, 5  ;;  %v348_v35 = vsel %vm5620_vm3, 0, %v347_v60  ;;  %v5204_v60 = vld [vmem:[%s6979_s5 + $0x1e4] ss:$8 sps:$4 sm:$0xff]  }
  0x77   : > { %2849 = vmatprep.subr.bf16.mxu1 %v5137_v24  ;;  %971 = vmatpush1.bf16.msra.mxu0 %v5150_v33  ;;  %v2736_v24 = vrot.slane %v5952_v37, 5  ;;  %v5166_v33 = vld [vmem:[%s6979_s5 + $0x180] ss:$8 sps:$4 sm:$0xff]   ;;  %v367_v37 = vld [vmem:[%s5608_s16 + $0xc] sm:$0xf]  ;;  %s2234_s16 = sld [smem:[#allocation3]] }
  0x78   : > { %1130 = vmatprep.subr.bf16.mxu0 %v5159_v27  ;;  %v4616_v27 = vrot.slane %v2712_v50, 9  ;;  %349 = vst [vmem:[#allocation2 + $0x20] sm:$0x1] %v348_v35  ;;  %v393_v6 = vshrl.u32 %v367_v37, 16  ;;  %v396_v25 = vshll.u32 %v367_v37, 16 }
  0x79   : > { %v5190_v50 = vld [vmem:[%s6979_s5 + $0x1c0] ss:$8 sps:$4 sm:$0xff]  }
  0x7a   : > { %2850 = vmatpush1.bf16.msra.mxu1 %v5135_v18  ;;  %989 = vmatmul.mubr.bf16.vlgmr.msra.gmra.mrb[0].mxu0 %v4332_v43  ;;  %v5155_v43 = vld [vmem:[%s6979_s5 + $0x164] ss:$8 sps:$4 sm:$0xff]   ;;  %v4617_v18 = vrot.slane %v2713_v23, 9  ;;  %v5198_v23 = vld [vmem:[%s6979_s5 + $0x1d4] ss:$8 sps:$4 sm:$0xff]  }
  0x7b   : > { %2851 = vmatprep.subr.bf16.mxu1 %v5143_v45  ;;  %1131 = vmatpush1.bf16.msra.mxu0 %v5157_v61  ;;  %v5174_v45 = vld [vmem:[%s6979_s5 + $0x194] ss:$8 sps:$4 sm:$0xff]   ;;  %v5187_v61 = vld [vmem:[%s6976_s2 + $0x1d0] ss:$8 sps:$4 sm:$0xff]  }
  0x7c   : > { %998 = vmatprep.mubr.bf16.mxu0 %v5460_v2  ;;  %1132 = vmatprep.subr.bf16.mxu0 %v5165_v40  ;;  %v5172_v40 = vld [vmem:[%s6979_s5 + $0x190] ss:$8 sps:$4 sm:$0xff]   ;;  %v2737_v51 = vsel %vm5709_vm12, %v4617_v18, %v2736_v24 }
  0x7d   : > { %v5196_v24 = vld [vmem:[%s6979_s5 + $0x1d0] ss:$8 sps:$4 sm:$0xff]  }
  0x7e   : > { %2852 = vmatpush1.bf16.msra.mxu1 %v5141_v22  ;;  %v2733_v22 = vsel %vm5709_vm12, %v4616_v27, %v2732_v62 }
  0x7f   : > { %2853 = vmatprep.subr.bf16.mxu1 %v5149_v48  ;;  %1133 = vmatpush1.bf16.msra.mxu0 %v5163_v14  ;;  %v2263_v48 = vld [vmem:[%s5635_s25 + $0xc] sm:$0xf]  ;;  %v5201_v14 = vld [vmem:[%s6976_s2 + $0x1f4] ss:$8 sps:$4 sm:$0xff]   ;;  %v4635_v57 = vcombine.low %v2733_v22, %v2737_v51  ;;  %v5208_v51 = vld [vmem:[%s6979_s5 + $0x1f0] ss:$8 sps:$4 sm:$0xff]  }
  0x80   : > { %1134 = vmatprep.subr.bf16.mxu0 %v5171_v39  ;;  %v5186_v39 = vld [vmem:[%s6979_s5 + $0x1b4] ss:$8 sps:$4 sm:$0xff]   ;;  %v5232_v22 = vld [vmem:[%s6976_s2 + $0x244] ss:$8 sps:$4 sm:$0xff]  }
  0x82   : > { %2854 = vmatpush1.bf16.msra.mxu1 %v5147_v7  ;;  %999 = vmatmul.mubr.bf16.gmra.mrb[4].mxu0 %v4333_v4  ;;  %v2289_v7 = vshrl.u32 %v2263_v48, 16  ;;  %v428_v4 = vld [vmem:[#allocation2 + $0x20] sm:$0xf] }
  0x83   : > { %2855 = vmatprep.subr.bf16.mxu1 %v5155_v43  ;;  %1135 = vmatpush1.bf16.msra.mxu0 %v5169_v47  ;;  %v5199_v43 = vld [vmem:[%s6976_s2 + $0x1f0] ss:$8 sps:$4 sm:$0xff]   ;;  %v5207_v47 = vld [vmem:[%s6976_s2 + $0x204] ss:$8 sps:$4 sm:$0xff]  }
  0x84   : > { %1162 = vmatprep.mubr.bf16.mxu0 %v5460_v2  ;;  %1136 = vmatprep.subr.bf16.mxu0 %v5177_v46 }
  0x86   : > { %2856 = vmatpush1.bf16.msra.mxu1 %v5153_v3  ;;  %v5184_v3 = vld [vmem:[%s6979_s5 + $0x1b0] ss:$8 sps:$4 sm:$0xff]  }
  0x87   : > { %2857 = vmatprep.subr.bf16.mxu1 %v5162_v0  ;;  %1137 = vmatpush1.bf16.msra.mxu0 %v5175_v13  ;;  %v5192_v0 = vld [vmem:[%s6979_s5 + $0x1c4] ss:$8 sps:$4 sm:$0xff]   ;;  %v2292_v13 = vshll.u32 %v2263_v48, 16  ;;  %v5217_v48 = vld [vmem:[#allocation2 + $0x8] ss:$8 sps:$4 sm:$0xff]  }
  0x88   : > { %1138 = vmatprep.subr.bf16.mxu0 %v5183_v19  ;;  %v5205_v19 = vld [vmem:[%s6976_s2 + $0x200] ss:$8 sps:$4 sm:$0xff]  }
  0x8a   : > { %2858 = vmatpush1.bf16.msra.mxu1 %v5160_v63  ;;  %v6238_v63 = vrot.slane %v2289_v7, 7  ;;  %v5236_v7 = vld [vmem:[%s6976_s2 + $0x250] ss:$8 sps:$4 sm:$0xff]  }
  0x8b   : > { %3017 = vmatprep.subr.bf16.mxu1 %v5168_v30  ;;  %1139 = vmatpush1.bf16.msra.mxu0 %v5181_v34  ;;  %v5213_v30 = vld [vmem:[%s6976_s2 + $0x214] ss:$8 sps:$4 sm:$0xff]   ;;  %v6996_v34 = vcombine.low %v5685_v11, %v5813_v1 }
  0x8c   : > { %1140 = vmatprep.subr.bf16.mxu0 %v5189_v44  ;;  %v5211_v44 = vld [vmem:[%s6976_s2 + $0x210] ss:$8 sps:$4 sm:$0xff]   ;;  %v2294_v62 = vor.u32 %v2292_v13, %v6238_v63 }
  0x8d   : > { %2876 = vmatmul.mubr.bf16.vlgmr.msra.gmra.mrb[0].mxu1 %v4634_v52  ;;  %v6207_v52 = vrot.slane %v393_v6, 7 }
  0x8e   : > { %3018 = vmatpush1.bf16.msra.mxu1 %v5166_v33  ;;  %2885 = vmatprep.mubr.bf16.mxu1 %v5460_v2  ;;  %v5220_v33 = vld [vmem:[%s6976_s2 + $0x224] ss:$8 sps:$4 sm:$0xff]  }
  0x8f   : > { %3019 = vmatprep.subr.bf16.mxu1 %v5174_v45  ;;  %1141 = vmatpush1.bf16.msra.mxu0 %v5187_v61  ;;  %v398_v59 = vor.u32 %v396_v25, %v6207_v52  ;;  %v5226_v25 = vld [vmem:[%s6976_s2 + $0x234] ss:$8 sps:$4 sm:$0xff]  }
  0x90   : > { %1142 = vmatprep.subr.bf16.mxu0 %v5195_v36  ;;  %v5218_v36 = vld [vmem:[%s6976_s2 + $0x220] ss:$8 sps:$4 sm:$0xff]  }
  0x91   : > { %v429_v46 = vsel %vm5660_vm6, %v398_v59, %v428_v4  ;;  %v5244_v4 = vld [vmem:[%s6976_s2 + $0x264] ss:$8 sps:$4 sm:$0xff]  }
  0x92   : > { %3020 = vmatpush1.bf16.msra.mxu1 %v5172_v40  ;;  %430 = vst [vmem:[#allocation2 + $0x20] sm:$0xf] %v429_v46  ;;  %v5210_v40 = vld [vmem:[%s6979_s5 + $0x1f4] ss:$8 sps:$4 sm:$0xff]   ;;  %v399_v46 = vrot.slane %v6207_v52, 4 }
  0x93   : > { %3021 = vmatprep.subr.bf16.mxu1 %v5180_v32  ;;  %1143 = vmatpush1.bf16.msra.mxu0 %v5193_v5  ;;  %v5216_v32 = vld [vmem:[%s6979_s5 + $0x204] ss:$8 sps:$4 sm:$0xff]   ;;  %v5230_v5 = vld [vmem:[%s6976_s2 + $0x240] ss:$8 sps:$4 sm:$0xff]  }
  0x94   : > { %1144 = vmatprep.subr.bf16.mxu0 %v5201_v14  ;;  %v361_v14 = vld [vmem:[#allocation2 + $0x24] sm:$0x1]  ;;  %v5227_v52 = vld [vmem:[%s6979_s5 + $0x220] ss:$8 sps:$4 sm:$0xff]  }
  0x95   : > { %2886 = vmatmul.mubr.bf16.gmra.mrb[4].mxu1 %v4635_v57  ;;  %v5238_v57 = vld [vmem:[%s6976_s2 + $0x254] ss:$8 sps:$4 sm:$0xff]   ;;  %v362_v59 = vsel %vm5627_vm4, 0, %v361_v14 }
  0x96   : > { %3022 = vmatpush1.bf16.msra.mxu1 %v5178_v38  ;;  %3049 = vmatprep.mubr.bf16.mxu1 %v5460_v2  ;;  %v5214_v38 = vld [vmem:[%s6979_s5 + $0x200] ss:$8 sps:$4 sm:$0xff]   ;;  %363 = vst [vmem:[#allocation2 + $0x24] sm:$0x1] %v362_v59 }
  0x97   : > { %3023 = vmatprep.subr.bf16.mxu1 %v5186_v39  ;;  %1145 = vmatpush1.bf16.msra.mxu0 %v5199_v43  ;;  %v5223_v39 = vld [vmem:[%s6979_s5 + $0x214] ss:$8 sps:$4 sm:$0xff]   ;;  %v5229_v43 = vld [vmem:[%s6979_s5 + $0x224] ss:$8 sps:$4 sm:$0xff]  }
  0x98   : > { %1360 = vmatprep.subr.bf16.mxu0 %v5207_v47  ;;  %v5242_v47 = vld [vmem:[%s6976_s2 + $0x260] ss:$8 sps:$4 sm:$0xff]  }
  0x99   : > { %v1020_v11 = vld [vmem:[#allocation2 + $0x20] sm:$0xf] }
  0x9a   : > { %3024 = vmatpush1.bf16.msra.mxu1 %v5184_v3  ;;  %1163 = vmatmul.mubr.bf16.vlgmr.msra.gmra.mrb[0].mxu0 %v6996_v34  ;;  %v6266_v1 = vld [vmem:[#allocation2 + $0x20] sm:$0xf]  ;;  %v4367_v35 = vcombine.low %v5870_v58, %v1020_v11  ;;  %v5250_v3 = vld [vmem:[%s6976_s2 + $0x274] ss:$8 sps:$4 sm:$0xff]  }
  0x9b   : > { %3025 = vmatprep.subr.bf16.mxu1 %v5192_v0  ;;  %1361 = vmatpush1.bf16.msra.mxu0 %v5205_v19  ;;  %v6268_v27 = vld [vmem:[#allocation2 + $0x20] sm:$0xe]  ;;  %v3078_v0 = vld [vmem:[#allocation2 + $0x8] sm:$0xf]  ;;  %v1242_v13 = vshrl.u32 %v6266_v1, 16  ;;  %v1245_v19 = vshll.u32 %v6266_v1, 16 }
  0x9c   : > { %1172 = vmatprep.mubr.bf16.mxu0 %v5460_v2  ;;  %1362 = vmatprep.subr.bf16.mxu0 %v5213_v30  ;;  %v6270_v18 = vld [vmem:[#allocation2 + $0x20] sm:$0xf]  ;;  %v3080_v30 = vld [vmem:[#allocation2 + $0x10] sm:$0xf]  ;;  %v5235_v34 = vld [vmem:[%s6979_s5 + $0x234] ss:$8 sps:$4 sm:$0xff]  }
  0x9d   : > { %v6272_v45 = vld [vmem:[#allocation2 + $0x20] sm:$0xf]  ;;  %v3090_v11 = vshll.u32 %v3078_v0, 16  ;;  %v1244_v1 = vrot.slane %v1242_v13, 4 }
  0x9e   : > { %3026 = vmatpush1.bf16.msra.mxu1 %v5190_v50  ;;  %v6274_v61 = vld [vmem:[#allocation2 + $0x20] sm:$0xe] }
  0x9f   : > { %3027 = vmatprep.subr.bf16.mxu1 %v5198_v23  ;;  %v2321_v37 = vld [vmem:[#allocation2 + $0x20] sm:$0xf]  ;;  %1363 = vmatpush1.bf16.msra.mxu0 %v5211_v44  ;;  %v431_v23 = vld [vmem:[#allocation2 + $0x24] sm:$0x1]  ;;  %v5248_v44 = vld [vmem:[%s6976_s2 + $0x270] ss:$8 sps:$4 sm:$0xff]  }
  0xa0   : > { %v2322_v6 = vsel %vm5660_vm6, %v2294_v62, %v2321_v37  ;;  %1364 = vmatprep.subr.bf16.mxu0 %v5220_v33  ;;  %v5202_v58 = vld [vmem:[%s6979_s5 + $0x1e0] ss:$8 sps:$4 sm:$0xff]   ;;  %v432_v62 = vsel %vm5620_vm3, %v399_v46, %v431_v23  ;;  %v3087_v33 = vshrl.u32 %v3078_v0, 16  ;;  %v6360_v37 = vld [vmem:[#allocation2 + $0xc] sm:$0x1] }
  0xa1   : > { %2323 = vst [vmem:[#allocation2 + $0x20] sm:$0xf] %v2322_v6  ;;  %433 = vst [vmem:[#allocation2 + $0x24] sm:$0x1] %v432_v62  ;;  %v3104_v6 = vshll.u32 %v3080_v30, 16  ;;  %v3096_v14 = vshll.u32 %v6360_v37, 16 }
  0xa2   : > { %3028 = vmatpush1.bf16.msra.mxu1 %v5196_v24  ;;  %1173 = vmatmul.mubr.bf16.gmra.mrb[4].mxu0 %v4367_v35  ;;  %v5257_v24 = vld [vmem:[%s6976_s2 + $0x284] ss:$8 sps:$4 sm:$0xff]   ;;  %v5233_v35 = vld [vmem:[%s6979_s5 + $0x230] ss:$8 sps:$4 sm:$0xff]  }
  0xa3   : > { %3029 = vmatprep.subr.bf16.mxu1 %v5204_v60  ;;  %1365 = vmatpush1.bf16.msra.mxu0 %v5218_v36  ;;  %v1247_v60 = vrot.slane %v1245_v19, 5  ;;  %v3101_v36 = vshrl.u32 %v3080_v30, 16  ;;  %v3106_v59 = vrot.slane %v3104_v6, 5  ;;  %v5261_v30 = vld [vmem:[%s6976_s2 + $0x290] ss:$8 sps:$4 sm:$0xff]  }
  0xa4   : > { %1392 = vmatprep.mubr.bf16.mxu0 %v5460_v2  ;;  %1366 = vmatprep.subr.bf16.mxu0 %v5226_v25  ;;  %v6362_v25 = vld [vmem:[#allocation2 + $0x14] sm:$0x1]  ;;  %v5269_v23 = vld [vmem:[%s6976_s2 + $0x2a4] ss:$8 sps:$4 sm:$0xff]   ;;  %v5251_v6 = vld [vmem:[%s6979_s5 + $0x260] ss:$8 sps:$4 sm:$0xff]  }
  0xa6   : > { %3030 = vmatpush1.bf16.msra.mxu1 %v5202_v58  ;;  %v5241_v58 = vld [vmem:[%s6979_s5 + $0x244] ss:$8 sps:$4 sm:$0xff]  }
  0xa7   : > { %3031 = vmatprep.subr.bf16.mxu1 %v5210_v40  ;;  %1367 = vmatpush1.bf16.msra.mxu0 %v5224_v49  ;;  %v5255_v40 = vld [vmem:[%s6976_s2 + $0x280] ss:$8 sps:$4 sm:$0xff]   ;;  %v5263_v49 = vld [vmem:[%s6976_s2 + $0x294] ss:$8 sps:$4 sm:$0xff]  }
  0xa8   : > { %1368 = vmatprep.subr.bf16.mxu0 %v5232_v22  ;;  %v5254_v50 = vld [vmem:[#allocation2 + $0x18] ss:$8 sps:$4 sm:$0xff]   ;;  %v3089_v22 = vrot.slane %v3087_v33, 4 }
  0xa9   : > { %v3084_v19 = vld [vmem:[#allocation2 + $0x20] sm:$0xf] }
  0xaa   : > { %3032 = vmatpush1.bf16.msra.mxu1 %v5208_v51  ;;  %v3092_v51 = vrot.slane %v3090_v11, 5  ;;  %v3129_v62 = vshrl.u32 %v3084_v19, 16 }
  0xab   : > { %3247 = vmatprep.subr.bf16.mxu1 %v5216_v32  ;;  %1369 = vmatpush1.bf16.msra.mxu0 %v5230_v5  ;;  %v1248_v32 = vor.u32 %v1247_v60, %v1244_v1  ;;  %v5239_v5 = vld [vmem:[%s6979_s5 + $0x240] ss:$8 sps:$4 sm:$0xff]   ;;  %v3098_v60 = vrot.slane %v3096_v14, 5 }
  0xac   : > { %1370 = vmatprep.subr.bf16.mxu0 %v5238_v57  ;;  %v3103_v57 = vrot.slane %v3101_v36, 4  ;;  %v3093_v46 = vor.u32 %v3092_v51, %v3089_v22 }
  0xad   : > { %3050 = vmatmul.mubr.bf16.vlgmr.msra.gmra.mrb[0].mxu1 %v5217_v48  ;;  %v2295_v48 = vrot.slane %v6238_v63, 4  ;;  %v1830_v63 = vshll.u32 %v6272_v45, 16 }
  0xae   : > { %3248 = vmatpush1.bf16.msra.mxu1 %v5214_v38  ;;  %3059 = vmatprep.mubr.bf16.mxu1 %v5460_v2  ;;  %v3110_v38 = vshll.u32 %v6362_v25, 16  ;;  %v3094_v1 = vrot.slane %v3093_v46, 4 }
  0xaf   : > { %3249 = vmatprep.subr.bf16.mxu1 %v5223_v39  ;;  %1371 = vmatpush1.bf16.msra.mxu0 %v5236_v7  ;;  %v5247_v39 = vld [vmem:[%s6979_s5 + $0x254] ss:$8 sps:$4 sm:$0xff]   ;;  %v3082_v7 = vld [vmem:[#allocation2 + $0x18] sm:$0xf]  ;;  %v1832_v33 = vrot.slane %v1830_v63, 5 }
  0xb0   : > { %1372 = vmatprep.subr.bf16.mxu0 %v5244_v4  ;;  %v6387_v4 = vld [vmem:[#allocation2 + $0x24] sm:$0x1] }
  0xb1   : > { %v1836_v11 = vshll.u32 %v6387_v4, 16 }
  0xb2   : > { %3250 = vmatpush1.bf16.msra.mxu1 %v5221_v31  ;;  %v1827_v31 = vshrl.u32 %v6272_v45, 16  ;;  %v5245_v45 = vld [vmem:[%s6979_s5 + $0x250] ss:$8 sps:$4 sm:$0xff]  }
  0xb3   : > { %3251 = vmatprep.subr.bf16.mxu1 %v5229_v43  ;;  %1373 = vmatpush1.bf16.msra.mxu0 %v5242_v47  ;;  %v6385_v43 = vld [vmem:[#allocation2 + $0x24] sm:$0x1]  ;;  %v6420_v51 = vrot.slane %v1836_v11, 5 }
  0xb4   : > { %1374 = vmatprep.subr.bf16.mxu0 %v5250_v3  ;;  %v2324_v47 = vld [vmem:[#allocation2 + $0x24] sm:$0x1]  ;;  %v1249_v3 = vrot.slane %v1248_v32, 4  ;;  %v1251_v0 = vshll.u32 %v6385_v43, 16  ;;  %v5275_v32 = vld [vmem:[%s6976_s2 + $0x2b4] ss:$8 sps:$4 sm:$0xff]  }
  0xb5   : > { %3060 = vmatmul.mubr.bf16.gmra.mrb[4].mxu1 %v5254_v50  ;;  %v2325_v13 = vsel %vm5620_vm3, %v2295_v48, %v2324_v47  ;;  %v3107_v50 = vor.u32 %v3106_v59, %v3103_v57  ;;  %v6425_v48 = vld [vmem:[#allocation2 + $0x1c] sm:$0x1]  ;;  %v3131_v57 = vrot.slane %v3129_v62, 4  ;;  %v5258_v47 = vld [vmem:[%s6979_s5 + $0x270] ss:$8 sps:$4 sm:$0xff]   ;;  %v2042_v62 = vrot.slane %v6387_v4, 5 }
  0xb6   : > { %3252 = vmatpush1.bf16.msra.mxu1 %v5227_v52  ;;  %3279 = vmatprep.mubr.bf16.mxu1 %v5460_v2  ;;  %2326 = vst [vmem:[#allocation2 + $0x24] sm:$0x1] %v2325_v13  ;;  %v1253_v52 = vrot.slane %v1251_v0, 5  ;;  %v3124_v63 = vshll.u32 %v6425_v48, 16  ;;  %v5270_v4 = vld [vmem:[%s6979_s5 + $0x290] ss:$8 sps:$4 sm:$0xff]  }
  0xb7   : > { %3253 = vmatprep.subr.bf16.mxu1 %v5235_v34  ;;  %1375 = vmatpush1.bf16.msra.mxu0 %v5248_v44  ;;  %v3115_v34 = vshrl.u32 %v3082_v7, 16  ;;  %v3118_v44 = vshll.u32 %v3082_v7, 16  ;;  %v3099_v7 = vsel %vm5693_vm11, %v3094_v1, %v3098_v60 }
  0xb8   : > { %1554 = vmatprep.subr.bf16.mxu0 %v5257_v24  ;;  %v3132_v24 = vshll.u32 %v3084_v19, 16  ;;  %v1254_v36 = vsel %vm5693_vm11, %v1249_v3, %v1253_v52  ;;  %v5266_v19 = vld [vmem:[%s6979_s5 + $0x284] ss:$8 sps:$4 sm:$0xff]  }
  0xb9   : > { %v3120_v14 = vrot.slane %v3118_v44, 5 }
  0xba   : > { %3254 = vmatpush1.bf16.msra.mxu1 %v5233_v35  ;;  %1393 = vmatmul.mubr.bf16.vlgmr.msra.gmra.mrb[0].mxu0 %v6003_v26  ;;  %v1829_v26 = vrot.slane %v1827_v31, 4  ;;  %v3112_v35 = vrot.slane %v3110_v38, 5  ;;  %v3134_v59 = vrot.slane %v3132_v24, 5  ;;  %v5281_v31 = vld [vmem:[%s6976_s2 + $0x2c4] ss:$8 sps:$4 sm:$0xff]  }
  0xbb   : > { %3255 = vmatprep.subr.bf16.mxu1 %v5241_v58  ;;  %1555 = vmatpush1.bf16.msra.mxu0 %v5255_v40  ;;  %v3108_v58 = vrot.slane %v3107_v50, 4  ;;  %v5267_v40 = vld [vmem:[%s6976_s2 + $0x2a0] ss:$8 sps:$4 sm:$0xff]   ;;  %v5272_v24 = vld [vmem:[%s6979_s5 + $0x294] ss:$8 sps:$4 sm:$0xff]  }
  0xbc   : > { %1402 = vmatprep.mubr.bf16.mxu0 %v5460_v2  ;;  %1556 = vmatprep.subr.bf16.mxu0 %v5263_v49  ;;  %v4401_v49 = vcombine.low %v1240_v20, %v1254_v36  ;;  %v1833_v22 = vor.u32 %v1832_v33, %v1829_v26  ;;  %v5273_v20 = vld [vmem:[%s6976_s2 + $0x2b0] ss:$8 sps:$4 sm:$0xff]   ;;  %v3135_v0 = vor.u32 %v3134_v59, %v3131_v57  ;;  %v5287_v26 = vld [vmem:[%s6976_s2 + $0x2d4] ss:$8 sps:$4 sm:$0xff]   ;;  %v5291_v36 = vld [vmem:[%s6976_s2 + $0x2e0] ss:$8 sps:$4 sm:$0xff]  }
  0xbd   : > { %v6432_v56 = vld [vmem:[#allocation2 + $0x24] sm:$0x1]  ;;  %v3113_v46 = vsel %vm5693_vm11, %v3108_v58, %v3112_v35  ;;  %v5285_v33 = vld [vmem:[%s6976_s2 + $0x2d0] ss:$8 sps:$4 sm:$0xff]   ;;  %v5303_v57 = vld [vmem:[%s6976_s2 + $0x300] ss:$8 sps:$4 sm:$0xff]  }
  0xbe   : > { %3256 = vmatpush1.bf16.msra.mxu1 %v5239_v5  ;;  %v3117_v5 = vrot.slane %v3115_v34, 4  ;;  %v6427_v38 = vrot.slane %v1833_v22, 4  ;;  %v3138_v13 = vshll.u32 %v6432_v56, 16  ;;  %v4702_v50 = vcombine.low %v3099_v7, %v3113_v46  ;;  %v5278_v35 = vld [vmem:[%s6979_s5 + $0x2a4] ss:$8 sps:$4 sm:$0xff]  }
  0xbf   : > { %3257 = vmatprep.subr.bf16.mxu1 %v5247_v39  ;;  %1557 = vmatpush1.bf16.msra.mxu0 %v5261_v30  ;;  %v5279_v30 = vld [vmem:[%s6976_s2 + $0x2c0] ss:$8 sps:$4 sm:$0xff]   ;;  %v3136_v34 = vrot.slane %v3135_v0, 4  ;;  %v5297_v22 = vld [vmem:[%s6976_s2 + $0x2f0] ss:$8 sps:$4 sm:$0xff]   ;;  %v4421_v59 = vrot.slane %v6268_v27, 9 }
  0xc0   : > { %1558 = vmatprep.subr.bf16.mxu0 %v5269_v23  ;;  %v1839_v39 = vsel %vm5693_vm11, %v6427_v38, %v6420_v51  ;;  %v3121_v3 = vor.u32 %v3120_v14, %v3117_v5  ;;  %v4526_v23 = vrot.slane %v6274_v61, 9  ;;  %v3140_v44 = vrot.slane %v3138_v13, 5  ;;  %v5293_v61 = vld [vmem:[%s6976_s2 + $0x2e4] ss:$8 sps:$4 sm:$0xff]   ;;  %v5282_v5 = vld [vmem:[%s6979_s5 + $0x2b0] ss:$8 sps:$4 sm:$0xff]  }
  0xc1   : > { %v5290_v14 = vld [vmem:[%s6979_s5 + $0x2c4] ss:$8 sps:$4 sm:$0xff]   ;;  %v5288_v7 = vld [vmem:[%s6979_s5 + $0x2c0] ss:$8 sps:$4 sm:$0xff]   ;;  %v5309_v27 = vld [vmem:[%s6976_s2 + $0x310] ss:$8 sps:$4 sm:$0xff]  }
  0xc2   : > { %3258 = vmatpush1.bf16.msra.mxu1 %v5245_v45  ;;  %1403 = vmatmul.mubr.bf16.gmra.mrb[4].mxu0 %v4401_v49  ;;  %v5264_v45 = vld [vmem:[%s6979_s5 + $0x280] ss:$8 sps:$4 sm:$0xff]   ;;  %v3122_v52 = vrot.slane %v3121_v3, 4  ;;  %v6476_v11 = vsel %vm5709_vm12, %v4526_v23, %v2042_v62  ;;  %v3141_v60 = vsel %vm5693_vm11, %v3136_v34, %v3140_v44  ;;  %v5284_v49 = vld [vmem:[%s6979_s5 + $0x2b4] ss:$8 sps:$4 sm:$0xff]   ;;  %v3322_v0 = vrot.slane %v6360_v37, 5 }
  0xc3   : > { %3259 = vmatprep.subr.bf16.mxu1 %v5253_v28  ;;  %1559 = vmatpush1.bf16.msra.mxu0 %v5267_v40  ;;  %v3126_v28 = vrot.slane %v3124_v63, 5  ;;  %v5276_v40 = vld [vmem:[%s6979_s5 + $0x2a0] ss:$8 sps:$4 sm:$0xff]   ;;  %v5294_v63 = vld [vmem:[%s6979_s5 + $0x2d0] ss:$8 sps:$4 sm:$0xff]  }
  0xc4   : > { %1586 = vmatprep.mubr.bf16.mxu0 %v5460_v2  ;;  %1560 = vmatprep.subr.bf16.mxu0 %v5275_v32  ;;  %v5305_v32 = vld [vmem:[%s6976_s2 + $0x304] ss:$8 sps:$4 sm:$0xff]   ;;  %v5315_v3 = vld [vmem:[%s6976_s2 + $0x320] ss:$8 sps:$4 sm:$0xff]   ;;  %v5323_v13 = vld [vmem:[%s6976_s2 + $0x334] ss:$8 sps:$4 sm:$0xff]  }
  0xc5   : > { %v3127_v1 = vsel %vm5693_vm11, %v3122_v52, %v3126_v28  ;;  %v5321_v37 = vld [vmem:[%s6976_s2 + $0x330] ss:$8 sps:$4 sm:$0xff]   ;;  %v5314_v52 = vld [vmem:[%s6979_s5 + $0x304] ss:$8 sps:$4 sm:$0xff]   ;;  %v3311_v44 = vld [vmem:[#allocation2 + $0x20] sm:$0xe] }
  0xc6   : > { %3260 = vmatpush1.bf16.msra.mxu1 %v5251_v6  ;;  %v5299_v6 = vld [vmem:[%s6976_s2 + $0x2f4] ss:$8 sps:$4 sm:$0xff]   ;;  %v4703_v58 = vcombine.low %v3127_v1, %v3141_v60  ;;  %v3310_v34 = vld [vmem:[#allocation2 + $0x18] sm:$0xe]  ;;  %v5312_v62 = vld [vmem:[%s6979_s5 + $0x300] ss:$8 sps:$4 sm:$0xff]  }
  0xc7   : > { %3261 = vmatprep.subr.bf16.mxu1 %v5260_v42  ;;  %1561 = vmatpush1.bf16.msra.mxu0 %v5273_v20  ;;  %v1447_v42 = vrot.slane %v6385_v43, 5  ;;  %v5311_v20 = vld [vmem:[%s6976_s2 + $0x314] ss:$8 sps:$4 sm:$0xff]   ;;  %v3330_v1 = vrot.slane %v6425_v48, 5  ;;  %v4723_v60 = vrot.slane %v3311_v44, 9 }
  0xc8   : > { %1562 = vmatprep.subr.bf16.mxu0 %v5281_v31  ;;  %v5296_v31 = vld [vmem:[%s6979_s5 + $0x2d4] ss:$8 sps:$4 sm:$0xff]   ;;  %v5318_v48 = vld [vmem:[%s6979_s5 + $0x310] ss:$8 sps:$4 sm:$0xff]   ;;  %v5360_v44 = vld [vmem:[%s6979_s5 + $0x380] ss:$8 sps:$4 sm:$0xff]  }
  0xc9   : > { %v1448_v43 = vsel %vm5709_vm12, %v4421_v59, %v1447_v42  ;;  %v5345_v59 = vld [vmem:[%s6976_s2 + $0x370] ss:$8 sps:$4 sm:$0xff]   ;;  %v5353_v42 = vld [vmem:[%s6976_s2 + $0x384] ss:$8 sps:$4 sm:$0xff]   ;;  %v5397_v51 = vld [vmem:[%s6979_s5 + $0x3e0] ss:$8 sps:$4 sm:$0xff]  }
  0xca   : > { %3262 = vmatpush1.bf16.msra.mxu1 %v5258_v47  ;;  %v3309_v47 = vld [vmem:[#allocation2 + $0x10] sm:$0xe]  ;;  %v4439_v46 = vcombine.low %v6138_v9, %v1448_v43  ;;  %v3326_v9 = vrot.slane %v6362_v25, 5  ;;  %v5336_v43 = vld [vmem:[%s6979_s5 + $0x340] ss:$8 sps:$4 sm:$0xff]  }
  0xcb   : > { %3441 = vmatprep.subr.bf16.mxu1 %v5266_v19  ;;  %1563 = vmatpush1.bf16.msra.mxu0 %v5279_v30  ;;  %v5300_v19 = vld [vmem:[%s6979_s5 + $0x2e0] ss:$8 sps:$4 sm:$0xff]   ;;  %v4721_v30 = vrot.slane %v3309_v47, 9  ;;  %v5306_v25 = vld [vmem:[%s6979_s5 + $0x2f0] ss:$8 sps:$4 sm:$0xff]  }
  0xcc   : > { %1564 = vmatprep.subr.bf16.mxu0 %v5287_v26  ;;  %v5329_v26 = vld [vmem:[%s6976_s2 + $0x344] ss:$8 sps:$4 sm:$0xff]   ;;  %v5342_v47 = vld [vmem:[%s6979_s5 + $0x350] ss:$8 sps:$4 sm:$0xff]  }
  0xcd   : > { %3280 = vmatmul.mubr.bf16.vlgmr.msra.gmra.mrb[0].mxu1 %v4702_v50  ;;  %v5308_v50 = vld [vmem:[%s6979_s5 + $0x2f4] ss:$8 sps:$4 sm:$0xff]   ;;  %v3327_v23 = vsel %vm5709_vm12, %v4721_v30, %v3326_v9  ;;  %v1816_v30 = vshll.u32 %v5884_v21, 16  ;;  %v5378_v9 = vld [vmem:[%s6976_s2 + $0x3c4] ss:$8 sps:$4 sm:$0xff]  }
  0xce   : > { %3442 = vmatpush1.bf16.msra.mxu1 %v5264_v45  ;;  %3289 = vmatprep.mubr.bf16.mxu1 %v5460_v2 }
  0xcf   : > { %3443 = vmatprep.subr.bf16.mxu1 %v5272_v24  ;;  %1565 = vmatpush1.bf16.msra.mxu0 %v5285_v33  ;;  %v5327_v24 = vld [vmem:[%s6976_s2 + $0x340] ss:$8 sps:$4 sm:$0xff]  }
  0xd0   : > { %1566 = vmatprep.subr.bf16.mxu0 %v5293_v61  ;;  %v5335_v61 = vld [vmem:[%s6976_s2 + $0x354] ss:$8 sps:$4 sm:$0xff]  }
  0xd2   : > { %3444 = vmatpush1.bf16.msra.mxu1 %v5270_v4  ;;  %v4722_v4 = vrot.slane %v3310_v34, 9  ;;  %v1796_v34 = vld [vmem:[#allocation2 + $0x28] sm:$0xf] }
  0xd3   : > { %3445 = vmatprep.subr.bf16.mxu1 %v5278_v35  ;;  %1567 = vmatpush1.bf16.msra.mxu0 %v5291_v36  ;;  %v3334_v35 = vrot.slane %v6432_v56, 5  ;;  %v5320_v36 = vld [vmem:[%s6979_s5 + $0x314] ss:$8 sps:$4 sm:$0xff]  }
  0xd4   : > { %1568 = vmatprep.subr.bf16.mxu0 %v5299_v6  ;;  %v5333_v6 = vld [vmem:[%s6976_s2 + $0x350] ss:$8 sps:$4 sm:$0xff]   ;;  %v3331_v56 = vsel %vm5709_vm12, %v4722_v4, %v3330_v1  ;;  %v1822_v1 = vshll.u32 %v5892_v15, 16 }
  0xd5   : > { %3290 = vmatmul.mubr.bf16.gmra.mrb[4].mxu1 %v4703_v58  ;;  %v5341_v58 = vld [vmem:[%s6976_s2 + $0x364] ss:$8 sps:$4 sm:$0xff]  }
  0xd6   : > { %3446 = vmatpush1.bf16.msra.mxu1 %v5276_v40  ;;  %3473 = vmatprep.mubr.bf16.mxu1 %v5460_v2  ;;  %v3335_v40 = vsel %vm5709_vm12, %v4723_v60, %v3334_v35  ;;  %v1841_v60 = vshrl.u32 %v1796_v34, 16  ;;  %v1844_v35 = vshll.u32 %v1796_v34, 16 }
  0xd7   : > { %3447 = vmatprep.subr.bf16.mxu1 %v5284_v49  ;;  %1569 = vmatpush1.bf16.msra.mxu0 %v5297_v22  ;;  %v5326_v49 = vld [vmem:[%s6979_s5 + $0x324] ss:$8 sps:$4 sm:$0xff]   ;;  %v5339_v22 = vld [vmem:[%s6976_s2 + $0x360] ss:$8 sps:$4 sm:$0xff]  }
  0xd8   : > { %1729 = vmatprep.subr.bf16.mxu0 %v5305_v32  ;;  %v5324_v32 = vld [vmem:[%s6979_s5 + $0x320] ss:$8 sps:$4 sm:$0xff]  }
  0xda   : > { %3448 = vmatpush1.bf16.msra.mxu1 %v5282_v5  ;;  %1587 = vmatmul.mubr.bf16.vlgmr.msra.gmra.mrb[0].mxu0 %v4438_v10  ;;  %v3308_v10 = vld [vmem:[#allocation2 + $0x8] sm:$0xe]  ;;  %v5347_v5 = vld [vmem:[%s6976_s2 + $0x374] ss:$8 sps:$4 sm:$0xff]  }
  0xdb   : > { %3449 = vmatprep.subr.bf16.mxu1 %v5290_v14  ;;  %1730 = vmatpush1.bf16.msra.mxu0 %v5303_v57  ;;  %v4720_v45 = vrot.slane %v3308_v10, 9  ;;  %v4741_v14 = vcombine.low %v3331_v56, %v3335_v40  ;;  %v5332_v57 = vld [vmem:[%s6979_s5 + $0x334] ss:$8 sps:$4 sm:$0xff]   ;;  %v5366_v10 = vld [vmem:[%s6976_s2 + $0x3a4] ss:$8 sps:$4 sm:$0xff]  }
  0xdc   : > { %1596 = vmatprep.mubr.bf16.mxu0 %v5460_v2  ;;  %1731 = vmatprep.subr.bf16.mxu0 %v5311_v20  ;;  %v5330_v20 = vld [vmem:[%s6979_s5 + $0x330] ss:$8 sps:$4 sm:$0xff]   ;;  %v5388_v40 = vld [vmem:[%s6976_s2 + $0x3e0] ss:$8 sps:$4 sm:$0xff]  }
  0xdd   : > { %v3323_v28 = vsel %vm5709_vm12, %v4720_v45, %v3322_v0  ;;  %v1799_v0 = vshrl.u32 %v5880_v12, 16  ;;  %v1813_v45 = vshrl.u32 %v5884_v21, 16  ;;  %v5376_v21 = vld [vmem:[%s6976_s2 + $0x3c0] ss:$8 sps:$4 sm:$0xff]  }
  0xde   : > { %3450 = vmatpush1.bf16.msra.mxu1 %v5288_v7  ;;  %v4740_v33 = vcombine.low %v3323_v28, %v3327_v23  ;;  %v5338_v7 = vld [vmem:[%s6979_s5 + $0x344] ss:$8 sps:$4 sm:$0xff]   ;;  %v1818_v28 = vrot.slane %v1816_v30, 5  ;;  %v5363_v23 = vld [vmem:[#allocation2 + $0x10] ss:$8 sps:$4 sm:$0xff]  }
  0xdf   : > { %3451 = vmatprep.subr.bf16.mxu1 %v5296_v31  ;;  %1732 = vmatpush1.bf16.msra.mxu0 %v5309_v27  ;;  %v5351_v31 = vld [vmem:[%s6976_s2 + $0x380] ss:$8 sps:$4 sm:$0xff]   ;;  %v5359_v27 = vld [vmem:[%s6976_s2 + $0x394] ss:$8 sps:$4 sm:$0xff]  }
  0xe0   : > { %1733 = vmatprep.subr.bf16.mxu0 %v5317_v41  ;;  %v5357_v41 = vld [vmem:[%s6976_s2 + $0x390] ss:$8 sps:$4 sm:$0xff]  }
  0xe2   : > { %3452 = vmatpush1.bf16.msra.mxu1 %v5294_v63  ;;  %1597 = vmatmul.mubr.bf16.gmra.mrb[4].mxu0 %v4439_v46  ;;  %v5344_v63 = vld [vmem:[%s6979_s5 + $0x354] ss:$8 sps:$4 sm:$0xff]  }
  0xe3   : > { %3453 = vmatprep.subr.bf16.mxu1 %v5302_v53  ;;  %1734 = vmatpush1.bf16.msra.mxu0 %v5315_v3  ;;  %v1619_v53 = vld [vmem:[#allocation2 + $0x28] sm:$0xf]  ;;  %v5372_v46 = vld [vmem:[%s6976_s2 + $0x3b4] ss:$8 sps:$4 sm:$0xff]  }
  0xe4   : > { %1761 = vmatprep.mubr.bf16.mxu0 %v5460_v2  ;;  %1735 = vmatprep.subr.bf16.mxu0 %v5323_v13  ;;  %v4473_v8 = vcombine.low %v6270_v18, %v1619_v53  ;;  %v5348_v3 = vld [vmem:[%s6979_s5 + $0x360] ss:$8 sps:$4 sm:$0xff]   ;;  %v5356_v18 = vld [vmem:[%s6979_s5 + $0x374] ss:$8 sps:$4 sm:$0xff]   ;;  %v1802_v13 = vshll.u32 %v5880_v12, 16 }
  0xe5   : > { %v5354_v12 = vld [vmem:[%s6979_s5 + $0x370] ss:$8 sps:$4 sm:$0xff]  }
  0xe6   : > { %3454 = vmatpush1.bf16.msra.mxu1 %v5300_v19  ;;  %v5370_v19 = vld [vmem:[%s6976_s2 + $0x3b0] ss:$8 sps:$4 sm:$0xff]  }
  0xe7   : > { %3455 = vmatprep.subr.bf16.mxu1 %v5308_v50  ;;  %1736 = vmatpush1.bf16.msra.mxu0 %v5321_v37  ;;  %v5362_v50 = vld [vmem:[%s6979_s5 + $0x384] ss:$8 sps:$4 sm:$0xff]   ;;  %v1801_v37 = vrot.slane %v1799_v0, 4  ;;  %v5401_v0 = vld [vmem:[%s6976_s2 + $0x400] ss:$8 sps:$4 sm:$0xff]  }
  0xe8   : > { %1737 = vmatprep.subr.bf16.mxu0 %v5329_v26  ;;  %v1804_v26 = vrot.slane %v1802_v13, 5 }
  0xea   : > { %3456 = vmatpush1.bf16.msra.mxu1 %v5306_v25  ;;  %v1815_v25 = vrot.slane %v1813_v45, 4  ;;  %v5409_v45 = vld [vmem:[%s6976_s2 + $0x414] ss:$8 sps:$4 sm:$0xff]  }
  0xeb   : > { %3615 = vmatprep.subr.bf16.mxu1 %v5314_v52  ;;  %1738 = vmatpush1.bf16.msra.mxu0 %v5327_v24  ;;  %v5384_v52 = vld [vmem:[%s6976_s2 + $0x3d4] ss:$8 sps:$4 sm:$0xff]   ;;  %v1805_v24 = vor.u32 %v1804_v26, %v1801_v37  ;;  %v5385_v37 = vld [vmem:[%s6979_s5 + $0x3c0] ss:$8 sps:$4 sm:$0xff]  }
  0xec   : > { %1739 = vmatprep.subr.bf16.mxu0 %v5335_v61  ;;  %v5382_v61 = vld [vmem:[%s6976_s2 + $0x3d0] ss:$8 sps:$4 sm:$0xff]   ;;  %v1819_v4 = vor.u32 %v1818_v28, %v1815_v25  ;;  %v6763_v26 = vld [vmem:[#allocation2 + $0x14] sm:$0x1]  ;;  %v3680_v28 = vld [vmem:[#allocation2 + $0x20] sm:$0xf] }
  0xed   : > { %3474 = vmatmul.mubr.bf16.vlgmr.msra.gmra.mrb[0].mxu1 %v4740_v33  ;;  %v1808_v33 = vshll.u32 %v5882_v17, 16  ;;  %v5393_v25 = vld [vmem:[%s6979_s5 + $0x3d4] ss:$8 sps:$4 sm:$0xff]  }
  0xee   : > { %3616 = vmatpush1.bf16.msra.mxu1 %v5312_v62  ;;  %3483 = vmatprep.mubr.bf16.mxu1 %v5460_v2  ;;  %v5369_v62 = vld [vmem:[%s6979_s5 + $0x394] ss:$8 sps:$4 sm:$0xff]  }
  0xef   : > { %3617 = vmatprep.subr.bf16.mxu1 %v5320_v36  ;;  %1740 = vmatpush1.bf16.msra.mxu0 %v5333_v6  ;;  %v5390_v36 = vld [vmem:[%s6976_s2 + $0x3e4] ss:$8 sps:$4 sm:$0xff]   ;;  %v5367_v6 = vld [vmem:[%s6979_s5 + $0x390] ss:$8 sps:$4 sm:$0xff]   ;;  %v1810_v56 = vrot.slane %v1808_v33, 5 }
  0xf0   : > { %1741 = vmatprep.subr.bf16.mxu0 %v5341_v58  ;;  %v5375_v58 = vld [vmem:[%s6979_s5 + $0x3a4] ss:$8 sps:$4 sm:$0xff]  }
  0xf2   : > { %3618 = vmatpush1.bf16.msra.mxu1 %v5318_v48  ;;  %v1806_v48 = vrot.slane %v1805_v24, 4 }
  0xf3   : > { %3619 = vmatprep.subr.bf16.mxu1 %v5326_v49  ;;  %1742 = vmatpush1.bf16.msra.mxu0 %v5339_v22  ;;  %v1820_v49 = vrot.slane %v1819_v4, 4  ;;  %v1824_v22 = vrot.slane %v1822_v1, 5  ;;  %v5391_v4 = vld [vmem:[%s6979_s5 + $0x3d0] ss:$8 sps:$4 sm:$0xff]   ;;  %v3713_v1 = vshrl.u32 %v3680_v28, 16 }
  0xf4   : > { %1743 = vmatprep.subr.bf16.mxu0 %v5347_v5  ;;  %v1846_v5 = vrot.slane %v1844_v35, 5 }
  0xf5   : > { %3484 = vmatmul.mubr.bf16.gmra.mrb[4].mxu1 %v4741_v14  ;;  %v5396_v14 = vld [vmem:[%s6976_s2 + $0x3f4] ss:$8 sps:$4 sm:$0xff]   ;;  %v3715_v38 = vrot.slane %v3713_v1, 4 }
  0xf6   : > { %3620 = vmatpush1.bf16.msra.mxu1 %v5324_v32  ;;  %3647 = vmatprep.mubr.bf16.mxu1 %v5460_v2  ;;  %v1843_v32 = vrot.slane %v1841_v60, 4  ;;  %v3716_v60 = vshll.u32 %v3680_v28, 16  ;;  %v5437_v28 = vld [vmem:[%s6976_s2 + $0x460] ss:$8 sps:$4 sm:$0xff]  }
  0xf7   : > { %3621 = vmatprep.subr.bf16.mxu1 %v5332_v57  ;;  %1744 = vmatpush1.bf16.msra.mxu0 %v5345_v59  ;;  %v5400_v57 = vld [vmem:[#allocation2 + $0x20] ss:$8 sps:$4 sm:$0xff]   ;;  %v6728_v59 = vld [vmem:[#allocation2 + $0x2c] sm:$0x1] }
  0xf8   : > { %1959 = vmatprep.subr.bf16.mxu0 %v5353_v42  ;;  %v5373_v42 = vld [vmem:[%s6979_s5 + $0x3a0] ss:$8 sps:$4 sm:$0xff]   ;;  %v1850_v53 = vshll.u32 %v6728_v59, 16 }
  0xfa   : > { %3622 = vmatpush1.bf16.msra.mxu1 %v5330_v20  ;;  %1762 = vmatmul.mubr.bf16.vlgmr.msra.gmra.mrb[0].mxu0 %v4472_v54  ;;  %v5364_v54 = vld [vmem:[%s6976_s2 + $0x3a0] ss:$8 sps:$4 sm:$0xff]   ;;  %v3676_v20 = vld [vmem:[#allocation2 + $0x10] sm:$0xf] }
  0xfb   : > { %3623 = vmatprep.subr.bf16.mxu1 %v5338_v7  ;;  %1960 = vmatpush1.bf16.msra.mxu0 %v5351_v31  ;;  %v3678_v7 = vld [vmem:[#allocation2 + $0x18] sm:$0xf]  ;;  %v5381_v31 = vld [vmem:[%s6979_s5 + $0x3b4] ss:$8 sps:$4 sm:$0xff]  }
  0xfc   : > { %1771 = vmatprep.mubr.bf16.mxu0 %v5460_v2  ;;  %1961 = vmatprep.subr.bf16.mxu0 %v5359_v27  ;;  %v5394_v27 = vld [vmem:[%s6976_s2 + $0x3f0] ss:$8 sps:$4 sm:$0xff]  }
  0xfe   : > { %3624 = vmatpush1.bf16.msra.mxu1 %v5336_v43  ;;  %v1811_v43 = vsel %vm5693_vm11, %v1806_v48, %v1810_v56  ;;  %v5413_v48 = vld [vmem:[%s6976_s2 + $0x420] ss:$8 sps:$4 sm:$0xff]  }
  0xff   : > { %3625 = vmatprep.subr.bf16.mxu1 %v5344_v63  ;;  %1962 = vmatpush1.bf16.msra.mxu0 %v5357_v41  ;;  %v1825_v63 = vsel %vm5693_vm11, %v1820_v49, %v1824_v22  ;;  %v1847_v41 = vor.u32 %v1846_v5, %v1843_v32  ;;  %v5421_v32 = vld [vmem:[%s6976_s2 + $0x434] ss:$8 sps:$4 sm:$0xff]  }
 0x100   : > { %1963 = vmatprep.subr.bf16.mxu0 %v5366_v10  ;;  %v5403_v10 = vld [vmem:[%s6976_s2 + $0x404] ss:$8 sps:$4 sm:$0xff]  }
 0x101   : > { %v1848_v13 = vrot.slane %v1847_v41, 4 }
 0x102   : > { %3626 = vmatpush1.bf16.msra.mxu1 %v5342_v47  ;;  %1772 = vmatmul.mubr.bf16.gmra.mrb[4].mxu0 %v4473_v8  ;;  %v3685_v47 = vshrl.u32 %v3676_v20, 16  ;;  %v3699_v8 = vshrl.u32 %v3678_v7, 16 }
 0x103   : > { %3627 = vmatprep.subr.bf16.mxu1 %v5350_v55  ;;  %1964 = vmatpush1.bf16.msra.mxu0 %v5364_v54  ;;  %v3688_v55 = vshll.u32 %v3676_v20, 16  ;;  %v3702_v54 = vshll.u32 %v3678_v7, 16  ;;  %v6806_v20 = vld [vmem:[#allocation2 + $0x2c] sm:$0x1]  ;;  %v5419_v7 = vld [vmem:[%s6976_s2 + $0x430] ss:$8 sps:$4 sm:$0xff]  }
 0x104   : > { %1991 = vmatprep.mubr.bf16.mxu0 %v5460_v2  ;;  %1965 = vmatprep.subr.bf16.mxu0 %v5372_v46  ;;  %v5379_v46 = vld [vmem:[%s6979_s5 + $0x3b0] ss:$8 sps:$4 sm:$0xff]   ;;  %v3687_v30 = vrot.slane %v3685_v47, 4  ;;  %v3736_v47 = vshll.u32 %v6806_v20, 16 }
 0x106   : > { %3628 = vmatpush1.bf16.msra.mxu1 %v5348_v3  ;;  %v5387_v3 = vld [vmem:[%s6979_s5 + $0x3c4] ss:$8 sps:$4 sm:$0xff]  }
 0x107   : > { %3629 = vmatprep.subr.bf16.mxu1 %v5356_v18  ;;  %1966 = vmatpush1.bf16.msra.mxu0 %v5370_v19  ;;  %v4506_v18 = vcombine.low %v1811_v43, %v1825_v63  ;;  %v1852_v19 = vrot.slane %v1850_v53, 5  ;;  %v5427_v43 = vld [vmem:[%s6976_s2 + $0x444] ss:$8 sps:$4 sm:$0xff]   ;;  %v5404_v63 = vld [vmem:[%s6979_s5 + $0x3f0] ss:$8 sps:$4 sm:$0xff]  }
 0x108   : > { %1967 = vmatprep.subr.bf16.mxu0 %v5378_v9  ;;  %v3690_v9 = vrot.slane %v3688_v55, 5  ;;  %v5412_v55 = vld [vmem:[%s6979_s5 + $0x404] ss:$8 sps:$4 sm:$0xff]  }
 0x109   : > { %v1853_v34 = vsel %vm5693_vm11, %v1848_v13, %v1852_v19  ;;  %v3738_v19 = vrot.slane %v3736_v47, 5  ;;  %v3932_v47 = vrot.slane %v6806_v20, 5  ;;  %v2214_v20 = vld [vmem:[%s6977_s3] sm:$0x3] }
 0x10a   : > { %3630 = vmatpush1.bf16.msra.mxu1 %v5354_v12  ;;  %v3701_v12 = vrot.slane %v3699_v8, 4  ;;  %v5425_v8 = vld [vmem:[%s6976_s2 + $0x440] ss:$8 sps:$4 sm:$0xff]  }
 0x10b   : > { %3845 = vmatprep.subr.bf16.mxu1 %v5362_v50  ;;  %1968 = vmatpush1.bf16.msra.mxu0 %v5376_v21  ;;  %v3704_v50 = vrot.slane %v3702_v54, 5  ;;  %v6765_v21 = vld [vmem:[#allocation2 + $0x1c] sm:$0x1] }
 0x10c   : > { %1969 = vmatprep.subr.bf16.mxu0 %v5384_v52  ;;  %v5407_v52 = vld [vmem:[%s6976_s2 + $0x410] ss:$8 sps:$4 sm:$0xff]   ;;  %v3708_v33 = vshll.u32 %v6765_v21, 16 }
 0x10d   : > { %3648 = vmatmul.mubr.bf16.vlgmr.msra.gmra.mrb[0].mxu1 %v5363_v23  ;;  %v3682_v23 = vld [vmem:[#allocation2 + $0x28] sm:$0xf]  ;;  %v3705_v24 = vor.u32 %v3704_v50, %v3701_v12  ;;  %v5416_v12 = vld [vmem:[%s6979_s5 + $0x410] ss:$8 sps:$4 sm:$0xff]  }
 0x10e   : > { %3846 = vmatpush1.bf16.msra.mxu1 %v5360_v44  ;;  %3657 = vmatprep.mubr.bf16.mxu1 %v5460_v2  ;;  %v3691_v44 = vor.u32 %v3690_v9, %v3687_v30  ;;  %v3727_v35 = vshrl.u32 %v3682_v23, 16  ;;  %v3710_v22 = vrot.slane %v3708_v33, 5  ;;  %v5431_v30 = vld [vmem:[%s6976_s2 + $0x450] ss:$8 sps:$4 sm:$0xff]   ;;  %v5439_v9 = vld [vmem:[%s6976_s2 + $0x464] ss:$8 sps:$4 sm:$0xff]  }
 0x10f   : > { %3847 = vmatprep.subr.bf16.mxu1 %v5369_v62  ;;  %1970 = vmatpush1.bf16.msra.mxu0 %v5382_v61  ;;  %v3694_v62 = vshll.u32 %v6763_v26, 16  ;;  %v5415_v61 = vld [vmem:[%s6976_s2 + $0x424] ss:$8 sps:$4 sm:$0xff]   ;;  %v3706_v49 = vrot.slane %v3705_v24, 4  ;;  %v2038_v24 = vrot.slane %v5892_v15, 5 }
 0x110   : > { %1971 = vmatprep.subr.bf16.mxu0 %v5390_v36  ;;  %v3730_v36 = vshll.u32 %v3682_v23, 16  ;;  %v3692_v56 = vrot.slane %v3691_v44, 4  ;;  %v3729_v5 = vrot.slane %v3727_v35, 4  ;;  %v6997_v23 = vld [vmem:[#allocation5_spill] sm:$0xff]  ;;  %v6998_v44 = vld [vmem:[#allocation6_spill] sm:$0xff] }
 0x111   : > { %v5443_v15 = vld [vmem:[%s6976_s2 + $0x470] ss:$8 sps:$4 sm:$0xff]  }
 0x112   : > { %3848 = vmatpush1.bf16.msra.mxu1 %v5367_v6  ;;  %v5399_v6 = vld [vmem:[%s6979_s5 + $0x3e4] ss:$8 sps:$4 sm:$0xff]   ;;  %v5428_v35 = vld [vmem:[%s6979_s5 + $0x430] ss:$8 sps:$4 sm:$0xff]  }
 0x113   : > { %3849 = vmatprep.subr.bf16.mxu1 %v5375_v58  ;;  %1972 = vmatpush1.bf16.msra.mxu0 %v5388_v40  ;;  %v4507_v58 = vcombine.low %v1839_v39, %v1853_v34  ;;  %v3696_v40 = vrot.slane %v3694_v62, 5  ;;  %v3718_v39 = vrot.slane %v3716_v60, 5  ;;  %v2034_v34 = vrot.slane %v5882_v17, 5  ;;  %v5430_v17 = vld [vmem:[%s6979_s5 + $0x434] ss:$8 sps:$4 sm:$0xff]  }
 0x114   : > { %1973 = vmatprep.subr.bf16.mxu0 %v5396_v14  ;;  %v3732_v14 = vrot.slane %v3730_v36, 5  ;;  %v4525_v62 = vrot.slane %v6998_v44, 9  ;;  %v2023_v60 = vld [vmem:[#allocation2 + $0x28] sm:$0xe]  ;;  %v5436_v36 = vld [vmem:[%s6979_s5 + $0x444] ss:$8 sps:$4 sm:$0xff]  }
 0x115   : > { %3658 = vmatmul.mubr.bf16.gmra.mrb[4].mxu1 %v5400_v57  ;;  %v5406_v57 = vld [vmem:[%s6979_s5 + $0x3f4] ss:$8 sps:$4 sm:$0xff]   ;;  %v3719_v41 = vor.u32 %v3718_v39, %v3715_v38  ;;  %v5446_v39 = vld [vmem:[%s6979_s5 + $0x460] ss:$8 sps:$4 sm:$0xff]  }
 0x116   : > { %3850 = vmatpush1.bf16.msra.mxu1 %v5373_v42  ;;  %3877 = vmatprep.mubr.bf16.mxu1 %v5460_v2  ;;  %v6804_v42 = vld [vmem:[#allocation2 + $0x24] sm:$0x1]  ;;  %v2039_v1 = vsel %vm5709_vm12, %v4525_v62, %v2038_v24 }
 0x117   : > { %3851 = vmatprep.subr.bf16.mxu1 %v5381_v31  ;;  %1974 = vmatpush1.bf16.msra.mxu0 %v5394_v27  ;;  %v3697_v31 = vsel %vm5693_vm11, %v3692_v56, %v3696_v40  ;;  %v3711_v27 = vsel %vm5693_vm11, %v3706_v49, %v3710_v22  ;;  %v3722_v53 = vshll.u32 %v6804_v42, 16  ;;  %v5434_v56 = vld [vmem:[%s6979_s5 + $0x440] ss:$8 sps:$4 sm:$0xff]   ;;  %v5442_v40 = vld [vmem:[%s6979_s5 + $0x454] ss:$8 sps:$4 sm:$0xff]  }
 0x118   : > { %2153 = vmatprep.subr.bf16.mxu0 %v5403_v10  ;;  %v3733_v10 = vor.u32 %v3732_v14, %v3729_v5  ;;  %v4808_v54 = vcombine.low %v3697_v31, %v3711_v27  ;;  %v5448_v22 = vld [vmem:[%s6979_s5 + $0x464] ss:$8 sps:$4 sm:$0xff]   ;;  %v3920_v14 = vrot.slane %v6763_v26, 5  ;;  %v5451_v31 = vld [vmem:[%s6979_s5 + $0x474] ss:$8 sps:$4 sm:$0xff]  }
 0x11a   : > { %3852 = vmatpush1.bf16.msra.mxu1 %v5379_v46  ;;  %1992 = vmatmul.mubr.bf16.vlgmr.msra.gmra.mrb[0].mxu0 %v4506_v18  ;;  %v5433_v46 = vld [vmem:[%s6976_s2 + $0x454] ss:$8 sps:$4 sm:$0xff]   ;;  %v3720_v18 = vrot.slane %v3719_v41, 4  ;;  %v3734_v13 = vrot.slane %v3733_v10, 4 }
 0x11b   : > { %3853 = vmatprep.subr.bf16.mxu1 %v5387_v3  ;;  %2154 = vmatpush1.bf16.msra.mxu0 %v5401_v0  ;;  %v5410_v3 = vld [vmem:[%s6979_s5 + $0x400] ss:$8 sps:$4 sm:$0xff]   ;;  %v3724_v0 = vrot.slane %v3722_v53, 5  ;;  %v3928_v53 = vrot.slane %v6804_v42, 5 }
 0x11c   : > { %2001 = vmatprep.mubr.bf16.mxu0 %v5460_v2  ;;  %2155 = vmatprep.subr.bf16.mxu0 %v5409_v45  ;;  %v5418_v45 = vld [vmem:[%s6979_s5 + $0x414] ss:$8 sps:$4 sm:$0xff]  }
 0x11d   : > { %v3725_v50 = vsel %vm5693_vm11, %v3720_v18, %v3724_v0 }
 0x11e   : > { %3854 = vmatpush1.bf16.msra.mxu1 %v5385_v37  ;;  %v3739_v37 = vsel %vm5693_vm11, %v3734_v13, %v3738_v19 }
 0x11f   : > { %3855 = vmatprep.subr.bf16.mxu1 %v5393_v25  ;;  %2156 = vmatpush1.bf16.msra.mxu0 %v5407_v52  ;;  %v5424_v25 = vld [vmem:[%s6979_s5 + $0x424] ss:$8 sps:$4 sm:$0xff]   ;;  %v4524_v52 = vrot.slane %v6997_v23, 9  ;;  %v4809_v33 = vcombine.low %v3725_v50, %v3739_v37  ;;  %v6928_v37 = vstv %s2234_s16  ;;  %v4100_v23 = vld [vmem:[%s6980_s6] sm:$0x3] }
 0x120   : > { %2157 = vmatprep.subr.bf16.mxu0 %v5415_v61  ;;  %v5422_v61 = vld [vmem:[%s6979_s5 + $0x420] ss:$8 sps:$4 sm:$0xff]  }
 0x122   : > { %3856 = vmatpush1.bf16.msra.mxu1 %v5391_v4  ;;  %2002 = vmatmul.mubr.bf16.gmra.mrb[4].mxu0 %v4507_v58  ;;  %v2035_v4 = vsel %vm5709_vm12, %v4524_v52, %v2034_v34  ;;  %v4527_v58 = vrot.slane %v2023_v60, 9 }
 0x123   : > { %3857 = vmatprep.subr.bf16.mxu1 %v5399_v6  ;;  %2158 = vmatpush1.bf16.msra.mxu0 %v5413_v48  ;;  %v4544_v6 = vcombine.low %v2035_v4, %v2039_v1  ;;  %v2046_v48 = vrot.slane %v6728_v59, 5  ;;  %v5440_v59 = vld [vmem:[%s6979_s5 + $0x450] ss:$8 sps:$4 sm:$0xff]  }
 0x124   : > { %2185 = vmatprep.mubr.bf16.mxu0 %v5460_v2  ;;  %2159 = vmatprep.subr.bf16.mxu0 %v5421_v32  ;;  %v3906_v32 = vld [vmem:[#allocation2 + $0x10] sm:$0xe] }
 0x125   : > { %v2047_v49 = vsel %vm5709_vm12, %v4527_v58, %v2046_v48  ;;  %v4826_v5 = vrot.slane %v3906_v32, 9 }
 0x126   : > { %3858 = vmatpush1.bf16.msra.mxu1 %v5397_v51  ;;  %v3907_v51 = vld [vmem:[#allocation2 + $0x18] sm:$0xe]  ;;  %v4545_v38 = vcombine.low %v6476_v11, %v2047_v49 }
 0x127   : > { %3859 = vmatprep.subr.bf16.mxu1 %v5406_v57  ;;  %2160 = vmatpush1.bf16.msra.mxu0 %v5419_v7  ;;  %v4827_v57 = vrot.slane %v3907_v51, 9  ;;  %v3924_v7 = vrot.slane %v6765_v21, 5  ;;  %v5449_v11 = vld [vmem:[%s6979_s5 + $0x470] ss:$8 sps:$4 sm:$0xff]   ;;  %v3921_v27 = vsel %vm5709_vm12, %v4826_v5, %v3920_v14  ;;  %v3909_v21 = vld [vmem:[#allocation2 + $0x28] sm:$0xe] }
 0x128   : > { %2161 = vmatprep.subr.bf16.mxu0 %v5427_v43  ;;  %v3908_v43 = vld [vmem:[#allocation2 + $0x20] sm:$0xe]  ;;  %v4829_v10 = vrot.slane %v3909_v21, 9 }
 0x129   : > { %v3925_v26 = vsel %vm5709_vm12, %v4827_v57, %v3924_v7  ;;  %v4828_v41 = vrot.slane %v3908_v43, 9 }
 0x12a   : > { %3860 = vmatpush1.bf16.msra.mxu1 %v5404_v63  ;;  %v4846_v63 = vcombine.low %v3921_v27, %v3925_v26 }
 0x12b   : > { %4039 = vmatprep.subr.bf16.mxu1 %v5412_v55  ;;  %2162 = vmatpush1.bf16.msra.mxu0 %v5425_v8  ;;  %v3929_v55 = vsel %vm5709_vm12, %v4828_v41, %v3928_v53  ;;  %v3933_v8 = vsel %vm5709_vm12, %v4829_v10, %v3932_v47 }
 0x12c   : > { %2163 = vmatprep.subr.bf16.mxu0 %v5433_v46  ;;  %v2216_v46 = vlaneseq }
 0x12d   : > { %3878 = vmatmul.mubr.bf16.vlgmr.msra.gmra.mrb[0].mxu1 %v4808_v54  ;;  %v4847_v54 = vcombine.low %v3929_v55, %v3933_v8 }
 0x12e   : > { %4040 = vmatpush1.bf16.msra.mxu1 %v5410_v3  ;;  %3887 = vmatprep.mubr.bf16.mxu1 %v5460_v2  ;;  %v2217_v3 = vshrl.u32 %v2216_v46, 7 }
 0x12f   : > { %4041 = vmatprep.subr.bf16.mxu1 %v5418_v45  ;;  %2164 = vmatpush1.bf16.msra.mxu0 %v5431_v30 }
 0x130   : > { %2165 = vmatprep.subr.bf16.mxu0 %v5439_v9  ;;  %v2218_v13 = vsub.s32 0, %v2217_v3 }
 0x132   : > { %4042 = vmatpush1.bf16.msra.mxu1 %v5416_v12  ;;  %v2219_v45 = vrot.slane %v2214_v20, %v2218_v13  ;;  %v4105_v62 = vrot.slane %v4100_v23, %v2218_v13 }
 0x133   : > { %4043 = vmatprep.subr.bf16.mxu1 %v5424_v25  ;;  %2166 = vmatpush1.bf16.msra.mxu0 %v5437_v28 }
 0x134   : > { %2167 = vmatprep.subr.bf16.mxu0 %v5445_v16 }
 0x135   : > { %3888 = vmatmul.mubr.bf16.gmra.mrb[4].mxu1 %v4809_v33 }
 0x136   : > { %4044 = vmatpush1.bf16.msra.mxu1 %v5422_v61  ;;  %4071 = vmatprep.mubr.bf16.mxu1 %v5460_v2 }
 0x137   : > { %4045 = vmatprep.subr.bf16.mxu1 %v5430_v17  ;;  %2168 = vmatpush1.bf16.msra.mxu0 %v5443_v15  ;;  %v6937_v15 = vstv %s4120_s17 }
 0x13a   : > { %4046 = vmatpush1.bf16.msra.mxu1 %v5428_v35  ;;  %2186 = vmatmul.mubr.bf16.vlgmr.msra.gmra.mrb[0].mxu0 %v4544_v6 }
 0x13b   : > { %4047 = vmatprep.subr.bf16.mxu1 %v5436_v36  ;;  %2195 = vmatprep.mubr.bf16.mxu0 %v5460_v2 }
 0x13e   : > { %4048 = vmatpush1.bf16.msra.mxu1 %v5434_v56 }
 0x13f   : > { %4049 = vmatprep.subr.bf16.mxu1 %v5442_v40 }
 0x142   : > { %4050 = vmatpush1.bf16.msra.mxu1 %v5440_v59  ;;  %2196 = vmatmul.mubr.bf16.gmra.mrb[4].mxu0 %v4545_v38 }
 0x143   : > { %4051 = vmatprep.subr.bf16.mxu1 %v5448_v22 }
 0x146   : > { %4052 = vmatpush1.bf16.msra.mxu1 %v5446_v39 }
 0x147   : > { %4053 = vmatprep.subr.bf16.mxu1 %v5451_v31 }
 0x14a   : > { %4054 = vmatpush1.bf16.msra.mxu1 %v5449_v11 }
 0x14d   : > { %4072 = vmatmul.mubr.bf16.vlgmr.msra.gmra.mrb[0].mxu1 %v4846_v63 }
 0x14e   : > { %4081 = vmatprep.mubr.bf16.mxu1 %v5460_v2  ;;  %v2222_v2 = vsub.s32 1, %v2217_v3 }
 0x150   : > { %v2223_v30 = vrot.slane %v2214_v20, %v2222_v2  ;;  %v6935_v16 = vrot.slane %v4100_v23, %v2222_v2 }
 0x155   : > { %4082 = vmatmul.mubr.bf16.gmra.mrb[4].mxu1 %v4847_v54 }
 0x20d   : > { %v2187_v18 = vpop.f32.mrb[0].mxu0 }
 0x20e   : > { %v2189_v0 = vpop.f32.mrb[1].mxu0  ;;  %v2226_v12 = vadd.f32 %v2219_v45, %v2187_v18 }
 0x20f   : > { %v2191_v42 = vpop.f32.mrb[2].mxu0  ;;  %v2227_v25 = vadd.f32 %v2223_v30, %v2189_v0 }
 0x210   : > { %v2193_v19 = vpop.f32.mrb[3].mxu0  ;;  %v2244_v52 = vmul.f32 %v6928_v37, %v2226_v12  ;;  %v2228_v34 = vadd.f32 %v2219_v45, %v2191_v42  ;;  %vm2235_vm13 = vcmp.ge.f32.partialorder %v2226_v12, 0.0 }
 0x211   : > { %v2245_v44 = vmul.f32 %v6928_v37, %v2227_v25  ;;  %vm2236_vm14 = vcmp.ge.f32.partialorder %v2227_v25, 0.0  ;;  %v2229_v24 = vadd.f32 %v2223_v30, %v2193_v19 }
 0x212   : > { %v2252_v61 = vsel %vm2235_vm13, %v2226_v12, %v2244_v52  ;;  %vm2237_vm15 = vcmp.ge.f32.partialorder %v2228_v34, 0.0  ;;  %v2246_v1 = vmul.f32 %v6928_v37, %v2228_v34 }
 0x213   : > { %v2253_v4 = vsel %vm2236_vm14, %v2227_v25, %v2245_v44  ;;  %vm2238_vm0 = vcmp.ge.f32.partialorder %v2229_v24, 0.0  ;;  %v2247_v6 = vmul.f32 %v6928_v37, %v2229_v24 }
 0x214   : > { %v2254_v31 = vsel %vm2237_vm15, %v2228_v34, %v2246_v1 }
 0x215   : > { %v2197_v9 = vpop.f32.mrb[4].mxu0  ;;  %v2255_v26 = vsel %vm2238_vm0, %v2229_v24, %v2247_v6 }
 0x216   : > { %v2199_v29 = vpop.f32.mrb[5].mxu0  ;;  %v2230_v33 = vadd.f32 %v2219_v45, %v2197_v9 }
 0x217   : > { %v2201_v50 = vpop.f32.mrb[6].mxu0  ;;  %v2231_v36 = vadd.f32 %v2223_v30, %v2199_v29 }
 0x218   : > { %v2203_v28 = vpop.f32.mrb[7].mxu0  ;;  %vm2239_vm1 = vcmp.ge.f32.partialorder %v2230_v33, 0.0  ;;  %v2248_v40 = vmul.f32 %v6928_v37, %v2230_v33  ;;  %v2232_v51 = vadd.f32 %v2219_v45, %v2201_v50 }
 0x219   : > { %v2249_v5 = vmul.f32 %v6928_v37, %v2231_v36  ;;  %vm2240_vm6 = vcmp.ge.f32.partialorder %v2231_v36, 0.0  ;;  %v2233_v63 = vadd.f32 %v2223_v30, %v2203_v28 }
 0x21a   : > { %v2256_v10 = vsel %vm2239_vm1, %v2230_v33, %v2248_v40  ;;  %vm2241_vm7 = vcmp.ge.f32.partialorder %v2232_v51, 0.0  ;;  %v2250_v46 = vmul.f32 %v6928_v37, %v2232_v51 }
 0x21b   : > { %v2257_v54 = vsel %vm2240_vm6, %v2231_v36, %v2249_v5  ;;  %v2251_v2 = vmul.f32 %v6928_v37, %v2233_v63  ;;  %vm2242_vm10 = vcmp.ge.f32.partialorder %v2233_v63, 0.0 }
 0x21c   : > { %v2258_v37 = vsel %vm2241_vm7, %v2232_v51, %v2250_v46 }
 0x21d   : > { %v2259_v23 = vsel %vm2242_vm10, %v2233_v63, %v2251_v2 }
 0x220   : > { %v4073_v17 = vpop.f32.mrb[0].mxu1 }
 0x221   : > { %v4112_v60 = vadd.f32 %v4105_v62, %v4073_v17  ;;  %v4075_v35 = vpop.f32.mrb[1].mxu1 }
 0x222   : > { %v4113_v58 = vadd.f32 %v6935_v16, %v4075_v35  ;;  %v4077_v48 = vpop.f32.mrb[2].mxu1 }
 0x223   : > { %vm4121_vm2 = vcmp.ge.f32.partialorder %v4112_v60, 0.0  ;;  %v4130_v56 = vmul.f32 %v6937_v15, %v4112_v60  ;;  %v4114_v49 = vadd.f32 %v4105_v62, %v4077_v48  ;;  %v4079_v59 = vpop.f32.mrb[3].mxu1 }
 0x224   : > { %vm4122_vm3 = vcmp.ge.f32.partialorder %v4113_v58, 0.0  ;;  %v4131_v22 = vmul.f32 %v6937_v15, %v4113_v58  ;;  %v4115_v32 = vadd.f32 %v6935_v16, %v4079_v59 }
 0x225   : > { %v4138_v38 = vsel %vm4121_vm2, %v4112_v60, %v4130_v56  ;;  %vm4123_vm4 = vcmp.ge.f32.partialorder %v4114_v49, 0.0  ;;  %v4132_v39 = vmul.f32 %v6937_v15, %v4114_v49 }
 0x226   : > { %v4146_v14 = vadd.f32 %v4138_v38, %v2252_v61  ;;  %v4139_v57 = vsel %vm4122_vm3, %v4113_v58, %v4131_v22  ;;  %vm4124_vm5 = vcmp.ge.f32.partialorder %v4115_v32, 0.0  ;;  %v4133_v7 = vmul.f32 %v6937_v15, %v4115_v32 }
 0x227   : > { %v4147_v11 = vadd.f32 %v4139_v57, %v2253_v4  ;;  %v4140_v27 = vsel %vm4123_vm4, %v4114_v49, %v4132_v39 }
 0x228   : > { %v4148_v43 = vadd.f32 %v4140_v27, %v2254_v31  ;;  %v4141_v21 = vsel %vm4124_vm5, %v4115_v32, %v4133_v7  ;;  %v4083_v41 = vpop.f32.mrb[4].mxu1 }
 0x229   : > { %v4873_v53 = vpack.c.bf16 %v4147_v11, %v4146_v14  ;;  %v4149_v47 = vadd.f32 %v4141_v21, %v2255_v26  ;;  %v4116_v55 = vadd.f32 %v4105_v62, %v4083_v41  ;;  %v4085_v8 = vpop.f32.mrb[5].mxu1 }
 0x22a   : > { %v4117_v3 = vadd.f32 %v6935_v16, %v4085_v8  ;;  %v4087_v18 = vpop.f32.mrb[6].mxu1 }
 0x22b   : > { %4178 = vst [vmem:[%s6955_s10] sm:$0xff] %v4873_v53  ;;  %v4874_v0 = vpack.c.bf16 %v4149_v47, %v4148_v43  ;;  %vm4125_vm8 = vcmp.ge.f32.partialorder %v4116_v55, 0.0  ;;  %v4134_v13 = vmul.f32 %v6937_v15, %v4116_v55  ;;  %v4118_v42 = vadd.f32 %v4105_v62, %v4087_v18  ;;  %v4089_v20 = vpop.f32.mrb[7].mxu1 }
 0x22c   : > { %vm4126_vm9 = vcmp.ge.f32.partialorder %v4117_v3, 0.0  ;;  %v4135_v19 = vmul.f32 %v6937_v15, %v4117_v3  ;;  %v4119_v45 = vadd.f32 %v6935_v16, %v4089_v20 }
 0x22d   : > { %4179 = vst [vmem:[%s6955_s10 + $0x8] sm:$0xff] %v4874_v0  ;;  %v4142_v30 = vsel %vm4125_vm8, %v4116_v55, %v4134_v13  ;;  %vm4127_vm11 = vcmp.ge.f32.partialorder %v4118_v42, 0.0  ;;  %v4136_v9 = vmul.f32 %v6937_v15, %v4118_v42 }
 0x22e   : > { %v4150_v29 = vadd.f32 %v4142_v30, %v2256_v10  ;;  %v4143_v12 = vsel %vm4126_vm9, %v4117_v3, %v4135_v19  ;;  %vm4128_vm12 = vcmp.ge.f32.partialorder %v4119_v45, 0.0  ;;  %v4137_v50 = vmul.f32 %v6937_v15, %v4119_v45 }
 0x22f   : > { %v4151_v25 = vadd.f32 %v4143_v12, %v2257_v54  ;;  %v4144_v28 = vsel %vm4127_vm11, %v4118_v42, %v4136_v9 }
 0x230   : > { %v4152_v52 = vadd.f32 %v4144_v28, %v2258_v37  ;;  %v4145_v34 = vsel %vm4128_vm12, %v4119_v45, %v4137_v50 }
 0x231   : > { %v4875_v44 = vpack.c.bf16 %v4151_v25, %v4150_v29  ;;  %v4153_v62 = vadd.f32 %v4145_v34, %v2259_v23 }
 0x233   : > { %4180 = vst [vmem:[%s6955_s10 + $0x10] sm:$0xff] %v4875_v44  ;;  %v4876_v24 = vpack.c.bf16 %v4153_v62, %v4152_v52 }
 0x235   : > { %4181 = vst [vmem:[%s6955_s10 + $0x18] sm:$0xff] %v4876_v24 }
 0x236 PF: > { %s20_s9 = sadd.s32 1, %s5458_s9  }
 0x237   : > { %p17_p4 = scmp.ge.s32.totalorder %s20_s9, 4  }
 0x239   :  { %19 = sbr.rel (!%p17_p4) target bundleno = 3 (0x3), region = 104 }

// kernel: forward.10
= control target key start
LH: loop header
LB: loop body
LE: loop exit
PB: predicated region body
PF: predicated region fallthrough
CT: control target
= control target key end

     0   :  { %s3196_s17 = smov 0   ;;  %s3822_s0 = inlined_call_operand.vmem [shape: bf16[2,4,16,128], index: 0, kind: input, shape index: {}]   ;;  %s3823_s1 = inlined_call_operand.vmem [shape: bf16[3,3,128,128], index: 1, kind: input, shape index: {}]   ;;  %s3824_s2 = inlined_call_operand.vmem [shape: f32[1,128], index: 2, kind: input, shape index: {}]   ;;  %s3825_s3 = inlined_call_operand.<no memory space> [shape: f32[1,1], index: 3, kind: input, shape index: {}]   ;;  %s3826_s4 = inlined_call_operand.vmem [shape: bf16[2,64,128], index: 4, kind: output, shape index: {}]  }
   0x1   :  { %9 = sst [smem:[#allocation3]] %s3825_s3 }
   0x2 LB: > { %s2361_s18 = sadd.s32 4294967295, %s3165_s17   ;;  %p2365_p0 = scmp.ge.s32.totalorder %s3165_s17, 1  ;;  %s3165_s17 = sphi %s3196_s17, %s15_s17  }
   0x3   : > { %p163_p1 = scmp.lt.s32.totalorder %s3165_s17, 3 }
   0x5   : > { %p164_p2 = pnand %p2365_p0, %p163_p1 }
   0x6   : > { %v3075_v0 = vld [vmem:[%s3823_s1 + $0x40] sm:$0xff] (!%p164_p2)   ;;  %v3167_v2 = vmov (!%p164_p2), 0   ;;  %v3077_v3 = vld [vmem:[%s3823_s1 + $0x48] sm:$0xff] (!%p164_p2)   ;;  %v3079_v5 = vld [vmem:[%s3823_s1 + $0x50] sm:$0xff] (!%p164_p2)   ;;  %p189_p3 = scmp.lt.s32.totalorder (!%p164_p2), %s2361_s18, 1  ;;  %vm208_vm2 = vcmask (!%p164_p2), 1040384  }
   0x7   : > { %167 = sbr.rel (%p164_p2) target bundleno = 414 (0x19e), region = 36  ;;  %v3076_v1 = vld [vmem:[%s3823_s1 + $0x100] sm:$0xff] (!%p164_p2)   ;;  %200 = vst [vmem:[#allocation2] sm:$0xf] (!%p164_p2), %v3167_v2  ;;  %201 = vst [vmem:[#allocation2 + $0x4] sm:$0xf] (!%p164_p2), %v3167_v2  ;;  %2770 = vmatprep.subr.bf16.mxu1 (!%p164_p2), %v3075_v0 }
   0x8   : > { %202 = vst [vmem:[#allocation2 + $0x8] sm:$0x1] (!%p164_p2), %v3167_v2  ;;  %204 = vst [vmem:[#allocation2 + $0x3c] sm:$0xf] (!%p164_p2), %v3167_v2  ;;  %2866 = vmatprep.subr.bf16.mxu0 (!%p164_p2), %v3076_v1  ;;  %2771 = vmatpush3.bf16.msra.mxu1 (!%p164_p2), %v3075_v0  ;;  %v3078_v4 = vld [vmem:[%s3823_s1 + $0x108] sm:$0xff] (!%p164_p2)   ;;  %v3080_v6 = vld [vmem:[%s3823_s1 + $0x110] sm:$0xff] (!%p164_p2)  }
   0x9   : > { %205 = vst [vmem:[#allocation2 + $0x40] sm:$0xf] (!%p164_p2), %v3167_v2  ;;  %206 = vst [vmem:[#allocation2 + $0x44] sm:$0x1] (!%p164_p2), %v3167_v2  ;;  %2867 = vmatpush3.bf16.msra.mxu0 (!%p164_p2), %v3076_v1  ;;  %2772 = vmatprep.subr.bf16.mxu1 (!%p164_p2), %v3077_v3  ;;  %v3081_v7 = vld [vmem:[%s3823_s1 + $0x58] sm:$0xff] (!%p164_p2)   ;;  %v3083_v9 = vld [vmem:[%s3823_s1 + $0x60] sm:$0xff] (!%p164_p2)  }
   0xa   : > { %2868 = vmatprep.subr.bf16.mxu0 (!%p164_p2), %v3078_v4  ;;  %v3082_v8 = vld [vmem:[%s3823_s1 + $0x118] sm:$0xff] (!%p164_p2)   ;;  %v3084_v10 = vld [vmem:[%s3823_s1 + $0x120] sm:$0xff] (!%p164_p2)   ;;  %v3085_v11 = vld [vmem:[%s3823_s1 + $0x68] sm:$0xff] (!%p164_p2)   ;;  %vm385_vm0 = vsmask.f32 (!%p164_p2), 3328  ;;  %vm327_vm3 = vcmask (!%p164_p2), 1043456  }
   0xb   : > { %v3086_v12 = vld [vmem:[%s3823_s1 + $0x128] sm:$0xff] (!%p164_p2)   ;;  %vm386_vm1 = vsmask.f32 (!%p164_p2), 7440  ;;  %v3087_v24 = vld [vmem:[%s3823_s1 + $0x70] sm:$0xff] (!%p164_p2)   ;;  %vm209_vm5 = vsmask.f32 (!%p164_p2), 256 }
   0xc   : > { %2773 = vmatpush3.bf16.msra.mxu1 (!%p164_p2), %v3077_v3  ;;  %v3088_v25 = vld [vmem:[%s3823_s1 + $0x130] sm:$0xff] (!%p164_p2)   ;;  %vm3275_vm4 = vmor (!%p164_p2), %vm385_vm0, %vm386_vm1  ;;  %v211_v31 = vld [vmem:[#allocation2 + $0xc] sm:$0x1] (!%p164_p2)  ;;  %vm223_vm7 = vsmask.f32 (!%p164_p2), 7938  ;;  %vm779_vm12 = vcmask (!%p164_p2), 1042432  }
   0xd   : > { %2869 = vmatpush3.bf16.msra.mxu0 (!%p164_p2), %v3078_v4  ;;  %2774 = vmatprep.subr.bf16.mxu1 (!%p164_p2), %v3079_v5  ;;  %vm3281_vm6 = vmand (!%p164_p2), %vm208_vm2, %vm209_vm5  ;;  %v225_v32 = vld [vmem:[#allocation2 + $0x14] sm:$0x1] (!%p164_p2)  ;;  %v3089_v39 = vld [vmem:[%s3823_s1 + $0x78] sm:$0xff] (!%p164_p2)   ;;  %vm245_vm9 = vsmask.f32 (!%p164_p2), 4368  ;;  %vm780_vm13 = vcmask (!%p164_p2), 1046532  }
   0xe   : > { %2870 = vmatprep.subr.bf16.mxu0 %v3080_v6  ;;  %s3840_s18 = smov (!%p189_p3, %s2361_s18), 1  ;;  %v3247_v13 = vld [vmem:[#allocation2] sm:$0xf]  ;;  %v3249_v14 = vld [vmem:[#allocation2 + $0x4] sm:$0xf]  ;;  %v212_v35 = vsel %vm3281_vm6, 0, %v211_v31  ;;  %vm3289_vm8 = vmand %vm208_vm2, %vm223_vm7 }
   0xf   : > { %s2629_s16 = sshll.u32 %s3840_s18, 5  ;;  %v3251_v15 = vld [vmem:[#allocation2 + $0x8] sm:$0x1]  ;;  %v389_v16 = vshrl.u32 %v3247_v13, 16  ;;  %v392_v17 = vshll.u32 %v3247_v13, 16  ;;  %v398_v18 = vshll.u32 %v3249_v14, 16  ;;  %v2398_v23 = vcombine.low %v3247_v13, %v3249_v14  ;;  %vm3317_vm10 = vmor %vm209_vm5, %vm245_vm9 }
  0x10   : > { %2775 = vmatpush3.bf16.msra.mxu1 %v3079_v5  ;;  %v402_v19 = vshrl.u32 %v3249_v14, 16  ;;  %v408_v20 = vshll.u32 %v3251_v15, 16  ;;  %s3263_s3 = scalar_lea.vmem %s3822_s0, %s2629_s16  ;;  %213 = vst [vmem:[#allocation2 + $0xc] sm:$0x1] %v212_v35  ;;  %v226_v41 = vsel %vm3289_vm8, 0, %v225_v32  ;;  %v3090_v47 = vld [vmem:[%s3823_s1 + $0x138] sm:$0xff]   ;;  %vm3326_vm11 = vmand %vm327_vm3, %vm223_vm7  ;;  %s198_s26 = scalar_lea.vmem %s3826_s4, %s2629_s16 }
  0x11   : > { %2871 = vmatpush3.bf16.msra.mxu0 %v3080_v6  ;;  %2776 = vmatprep.subr.bf16.mxu1 %v3081_v7  ;;  %v391_v21 = vrot.slane %v389_v16, 4  ;;  %v394_v22 = vrot.slane %v392_v17, 5  ;;  %v400_v27 = vrot.slane %v398_v18, 5  ;;  %v237_v37 = vld [vmem:[%s3263_s3] sm:$0xf]  ;;  %v787_v16 = vrot.slane %v3251_v15, 5  ;;  %vm3357_vm14 = vmor %vm779_vm12, %vm780_vm13 }
  0x12   : > { %2872 = vmatprep.subr.bf16.mxu0 %v3082_v8  ;;  %v404_v28 = vrot.slane %v402_v19, 4  ;;  %v410_v34 = vrot.slane %v408_v20, 5  ;;  %v238_v38 = vld [vmem:[%s3263_s3 + $0x4] sm:$0xf]  ;;  %v248_v42 = vshrl.u32 %v237_v37, 16  ;;  %v251_v44 = vshll.u32 %v237_v37, 16 }
  0x13   : > { %v395_v29 = vor.u32 %v394_v22, %v391_v21  ;;  %227 = vst [vmem:[#allocation2 + $0x14] sm:$0x1] %v226_v41  ;;  %v256_v45 = vshrl.u32 %v238_v38, 16  ;;  %v259_v46 = vshll.u32 %v238_v38, 16  ;;  %v214_v50 = vld [vmem:[#allocation2 + $0x18] sm:$0x1] }
  0x14   : > { %2777 = vmatpush3.bf16.msra.mxu1 %v3081_v7  ;;  %v405_v33 = vor.u32 %v404_v28, %v400_v27  ;;  %v250_v49 = vrot.slane %v248_v42, 7  ;;  %v3310_v52 = vld [vmem:[%s3823_s1] sm:$0xff]   ;;  %v215_v54 = vsel %vm3281_vm6, 0, %v214_v50  ;;  %v239_v56 = vld [vmem:[%s3263_s3 + $0x8] sm:$0xf]  ;;  %v784_v22 = vrot.slane %v3249_v14, 5 }
  0x15   : > { %2873 = vmatpush3.bf16.msra.mxu0 %v3082_v8  ;;  %2778 = vmatprep.subr.bf16.mxu1 %v3083_v9  ;;  %v396_v40 = vrot.slane %v395_v29, 4  ;;  %v258_v53 = vrot.slane %v256_v45, 7  ;;  %v228_v55 = vld [vmem:[#allocation2 + $0x20] sm:$0x1]  ;;  %216 = vst [vmem:[#allocation2 + $0x18] sm:$0x1] %v215_v54 }
  0x16   : > { %2874 = vmatprep.subr.bf16.mxu0 %v3084_v10  ;;  %v406_v43 = vrot.slane %v405_v33, 4  ;;  %v253_v59 = vor.u32 %v251_v44, %v250_v49  ;;  %v254_v60 = vrot.slane %v250_v49, 4  ;;  %v229_v61 = vsel %vm3289_vm8, 0, %v228_v55  ;;  %v240_v62 = vld [vmem:[%s3263_s3 + $0xc] sm:$0xf]  ;;  %v3333_v2 = vld [vmem:[%s3823_s1 + $0x140] sm:$0xff]  }
  0x17   : > { %v401_v48 = vsel %vm3275_vm4, %v396_v40, %v400_v27  ;;  %v261_v63 = vor.u32 %v259_v46, %v258_v53  ;;  %v263_v0 = vrot.slane %v258_v53, 4  ;;  %230 = vst [vmem:[#allocation2 + $0x20] sm:$0x1] %v229_v61  ;;  %v265_v3 = vshrl.u32 %v239_v56, 16  ;;  %v329_v8 = vld [vmem:[#allocation2 + $0xc] sm:$0xf] }
  0x18   : > { %2779 = vmatpush3.bf16.msra.mxu1 %v3083_v9  ;;  %v411_v51 = vsel %vm3275_vm4, %v406_v43, %v410_v34  ;;  %v268_v4 = vshll.u32 %v239_v56, 16  ;;  %v273_v5 = vshrl.u32 %v240_v62, 16  ;;  %v276_v6 = vshll.u32 %v240_v62, 16  ;;  %v3102_v1 = vld [vmem:[%s3823_s1 + $0x168] sm:$0xff]   ;;  %v3155_v26 = vld [vmem:[%s3823_s1 + $0x220] sm:$0xff]   ;;  %s2240_s21 = sld [smem:[#allocation3]] }
  0x19   : > { %2875 = vmatpush3.bf16.msra.mxu0 %v3084_v10  ;;  %2780 = vmatprep.subr.bf16.mxu1 %v3085_v11  ;;  %v2386_v57 = vcombine.low %v401_v48, %v411_v51  ;;  %v262_v7 = vsel %vm3317_vm10, %v254_v60, %v261_v63  ;;  %v267_v9 = vrot.slane %v265_v3, 7  ;;  %v330_v10 = vsel %vm3326_vm11, %v253_v59, %v329_v8 }
  0x1a   : > { %2876 = vmatprep.subr.bf16.mxu0 %v3086_v12  ;;  %332 = vst [vmem:[#allocation2 + $0x10] sm:$0xf] %v262_v7  ;;  %331 = vst [vmem:[#allocation2 + $0xc] sm:$0xf] %v330_v10  ;;  %v786_v29 = vrot.slane %v784_v22, 4 }
  0x1b   : > { %2786 = vmatprep.mubr.bf16.mxu1 %v2386_v57  ;;  %v270_v18 = vor.u32 %v268_v4, %v267_v9  ;;  %v271_v19 = vrot.slane %v267_v9, 4 }
  0x1c   : > { %2781 = vmatpush3.bf16.msra.mxu1 %v3085_v11  ;;  %v333_v11 = vld [vmem:[#allocation2 + $0x14] sm:$0x1]  ;;  %v3367_v38 = vsel %vm3357_vm14, %v786_v29, %v787_v16 }
  0x1d   : > { %2877 = vmatpush3.bf16.msra.mxu0 %v3086_v12  ;;  %2782 = vmatprep.subr.bf16.mxu1 %v3087_v24  ;;  %v275_v12 = vrot.slane %v273_v5, 7  ;;  %v334_v17 = vsel %vm3281_vm6, %v263_v0, %v333_v11 }
  0x1e   : > { %2878 = vmatprep.subr.bf16.mxu0 %v3088_v25  ;;  %335 = vst [vmem:[#allocation2 + $0x14] sm:$0x1] %v334_v17  ;;  %v340_v27 = vld [vmem:[#allocation2 + $0x20] sm:$0x1] }
  0x1f   : > { %v278_v20 = vor.u32 %v276_v6, %v275_v12  ;;  %v280_v21 = vrot.slane %v275_v12, 4 }
  0x20   : > { %2783 = vmatpush3.bf16.msra.mxu1 %v3087_v24  ;;  %v336_v24 = vld [vmem:[#allocation2 + $0x18] sm:$0xf] }
  0x21   : > { %2879 = vmatpush3.bf16.msra.mxu0 %v3088_v25  ;;  %2784 = vmatprep.subr.bf16.mxu1 %v3089_v39  ;;  %v279_v25 = vsel %vm3317_vm10, %v271_v19, %v278_v20  ;;  %v337_v15 = vsel %vm3326_vm11, %v270_v18, %v336_v24  ;;  %v341_v28 = vsel %vm3281_vm6, %v280_v21, %v340_v27  ;;  %v3353_v31 = vld [vmem:[#allocation2 + $0x10] sm:$0xf]  ;;  %v1134_v33 = vld [vmem:[#allocation2 + $0xc] sm:$0xf] }
  0x22   : > { %2880 = vmatprep.subr.bf16.mxu0 %v3090_v47  ;;  %338 = vst [vmem:[#allocation2 + $0x18] sm:$0xf] %v337_v15  ;;  %339 = vst [vmem:[#allocation2 + $0x1c] sm:$0xf] %v279_v25  ;;  %v1156_v34 = vshll.u32 %v3353_v31, 16  ;;  %v1160_v35 = vshrl.u32 %v3353_v31, 16 }
  0x23   : > { %342 = vst [vmem:[#allocation2 + $0x20] sm:$0x1] %v341_v28  ;;  %v3363_v37 = vld [vmem:[#allocation2 + $0xc] sm:$0xf]  ;;  %v1147_v40 = vshrl.u32 %v1134_v33, 16  ;;  %v1150_v41 = vshll.u32 %v1134_v33, 16 }
  0x24   : > { %2785 = vmatpush3.bf16.msra.mxu1 %v3089_v39  ;;  %v3371_v42 = vld [vmem:[#allocation2 + $0x10] sm:$0xf]  ;;  %v1158_v43 = vrot.slane %v1156_v34, 5  ;;  %v1162_v44 = vrot.slane %v1160_v35, 4  ;;  %v413_v49 = vshrl.u32 %v3363_v37, 16  ;;  %v416_v50 = vshll.u32 %v3363_v37, 16 }
  0x25   : > { %2881 = vmatpush3.bf16.msra.mxu0 %v3090_v47  ;;  %2794 = vmatprep.subr.bf16.mxu1 %v3310_v52  ;;  %v3369_v39 = vld [vmem:[#allocation2 + $0x14] sm:$0x1]  ;;  %v1149_v47 = vrot.slane %v1147_v40, 4  ;;  %v1152_v48 = vrot.slane %v1150_v41, 5  ;;  %v422_v54 = vshll.u32 %v3371_v42, 16  ;;  %v426_v55 = vshrl.u32 %v3371_v42, 16 }
  0x26   : > { %2890 = vmatprep.subr.bf16.mxu0 %v3333_v2  ;;  %v1166_v45 = vshll.u32 %v3369_v39, 16  ;;  %v3374_v46 = vld [vmem:[#allocation2 + $0x14] sm:$0x1]  ;;  %v1163_v51 = vor.u32 %v1162_v44, %v1158_v43  ;;  %v415_v59 = vrot.slane %v413_v49, 4  ;;  %v418_v60 = vrot.slane %v416_v50, 5  ;;  %v3093_v50 = vld [vmem:[%s3823_s1 + $0x8] sm:$0xff]  }
  0x27   : > { %v1153_v57 = vor.u32 %v1152_v48, %v1149_v47  ;;  %v432_v61 = vshll.u32 %v3374_v46, 16  ;;  %v424_v0 = vrot.slane %v422_v54, 5  ;;  %v428_v3 = vrot.slane %v426_v55, 4  ;;  %v217_v35 = vld [vmem:[#allocation2 + $0x24] sm:$0x1] }
  0x28   : > { %v1168_v53 = vrot.slane %v1166_v45, 5  ;;  %v1164_v63 = vrot.slane %v1163_v51, 4  ;;  %v419_v5 = vor.u32 %v418_v60, %v415_v59  ;;  %v231_v44 = vld [vmem:[#allocation2 + $0x2c] sm:$0x1]  ;;  %v241_v45 = vld [vmem:[%s3263_s3 + $0x10] sm:$0xf] }
  0x29   : > { %v1137_v56 = vld [vmem:[#allocation2 + $0x18] sm:$0xf]  ;;  %v3381_v62 = vld [vmem:[#allocation2 + $0x1c] sm:$0xf]  ;;  %v1154_v4 = vrot.slane %v1153_v57, 4  ;;  %v434_v6 = vrot.slane %v432_v61, 5  ;;  %v429_v9 = vor.u32 %v428_v3, %v424_v0 }
  0x2a   : > { %v1171_v7 = vshrl.u32 %v1137_v56, 16  ;;  %v1169_v8 = vsel %vm3275_vm4, %v1164_v63, %v1168_v53  ;;  %v3385_v10 = vld [vmem:[#allocation2 + $0x20] sm:$0x1]  ;;  %v1174_v11 = vshll.u32 %v1137_v56, 16  ;;  %v1180_v12 = vshll.u32 %v3381_v62, 16  ;;  %v3094_v3 = vld [vmem:[%s3823_s1 + $0x148] sm:$0xff]  }
  0x2b   : > { %v3388_v16 = vld [vmem:[#allocation2 + $0x18] sm:$0xf]  ;;  %v1159_v17 = vsel %vm3275_vm4, %v1154_v4, %v1158_v43  ;;  %v420_v18 = vrot.slane %v419_v5, 4  ;;  %v1184_v20 = vshrl.u32 %v3381_v62, 16  ;;  %v430_v24 = vrot.slane %v429_v9, 4 }
  0x2c   : > { %v1173_v19 = vrot.slane %v1171_v7, 4  ;;  %v2486_v21 = vcombine.low %v1159_v17, %v1169_v8  ;;  %v1176_v25 = vrot.slane %v1174_v11, 5  ;;  %v1182_v15 = vrot.slane %v1180_v12, 5  ;;  %v3393_v27 = vld [vmem:[#allocation2 + $0x1c] sm:$0xf] }
  0x2d   : > { %v425_v28 = vsel %vm3275_vm4, %v420_v18, %v424_v0  ;;  %v1186_v29 = vrot.slane %v1184_v20, 4  ;;  %v1190_v33 = vshll.u32 %v3385_v10, 16  ;;  %v3398_v34 = vld [vmem:[#allocation2 + $0x20] sm:$0x1]  ;;  %v435_v40 = vsel %vm3275_vm4, %v430_v24, %v434_v6  ;;  %v242_v56 = vld [vmem:[%s3263_s3 + $0x14] sm:$0xf] }
  0x2e   : > { %2882 = vmatprep.mubr.bf16.mxu0 %v2486_v21  ;;  %v1177_v41 = vor.u32 %v1176_v25, %v1173_v19  ;;  %v437_v43 = vshrl.u32 %v3388_v16, 16  ;;  %v2387_v47 = vcombine.low %v425_v28, %v435_v40  ;;  %v440_v54 = vshll.u32 %v3388_v16, 16  ;;  %v220_v63 = vld [vmem:[#allocation2 + $0x30] sm:$0x1]  ;;  %v234_v7 = vld [vmem:[#allocation2 + $0x38] sm:$0x1] }
  0x2f   : > { %v1187_v48 = vor.u32 %v1186_v29, %v1182_v15  ;;  %v1192_v49 = vrot.slane %v1190_v33, 5  ;;  %v446_v55 = vshll.u32 %v3393_v27, 16  ;;  %v450_v59 = vshrl.u32 %v3393_v27, 16  ;;  %v243_v17 = vld [vmem:[%s3263_s3 + $0x18] sm:$0xf] }
  0x30   : > { %v1178_v51 = vrot.slane %v1177_v41, 4  ;;  %v439_v53 = vrot.slane %v437_v43, 4  ;;  %2787 = vmatmul.mubr.bf16.vlgmr.msra.gmra.mrb[0].mxu1 %v2387_v47  ;;  %v456_v60 = vshll.u32 %v3398_v34, 16  ;;  %v218_v61 = vsel %vm3281_vm6, 0, %v217_v35  ;;  %v244_v24 = vld [vmem:[%s3263_s3 + $0x1c] sm:$0xf] }
  0x31   : > { %v1188_v57 = vrot.slane %v1187_v48, 4  ;;  %2795 = vmatpush3.bf16.msra.mxu1 %v3310_v52  ;;  %v442_v4 = vrot.slane %v440_v54, 5  ;;  %v448_v5 = vrot.slane %v446_v55, 5  ;;  %219 = vst [vmem:[#allocation2 + $0x24] sm:$0x1] %v218_v61  ;;  %v232_v6 = vsel %vm3289_vm8, 0, %v231_v44 }
  0x32   : > { %v1183_v0 = vsel %vm3275_vm4, %v1178_v51, %v1182_v15  ;;  %2796 = vmatprep.subr.bf16.mxu1 %v3093_v50  ;;  %v3095_v52 = vld [vmem:[%s3823_s1 + $0x10] sm:$0xff]   ;;  %v452_v9 = vrot.slane %v450_v59, 4  ;;  %v458_v11 = vrot.slane %v456_v60, 5  ;;  %233 = vst [vmem:[#allocation2 + $0x2c] sm:$0x1] %v232_v6  ;;  %v282_v12 = vshrl.u32 %v241_v45, 16 }
  0x33   : > { %v1193_v8 = vsel %vm3275_vm4, %v1188_v57, %v1192_v49  ;;  %v443_v19 = vor.u32 %v442_v4, %v439_v53  ;;  %v285_v20 = vshll.u32 %v241_v45, 16  ;;  %v290_v21 = vshrl.u32 %v242_v56, 16  ;;  %v3097_v43 = vld [vmem:[%s3823_s1 + $0x18] sm:$0xff]   ;;  %v3096_v49 = vld [vmem:[%s3823_s1 + $0x150] sm:$0xff]   ;;  %v3444_v57 = vld [vmem:[#allocation2 + $0xc] sm:$0xe] }
  0x34   : > { %v2487_v18 = vcombine.low %v1183_v0, %v1193_v8  ;;  %v453_v25 = vor.u32 %v452_v9, %v448_v5  ;;  %v284_v15 = vrot.slane %v282_v12, 7  ;;  %v293_v28 = vshll.u32 %v242_v56, 16  ;;  %v3098_v4 = vld [vmem:[%s3823_s1 + $0x158] sm:$0xff]  }
  0x35   : > { %v221_v29 = vsel %vm3281_vm6, 0, %v220_v63  ;;  %2797 = vmatpush3.bf16.msra.mxu1 %v3093_v50  ;;  %v444_v33 = vrot.slane %v443_v19, 4  ;;  %v292_v35 = vrot.slane %v290_v21, 7  ;;  %v235_v40 = vsel %vm3289_vm8, 0, %v234_v7 }
  0x36   : > { %2883 = vmatmul.mubr.bf16.vlgmr.msra.gmra.mrb[0].mxu0 %v2487_v18  ;;  %222 = vst [vmem:[#allocation2 + $0x30] sm:$0x1] %v221_v29  ;;  %v299_v41 = vshrl.u32 %v243_v17, 16  ;;  %2798 = vmatprep.subr.bf16.mxu1 %v3095_v52  ;;  %v454_v44 = vrot.slane %v453_v25, 4  ;;  %v287_v45 = vor.u32 %v285_v20, %v284_v15  ;;  %v288_v47 = vrot.slane %v284_v15, 4  ;;  %v3100_v20 = vld [vmem:[%s3823_s1 + $0x160] sm:$0xff]  }
  0x37   : > { %2891 = vmatpush3.bf16.msra.mxu0 %v3333_v2  ;;  %236 = vst [vmem:[#allocation2 + $0x38] sm:$0x1] %v235_v40  ;;  %v302_v48 = vshll.u32 %v243_v17, 16  ;;  %v449_v36 = vsel %vm3275_vm4, %v444_v33, %v448_v5  ;;  %v295_v50 = vor.u32 %v293_v28, %v292_v35  ;;  %v297_v2 = vrot.slane %v292_v35, 4  ;;  %v3099_v5 = vld [vmem:[%s3823_s1 + $0x20] sm:$0xff]   ;;  %v3103_v28 = vld [vmem:[%s3823_s1 + $0x30] sm:$0xff]  }
  0x38   : > { %2892 = vmatprep.subr.bf16.mxu0 %v3094_v3  ;;  %v301_v51 = vrot.slane %v299_v41, 7  ;;  %v459_v53 = vsel %vm3275_vm4, %v454_v44, %v458_v11  ;;  %v343_v54 = vld [vmem:[#allocation2 + $0x24] sm:$0xf]  ;;  %v307_v55 = vshrl.u32 %v244_v24, 16  ;;  %v310_v56 = vshll.u32 %v244_v24, 16  ;;  %v3101_v11 = vld [vmem:[%s3823_s1 + $0x28] sm:$0xff]  }
  0x39   : > { %2799 = vmatpush3.bf16.msra.mxu1 %v3095_v52  ;;  %v2388_v59 = vcombine.low %v449_v36, %v459_v53  ;;  %v296_v60 = vsel %vm3317_vm10, %v288_v47, %v295_v50  ;;  %v344_v61 = vsel %vm3326_vm11, %v287_v45, %v343_v54  ;;  %v347_v63 = vld [vmem:[#allocation2 + $0x2c] sm:$0x1]  ;;  %v1414_v52 = vrot.slane %v3353_v31, 5 }
  0x3a   : > { %v304_v0 = vor.u32 %v302_v48, %v301_v51  ;;  %2800 = vmatprep.subr.bf16.mxu1 %v3097_v43  ;;  %345 = vst [vmem:[#allocation2 + $0x24] sm:$0xf] %v344_v61  ;;  %346 = vst [vmem:[#allocation2 + $0x28] sm:$0xf] %v296_v60  ;;  %v348_v6 = vsel %vm3281_vm6, %v297_v2, %v347_v63  ;;  %v305_v7 = vrot.slane %v301_v51, 4  ;;  %v309_v8 = vrot.slane %v307_v55, 7 }
  0x3b   : > { %2893 = vmatpush3.bf16.msra.mxu0 %v3094_v3  ;;  %v1417_v3 = vrot.slane %v3369_v39, 5  ;;  %2790 = vmatprep.mubr.bf16.mxu1 %v2388_v59  ;;  %349 = vst [vmem:[#allocation2 + $0x2c] sm:$0x1] %v348_v6  ;;  %v2498_v9 = vrot.slane %v3444_v57, 9  ;;  %v3466_v19 = vrot.slane %v1414_v52, 4  ;;  %v3104_v61 = vld [vmem:[%s3823_s1 + $0x170] sm:$0xff]  }
  0x3c   : > { %2894 = vmatprep.subr.bf16.mxu0 %v3096_v49  ;;  %v312_v12 = vor.u32 %v310_v56, %v309_v8  ;;  %v314_v17 = vrot.slane %v309_v8, 4  ;;  %v767_v57 = vld [vmem:[#allocation2] sm:$0xe]  ;;  %v798_v14 = vrot.slane %v3393_v27, 5 }
  0x3d   : > { %v350_v18 = vld [vmem:[#allocation2 + $0x30] sm:$0xf]  ;;  %2801 = vmatpush3.bf16.msra.mxu1 %v3097_v43 }
  0x3e   : > { %v351_v21 = vsel %vm3326_vm11, %v304_v0, %v350_v18  ;;  %v354_v24 = vld [vmem:[#allocation2 + $0x38] sm:$0x1]  ;;  %2802 = vmatprep.subr.bf16.mxu1 %v3099_v5  ;;  %v313_v25 = vsel %vm3317_vm10, %v305_v7, %v312_v12 }
  0x3f   : > { %2895 = vmatpush3.bf16.msra.mxu0 %v3096_v49  ;;  %352 = vst [vmem:[#allocation2 + $0x30] sm:$0xf] %v351_v21  ;;  %v355_v15 = vsel %vm3281_vm6, %v314_v17, %v354_v24  ;;  %353 = vst [vmem:[#allocation2 + $0x34] sm:$0xf] %v313_v25 }
  0x40   : > { %2896 = vmatprep.subr.bf16.mxu0 %v3098_v4  ;;  %356 = vst [vmem:[#allocation2 + $0x38] sm:$0x1] %v355_v15 }
  0x41   : > { %2803 = vmatpush3.bf16.msra.mxu1 %v3099_v5  ;;  %v1140_v29 = vld [vmem:[#allocation2 + $0x24] sm:$0xf]  ;;  %v3483_v33 = vld [vmem:[#allocation2 + $0x28] sm:$0xf]  ;;  %v3105_v5 = vld [vmem:[%s3823_s1 + $0x38] sm:$0xff]  }
  0x42   : > { %v3485_v58 = vld [vmem:[#allocation2 + $0x24] sm:$0xf]  ;;  %2804 = vmatprep.subr.bf16.mxu1 %v3101_v11  ;;  %v3487_v30 = vld [vmem:[#allocation2 + $0x2c] sm:$0x1]  ;;  %v1195_v35 = vshrl.u32 %v1140_v29, 16  ;;  %v1198_v40 = vshll.u32 %v1140_v29, 16 }
  0x43   : > { %2897 = vmatpush3.bf16.msra.mxu0 %v3098_v4  ;;  %v1204_v41 = vshll.u32 %v3483_v33, 16  ;;  %v1208_v43 = vshrl.u32 %v3483_v33, 16  ;;  %v1214_v44 = vshll.u32 %v3487_v30, 16  ;;  %v3492_v45 = vld [vmem:[#allocation2 + $0x28] sm:$0xf]  ;;  %v461_v48 = vshrl.u32 %v3485_v58, 16 }
  0x44   : > { %2898 = vmatprep.subr.bf16.mxu0 %v3100_v20  ;;  %v3494_v47 = vld [vmem:[#allocation2 + $0x2c] sm:$0x1]  ;;  %v1197_v49 = vrot.slane %v1195_v35, 4  ;;  %v1200_v36 = vrot.slane %v1198_v40, 5  ;;  %v464_v54 = vshll.u32 %v3485_v58, 16  ;;  %v470_v55 = vshll.u32 %v3492_v45, 16 }
  0x45   : > { %v1206_v50 = vrot.slane %v1204_v41, 5  ;;  %v1210_v2 = vrot.slane %v1208_v43, 4  ;;  %2805 = vmatpush3.bf16.msra.mxu1 %v3101_v11  ;;  %v1216_v51 = vrot.slane %v1214_v44, 5  ;;  %v463_v53 = vrot.slane %v461_v48, 4  ;;  %v3106_v35 = vld [vmem:[%s3823_s1 + $0x178] sm:$0xff]  }
  0x46   : > { %v1143_v56 = vld [vmem:[#allocation2 + $0x30] sm:$0xf]  ;;  %2806 = vmatprep.subr.bf16.mxu1 %v3103_v28  ;;  %v1201_v59 = vor.u32 %v1200_v36, %v1197_v49  ;;  %v474_v63 = vshrl.u32 %v3492_v45, 16  ;;  %v480_v0 = vshll.u32 %v3494_v47, 16  ;;  %v3504_v4 = vld [vmem:[#allocation2 + $0x34] sm:$0xf] }
  0x47   : > { %2899 = vmatpush3.bf16.msra.mxu0 %v3100_v20  ;;  %v1211_v60 = vor.u32 %v1210_v2, %v1206_v50  ;;  %v466_v6 = vrot.slane %v464_v54, 5  ;;  %v472_v7 = vrot.slane %v470_v55, 5  ;;  %v3509_v8 = vld [vmem:[#allocation2 + $0x38] sm:$0x1]  ;;  %v1219_v11 = vshrl.u32 %v1143_v56, 16 }
  0x48   : > { %2900 = vmatprep.subr.bf16.mxu0 %v3102_v1  ;;  %v1222_v12 = vshll.u32 %v1143_v56, 16  ;;  %v1202_v17 = vrot.slane %v1201_v59, 4  ;;  %v476_v20 = vrot.slane %v474_v63, 4  ;;  %v482_v21 = vrot.slane %v480_v0, 5  ;;  %v3532_v56 = vld [vmem:[%s3823_s1 + $0x180] sm:$0xff]  }
  0x49   : > { %v1212_v18 = vrot.slane %v1211_v60, 4  ;;  %v467_v24 = vor.u32 %v466_v6, %v463_v53  ;;  %2807 = vmatpush3.bf16.msra.mxu1 %v3103_v28  ;;  %v1221_v25 = vrot.slane %v1219_v11, 4  ;;  %v1228_v29 = vshll.u32 %v3504_v4, 16  ;;  %v3523_v28 = vld [vmem:[%s3823_s1 + $0x80] sm:$0xff]   ;;  %v1397_v0 = vld [vmem:[#allocation2 + $0x18] sm:$0xe] }
  0x4a   : > { %v1224_v15 = vrot.slane %v1222_v12, 5  ;;  %v1207_v40 = vsel %vm3275_vm4, %v1202_v17, %v1206_v50  ;;  %v477_v43 = vor.u32 %v476_v20, %v472_v7  ;;  %v1232_v44 = vshrl.u32 %v3504_v4, 16  ;;  %2808 = vmatprep.subr.bf16.mxu1 %v3105_v5 }
  0x4b   : > { %2901 = vmatpush3.bf16.msra.mxu0 %v3102_v1  ;;  %v1217_v41 = vsel %vm3275_vm4, %v1212_v18, %v1216_v51  ;;  %v468_v49 = vrot.slane %v467_v24, 4  ;;  %v1230_v1 = vrot.slane %v1228_v29, 5  ;;  %v1421_v2 = vrot.slane %v3381_v62, 5  ;;  %v1399_v24 = vld [vmem:[#allocation2 + $0x30] sm:$0xe] }
  0x4c   : > { %v2488_v48 = vcombine.low %v1207_v40, %v1217_v41  ;;  %2902 = vmatprep.subr.bf16.mxu0 %v3104_v61  ;;  %v1225_v36 = vor.u32 %v1224_v15, %v1221_v25  ;;  %v478_v50 = vrot.slane %v477_v43, 4  ;;  %v1234_v53 = vrot.slane %v1232_v44, 4  ;;  %v768_v29 = vld [vmem:[#allocation2 + $0xc] sm:$0xe] }
  0x4d   : > { %v1238_v51 = vshll.u32 %v3509_v8, 16  ;;  %v473_v54 = vsel %vm3275_vm4, %v468_v49, %v472_v7  ;;  %2809 = vmatpush3.bf16.msra.mxu1 %v3105_v5  ;;  %v1424_v59 = vrot.slane %v3385_v10, 5  ;;  %v1415_v5 = vsel %vm3357_vm14, %v2498_v9, %v1414_v52  ;;  %v1398_v7 = vld [vmem:[#allocation2 + $0x24] sm:$0xe]  ;;  %v3112_v43 = vld [vmem:[%s3823_s1 + $0x188] sm:$0xff]  }
  0x4e   : > { %2886 = vmatprep.mubr.bf16.mxu0 %v2488_v48  ;;  %v1226_v55 = vrot.slane %v1225_v36, 4  ;;  %v483_v62 = vsel %vm3275_vm4, %v478_v50, %v482_v21  ;;  %v1235_v60 = vor.u32 %v1234_v53, %v1230_v1  ;;  %2818 = vmatprep.subr.bf16.mxu1 %v3523_v28  ;;  %v1418_v10 = vsel %vm3357_vm14, %v3466_v19, %v1417_v3 }
  0x4f   : > { %v1240_v63 = vrot.slane %v1238_v51, 5  ;;  %2903 = vmatpush3.bf16.msra.mxu0 %v3104_v61  ;;  %v2389_v6 = vcombine.low %v473_v54, %v483_v62  ;;  %v1423_v61 = vrot.slane %v1421_v2, 4  ;;  %v1428_v17 = vrot.slane %v3483_v33, 5  ;;  %v3115_v54 = vld [vmem:[%s3823_s1 + $0x98] sm:$0xff]   ;;  %v3117_v62 = vld [vmem:[%s3823_s1 + $0xa0] sm:$0xff]  }
  0x50   : > { %2904 = vmatprep.subr.bf16.mxu0 %v3106_v35  ;;  %v1231_v11 = vsel %vm3275_vm4, %v1226_v55, %v1230_v1  ;;  %v1236_v12 = vrot.slane %v1235_v60, 4  ;;  %v2499_v31 = vrot.slane %v1397_v0, 9  ;;  %v791_v18 = vrot.slane %v3371_v42, 5 }
  0x51   : > { %2791 = vmatmul.mubr.bf16.gmra.mrb[4].mxu1 %v2389_v6  ;;  %v794_v52 = vrot.slane %v3374_v46, 5  ;;  %v2518_v3 = vcombine.low %v1415_v5, %v1418_v10  ;;  %v2500_v9 = vrot.slane %v1398_v7, 9  ;;  %v1431_v33 = vrot.slane %v3487_v30, 5  ;;  %v3118_v6 = vld [vmem:[%s3823_s1 + $0x1a0] sm:$0xff]   ;;  %v3119_v5 = vld [vmem:[%s3823_s1 + $0xa8] sm:$0xff]   ;;  %v3122_v7 = vld [vmem:[%s3823_s1 + $0xb0] sm:$0xff]  }
  0x52   : > { %v1241_v39 = vsel %vm3275_vm4, %v1236_v12, %v1240_v63  ;;  %2810 = vmatprep.mubr.bf16.mxu1 %v2398_v23  ;;  %v2410_v20 = vrot.slane %v767_v57, 9  ;;  %v2399_v21 = vcombine.low %v3363_v37, %v3371_v42  ;;  %v1430_v46 = vrot.slane %v1428_v17, 4  ;;  %v3128_v63 = vld [vmem:[#allocation2 + $0x18] sm:$0xff]   ;;  %v3120_v10 = vld [vmem:[%s3823_s1 + $0x1a8] sm:$0xff]   ;;  %v3123_v12 = vld [vmem:[%s3823_s1 + $0x1b0] sm:$0xff]  }
  0x53   : > { %2905 = vmatpush3.bf16.msra.mxu0 %v3106_v35  ;;  %v2489_v19 = vcombine.low %v1231_v11, %v1241_v39  ;;  %v793_v25 = vrot.slane %v791_v18, 4  ;;  %v1422_v15 = vsel %vm3357_vm14, %v2499_v31, %v1421_v2  ;;  %v1425_v13 = vsel %vm3357_vm14, %v1423_v61, %v1424_v59  ;;  %v3116_v59 = vld [vmem:[%s3823_s1 + $0x198] sm:$0xff]  }
  0x54   : > { %2914 = vmatprep.subr.bf16.mxu0 %v3532_v56  ;;  %v2400_v23 = vcombine.low %v3388_v16, %v3393_v27  ;;  %v785_v30 = vsel %vm3357_vm14, %v2410_v20, %v784_v22  ;;  %v1435_v37 = vrot.slane %v3504_v4, 5  ;;  %v2411_v35 = vrot.slane %v768_v29, 9  ;;  %v3111_v16 = vld [vmem:[%s3823_s1 + $0x88] sm:$0xff]   ;;  %v1765_v61 = vld [vmem:[#allocation2 + $0x18] sm:$0xf] }
  0x55   : > { %2887 = vmatmul.mubr.bf16.gmra.mrb[4].mxu0 %v2489_v19  ;;  %v2430_v42 = vcombine.low %v785_v30, %v3367_v38  ;;  %v3577_v40 = vsel %vm3357_vm14, %v793_v25, %v794_v52  ;;  %v2519_v41 = vcombine.low %v1422_v15, %v1425_v13  ;;  %v1429_v22 = vsel %vm3357_vm14, %v2500_v9, %v1428_v17  ;;  %v3643_v11 = vld [vmem:[#allocation2 + $0x1c] sm:$0xf]  ;;  %v3127_v9 = vld [vmem:[%s3823_s1 + $0xc0] sm:$0xff]  }
  0x56   : > { %2906 = vmatprep.mubr.bf16.mxu0 %v2518_v3  ;;  %v3587_v4 = vsel %vm3357_vm14, %v2411_v35, %v791_v18  ;;  %v801_v38 = vrot.slane %v3398_v34, 5  ;;  %v1432_v44 = vsel %vm3357_vm14, %v1430_v46, %v1431_v33  ;;  %v2501_v48 = vrot.slane %v1399_v24, 9  ;;  %v3113_v34 = vld [vmem:[%s3823_s1 + $0x90] sm:$0xff]   ;;  %v3125_v17 = vld [vmem:[%s3823_s1 + $0xb8] sm:$0xff]   ;;  %v770_v19 = vld [vmem:[#allocation2 + $0x24] sm:$0xe] }
  0x57   : > { %v2431_v27 = vcombine.low %v3587_v4, %v3577_v40  ;;  %v800_v49 = vrot.slane %v798_v14, 4  ;;  %v1437_v36 = vrot.slane %v1435_v37, 4  ;;  %v1438_v1 = vrot.slane %v3509_v8, 5  ;;  %v3114_v8 = vld [vmem:[%s3823_s1 + $0x190] sm:$0xff]   ;;  %v3126_v39 = vld [vmem:[%s3823_s1 + $0x1b8] sm:$0xff]   ;;  %v3130_v29 = vld [vmem:[#allocation2 + $0x24] sm:$0xff]  }
  0x58   : > { %v2520_v50 = vcombine.low %v1429_v22, %v1432_v44  ;;  %v2401_v53 = vcombine.low %v3485_v58, %v3492_v45  ;;  %v769_v58 = vld [vmem:[#allocation2 + $0x18] sm:$0xe]  ;;  %v1778_v31 = vshrl.u32 %v1765_v61, 16  ;;  %v1781_v57 = vshll.u32 %v1765_v61, 16  ;;  %v3660_v33 = vld [vmem:[#allocation2 + $0x20] sm:$0x1] }
  0x59   : > { %2811 = vmatmul.mubr.bf16.vlgmr.msra.gmra.mrb[0].mxu1 %v2399_v21  ;;  %v3604_v2 = vsel %vm3357_vm14, %v800_v49, %v801_v38  ;;  %v1439_v51 = vsel %vm3357_vm14, %v1437_v36, %v1438_v1  ;;  %v1787_v18 = vshll.u32 %v3643_v11, 16  ;;  %v1791_v52 = vshrl.u32 %v3643_v11, 16  ;;  %v3133_v40 = vld [vmem:[%s3823_s1 + $0xd0] sm:$0xff]   ;;  %v3135_v44 = vld [vmem:[%s3823_s1 + $0xd8] sm:$0xff]   ;;  %v1768_v1 = vld [vmem:[#allocation2 + $0x24] sm:$0xf] }
  0x5a   : > { %2819 = vmatpush3.bf16.msra.mxu1 %v3523_v28  ;;  %2814 = vmatprep.mubr.bf16.mxu1 %v2400_v23  ;;  %v1436_v28 = vsel %vm3357_vm14, %v2501_v48, %v1435_v37  ;;  %v805_v3 = vrot.slane %v3492_v45, 5  ;;  %v1780_v20 = vrot.slane %v1778_v31, 4  ;;  %v1783_v21 = vrot.slane %v1781_v57, 5  ;;  %v3129_v45 = vld [vmem:[%s3823_s1 + $0x1c0] sm:$0xff]   ;;  %v3131_v23 = vld [vmem:[%s3823_s1 + $0xc8] sm:$0xff]  }
  0x5b   : > { %2820 = vmatprep.subr.bf16.mxu1 %v3111_v16  ;;  %v2521_v55 = vcombine.low %v1436_v28, %v1439_v51  ;;  %v1789_v46 = vrot.slane %v1787_v18, 5  ;;  %v1793_v24 = vrot.slane %v1791_v52, 4  ;;  %v2413_v25 = vrot.slane %v770_v19, 9  ;;  %v3147_v48 = vld [vmem:[#allocation2 + $0xc] sm:$0xff]   ;;  %v1774_v31 = vld [vmem:[#allocation2 + $0x3c] sm:$0xf] }
  0x5c   : > { %v807_v15 = vrot.slane %v805_v3, 4  ;;  %v808_v13 = vrot.slane %v3494_v47, 5  ;;  %v1797_v30 = vshll.u32 %v3660_v33, 16  ;;  %v1784_v37 = vor.u32 %v1783_v21, %v1780_v20  ;;  %v3132_v47 = vld [vmem:[%s3823_s1 + $0x1c8] sm:$0xff]   ;;  %v3723_v57 = vld [vmem:[#allocation2 + $0x40] sm:$0xf] }
  0x5d   : > { %2907 = vmatmul.mubr.bf16.vlgmr.msra.gmra.mrb[0].mxu0 %v2519_v41  ;;  %v806_v35 = vsel %vm3357_vm14, %v2413_v25, %v805_v3  ;;  %v1805_v28 = vshll.u32 %v1768_v1, 16  ;;  %v3140_v61 = vld [vmem:[%s3823_s1 + $0x1e8] sm:$0xff]   ;;  %v3729_v21 = vld [vmem:[#allocation2 + $0x38] sm:$0x1]  ;;  %v1859_v25 = vshll.u32 %v3723_v57, 16 }
  0x5e   : > { %2915 = vmatpush3.bf16.msra.mxu0 %v3532_v56  ;;  %2821 = vmatpush3.bf16.msra.mxu1 %v3111_v16  ;;  %v2412_v56 = vrot.slane %v769_v58, 9  ;;  %v809_v16 = vsel %vm3357_vm14, %v807_v15, %v808_v13  ;;  %v1799_v41 = vrot.slane %v1797_v30, 5  ;;  %v1785_v4 = vrot.slane %v1784_v37, 4  ;;  %v1771_v58 = vld [vmem:[#allocation2 + $0x30] sm:$0xf] }
  0x5f   : > { %2916 = vmatprep.subr.bf16.mxu0 %v3112_v43  ;;  %2822 = vmatprep.subr.bf16.mxu1 %v3113_v34  ;;  %v2433_v22 = vcombine.low %v806_v35, %v809_v16  ;;  %v1863_v15 = vshrl.u32 %v3723_v57, 16  ;;  %v3144_v13 = vld [vmem:[%s3823_s1 + $0x1f0] sm:$0xff]  }
  0x60   : > { %2910 = vmatprep.mubr.bf16.mxu0 %v2520_v50  ;;  %v3627_v60 = vsel %vm3357_vm14, %v2412_v56, %v798_v14  ;;  %v3141_v14 = vld [vmem:[#allocation2 + $0x30] sm:$0xff]   ;;  %v1790_v49 = vsel %vm3275_vm4, %v1785_v4, %v1789_v46  ;;  %v3137_v50 = vld [vmem:[%s3823_s1 + $0xe0] sm:$0xff]  }
  0x61   : > { %2815 = vmatmul.mubr.bf16.gmra.mrb[4].mxu1 %v2401_v53  ;;  %v2432_v0 = vcombine.low %v3627_v60, %v3604_v2  ;;  %v3136_v2 = vld [vmem:[%s3823_s1 + $0x1d8] sm:$0xff]   ;;  %v3138_v56 = vld [vmem:[%s3823_s1 + $0x1e0] sm:$0xff]   ;;  %v1829_v60 = vshll.u32 %v1771_v58, 16 }
  0x62   : > { %2917 = vmatpush3.bf16.msra.mxu0 %v3112_v43  ;;  %2823 = vmatpush3.bf16.msra.mxu1 %v3113_v34  ;;  %v3134_v43 = vld [vmem:[%s3823_s1 + $0x1d0] sm:$0xff]   ;;  %v3693_v34 = vld [vmem:[#allocation2 + $0x28] sm:$0xf]  ;;  %v3747_v4 = vld [vmem:[#allocation2 + $0x44] sm:$0x1] }
  0x63   : > { %2918 = vmatprep.subr.bf16.mxu0 %v3114_v8  ;;  %2824 = vmatprep.subr.bf16.mxu1 %v3115_v54  ;;  %v1811_v51 = vshll.u32 %v3693_v34, 16  ;;  %v1831_v52 = vrot.slane %v1829_v60, 5 }
  0x64   : > { %2834 = vmatprep.mubr.bf16.mxu1 %v2430_v42  ;;  %v1794_v42 = vor.u32 %v1793_v24, %v1789_v46  ;;  %v1850_v46 = vshrl.u32 %v1774_v31, 16  ;;  %v1853_v24 = vshll.u32 %v1774_v31, 16 }
  0x65   : > { %2911 = vmatmul.mubr.bf16.gmra.mrb[4].mxu0 %v2521_v55  ;;  %v3703_v55 = vld [vmem:[#allocation2 + $0x34] sm:$0xf] }
  0x66   : > { %2919 = vmatpush3.bf16.msra.mxu0 %v3114_v8  ;;  %2825 = vmatpush3.bf16.msra.mxu1 %v3115_v54  ;;  %v1795_v38 = vrot.slane %v1794_v42, 4  ;;  %v1802_v8 = vshrl.u32 %v1768_v1, 16  ;;  %v1815_v54 = vshrl.u32 %v3693_v34, 16  ;;  %v1852_v35 = vrot.slane %v1850_v46, 4  ;;  %v3156_v46 = vld [vmem:[%s3823_s1 + $0x228] sm:$0xff]  }
  0x67   : > { %2920 = vmatprep.subr.bf16.mxu0 %v3116_v59  ;;  %2826 = vmatprep.subr.bf16.mxu1 %v3117_v62  ;;  %v1855_v16 = vrot.slane %v1853_v24, 5  ;;  %v2066_v24 = vrot.slane %v3723_v57, 5  ;;  %v3158_v57 = vld [vmem:[%s3823_s1 + $0x238] sm:$0xff]  }
  0x68   : > { %2930 = vmatprep.mubr.bf16.mxu0 %v3128_v63  ;;  %v1800_v36 = vsel %vm3275_vm4, %v1795_v38, %v1799_v41  ;;  %v1835_v63 = vshll.u32 %v3703_v55, 16  ;;  %v3146_v41 = vld [vmem:[%s3823_s1 + $0x1f8] sm:$0xff]  }
  0x69   : > { %v2574_v53 = vcombine.low %v1790_v49, %v1800_v36  ;;  %v2059_v49 = vrot.slane %v3703_v55, 5  ;;  %v1856_v1 = vor.u32 %v1855_v16, %v1852_v35 }
  0x6a   : > { %2921 = vmatpush3.bf16.msra.mxu0 %v3116_v59  ;;  %2827 = vmatpush3.bf16.msra.mxu1 %v3117_v62  ;;  %v3139_v59 = vld [vmem:[%s3823_s1 + $0xe8] sm:$0xff]   ;;  %v1826_v62 = vshrl.u32 %v1771_v58, 16  ;;  %v2045_v58 = vrot.slane %v3643_v11, 5  ;;  %v3153_v11 = vld [vmem:[%s3823_s1 + $0x210] sm:$0xff]  }
  0x6b   : > { %2922 = vmatprep.subr.bf16.mxu0 %v3118_v6  ;;  %2828 = vmatprep.subr.bf16.mxu1 %v3119_v5  ;;  %v1857_v60 = vrot.slane %v1856_v1, 4 }
  0x6c   : > { %v1828_v18 = vrot.slane %v1826_v62, 4  ;;  %v2062_v62 = vrot.slane %v3729_v21, 5 }
  0x6e   : > { %2923 = vmatpush3.bf16.msra.mxu0 %v3118_v6  ;;  %2829 = vmatpush3.bf16.msra.mxu1 %v3119_v5  ;;  %v1804_v6 = vrot.slane %v1802_v8, 4  ;;  %v1807_v5 = vrot.slane %v1805_v28, 5  ;;  %v3150_v8 = vld [vmem:[%s3823_s1 + $0x208] sm:$0xff]  }
  0x6f   : > { %2924 = vmatprep.subr.bf16.mxu0 %v3120_v10  ;;  %2830 = vmatprep.subr.bf16.mxu1 %v3122_v7  ;;  %v3151_v28 = vld [vmem:[#allocation2 + $0x24] sm:$0xff]  }
  0x72   : > { %2925 = vmatpush3.bf16.msra.mxu0 %v3120_v10  ;;  %2831 = vmatpush3.bf16.msra.mxu1 %v3122_v7  ;;  %v3713_v10 = vrot.slane %v1811_v51, 5  ;;  %v1817_v7 = vrot.slane %v1815_v54, 4 }
  0x73   : > { %2926 = vmatprep.subr.bf16.mxu0 %v3123_v12  ;;  %2832 = vmatprep.subr.bf16.mxu1 %v3125_v17 }
  0x74   : > { %v1818_v19 = vor.u32 %v1817_v7, %v3713_v10  ;;  %v3152_v7 = vld [vmem:[#allocation2 + $0x30] sm:$0xff]  }
  0x76   : > { %2927 = vmatpush3.bf16.msra.mxu0 %v3123_v12  ;;  %2833 = vmatpush3.bf16.msra.mxu1 %v3125_v17  ;;  %v3718_v12 = vld [vmem:[#allocation2 + $0x2c] sm:$0x1]  ;;  %v3142_v17 = vld [vmem:[%s3823_s1 + $0xf0] sm:$0xff]   ;;  %v1819_v42 = vrot.slane %v1818_v19, 4 }
  0x77   : > { %2928 = vmatprep.subr.bf16.mxu0 %v3126_v39  ;;  %2842 = vmatprep.subr.bf16.mxu1 %v3127_v9  ;;  %v1821_v20 = vshll.u32 %v3718_v12, 16  ;;  %v2055_v35 = vrot.slane %v3718_v12, 5 }
  0x79   : > { %2835 = vmatmul.mubr.bf16.vlgmr.msra.gmra.mrb[0].mxu1 %v2431_v27  ;;  %v3143_v27 = vld [vmem:[#allocation2 + $0x3c] sm:$0xff]  }
  0x7a   : > { %2929 = vmatpush3.bf16.msra.mxu0 %v3126_v39  ;;  %2843 = vmatpush3.bf16.msra.mxu1 %v3127_v9  ;;  %v3725_v39 = vrot.slane %v1835_v63, 5  ;;  %v1808_v9 = vor.u32 %v1807_v5, %v1804_v6  ;;  %v2027_v6 = vld [vmem:[#allocation2 + $0x18] sm:$0xe] }
  0x7b   : > { %2938 = vmatprep.subr.bf16.mxu0 %v3129_v45  ;;  %2844 = vmatprep.subr.bf16.mxu1 %v3131_v23 }
  0x7c   : > { %2838 = vmatprep.mubr.bf16.mxu1 %v2432_v0  ;;  %v1839_v0 = vshrl.u32 %v3703_v55, 16  ;;  %v1809_v37 = vrot.slane %v1808_v9, 4 }
  0x7d   : > { %2931 = vmatmul.mubr.bf16.vlgmr.msra.gmra.mrb[0].mxu0 %v3130_v29  ;;  %v1845_v29 = vshll.u32 %v3729_v21, 16 }
  0x7e   : > { %2939 = vmatpush3.bf16.msra.mxu0 %v3129_v45  ;;  %2845 = vmatpush3.bf16.msra.mxu1 %v3131_v23  ;;  %v1841_v3 = vrot.slane %v1839_v0, 4  ;;  %v3145_v45 = vld [vmem:[%s3823_s1 + $0xf8] sm:$0xff]   ;;  %v1832_v23 = vor.u32 %v1831_v52, %v1828_v18 }
  0x7f   : > { %2940 = vmatprep.subr.bf16.mxu0 %v3132_v47  ;;  %2846 = vmatprep.subr.bf16.mxu1 %v3133_v40 }
  0x80   : > { %2934 = vmatprep.mubr.bf16.mxu0 %v3141_v14  ;;  %v1842_v30 = vor.u32 %v1841_v3, %v3725_v39  ;;  %v1865_v14 = vrot.slane %v1863_v15, 4  ;;  %v1833_v38 = vrot.slane %v1832_v23, 4  ;;  %v2030_v15 = vld [vmem:[#allocation2 + $0x3c] sm:$0xe]  ;;  %v2052_v23 = vrot.slane %v3693_v34, 5 }
  0x81   : > { %2839 = vmatmul.mubr.bf16.gmra.mrb[4].mxu1 %v2433_v22  ;;  %v3149_v22 = vld [vmem:[%s3823_s1 + $0x200] sm:$0xff]  }
  0x82   : > { %2941 = vmatpush3.bf16.msra.mxu0 %v3132_v47  ;;  %2847 = vmatpush3.bf16.msra.mxu1 %v3133_v40  ;;  %v1823_v47 = vrot.slane %v1821_v20, 5  ;;  %v1861_v40 = vrot.slane %v1859_v25, 5  ;;  %v1838_v51 = vsel %vm3275_vm4, %v1833_v38, %v3725_v39  ;;  %v3157_v25 = vld [vmem:[%s3823_s1 + $0x230] sm:$0xff]  }
  0x83   : > { %2942 = vmatprep.subr.bf16.mxu0 %v3134_v43  ;;  %2848 = vmatprep.subr.bf16.mxu1 %v3135_v44 }
  0x84   : > { %2858 = vmatprep.mubr.bf16.mxu1 %v3147_v48  ;;  %v3148_v48 = vld [vmem:[#allocation2 + $0x18] sm:$0xff]   ;;  %v1824_v36 = vsel %vm3275_vm4, %v1819_v42, %v1823_v47  ;;  %v1862_v52 = vsel %vm3275_vm4, %v1857_v60, %v1861_v40  ;;  %v2054_v47 = vrot.slane %v2052_v23, 4 }
  0x85   : > { %2935 = vmatmul.mubr.bf16.gmra.mrb[4].mxu0 %v3143_v27  ;;  %v1814_v27 = vsel %vm3275_vm4, %v1809_v37, %v3713_v10  ;;  %v2048_v10 = vrot.slane %v3660_v33, 5  ;;  %v3154_v33 = vld [vmem:[%s3823_s1 + $0x218] sm:$0xff]  }
  0x86   : > { %2943 = vmatpush3.bf16.msra.mxu0 %v3134_v43  ;;  %2849 = vmatpush3.bf16.msra.mxu1 %v3135_v44  ;;  %v1843_v43 = vrot.slane %v1842_v30, 4  ;;  %v1847_v44 = vrot.slane %v1845_v29, 5  ;;  %v2575_v55 = vcombine.low %v1814_v27, %v1824_v36  ;;  %v2589_v30 = vrot.slane %v2030_v15, 9  ;;  %v2028_v29 = vld [vmem:[#allocation2 + $0x24] sm:$0xe] }
  0x87   : > { %2944 = vmatprep.subr.bf16.mxu0 %v3136_v2  ;;  %2850 = vmatprep.subr.bf16.mxu1 %v3137_v50  ;;  %v2587_v42 = vrot.slane %v2028_v29, 9 }
  0x88   : > { %2954 = vmatprep.mubr.bf16.mxu0 %v2574_v53  ;;  %v2029_v53 = vld [vmem:[#allocation2 + $0x30] sm:$0xe]  ;;  %v1848_v54 = vsel %vm3275_vm4, %v1843_v43, %v1847_v44  ;;  %v2067_v34 = vsel %vm3357_vm14, %v2589_v30, %v2066_v24 }
  0x89   : > { %v2576_v5 = vcombine.low %v1838_v51, %v1848_v54 }
  0x8a   : > { %2945 = vmatpush3.bf16.msra.mxu0 %v3136_v2  ;;  %2851 = vmatpush3.bf16.msra.mxu1 %v3137_v50  ;;  %v1866_v2 = vor.u32 %v1865_v14, %v1861_v40  ;;  %v1869_v50 = vshll.u32 %v3747_v4, 16  ;;  %v2053_v40 = vsel %vm3357_vm14, %v2587_v42, %v2052_v23  ;;  %v2056_v14 = vsel %vm3357_vm14, %v2054_v47, %v2055_v35 }
  0x8b   : > { %2946 = vmatprep.subr.bf16.mxu0 %v3138_v56  ;;  %2852 = vmatprep.subr.bf16.mxu1 %v3139_v59 }
  0x8c   : > { %v1867_v63 = vrot.slane %v1866_v2, 4  ;;  %v1871_v0 = vrot.slane %v1869_v50, 5 }
  0x8e   : > { %2947 = vmatpush3.bf16.msra.mxu0 %v3138_v56  ;;  %2853 = vmatpush3.bf16.msra.mxu1 %v3139_v59  ;;  %v2588_v56 = vrot.slane %v2029_v53, 9  ;;  %v2061_v59 = vrot.slane %v2059_v49, 4  ;;  %v1872_v39 = vsel %vm3275_vm4, %v1867_v63, %v1871_v0 }
  0x8f   : > { %2948 = vmatprep.subr.bf16.mxu0 %v3140_v61  ;;  %2854 = vmatprep.subr.bf16.mxu1 %v3142_v17  ;;  %v2577_v9 = vcombine.low %v1862_v52, %v1872_v39 }
  0x90   : > { %v2060_v31 = vsel %vm3357_vm14, %v2588_v56, %v2059_v49  ;;  %v2063_v18 = vsel %vm3357_vm14, %v2061_v59, %v2062_v62 }
  0x91   : > { %v2608_v3 = vcombine.low %v2060_v31, %v2063_v18 }
  0x92   : > { %2949 = vmatpush3.bf16.msra.mxu0 %v3140_v61  ;;  %2855 = vmatpush3.bf16.msra.mxu1 %v3142_v17  ;;  %v2586_v61 = vrot.slane %v2027_v6, 9  ;;  %v2047_v17 = vrot.slane %v2045_v58, 4 }
  0x93   : > { %2950 = vmatprep.subr.bf16.mxu0 %v3144_v13  ;;  %2856 = vmatprep.subr.bf16.mxu1 %v3145_v45 }
  0x94   : > { %v2046_v19 = vsel %vm3357_vm14, %v2586_v61, %v2045_v58  ;;  %v2049_v20 = vsel %vm3357_vm14, %v2047_v17, %v2048_v10 }
  0x95   : > { %v2606_v21 = vcombine.low %v2046_v19, %v2049_v20 }
  0x96   : > { %2951 = vmatpush3.bf16.msra.mxu0 %v3144_v13  ;;  %2857 = vmatpush3.bf16.msra.mxu1 %v3145_v45  ;;  %v2068_v13 = vrot.slane %v2066_v24, 4  ;;  %v2069_v45 = vrot.slane %v3747_v4, 5 }
  0x97   : > { %2952 = vmatprep.subr.bf16.mxu0 %v3146_v41  ;;  %2986 = vmatprep.subr.bf16.mxu1 %v3149_v22 }
  0x98   : > { %v2070_v37 = vsel %vm3357_vm14, %v2068_v13, %v2069_v45 }
  0x99   : > { %2859 = vmatmul.mubr.bf16.vlgmr.msra.gmra.mrb[0].mxu1 %v3148_v48  ;;  %v2609_v16 = vcombine.low %v2067_v34, %v2070_v37 }
  0x9a   : > { %2953 = vmatpush3.bf16.msra.mxu0 %v3146_v41  ;;  %2994 = vmatpush3.bf16.msra.mxu1 %v3149_v22  ;;  %v2607_v41 = vcombine.low %v2053_v40, %v2056_v14 }
  0x9b   : > { %2962 = vmatprep.subr.bf16.mxu0 %v3149_v22  ;;  %2987 = vmatprep.subr.bf16.mxu1 %v3150_v8 }
  0x9c   : > { %2862 = vmatprep.mubr.bf16.mxu1 %v3151_v28  ;;  %v2618_v28 = vld [vmem:[%s3824_s2] ss:$0 sm:$0xff] }
  0x9d   : > { %2955 = vmatmul.mubr.bf16.vlgmr.msra.gmra.mrb[0].mxu0 %v2575_v55  ;;  %v2249_v55 = vstv %s2240_s21 }
  0x9e   : > { %2963 = vmatpush3.bf16.msra.mxu0 %v3149_v22  ;;  %2995 = vmatpush3.bf16.msra.mxu1 %v3150_v8 }
  0x9f   : > { %2964 = vmatprep.subr.bf16.mxu0 %v3150_v8  ;;  %2958 = vmatprep.mubr.bf16.mxu0 %v2576_v5 }
  0xa0   : > { %2988 = vmatprep.subr.bf16.mxu1 %v3153_v11 }
  0xa1   : > { %2863 = vmatmul.mubr.bf16.gmra.mrb[4].mxu1 %v3152_v7 }
  0xa2   : > { %2965 = vmatpush3.bf16.msra.mxu0 %v3150_v8  ;;  %2996 = vmatpush3.bf16.msra.mxu1 %v3153_v11 }
  0xa3   : > { %2966 = vmatprep.subr.bf16.mxu0 %v3153_v11  ;;  %2989 = vmatprep.subr.bf16.mxu1 %v3154_v33 }
  0xa4   : > { %2982 = vmatprep.mubr.bf16.mxu1 %v2608_v3 }
  0xa5   : > { %2959 = vmatmul.mubr.bf16.gmra.mrb[4].mxu0 %v2577_v9 }
  0xa6   : > { %2967 = vmatpush3.bf16.msra.mxu0 %v3153_v11  ;;  %2997 = vmatpush3.bf16.msra.mxu1 %v3154_v33 }
  0xa7   : > { %2968 = vmatprep.subr.bf16.mxu0 %v3154_v33  ;;  %2990 = vmatprep.subr.bf16.mxu1 %v3155_v26 }
  0xa8   : > { %2978 = vmatprep.mubr.bf16.mxu0 %v2606_v21 }
  0xaa   : > { %2969 = vmatpush3.bf16.msra.mxu0 %v3154_v33  ;;  %2998 = vmatpush3.bf16.msra.mxu1 %v3155_v26 }
  0xab   : > { %2970 = vmatprep.subr.bf16.mxu0 %v3155_v26  ;;  %2991 = vmatprep.subr.bf16.mxu1 %v3156_v46 }
  0xae   : > { %2971 = vmatpush3.bf16.msra.mxu0 %v3155_v26  ;;  %2999 = vmatpush3.bf16.msra.mxu1 %v3156_v46 }
  0xaf   : > { %2972 = vmatprep.subr.bf16.mxu0 %v3156_v46  ;;  %2992 = vmatprep.subr.bf16.mxu1 %v3157_v25 }
  0xb2   : > { %2973 = vmatpush3.bf16.msra.mxu0 %v3156_v46  ;;  %3000 = vmatpush3.bf16.msra.mxu1 %v3157_v25 }
  0xb3   : > { %2974 = vmatprep.subr.bf16.mxu0 %v3157_v25  ;;  %2993 = vmatprep.subr.bf16.mxu1 %v3158_v57 }
  0xb6   : > { %2975 = vmatpush3.bf16.msra.mxu0 %v3157_v25  ;;  %3001 = vmatpush3.bf16.msra.mxu1 %v3158_v57 }
  0xb7   : > { %2976 = vmatprep.subr.bf16.mxu0 %v3158_v57 }
  0xb9   : > { %2983 = vmatmul.mubr.bf16.vlgmr.msra.gmra.mrb[8].mxu1 %v2609_v16 }
  0xba   : > { %2977 = vmatpush3.bf16.msra.mxu0 %v3158_v57 }
  0xbd   : > { %2979 = vmatmul.mubr.bf16.vlgmr.msra.gmra.mrb[0].mxu0 %v2607_v41 }
 0x16c   : > { %v2860_v12 = vpop.f32.mrb[0].mxu1 }
 0x16d   : > { %v1095_v22 = vpop.f32.mrb[1].mxu1 }
 0x16e   : > { %v2861_v4 = vpop.f32.mrb[2].mxu1 }
 0x16f   : > { %v1098_v38 = vpop.f32.mrb[3].mxu1 }
 0x174   : > { %v2864_v43 = vpop.f32.mrb[4].mxu1 }
 0x175   : > { %v1111_v44 = vpop.f32.mrb[5].mxu1 }
 0x176   : > { %v2865_v48 = vpop.f32.mrb[6].mxu1 }
 0x177   : > { %v1114_v27 = vpop.f32.mrb[7].mxu1 }
 0x178   : > { %v2960_v49 = vpop.f32.mrb[4].mxu0 }
 0x179   : > { %v3006_v36 = vadd.f32 %v2960_v49, %v2864_v43  ;;  %v2004_v1 = vpop.f32.mrb[5].mxu0 }
 0x17a   : > { %v3008_v2 = vadd.f32 %v2004_v1, %v1111_v44  ;;  %v2961_v50 = vpop.f32.mrb[6].mxu0 }
 0x17b   : > { %v3010_v32 = vadd.f32 %v2961_v50, %v2865_v48  ;;  %v2007_v53 = vpop.f32.mrb[7].mxu0 }
 0x17c   : > { %v3012_v8 = vadd.f32 %v2007_v53, %v1114_v27 }
 0x18c   : > { %v2984_v51 = vpop.f32.mrb[8].mxu1 }
 0x18d   : > { %v3007_v54 = vadd.f32 %v3006_v36, %v2984_v51  ;;  %v2202_v58 = vpop.f32.mrb[9].mxu1 }
 0x18e   : > { %v3009_v56 = vadd.f32 %v3008_v2, %v2202_v58  ;;  %v2985_v59 = vpop.f32.mrb[10].mxu1 }
 0x18f   : > { %v2238_v62 = vadd.f32 %v3007_v54, %v2618_v28  ;;  %v3011_v60 = vadd.f32 %v3010_v32, %v2985_v59  ;;  %v2205_v63 = vpop.f32.mrb[11].mxu1 }
 0x190   : > { %v2980_v0 = vpop.f32.mrb[0].mxu0  ;;  %v2236_v6 = vadd.f32 %v3009_v56, %v2618_v28  ;;  %v3013_v5 = vadd.f32 %v3012_v8, %v2205_v63 }
 0x191   : > { %v3002_v11 = vadd.f32 %v2980_v0, %v2860_v12  ;;  %v2256_v10 = vmul.f32 %v2249_v55, %v2238_v62  ;;  %v2186_v7 = vpop.f32.mrb[1].mxu0  ;;  %v2239_v61 = vadd.f32 %v3011_v60, %v2618_v28  ;;  %vm2247_vm15 = vcmp.ge.f32.partialorder %v2238_v62, 0.0 }
 0x192   : > { %v3003_v17 = vadd.f32 %v2186_v7, %v1095_v22  ;;  %v2981_v31 = vpop.f32.mrb[2].mxu0  ;;  %v2237_v18 = vadd.f32 %v3013_v5, %v2618_v28  ;;  %vm2245_vm0 = vcmp.ge.f32.partialorder %v2236_v6, 0.0  ;;  %v2254_v9 = vmul.f32 %v2249_v55, %v2236_v6 }
 0x193   : > { %v2234_v52 = vadd.f32 %v3002_v11, %v2618_v28  ;;  %v3004_v39 = vadd.f32 %v2981_v31, %v2861_v4  ;;  %vm2248_vm1 = vcmp.ge.f32.partialorder %v2239_v61, 0.0  ;;  %v2189_v33 = vpop.f32.mrb[3].mxu0  ;;  %v2257_v19 = vmul.f32 %v2249_v55, %v2239_v61 }
 0x194   : > { %v2232_v3 = vadd.f32 %v3003_v17, %v2618_v28  ;;  %v3005_v20 = vadd.f32 %v2189_v33, %v1098_v38  ;;  %v2264_v21 = vsel %vm2247_vm15, %v2238_v62, %v2256_v10  ;;  %vm2246_vm3 = vcmp.ge.f32.partialorder %v2237_v18, 0.0 }
 0x195   : > { %vm2243_vm2 = vcmp.ge.f32.partialorder %v2234_v52, 0.0  ;;  %v2252_v26 = vmul.f32 %v2249_v55, %v2234_v52  ;;  %v2235_v46 = vadd.f32 %v3004_v39, %v2618_v28  ;;  %v2265_v25 = vsel %vm2248_vm1, %v2239_v61, %v2257_v19 }
 0x196   : > { %v2250_v24 = vmul.f32 %v2249_v55, %v2232_v3  ;;  %v2233_v15 = vadd.f32 %v3005_v20, %v2618_v28  ;;  %vm2241_vm4 = vcmp.ge.f32.partialorder %v2232_v3, 0.0  ;;  %v2657_v45 = vpack.c.bf16 %v2265_v25, %v2264_v21 }
 0x197   : > { %vm2244_vm5 = vcmp.ge.f32.partialorder %v2235_v46, 0.0  ;;  %v2253_v13 = vmul.f32 %v2249_v55, %v2235_v46  ;;  %v2255_v30 = vmul.f32 %v2249_v55, %v2237_v18  ;;  %v2260_v57 = vsel %vm2243_vm2, %v2234_v52, %v2252_v26 }
 0x198   : > { %vm2242_vm6 = vcmp.ge.f32.partialorder %v2233_v15, 0.0  ;;  %v2251_v23 = vmul.f32 %v2249_v55, %v2233_v15  ;;  %v2262_v29 = vsel %vm2245_vm0, %v2236_v6, %v2254_v9  ;;  %2661 = vst [vmem:[%s198_s26 + $0x18] sm:$0xff] %v2657_v45   ;;  %v2258_v42 = vsel %vm2241_vm4, %v2232_v3, %v2250_v24 }
 0x199   : > { %v2261_v37 = vsel %vm2244_vm5, %v2235_v46, %v2253_v13  ;;  %v2263_v34 = vsel %vm2246_vm3, %v2237_v18, %v2255_v30 }
 0x19a   : > { %v2647_v47 = vpack.c.bf16 %v2261_v37, %v2260_v57  ;;  %v2259_v35 = vsel %vm2242_vm6, %v2233_v15, %v2251_v23  ;;  %v2652_v40 = vpack.c.bf16 %v2263_v34, %v2262_v29 }
 0x19b   : > { %v2642_v16 = vpack.c.bf16 %v2259_v35, %v2258_v42 }
 0x19c   : > { %2659 = vst [vmem:[%s198_s26 + $0x8] sm:$0xff] %v2647_v47   ;;  %2660 = vst [vmem:[%s198_s26 + $0x10] sm:$0xff] %v2652_v40  }
 0x19d   : > { %2643 = vst [vmem:[%s198_s26] sm:$0xff] %v2642_v16  }
 0x19e PF: > { %s15_s17 = sadd.s32 1, %s3165_s17  }
 0x19f   : > { %p12_p4 = scmp.ge.s32.totalorder %s15_s17, 4  }
 0x1a1   :  { %14 = sbr.rel (!%p12_p4) target bundleno = 2 (0x2), region = 77 }

// kernel: forward.11
= control target key start
LH: loop header
LB: loop body
LE: loop exit
PB: predicated region body
PF: predicated region fallthrough
CT: control target
= control target key end

     0   :  { %s4710_s17 = smov 0   ;;  %s6708_s0 = inlined_call_operand.vmem [shape: f32[2,4,32,256], index: 0, kind: input, shape index: {}]   ;;  %s6709_s1 = inlined_call_operand.vmem [shape: f32[3,3,256,128], index: 1, kind: input, shape index: {}]   ;;  %s6710_s2 = inlined_call_operand.vmem [shape: f32[1,128], index: 2, kind: input, shape index: {}]   ;;  %s6711_s3 = inlined_call_operand.<no memory space> [shape: f32[1,1], index: 3, kind: input, shape index: {}]   ;;  %s6712_s4 = inlined_call_operand.vmem [shape: f32[2,128,128], index: 4, kind: output, shape index: {}]  }
   0x1   :  { %9 = sst [smem:[#allocation3]] %s6711_s3 }
   0x2 LB: > { %s3348_s18 = sadd.s32 4294967295, %s4679_s17   ;;  %p3352_p0 = scmp.ge.s32.totalorder %s4679_s17, 1  ;;  %s4679_s17 = sphi %s4710_s17, %s15_s17  }
   0x3   : > { %p163_p1 = scmp.lt.s32.totalorder %s4679_s17, 3 }
   0x5   : > { %p164_p2 = pnand %p3352_p0, %p163_p1 }
   0x6   : > { %v3373_v0 = vld [vmem:[%s6709_s1 + $0x180] sm:$0xff] (!%p164_p2)  ;;  %v3374_v1 = vld [vmem:[%s6709_s1 + $0x188] sm:$0xff] (!%p164_p2)  ;;  %p189_p3 = scmp.lt.s32.totalorder (!%p164_p2), %s3348_s18, 1  ;;  %v221_v3 = vlaneseq (!%p164_p2)  ;;  %v3375_v6 = vld [vmem:[%s6709_s1 + $0x190] sm:$0xff] (!%p164_p2)  ;;  %v4681_v13 = vmov (!%p164_p2), 0.0   ;;  %vm312_vm1 = vcmask (!%p164_p2), 1040384  }
   0x7   : > { %167 = sbr.rel (%p164_p2) target bundleno = 550 (0x226), region = 36  ;;  %v3357_v2 = vld [vmem:[%s6709_s1 + $0x100] sm:$0xff] (!%p164_p2)  ;;  %v4338_v4 = vpack.c.bf16 (!%p164_p2), %v3374_v1, %v3373_v0  ;;  %v3358_v5 = vld [vmem:[%s6709_s1 + $0x108] sm:$0xff] (!%p164_p2)  ;;  %v3376_v7 = vld [vmem:[%s6709_s1 + $0x198] sm:$0xff] (!%p164_p2)  ;;  %200 = vst [vmem:[#allocation2 + $0x8] sm:$0xff] (!%p164_p2), %v4681_v13  ;;  %v4801_v32 = vrot.slane (!%p164_p2), %v4681_v13, 1 }
   0x8   : > { %v4340_v8 = vpack.c.bf16 (!%p164_p2), %v3358_v5, %v3357_v2  ;;  %v4342_v9 = vpack.c.bf16 (!%p164_p2), %v3376_v7, %v3375_v6  ;;  %v3359_v10 = vld [vmem:[%s6709_s1 + $0x110] sm:$0xff] (!%p164_p2)  ;;  %v3360_v11 = vld [vmem:[%s6709_s1 + $0x118] sm:$0xff] (!%p164_p2)  ;;  %v3377_v12 = vld [vmem:[%s6709_s1 + $0x1a0] sm:$0xff] (!%p164_p2)  ;;  %199 = vst [vmem:[#allocation2] sm:$0xff] (!%p164_p2), %v4681_v13  ;;  %vm223_vm0 = vcmp.lt.s32.totalorder (!%p164_p2), %v221_v3, 256  ;;  %vm569_vm2 = vcmask (!%p164_p2), 1046528  }
   0x9   : > { %207 = vst [vmem:[#allocation2 + $0x40] sm:$0x3] (!%p164_p2), %v4681_v13  ;;  %208 = vst [vmem:[#allocation2 + $0x48] sm:$0x3] (!%p164_p2), %v4681_v13  ;;  %4626 = vmatprep.subr.bf16.mxu1 (!%p164_p2), %v4338_v4  ;;  %4339 = vmatprep.subr.bf16.mxu0 (!%p164_p2), %v4338_v4  ;;  %v3378_v14 = vld [vmem:[%s6709_s1 + $0x1a8] sm:$0xff] (!%p164_p2)  ;;  %v4344_v15 = vpack.c.bf16 (!%p164_p2), %v3360_v11, %v3359_v10  ;;  %v3361_v17 = vld [vmem:[%s6709_s1 + $0x120] sm:$0xff] (!%p164_p2) }
   0xa   : > { %210 = vst [vmem:[#allocation2 + $0x190] sm:$0xff] (!%p164_p2), %v4681_v13  ;;  %211 = vst [vmem:[#allocation2 + $0x198] sm:$0xff] (!%p164_p2), %v4681_v13  ;;  %4634 = vmatpush3.bf16.msra.mxu1 (!%p164_p2), %v4340_v8  ;;  %4341 = vmatpush3.bf16.msra.mxu0 (!%p164_p2), %v4340_v8  ;;  %v4346_v16 = vpack.c.bf16 (!%p164_p2), %v3378_v14, %v3377_v12  ;;  %v3362_v18 = vld [vmem:[%s6709_s1 + $0x128] sm:$0xff] (!%p164_p2)  ;;  %v3379_v19 = vld [vmem:[%s6709_s1 + $0x1b0] sm:$0xff] (!%p164_p2)  ;;  %vm1029_vm3 = vcmask (!%p164_p2), 1045504   ;;  %s3220_s9 = sld [smem:[#allocation3]] (!%p164_p2) }
   0xb   : > { %218 = vst [vmem:[#allocation2 + $0x1d0] sm:$0x3] (!%p164_p2), %v4681_v13  ;;  %219 = vst [vmem:[#allocation2 + $0x1d8] sm:$0x3] (!%p164_p2), %v4681_v13  ;;  %4627 = vmatprep.subr.bf16.mxu1 (!%p164_p2), %v4342_v9  ;;  %4343 = vmatprep.subr.bf16.mxu0 (!%p164_p2), %v4342_v9  ;;  %v3380_v20 = vld [vmem:[%s6709_s1 + $0x1b8] sm:$0xff] (!%p164_p2)  ;;  %v4348_v21 = vpack.c.bf16 (!%p164_p2), %v3362_v18, %v3361_v17  ;;  %v3363_v23 = vld [vmem:[%s6709_s1 + $0x130] sm:$0xff] (!%p164_p2) }
   0xc   : > { %225 = vst.msk [vmem:[#allocation2 + $0x50] ss:$8 sm:$0x3] (!%p164_p2), %vm223_vm0, %v4681_v13  ;;  %228 = vst.msk [vmem:[#allocation2 + $0xa0] ss:$8 sm:$0x3] (!%p164_p2), %vm223_vm0, %v4681_v13  ;;  %v4350_v22 = vpack.c.bf16 (!%p164_p2), %v3380_v20, %v3379_v19 }
   0xd   : > { %231 = vst.msk [vmem:[#allocation2 + $0xf0] ss:$8 sm:$0x3] (!%p164_p2), %vm223_vm0, %v4681_v13  ;;  %234 = vst.msk [vmem:[#allocation2 + $0x140] ss:$8 sm:$0x3] (!%p164_p2), %vm223_vm0, %v4681_v13 }
   0xe   : > { %s6714_s18 = smov (!%p189_p3, %s3348_s18), 1  ;;  %237 = vst.msk [vmem:[#allocation2 + $0x91] ss:$8 sm:$0x3] %vm223_vm0, %v4681_v13  ;;  %4635 = vmatpush3.bf16.msra.mxu1 %v4344_v15  ;;  %4345 = vmatpush3.bf16.msra.mxu0 %v4344_v15  ;;  %v3364_v24 = vld [vmem:[%s6709_s1 + $0x138] sm:$0xff]  ;;  %v3381_v25 = vld [vmem:[%s6709_s1 + $0x1c0] sm:$0xff] }
   0xf   : > { %s3616_s12 = sshll.u32 %s6714_s18, 8  ;;  %240 = vst.msk [vmem:[#allocation2 + $0xe1] ss:$8 sm:$0x3] %vm223_vm0, %v4681_v13  ;;  %4628 = vmatprep.subr.bf16.mxu1 %v4346_v16  ;;  %4347 = vmatprep.subr.bf16.mxu0 %v4346_v16  ;;  %v3382_v26 = vld [vmem:[%s6709_s1 + $0x1c8] sm:$0xff]  ;;  %v4352_v33 = vpack.c.bf16 %v3364_v24, %v3363_v23  ;;  %v3365_v38 = vld [vmem:[%s6709_s1 + $0x140] sm:$0xff] }
  0x10   : > { %243 = vst.msk [vmem:[#allocation2 + $0x131] ss:$8 sm:$0x3] %vm223_vm0, %v4681_v13  ;;  %246 = vst.msk [vmem:[#allocation2 + $0x181] ss:$8 sm:$0x3] %vm223_vm0, %v4681_v13  ;;  %s4782_s24 = scalar_lea.vmem %s6708_s0, %s3616_s12  ;;  %v4354_v37 = vpack.c.bf16 %v3382_v26, %v3381_v25 }
  0x11   : > { %v257_v27 = vld [vmem:[%s4782_s24 + $0x48] sm:$0xff]  ;;  %v259_v28 = vld [vmem:[%s4782_s24 + $0x58] sm:$0xff]  ;;  %v256_v30 = vld [vmem:[%s4782_s24 + $0x40] sm:$0xff]  ;;  %s3617_s11 = sshll.u32 %s6714_s18, 7 }
  0x12   : > { %v328_v29 = vrot.slane %v257_v27, 7  ;;  %v258_v31 = vld [vmem:[%s4782_s24 + $0x50] sm:$0xff]  ;;  %4636 = vmatpush3.bf16.msra.mxu1 %v4348_v21  ;;  %4349 = vmatpush3.bf16.msra.mxu0 %v4348_v21  ;;  %v331_v34 = vrot.slane %v259_v28, 7  ;;  %v327_v35 = vrot.slane %v256_v30, 7  ;;  %v3366_v39 = vld [vmem:[%s6709_s1 + $0x148] sm:$0xff]  ;;  %v3384_v42 = vld [vmem:[%s6709_s1 + $0x1d8] sm:$0xff]  ;;  %s6642_s14 = scalar_lea.vmem %s6712_s4, %s3617_s11 }
  0x13   : > { %v329_v36 = vrot.slane %v258_v31, 7  ;;  %4629 = vmatprep.subr.bf16.mxu1 %v4350_v22  ;;  %4351 = vmatprep.subr.bf16.mxu0 %v4350_v22  ;;  %v514_v40 = vld [vmem:[#allocation2 + $0x8] sm:$0xfe]  ;;  %v3383_v41 = vld [vmem:[%s6709_s1 + $0x1d0] sm:$0xff]  ;;  %v260_v47 = vld [vmem:[%s4782_s24 + $0x60] sm:$0xff]  ;;  %v4356_v48 = vpack.c.bf16 %v3366_v39, %v3365_v38 }
  0x14   : > { %420 = vst [vmem:[#allocation2 + $0xa8] sm:$0xfe] %v328_v29  ;;  %v4816_v43 = vsel %vm312_vm1, %v328_v29, %v331_v34  ;;  %419 = vst [vmem:[#allocation2 + $0xa0] sm:$0xfe] %v327_v35  ;;  %v573_v45 = vrot.slane %v514_v40, 1  ;;  %v261_v46 = vld [vmem:[%s4782_s24 + $0x68] sm:$0xff]  ;;  %v4358_v52 = vpack.c.bf16 %v3384_v42, %v3383_v41 }
  0x15   : > { %v4819_v44 = vsel %vm312_vm1, %v327_v35, %v329_v36  ;;  %422 = vst [vmem:[#allocation2 + $0xb8] sm:$0xff] %v4816_v43  ;;  %v335_v50 = vrot.slane %v261_v46, 7  ;;  %v333_v51 = vrot.slane %v260_v47, 7  ;;  %v3367_v53 = vld [vmem:[%s6709_s1 + $0x150] sm:$0xff]  ;;  %v3368_v54 = vld [vmem:[%s6709_s1 + $0x158] sm:$0xff]  ;;  %v3385_v55 = vld [vmem:[%s6709_s1 + $0x1e0] sm:$0xff] }
  0x16   : > { %421 = vst [vmem:[#allocation2 + $0xb0] sm:$0xff] %v4819_v44  ;;  %4637 = vmatpush3.bf16.msra.mxu1 %v4352_v33  ;;  %4353 = vmatpush3.bf16.msra.mxu0 %v4352_v33  ;;  %v575_v49 = vsel %vm569_vm2, %v573_v45, %v4801_v32  ;;  %v3386_v56 = vld [vmem:[%s6709_s1 + $0x1e8] sm:$0xff]  ;;  %v263_v59 = vld [vmem:[%s4782_s24 + $0x78] sm:$0xff]  ;;  %v610_v60 = vrot.slane %v4816_v43, 1  ;;  %v262_v62 = vld [vmem:[%s4782_s24 + $0x70] sm:$0xff]  ;;  %v4360_v63 = vpack.c.bf16 %v3368_v54, %v3367_v53  ;;  %v607_v42 = vrot.slane %v4819_v44, 1 }
  0x17   : > { %4630 = vmatprep.subr.bf16.mxu1 %v4354_v37  ;;  %4355 = vmatprep.subr.bf16.mxu0 %v4354_v37  ;;  %v4840_v57 = vsel %vm312_vm1, %v331_v34, %v335_v50  ;;  %v4843_v58 = vsel %vm312_vm1, %v329_v36, %v333_v51  ;;  %v339_v61 = vrot.slane %v263_v59, 7  ;;  %v337_v1 = vrot.slane %v262_v62, 7  ;;  %v3369_v3 = vld [vmem:[%s6709_s1 + $0x160] sm:$0xff]  ;;  %v3370_v4 = vld [vmem:[%s6709_s1 + $0x168] sm:$0xff]  ;;  %v3387_v7 = vld [vmem:[%s6709_s1 + $0x1f0] sm:$0xff] }
  0x18   : > { %771 = vmatprep.mubr.f32.mxu0 %v575_v49  ;;  %424 = vst [vmem:[#allocation2 + $0xc8] sm:$0xff] %v4840_v57  ;;  %423 = vst [vmem:[#allocation2 + $0xc0] sm:$0xff] %v4843_v58  ;;  %v4362_v2 = vpack.c.bf16 %v3386_v56, %v3385_v55  ;;  %v3388_v8 = vld [vmem:[%s6709_s1 + $0x1f8] sm:$0xff]  ;;  %v3371_v9 = vld [vmem:[%s6709_s1 + $0x170] sm:$0xff]  ;;  %v4364_v16 = vpack.c.bf16 %v3370_v4, %v3369_v3 }
  0x19   : > { %v4857_v6 = vsel %vm312_vm1, %v335_v50, %v339_v61  ;;  %428 = vst [vmem:[#allocation2 + $0xe8] sm:$0x1] %v339_v61  ;;  %v4870_v10 = vsel %vm312_vm1, %v333_v51, %v337_v1  ;;  %427 = vst [vmem:[#allocation2 + $0xe0] sm:$0x1] %v337_v1  ;;  %v3372_v11 = vld [vmem:[%s6709_s1 + $0x178] sm:$0xff]  ;;  %v4881_v14 = vld [vmem:[%s6709_s1 + $0x80] sm:$0xff]  ;;  %v4366_v20 = vpack.c.bf16 %v3388_v8, %v3387_v7 }
  0x1a   : > { %4638 = vmatpush3.bf16.msra.mxu1 %v4356_v48  ;;  %4357 = vmatpush3.bf16.msra.mxu0 %v4356_v48  ;;  %426 = vst [vmem:[#allocation2 + $0xd8] sm:$0xff] %v4857_v6  ;;  %v4886_v15 = vld [vmem:[%s6709_s1 + $0x88] sm:$0xff]  ;;  %425 = vst [vmem:[#allocation2 + $0xd0] sm:$0xff] %v4870_v10  ;;  %v513_v17 = vld [vmem:[#allocation2] sm:$0xfe]  ;;  %v4368_v34 = vpack.c.bf16 %v3372_v11, %v3371_v9  ;;  %v614_v50 = vrot.slane %v4840_v57, 1 }
  0x1b   : > { %v522_v0 = vld [vmem:[#allocation2 + $0xa8] sm:$0xfe]  ;;  %4631 = vmatprep.subr.bf16.mxu1 %v4358_v52  ;;  %4359 = vmatprep.subr.bf16.mxu0 %v4358_v52  ;;  %v4892_v18 = vld [vmem:[%s6709_s1 + $0x280] sm:$0xff]  ;;  %v4921_v27 = vld [vmem:[%s4782_s24 + $0x98] sm:$0xff]  ;;  %v4370_v35 = vpack.c.bf16 %v4886_v15, %v4881_v14  ;;  %v570_v36 = vrot.slane %v513_v17, 1  ;;  %v612_v61 = vrot.slane %v4843_v58, 1 }
  0x1c   : > { %v609_v5 = vrot.slane %v522_v0, 1  ;;  %v4897_v19 = vld [vmem:[%s6709_s1 + $0x288] sm:$0xff]  ;;  %v521_v21 = vld [vmem:[#allocation2 + $0xa0] sm:$0xfe]  ;;  %v4926_v28 = vld [vmem:[%s6709_s1 + $0x90] sm:$0xff]  ;;  %v345_v31 = vrot.slane %v4921_v27, 7 }
  0x1d   : > { %v4902_v22 = vld [vmem:[%s6709_s1] sm:$0xff]  ;;  %v4907_v23 = vld [vmem:[%s6709_s1 + $0x8] sm:$0xff]  ;;  %v4931_v29 = vld [vmem:[%s6709_s1 + $0x98] sm:$0xff]  ;;  %v606_v41 = vrot.slane %v521_v21, 1  ;;  %v4402_v44 = vpack.c.bf16 %v4897_v19, %v4892_v18  ;;  %v618_v21 = vrot.slane %v4857_v6, 1 }
  0x1e   : > { %v611_v12 = vsel %vm569_vm2, %v609_v5, %v610_v60  ;;  %4639 = vmatpush3.bf16.msra.mxu1 %v4360_v63  ;;  %4361 = vmatpush3.bf16.msra.mxu0 %v4360_v63  ;;  %v4912_v24 = vld [vmem:[%s6709_s1 + $0x200] sm:$0xff]  ;;  %v4917_v25 = vld [vmem:[%s6709_s1 + $0x208] sm:$0xff]  ;;  %v4940_v37 = vld [vmem:[%s6709_s1 + $0x10] sm:$0xff]  ;;  %v4372_v56 = vpack.c.bf16 %v4907_v23, %v4902_v22  ;;  %v4374_v3 = vpack.c.bf16 %v4931_v29, %v4926_v28 }
  0x1f   : > { %4632 = vmatprep.subr.bf16.mxu1 %v4362_v2  ;;  %4363 = vmatprep.subr.bf16.mxu0 %v4362_v2  ;;  %v265_v26 = vld [vmem:[%s4782_s24 + $0x88] sm:$0xff]  ;;  %v264_v33 = vld [vmem:[%s4782_s24 + $0x80] sm:$0xff]  ;;  %v4945_v38 = vld [vmem:[%s6709_s1 + $0x18] sm:$0xff]  ;;  %v4404_v59 = vpack.c.bf16 %v4917_v25, %v4912_v24  ;;  %v572_v2 = vsel %vm569_vm2, %v570_v36, %v4801_v32 }
  0x20   : > { %811 = vmatprep.mubr.f32.mxu1 %v611_v12  ;;  %v342_v30 = vrot.slane %v265_v26, 7  ;;  %v4948_v39 = vld [vmem:[%s4782_s24 + $0x90] sm:$0xff]  ;;  %v341_v40 = vrot.slane %v264_v33, 7  ;;  %v249_v48 = vld [vmem:[%s4782_s24 + $0x8] sm:$0xff]  ;;  %v4964_v49 = vld [vmem:[%s4782_s24 + $0x18] sm:$0xff]  ;;  %v4376_v4 = vpack.c.bf16 %v4945_v38, %v4940_v37  ;;  %v608_v12 = vsel %vm569_vm2, %v606_v41, %v607_v42 }
  0x21   : > { %v4954_v45 = vld [vmem:[%s6709_s1 + $0x290] sm:$0xff]  ;;  %v343_v47 = vrot.slane %v4948_v39, 7  ;;  %v4972_v51 = vld [vmem:[%s6709_s1 + $0x298] sm:$0xff]  ;;  %v314_v54 = vrot.slane %v249_v48, 7  ;;  %v317_v55 = vrot.slane %v4964_v49, 7  ;;  %v4994_v62 = vld [vmem:[%s6709_s1 + $0xa0] sm:$0xff] }
  0x22   : > { %4640 = vmatpush3.bf16.msra.mxu1 %v4364_v16  ;;  %4365 = vmatpush3.bf16.msra.mxu0 %v4364_v16  ;;  %v4959_v46 = vsel %vm312_vm1, %v342_v30, %v345_v31  ;;  %430 = vst [vmem:[#allocation2 + $0xf8] sm:$0xfe] %v342_v30  ;;  %v4977_v52 = vld [vmem:[%s6709_s1 + $0x210] sm:$0xff]  ;;  %v4982_v53 = vld [vmem:[%s6709_s1 + $0x218] sm:$0xff]  ;;  %429 = vst [vmem:[#allocation2 + $0xf0] sm:$0xfe] %v341_v40  ;;  %v4406_v14 = vpack.c.bf16 %v4972_v51, %v4954_v45 }
  0x23   : > { %4633 = vmatprep.subr.bf16.mxu1 %v4366_v20  ;;  %4367 = vmatprep.subr.bf16.mxu0 %v4366_v20  ;;  %432 = vst [vmem:[#allocation2 + $0x108] sm:$0xff] %v4959_v46  ;;  %v4999_v63 = vld [vmem:[%s6709_s1 + $0xa8] sm:$0xff]  ;;  %v5004_v0 = vsel %vm312_vm1, %v341_v40, %v343_v47  ;;  %v248_v1 = vld [vmem:[%s4782_s24] sm:$0xff]  ;;  %v5032_v9 = vsel %vm312_vm1, %v314_v54, %v317_v55  ;;  %410 = vst [vmem:[#allocation2 + $0x58] sm:$0xfe] %v314_v54  ;;  %v616_v40 = vrot.slane %v4870_v10, 1 }
  0x24   : > { %v5016_v5 = vld [vmem:[%s6709_s1 + $0x20] sm:$0xff]  ;;  %v5021_v7 = vld [vmem:[%s6709_s1 + $0x28] sm:$0xff]  ;;  %431 = vst [vmem:[#allocation2 + $0x100] sm:$0xff] %v5004_v0  ;;  %v5035_v11 = vld [vmem:[%s4782_s24 + $0x10] sm:$0xff]  ;;  %v313_v17 = vrot.slane %v248_v1, 7  ;;  %v615_v20 = vsel %vm569_vm2, %v610_v60, %v614_v50  ;;  %v4408_v22 = vpack.c.bf16 %v4982_v53, %v4977_v52  ;;  %v613_v60 = vsel %vm569_vm2, %v607_v42, %v612_v61 }
  0x25   : > { %v5026_v8 = vld [vmem:[%s6709_s1 + $0x2a0] sm:$0xff]  ;;  %v5043_v15 = vld [vmem:[%s6709_s1 + $0x2a8] sm:$0xff]  ;;  %412 = vst [vmem:[#allocation2 + $0x68] sm:$0xff] %v5032_v9  ;;  %v315_v18 = vrot.slane %v5035_v11, 7  ;;  %v4378_v29 = vpack.c.bf16 %v4999_v63, %v4994_v62  ;;  %v5094_v41 = vld [vmem:[%s6709_s1 + $0xb0] sm:$0xff]  ;;  %v4380_v54 = vpack.c.bf16 %v5021_v7, %v5016_v5  ;;  %v619_v11 = vsel %vm569_vm2, %v614_v50, %v618_v21 }
  0x26   : > { %4641 = vmatpush3.bf16.msra.mxu1 %v4368_v34  ;;  %4369 = vmatpush3.bf16.msra.mxu0 %v4368_v34  ;;  %v5045_v16 = vld [vmem:[#allocation2 + $0x48] sm:$0x1]  ;;  %v5063_v23 = vld [vmem:[%s6709_s1 + $0x220] sm:$0xff]  ;;  %409 = vst [vmem:[#allocation2 + $0x50] sm:$0xfe] %v313_v17  ;;  %v5099_v42 = vld [vmem:[%s6709_s1 + $0xb8] sm:$0xff]  ;;  %v4410_v1 = vpack.c.bf16 %v5043_v15, %v5026_v8 }
  0x27   : > { %v5050_v19 = vld [vmem:[%s4782_s24 + $0xa8] sm:$0xff]  ;;  %4371 = vmatprep.subr.bf16.mxu1 %v4370_v35  ;;  %4403 = vmatprep.subr.bf16.mxu0 %v4402_v44  ;;  %v5072_v43 = vld [vmem:[%s4782_s24 + $0xa0] sm:$0xff]  ;;  %v5084_v34 = vsel %vm312_vm1, %v313_v17, %v315_v18  ;;  %v586_v45 = vrot.slane %v5045_v16, 1  ;;  %v5121_v27 = vld [vmem:[%s6709_s1 + $0x30] sm:$0xff]  ;;  %v4382_v50 = vpack.c.bf16 %v5099_v42, %v5094_v41  ;;  %v628_v17 = vrot.slane %v4959_v46, 1 }
  0x28   : > { %v5068_v26 = vld [vmem:[%s6709_s1 + $0x228] sm:$0xff]  ;;  %v349_v28 = vrot.slane %v5050_v19, 7  ;;  %v5081_v33 = vld [vmem:[#allocation2 + $0x40] sm:$0x1]  ;;  %v347_v35 = vrot.slane %v5072_v43, 7  ;;  %411 = vst [vmem:[#allocation2 + $0x60] sm:$0xff] %v5084_v34 }
  0x29   : > { %v5079_v30 = vld [vmem:[#allocation2 + $0xe8] sm:$0x1]  ;;  %812 = vmatmul.mubr.f32.vlgmr.msra.gmra.mrb[0].mxu1 %v608_v12  ;;  %772 = vmatmul.mubr.f32.vlgmr.msra.gmra.mrb[0].mxu0 %v572_v2  ;;  %v5112_v51 = vld [vmem:[%s4782_s24 + $0x20] sm:$0xff]  ;;  %v5157_v15 = vld [vmem:[%s6709_s1 + $0x2b8] sm:$0xff]  ;;  %v4412_v25 = vpack.c.bf16 %v5068_v26, %v5063_v23  ;;  %v625_v53 = vrot.slane %v5004_v0, 1 }
  0x2a   : > { %v5088_v36 = vld [vmem:[%s4782_s24 + $0x28] sm:$0xff]  ;;  %v5108_v48 = vsel %vm312_vm1, %v345_v31, %v349_v28  ;;  %4373 = vmatpush3.bf16.msra.mxu1 %v4372_v56  ;;  %816 = vmatprep.mubr.f32.mxu1 %v615_v20  ;;  %v5126_v31 = vld [vmem:[%s6709_s1 + $0x38] sm:$0xff]  ;;  %v5131_v56 = vld [vmem:[%s6709_s1 + $0x2b0] sm:$0xff]  ;;  %v5139_v2 = vsel %vm312_vm1, %v343_v47, %v347_v35  ;;  %v319_v8 = vrot.slane %v5112_v51, 7  ;;  %v622_v12 = vrot.slane %v5079_v30, 1 }
  0x2b   : > { %v321_v44 = vrot.slane %v5088_v36, 7  ;;  %434 = vst [vmem:[#allocation2 + $0x118] sm:$0xff] %v5108_v48  ;;  %4405 = vmatpush3.bf16.msra.mxu0 %v4404_v59  ;;  %4375 = vmatprep.subr.bf16.mxu1 %v4374_v3  ;;  %v5151_v39 = vld [vmem:[#allocation2 + $0xe0] sm:$0x1]  ;;  %v584_v47 = vrot.slane %v5081_v33, 1  ;;  %433 = vst [vmem:[#allocation2 + $0x110] sm:$0xff] %v5139_v2  ;;  %v617_v3 = vsel %vm569_vm2, %v612_v61, %v616_v40 }
  0x2c   : > { %v271_v24 = vld [vmem:[%s4782_s24 + $0xb8] sm:$0xff]  ;;  %776 = vmatprep.mubr.f32.mxu0 %v4801_v32  ;;  %4407 = vmatprep.subr.bf16.mxu0 %v4406_v14  ;;  %v5179_v49 = vsel %vm312_vm1, %v315_v18, %v319_v8  ;;  %v587_v14 = vsel %vm569_vm2, %v4801_v32, %v586_v45  ;;  %v4384_v16 = vpack.c.bf16 %v5126_v31, %v5121_v27  ;;  %v5196_v18 = vld [vmem:[%s6709_s1 + $0x230] sm:$0xff]  ;;  %v620_v20 = vrot.slane %v5151_v39, 1  ;;  %v505_v6 = vld [vmem:[%s6709_s1 + $0xc0] sm:$0xff] }
  0x2d   : > { %v5165_v57 = vsel %vm312_vm1, %v317_v55, %v321_v44  ;;  %v5173_v59 = vld [vmem:[#allocation2 + $0xf8] sm:$0xfe]  ;;  %v270_v55 = vld [vmem:[%s4782_s24 + $0xb0] sm:$0xff]  ;;  %817 = vmatmul.mubr.f32.gmra.mrb[2].mxu1 %v613_v60  ;;  %777 = vmatmul.mubr.f32.gmra.mrb[2].mxu0 %v4801_v32  ;;  %413 = vst [vmem:[#allocation2 + $0x70] sm:$0xff] %v5179_v49  ;;  %v4414_v23 = vpack.c.bf16 %v5157_v15, %v5131_v56  ;;  %v353_v60 = vrot.slane %v271_v24, 7  ;;  %v506_v62 = vld [vmem:[%s6709_s1 + $0xc8] sm:$0xff] }
  0x2e   : > { %414 = vst [vmem:[#allocation2 + $0x78] sm:$0xff] %v5165_v57  ;;  %v5201_v58 = vld [vmem:[%s6709_s1 + $0x238] sm:$0xff]  ;;  %4377 = vmatpush3.bf16.msra.mxu1 %v4376_v4  ;;  %821 = vmatprep.mubr.f32.mxu1 %v619_v11  ;;  %v351_v30 = vrot.slane %v270_v55, 7  ;;  %v254_v33 = vld [vmem:[%s4782_s24 + $0x30] sm:$0xff]  ;;  %v623_v37 = vsel %vm569_vm2, %v618_v21, %v622_v12  ;;  %v585_v38 = vsel %vm569_vm2, %v4801_v32, %v584_v47  ;;  %v627_v4 = vrot.slane %v5173_v59, 1  ;;  %v3413_v19 = vld [vmem:[%s6709_s1 + $0x2c0] sm:$0xff] }
  0x2f   : > { %v255_v61 = vld [vmem:[%s4782_s24 + $0x38] sm:$0xff]  ;;  %4409 = vmatpush3.bf16.msra.mxu0 %v4408_v22  ;;  %4379 = vmatprep.subr.bf16.mxu1 %v4378_v29  ;;  %v525_v41 = vld [vmem:[#allocation2 + $0xf0] sm:$0xfe]  ;;  %v4416_v52 = vpack.c.bf16 %v5201_v58, %v5196_v18  ;;  %v5237_v63 = vsel %vm312_vm1, %v349_v28, %v353_v60  ;;  %438 = vst [vmem:[#allocation2 + $0x138] sm:$0x1] %v353_v60  ;;  %v5246_v29 = vrot.slane %v5032_v9, 1 }
  0x30   : > { %v518_v26 = vld [vmem:[#allocation2 + $0x58] sm:$0xfe]  ;;  %v517_v42 = vld [vmem:[#allocation2 + $0x50] sm:$0xfe]  ;;  %v325_v45 = vrot.slane %v255_v61, 7  ;;  %781 = vmatprep.mubr.f32.mxu0 %v4801_v32  ;;  %4411 = vmatprep.subr.bf16.mxu0 %v4410_v1  ;;  %v5242_v21 = vsel %vm312_vm1, %v347_v35, %v351_v30  ;;  %v3414_v28 = vld [vmem:[%s6709_s1 + $0x2c8] sm:$0xff]  ;;  %v621_v35 = vsel %vm569_vm2, %v616_v40, %v620_v20  ;;  %v629_v10 = vsel %vm569_vm2, %v627_v4, %v628_v17 }
  0x31   : > { %437 = vst [vmem:[#allocation2 + $0x130] sm:$0x1] %v351_v30  ;;  %822 = vmatmul.mubr.f32.gmra.mrb[4].mxu1 %v617_v3  ;;  %782 = vmatmul.mubr.f32.gmra.mrb[4].mxu0 %v4801_v32  ;;  %v591_v22 = vrot.slane %v518_v26, 1  ;;  %436 = vst [vmem:[#allocation2 + $0x128] sm:$0xff] %v5237_v63  ;;  %v323_v43 = vrot.slane %v254_v33, 7  ;;  %v624_v1 = vrot.slane %v525_v41, 1  ;;  %v4386_v5 = vpack.c.bf16 %v506_v62, %v505_v6 }
  0x32   : > { %435 = vst [vmem:[#allocation2 + $0x120] sm:$0xff] %v5242_v21  ;;  %v5259_v32 = vsel %vm312_vm1, %v321_v44, %v325_v45  ;;  %418 = vst [vmem:[#allocation2 + $0x98] sm:$0x1] %v325_v45  ;;  %4381 = vmatpush3.bf16.msra.mxu1 %v4380_v54  ;;  %826 = vmatprep.mubr.f32.mxu1 %v623_v37  ;;  %v489_v56 = vld [vmem:[%s6709_s1 + $0x40] sm:$0xff]  ;;  %v490_v36 = vld [vmem:[%s6709_s1 + $0x48] sm:$0xff]  ;;  %v588_v44 = vrot.slane %v517_v42, 1  ;;  %v4418_v12 = vpack.c.bf16 %v3414_v28, %v3413_v19 }
  0x33   : > { %v5274_v11 = vrot.slane %v5084_v34, 1  ;;  %416 = vst [vmem:[#allocation2 + $0x88] sm:$0xff] %v5259_v32  ;;  %4413 = vmatpush3.bf16.msra.mxu0 %v4412_v25  ;;  %4383 = vmatprep.subr.bf16.mxu1 %v4382_v50  ;;  %v632_v7 = vrot.slane %v5108_v48, 1  ;;  %v3397_v40 = vld [vmem:[%s6709_s1 + $0x240] sm:$0xff]  ;;  %v5287_v54 = vsel %vm312_vm1, %v319_v8, %v323_v43  ;;  %417 = vst [vmem:[#allocation2 + $0x90] sm:$0x1] %v323_v43 }
  0x34   : > { %786 = vmatprep.mubr.f32.mxu0 %v587_v14  ;;  %4415 = vmatprep.subr.bf16.mxu0 %v4414_v23  ;;  %v3398_v39 = vld [vmem:[%s6709_s1 + $0x248] sm:$0xff]  ;;  %v507_v47 = vld [vmem:[%s6709_s1 + $0xd0] sm:$0xff]  ;;  %v508_v15 = vld [vmem:[%s6709_s1 + $0xd8] sm:$0xff]  ;;  %415 = vst [vmem:[#allocation2 + $0x80] sm:$0xff] %v5287_v54  ;;  %v593_v51 = vsel %vm569_vm2, %v591_v22, %v5246_v29  ;;  %v4388_v8 = vpack.c.bf16 %v490_v36, %v489_v56  ;;  %v596_v24 = vrot.slane %v5165_v57, 1  ;;  %v630_v3 = vrot.slane %v5139_v2, 1 }
  0x35   : > { %827 = vmatmul.mubr.f32.gmra.mrb[6].mxu1 %v621_v35  ;;  %787 = vmatmul.mubr.f32.gmra.mrb[6].mxu0 %v585_v38  ;;  %v3415_v25 = vld [vmem:[%s6709_s1 + $0x2d0] sm:$0xff]  ;;  %v3416_v50 = vld [vmem:[%s6709_s1 + $0x2d8] sm:$0xff]  ;;  %v626_v59 = vsel %vm569_vm2, %v624_v1, %v625_v53  ;;  %v590_v55 = vsel %vm569_vm2, %v588_v44, %v5274_v11  ;;  %v594_v27 = vrot.slane %v5179_v49, 1  ;;  %v633_v31 = vsel %vm569_vm2, %v628_v17, %v632_v7  ;;  %v509_v46 = vld [vmem:[%s6709_s1 + $0xe0] sm:$0xff] }
  0x36   : > { %4385 = vmatpush3.bf16.msra.mxu1 %v4384_v16  ;;  %831 = vmatprep.mubr.f32.mxu1 %v629_v10  ;;  %v491_v14 = vld [vmem:[%s6709_s1 + $0x50] sm:$0xff]  ;;  %v492_v18 = vld [vmem:[%s6709_s1 + $0x58] sm:$0xff]  ;;  %v4420_v16 = vpack.c.bf16 %v3398_v39, %v3397_v40  ;;  %v4390_v58 = vpack.c.bf16 %v508_v15, %v507_v47  ;;  %v636_v61 = vrot.slane %v5237_v63, 1  ;;  %v4422_v26 = vpack.c.bf16 %v3416_v50, %v3415_v25  ;;  %v510_v17 = vld [vmem:[%s6709_s1 + $0xe8] sm:$0xff] }
  0x37   : > { %4417 = vmatpush3.bf16.msra.mxu0 %v4416_v52  ;;  %4387 = vmatprep.subr.bf16.mxu1 %v4386_v5  ;;  %v3399_v20 = vld [vmem:[%s6709_s1 + $0x250] sm:$0xff]  ;;  %v3400_v23 = vld [vmem:[%s6709_s1 + $0x258] sm:$0xff]  ;;  %v5342_v30 = vsel %vm569_vm2, %v5246_v29, %v596_v24  ;;  %v4392_v33 = vpack.c.bf16 %v492_v18, %v491_v14  ;;  %v5345_v37 = vrot.slane %v5259_v32, 1  ;;  %v3417_v38 = vld [vmem:[%s6709_s1 + $0x2e0] sm:$0xff]  ;;  %v631_v41 = vsel %vm569_vm2, %v625_v53, %v630_v3 }
  0x38   : > { %791 = vmatprep.mubr.f32.mxu0 %v593_v51  ;;  %4419 = vmatprep.subr.bf16.mxu0 %v4418_v12  ;;  %v528_v60 = vld [vmem:[#allocation2 + $0x138] sm:$0x1]  ;;  %v3418_v4 = vld [vmem:[%s6709_s1 + $0x2e8] sm:$0xff]  ;;  %v5358_v42 = vsel %vm569_vm2, %v5274_v11, %v594_v27  ;;  %v634_v45 = vrot.slane %v5242_v21, 1  ;;  %v493_v52 = vld [vmem:[%s6709_s1 + $0x60] sm:$0xff]  ;;  %v5368_v62 = vrot.slane %v5287_v54, 1  ;;  %v637_v53 = vsel %vm569_vm2, %v632_v7, %v636_v61 }
  0x39   : > { %832 = vmatmul.mubr.f32.gmra.mrb[8].mxu1 %v626_v59  ;;  %792 = vmatmul.mubr.f32.gmra.mrb[8].mxu0 %v590_v55  ;;  %v494_v6 = vld [vmem:[%s6709_s1 + $0x68] sm:$0xff]  ;;  %v520_v0 = vld [vmem:[#allocation2 + $0x98] sm:$0x1]  ;;  %v4424_v22 = vpack.c.bf16 %v3400_v23, %v3399_v20  ;;  %v4394_v19 = vpack.c.bf16 %v510_v17, %v509_v46  ;;  %v640_v28 = vrot.slane %v528_v60, 1  ;;  %v3401_v43 = vld [vmem:[%s6709_s1 + $0x260] sm:$0xff]  ;;  %v4426_v56 = vpack.c.bf16 %v3418_v4, %v3417_v38 }
  0x3a   : > { %4389 = vmatpush3.bf16.msra.mxu1 %v4388_v8  ;;  %836 = vmatprep.mubr.f32.mxu1 %v633_v31  ;;  %v527_v35 = vld [vmem:[#allocation2 + $0x130] sm:$0x1]  ;;  %v3402_v36 = vld [vmem:[%s6709_s1 + $0x268] sm:$0xff]  ;;  %v512_v10 = vld [vmem:[%s6709_s1 + $0xf8] sm:$0xff]  ;;  %v5387_v5 = vsel %vm569_vm2, %v596_v24, %v5345_v37  ;;  %v4396_v7 = vpack.c.bf16 %v494_v6, %v493_v52  ;;  %v604_v40 = vrot.slane %v520_v0, 1  ;;  %v635_v47 = vsel %vm569_vm2, %v630_v3, %v634_v45 }
  0x3b   : > { %4421 = vmatpush3.bf16.msra.mxu0 %v4420_v16  ;;  %4391 = vmatprep.subr.bf16.mxu1 %v4390_v58  ;;  %v519_v1 = vld [vmem:[#allocation2 + $0x90] sm:$0x1]  ;;  %v3420_v39 = vld [vmem:[%s6709_s1 + $0x2f8] sm:$0xff]  ;;  %v5398_v15 = vsel %vm569_vm2, %v594_v27, %v5368_v62  ;;  %v638_v51 = vrot.slane %v527_v35, 1  ;;  %v998_v25 = vld [vmem:[#allocation2 + $0x8] sm:$0xfc]  ;;  %v641_v50 = vsel %vm569_vm2, %v636_v61, %v640_v28  ;;  %v4428_v59 = vpack.c.bf16 %v3402_v36, %v3401_v43 }
  0x3c   : > { %796 = vmatprep.mubr.f32.mxu0 %v5342_v30  ;;  %4423 = vmatprep.subr.bf16.mxu0 %v4422_v26  ;;  %v511_v44 = vld [vmem:[%s6709_s1 + $0xf0] sm:$0xff]  ;;  %v602_v24 = vrot.slane %v519_v1, 1  ;;  %v496_v3 = vld [vmem:[%s6709_s1 + $0x78] sm:$0xff]  ;;  %v3437_v31 = vld [vmem:[%s6709_s1 + $0x380] sm:$0xff]  ;;  %v605_v61 = vsel %vm569_vm2, %v5345_v37, %v604_v40  ;;  %v1033_v20 = vrot.slane %v998_v25, 2  ;;  %v5424_v23 = vrot.slane %v4681_v13, 2 }
  0x3d   : > { %837 = vmatmul.mubr.f32.gmra.mrb[10].mxu1 %v631_v41  ;;  %797 = vmatmul.mubr.f32.gmra.mrb[10].mxu0 %v5358_v42  ;;  %v3419_v12 = vld [vmem:[%s6709_s1 + $0x2f0] sm:$0xff]  ;;  %v4398_v55 = vpack.c.bf16 %v512_v10, %v511_v44  ;;  %v3404_v18 = vld [vmem:[%s6709_s1 + $0x278] sm:$0xff]  ;;  %v3438_v16 = vld [vmem:[%s6709_s1 + $0x388] sm:$0xff]  ;;  %v639_v17 = vsel %vm569_vm2, %v634_v45, %v638_v51 }
  0x3e   : > { %4393 = vmatpush3.bf16.msra.mxu1 %v4392_v33  ;;  %841 = vmatprep.mubr.f32.mxu1 %v637_v53  ;;  %v495_v8 = vld [vmem:[%s6709_s1 + $0x70] sm:$0xff]  ;;  %v4430_v27 = vpack.c.bf16 %v3420_v39, %v3419_v12  ;;  %v997_v58 = vld [vmem:[#allocation2] sm:$0xfc]  ;;  %v3470_v46 = vld [vmem:[%s6709_s1 + $0x488] sm:$0xff]  ;;  %v603_v33 = vsel %vm569_vm2, %v5368_v62, %v602_v24  ;;  %v4434_v4 = vpack.c.bf16 %v3438_v16, %v3437_v31 }
  0x3f   : > { %4425 = vmatpush3.bf16.msra.mxu0 %v4424_v22  ;;  %4395 = vmatprep.subr.bf16.mxu1 %v4394_v19  ;;  %v3403_v14 = vld [vmem:[%s6709_s1 + $0x270] sm:$0xff]  ;;  %v3469_v26 = vld [vmem:[%s6709_s1 + $0x480] sm:$0xff]  ;;  %v4400_v60 = vpack.c.bf16 %v496_v3, %v495_v8  ;;  %v3422_v52 = vld [vmem:[%s6709_s1 + $0x308] sm:$0xff]  ;;  %v1030_v6 = vrot.slane %v997_v58, 2  ;;  %v1035_v22 = vsel %vm1029_vm3, %v1033_v20, %v5424_v23 }
  0x40   : > { %801 = vmatprep.mubr.f32.mxu0 %v5387_v5  ;;  %4427 = vmatprep.subr.bf16.mxu0 %v4426_v56  ;;  %v4432_v38 = vpack.c.bf16 %v3404_v18, %v3403_v14  ;;  %v3421_v41 = vld [vmem:[%s6709_s1 + $0x300] sm:$0xff]  ;;  %v4466_v45 = vpack.c.bf16 %v3470_v46, %v3469_v26  ;;  %v3454_v53 = vld [vmem:[%s6709_s1 + $0x408] sm:$0xff]  ;;  %v3439_v19 = vld [vmem:[%s6709_s1 + $0x390] sm:$0xff] }
  0x41   : > { %842 = vmatmul.mubr.f32.gmra.mrb[12].mxu1 %v635_v47  ;;  %802 = vmatmul.mubr.f32.gmra.mrb[12].mxu0 %v5398_v15  ;;  %v3453_v0 = vld [vmem:[%s6709_s1 + $0x400] sm:$0xff]  ;;  %v3440_v28 = vld [vmem:[%s6709_s1 + $0x398] sm:$0xff]  ;;  %v4436_v43 = vpack.c.bf16 %v3422_v52, %v3421_v41  ;;  %v3471_v35 = vld [vmem:[%s6709_s1 + $0x490] sm:$0xff]  ;;  %v1032_v56 = vsel %vm1029_vm3, %v1030_v6, %v5424_v23 }
  0x42   : > { %4397 = vmatpush3.bf16.msra.mxu1 %v4396_v7  ;;  %846 = vmatprep.mubr.f32.mxu1 %v641_v50  ;;  %v3472_v1 = vld [vmem:[%s6709_s1 + $0x498] sm:$0xff]  ;;  %v4468_v36 = vpack.c.bf16 %v3454_v53, %v3453_v0  ;;  %v3423_v44 = vld [vmem:[%s6709_s1 + $0x310] sm:$0xff]  ;;  %v4438_v10 = vpack.c.bf16 %v3440_v28, %v3439_v19  ;;  %v1000_v47 = vld [vmem:[#allocation2 + $0x48] sm:$0x3] }
  0x43   : > { %4429 = vmatpush3.bf16.msra.mxu0 %v4428_v59  ;;  %4399 = vmatprep.subr.bf16.mxu1 %v4398_v55  ;;  %v3424_v7 = vld [vmem:[%s6709_s1 + $0x318] sm:$0xff]  ;;  %v3455_v40 = vld [vmem:[%s6709_s1 + $0x410] sm:$0xff]  ;;  %v4470_v39 = vpack.c.bf16 %v3472_v1, %v3471_v35  ;;  %v3441_v51 = vld [vmem:[%s6709_s1 + $0x3a0] sm:$0xff]  ;;  %v1046_v14 = vrot.slane %v1000_v47, 2 }
  0x44   : > { %806 = vmatprep.mubr.f32.mxu0 %v605_v61  ;;  %4431 = vmatprep.subr.bf16.mxu0 %v4430_v27  ;;  %v3456_v12 = vld [vmem:[%s6709_s1 + $0x418] sm:$0xff]  ;;  %v3442_v8 = vld [vmem:[%s6709_s1 + $0x3a8] sm:$0xff]  ;;  %v3473_v24 = vld [vmem:[%s6709_s1 + $0x4a0] sm:$0xff]  ;;  %v4440_v50 = vpack.c.bf16 %v3424_v7, %v3423_v44  ;;  %v1049_v7 = vrot.slane %v5084_v34, 2 }
  0x45   : > { %847 = vmatmul.mubr.f32.gmra.mrb[14].mxu1 %v639_v17  ;;  %807 = vmatmul.mubr.f32.gmra.mrb[14].mxu0 %v603_v33  ;;  %v3474_v25 = vld [vmem:[%s6709_s1 + $0x4a8] sm:$0xff]  ;;  %v999_v59 = vld [vmem:[#allocation2 + $0x40] sm:$0x3]  ;;  %v1002_v55 = vld [vmem:[#allocation2 + $0x58] sm:$0xfc]  ;;  %v4472_v3 = vpack.c.bf16 %v3456_v12, %v3455_v40  ;;  %v4442_v18 = vpack.c.bf16 %v3442_v8, %v3441_v51  ;;  %v1052_v33 = vrot.slane %v5032_v9, 2 }
  0x46   : > { %4401 = vmatpush3.bf16.msra.mxu1 %v4400_v60  ;;  %916 = vmatprep.mubr.f32.mxu1 %v4681_v13  ;;  %v3425_v27 = vld [vmem:[%s6709_s1 + $0x320] sm:$0xff]  ;;  %v3426_v31 = vld [vmem:[%s6709_s1 + $0x328] sm:$0xff]  ;;  %v4474_v58 = vpack.c.bf16 %v3474_v25, %v3473_v24  ;;  %v3443_v20 = vld [vmem:[%s6709_s1 + $0x3b0] sm:$0xff]  ;;  %v1044_v60 = vrot.slane %v999_v59, 2  ;;  %v1051_v41 = vrot.slane %v1002_v55, 2 }
  0x47   : > { %4433 = vmatpush3.bf16.msra.mxu0 %v4432_v38  ;;  %4435 = vmatprep.subr.bf16.mxu1 %v4434_v4  ;;  %v3457_v16 = vld [vmem:[%s6709_s1 + $0x420] sm:$0xff]  ;;  %v3458_v61 = vld [vmem:[%s6709_s1 + $0x428] sm:$0xff]  ;;  %v3444_v26 = vld [vmem:[%s6709_s1 + $0x3b8] sm:$0xff]  ;;  %v4444_v38 = vpack.c.bf16 %v3426_v31, %v3425_v27  ;;  %v1054_v31 = vrot.slane %v5179_v49, 2 }
  0x48   : > { %1231 = vmatprep.mubr.f32.mxu0 %v1035_v22  ;;  %4467 = vmatprep.subr.bf16.mxu0 %v4466_v45  ;;  %v3475_v46 = vld [vmem:[%s6709_s1 + $0x4b0] sm:$0xff]  ;;  %v3476_v17 = vld [vmem:[%s6709_s1 + $0x4b8] sm:$0xff]  ;;  %v4476_v52 = vpack.c.bf16 %v3458_v61, %v3457_v16  ;;  %v4446_v6 = vpack.c.bf16 %v3444_v26, %v3443_v20  ;;  %v4651_v22 = vld [vmem:[#allocation2 + $0x8] sm:$0xff]  ;;  %v1053_v12 = vsel %vm1029_vm3, %v1051_v41, %v1052_v33  ;;  %v1060_v20 = vrot.slane %v5259_v32, 2 }
  0x49   : > { %917 = vmatmul.mubr.f32.vlgmr.msra.gmra.mrb[16].mxu1 %v4681_v13  ;;  %v1001_v4 = vld [vmem:[#allocation2 + $0x50] sm:$0xfc]  ;;  %v3428_v0 = vld [vmem:[%s6709_s1 + $0x338] sm:$0xff]  ;;  %v4478_v19 = vpack.c.bf16 %v3476_v17, %v3475_v46  ;;  %v3446_v35 = vld [vmem:[%s6709_s1 + $0x3c8] sm:$0xff] }
  0x4a   : > { %4437 = vmatpush3.bf16.msra.mxu1 %v4436_v43  ;;  %1232 = vmatmul.mubr.f32.vlgmr.msra.gmra.mrb[16].mxu0 %v1032_v56  ;;  %v3427_v45 = vld [vmem:[%s6709_s1 + $0x330] sm:$0xff]  ;;  %v3460_v28 = vld [vmem:[%s6709_s1 + $0x438] sm:$0xff]  ;;  %v3445_v43 = vld [vmem:[%s6709_s1 + $0x3c0] sm:$0xff] }
  0x4b   : > { %921 = vmatprep.mubr.f32.mxu1 %v4681_v13  ;;  %4469 = vmatpush3.bf16.msra.mxu0 %v4468_v36  ;;  %v3459_v53 = vld [vmem:[%s6709_s1 + $0x430] sm:$0xff]  ;;  %v3477_v1 = vld [vmem:[%s6709_s1 + $0x4c0] sm:$0xff]  ;;  %v3478_v56 = vld [vmem:[%s6709_s1 + $0x4c8] sm:$0xff]  ;;  %v1045_v36 = vsel %vm1029_vm3, %v5424_v23, %v1044_v60  ;;  %v4448_v40 = vpack.c.bf16 %v3428_v0, %v3427_v45  ;;  %v4450_v51 = vpack.c.bf16 %v3446_v35, %v3445_v43  ;;  %v1058_v0 = vrot.slane %v5287_v54, 2 }
  0x4c   : > { %1236 = vmatprep.mubr.f32.mxu0 %v5424_v23  ;;  %4439 = vmatprep.subr.bf16.mxu1 %v4438_v10  ;;  %v5549_v44 = vld [vmem:[#allocation2 + $0x58] sm:$0xff]  ;;  %v1048_v10 = vrot.slane %v1001_v4, 2  ;;  %v4480_v47 = vpack.c.bf16 %v3460_v28, %v3459_v53  ;;  %v3429_v8 = vld [vmem:[%s6709_s1 + $0x340] sm:$0xff]  ;;  %v4482_v25 = vpack.c.bf16 %v3478_v56, %v3477_v1  ;;  %v3447_v59 = vld [vmem:[%s6709_s1 + $0x3d0] sm:$0xff]  ;;  %v1055_v45 = vsel %vm1029_vm3, %v1049_v7, %v1054_v31 }
  0x4d   : > { %922 = vmatmul.mubr.f32.gmra.mrb[18].mxu1 %v4681_v13  ;;  %4471 = vmatprep.subr.bf16.mxu0 %v4470_v39  ;;  %v1056_v39 = vrot.slane %v5165_v57, 2  ;;  %v3461_v24 = vld [vmem:[%s6709_s1 + $0x440] sm:$0xff]  ;;  %v3448_v55 = vld [vmem:[%s6709_s1 + $0x3d8] sm:$0xff]  ;;  %v3431_v17 = vld [vmem:[%s6709_s1 + $0x350] sm:$0xff] }
  0x4e   : > { %1237 = vmatmul.mubr.f32.gmra.mrb[18].mxu0 %v5424_v23  ;;  %926 = vmatprep.mubr.f32.mxu1 %v4681_v13  ;;  %v1047_v13 = vsel %vm1029_vm3, %v5424_v23, %v1046_v14  ;;  %v3479_v14 = vld [vmem:[%s6709_s1 + $0x4d0] sm:$0xff]  ;;  %v1050_v27 = vsel %vm1029_vm3, %v1048_v10, %v1049_v7  ;;  %v1004_v16 = vld [vmem:[#allocation2 + $0x98] sm:$0x3]  ;;  %v4454_v46 = vpack.c.bf16 %v3448_v55, %v3447_v59  ;;  %v3450_v41 = vld [vmem:[%s6709_s1 + $0x3e8] sm:$0xff] }
  0x4f   : > { %1241 = vmatprep.mubr.f32.mxu0 %v5424_v23  ;;  %4441 = vmatpush3.bf16.msra.mxu1 %v4440_v50  ;;  %v3462_v50 = vld [vmem:[%s6709_s1 + $0x448] sm:$0xff]  ;;  %v1057_v61 = vsel %vm1029_vm3, %v1052_v33, %v1056_v39  ;;  %v3432_v60 = vld [vmem:[%s6709_s1 + $0x358] sm:$0xff]  ;;  %v1003_v53 = vld [vmem:[#allocation2 + $0x90] sm:$0x3]  ;;  %v1061_v28 = vsel %vm1029_vm3, %v1056_v39, %v1060_v20 }
  0x50   : > { %4473 = vmatpush3.bf16.msra.mxu0 %v4472_v3  ;;  %4443 = vmatprep.subr.bf16.mxu1 %v4442_v18  ;;  %v5573_v3 = vld [vmem:[#allocation2 + $0x50] sm:$0xff]  ;;  %v3480_v18 = vld [vmem:[%s6709_s1 + $0x4d8] sm:$0xff]  ;;  %v4484_v26 = vpack.c.bf16 %v3462_v50, %v3461_v24  ;;  %v3433_v1 = vld [vmem:[%s6709_s1 + $0x360] sm:$0xff] }
  0x51   : > { %927 = vmatmul.mubr.f32.gmra.mrb[20].mxu1 %v4651_v22  ;;  %4475 = vmatprep.subr.bf16.mxu0 %v4474_v58  ;;  %v4486_v33 = vpack.c.bf16 %v3480_v18, %v3479_v14  ;;  %v3464_v4 = vld [vmem:[%s6709_s1 + $0x458] sm:$0xff]  ;;  %v3434_v56 = vld [vmem:[%s6709_s1 + $0x368] sm:$0xff]  ;;  %v1005_v24 = vld [vmem:[#allocation2 + $0xa0] sm:$0xfc] }
  0x52   : > { %1242 = vmatmul.mubr.f32.gmra.mrb[20].mxu0 %v5424_v23  ;;  %931 = vmatprep.mubr.f32.mxu1 %v4651_v22  ;;  %v3430_v23 = vld [vmem:[%s6709_s1 + $0x348] sm:$0xff]  ;;  %v3484_v39 = vld [vmem:[%s6709_s1 + $0x4f8] sm:$0xff]  ;;  %v3435_v14 = vld [vmem:[%s6709_s1 + $0x370] sm:$0xff] }
  0x53   : > { %1246 = vmatprep.mubr.f32.mxu0 %v1047_v13  ;;  %4445 = vmatpush3.bf16.msra.mxu1 %v4444_v38  ;;  %v4452_v58 = vpack.c.bf16 %v3430_v23, %v3429_v8  ;;  %v3463_v38 = vld [vmem:[%s6709_s1 + $0x450] sm:$0xff]  ;;  %v3449_v13 = vld [vmem:[%s6709_s1 + $0x3e0] sm:$0xff]  ;;  %v3466_v7 = vld [vmem:[%s6709_s1 + $0x468] sm:$0xff] }
  0x54   : > { %4477 = vmatpush3.bf16.msra.mxu0 %v4476_v52  ;;  %4447 = vmatprep.subr.bf16.mxu1 %v4446_v6  ;;  %v3481_v52 = vld [vmem:[%s6709_s1 + $0x4e0] sm:$0xff]  ;;  %v3482_v6 = vld [vmem:[%s6709_s1 + $0x4e8] sm:$0xff]  ;;  %v4488_v43 = vpack.c.bf16 %v3464_v4, %v3463_v38  ;;  %v4458_v35 = vpack.c.bf16 %v3450_v41, %v3449_v13  ;;  %v4652_v8 = vld [vmem:[#allocation2 + $0xb8] sm:$0xff] }
  0x55   : > { %932 = vmatmul.mubr.f32.gmra.mrb[22].mxu1 %v4651_v22  ;;  %4479 = vmatprep.subr.bf16.mxu0 %v4478_v19  ;;  %v1006_v22 = vld [vmem:[#allocation2 + $0xa8] sm:$0xfc]  ;;  %v4456_v19 = vpack.c.bf16 %v3432_v60, %v3431_v17  ;;  %v4490_v10 = vpack.c.bf16 %v3482_v6, %v3481_v52  ;;  %v1070_v23 = vrot.slane %v4652_v8, 2  ;;  %v3436_v18 = vld [vmem:[%s6709_s1 + $0x378] sm:$0xff]  ;;  %v1066_v17 = vrot.slane %v1005_v24, 2  ;;  %v4653_v60 = vld [vmem:[#allocation2 + $0xb0] sm:$0xff] }
  0x56   : > { %1247 = vmatmul.mubr.f32.gmra.mrb[22].mxu0 %v1045_v36  ;;  %936 = vmatprep.mubr.f32.mxu1 %v5549_v44  ;;  %v3465_v36 = vld [vmem:[%s6709_s1 + $0x460] sm:$0xff]  ;;  %v1067_v38 = vrot.slane %v4653_v60, 2  ;;  %v4654_v4 = vld [vmem:[#allocation2 + $0xc8] sm:$0xff] }
  0x57   : > { %1251 = vmatprep.mubr.f32.mxu0 %v1053_v12  ;;  %4449 = vmatpush3.bf16.msra.mxu1 %v4448_v40  ;;  %v3451_v40 = vld [vmem:[%s6709_s1 + $0x3f0] sm:$0xff]  ;;  %v3452_v12 = vld [vmem:[%s6709_s1 + $0x3f8] sm:$0xff]  ;;  %v4492_v59 = vpack.c.bf16 %v3466_v7, %v3465_v36  ;;  %v1074_v13 = vrot.slane %v4654_v4, 2 }
  0x58   : > { %4481 = vmatpush3.bf16.msra.mxu0 %v4480_v47  ;;  %4451 = vmatprep.subr.bf16.mxu1 %v4450_v51  ;;  %v1059_v47 = vsel %vm1029_vm3, %v1054_v31, %v1058_v0  ;;  %v1062_v51 = vrot.slane %v1003_v53, 2  ;;  %v4462_v55 = vpack.c.bf16 %v3452_v12, %v3451_v40  ;;  %v4655_v53 = vld [vmem:[#allocation2 + $0xc0] sm:$0xff]  ;;  %v275_v7 = vld [vmem:[%s4782_s24 + $0xd8] sm:$0xff] }
  0x59   : > { %937 = vmatmul.mubr.f32.gmra.mrb[24].mxu1 %v5573_v3  ;;  %4483 = vmatprep.subr.bf16.mxu0 %v4482_v25  ;;  %v4460_v25 = vpack.c.bf16 %v3434_v56, %v3433_v1  ;;  %v4657_v1 = vld [vmem:[#allocation2 + $0xd0] sm:$0xff] }
  0x5a   : > { %1252 = vmatmul.mubr.f32.gmra.mrb[24].mxu0 %v1050_v27  ;;  %941 = vmatprep.mubr.f32.mxu1 %v5032_v9  ;;  %v1064_v9 = vrot.slane %v1004_v16, 2  ;;  %v3467_v27 = vld [vmem:[%s6709_s1 + $0x470] sm:$0xff]  ;;  %v3468_v16 = vld [vmem:[%s6709_s1 + $0x478] sm:$0xff]  ;;  %v1076_v56 = vrot.slane %v4657_v1, 2 }
  0x5b   : > { %1256 = vmatprep.mubr.f32.mxu0 %v1057_v61  ;;  %4453 = vmatpush3.bf16.msra.mxu1 %v4452_v58  ;;  %v3501_v58 = vld [vmem:[%s6709_s1 + $0x580] sm:$0xff]  ;;  %v3502_v61 = vld [vmem:[%s6709_s1 + $0x588] sm:$0xff]  ;;  %v4496_v41 = vpack.c.bf16 %v3468_v16, %v3467_v27 }
  0x5c   : > { %4485 = vmatpush3.bf16.msra.mxu0 %v4484_v26  ;;  %4455 = vmatprep.subr.bf16.mxu1 %v4454_v46  ;;  %v1065_v50 = vsel %vm1029_vm3, %v1060_v20, %v1064_v9  ;;  %v3534_v20 = vld [vmem:[%s6709_s1 + $0x688] sm:$0xff]  ;;  %v1063_v26 = vsel %vm1029_vm3, %v1058_v0, %v1062_v51  ;;  %v4498_v52 = vpack.c.bf16 %v3502_v61, %v3501_v58  ;;  %v1007_v51 = vld [vmem:[#allocation2 + $0xe0] sm:$0x3] }
  0x5d   : > { %942 = vmatmul.mubr.f32.gmra.mrb[26].mxu1 %v5084_v34  ;;  %4487 = vmatprep.subr.bf16.mxu0 %v4486_v33  ;;  %v3483_v34 = vld [vmem:[%s6709_s1 + $0x4f0] sm:$0xff]  ;;  %v5669_v46 = vld [vmem:[#allocation2 + $0xa8] sm:$0xff]  ;;  %v4464_v33 = vpack.c.bf16 %v3436_v18, %v3435_v14  ;;  %v1068_v0 = vsel %vm1029_vm3, %v1066_v17, %v1067_v38  ;;  %v279_v18 = vld [vmem:[%s4782_s24 + $0xf8] sm:$0xff] }
  0x5e   : > { %1257 = vmatmul.mubr.f32.gmra.mrb[26].mxu0 %v1055_v45  ;;  %946 = vmatprep.mubr.f32.mxu1 %v5165_v57  ;;  %v1069_v57 = vrot.slane %v1006_v22, 2  ;;  %v4494_v31 = vpack.c.bf16 %v3484_v39, %v3483_v34  ;;  %v5674_v45 = vld [vmem:[#allocation2 + $0xa0] sm:$0xff]  ;;  %v1072_v22 = vrot.slane %v4655_v53, 2  ;;  %v1008_v9 = vld [vmem:[#allocation2 + $0xe8] sm:$0x3]  ;;  %v359_v34 = vrot.slane %v275_v7, 7 }
  0x5f   : > { %1261 = vmatprep.mubr.f32.mxu0 %v1061_v28  ;;  %4457 = vmatpush3.bf16.msra.mxu1 %v4456_v19  ;;  %v1075_v19 = vsel %vm1029_vm3, %v1070_v23, %v1074_v13  ;;  %v4656_v28 = vld [vmem:[#allocation2 + $0xd8] sm:$0xff]  ;;  %v1082_v12 = vrot.slane %v1008_v9, 2  ;;  %v274_v39 = vld [vmem:[%s4782_s24 + $0xd0] sm:$0xff]  ;;  %v4658_v16 = vld [vmem:[#allocation2 + $0x108] sm:$0xff]  ;;  %v367_v61 = vrot.slane %v279_v18, 7  ;;  %v1096_v9 = vrot.slane %v5237_v63, 2 }
  0x60   : > { %4489 = vmatpush3.bf16.msra.mxu0 %v4488_v43  ;;  %4459 = vmatprep.subr.bf16.mxu1 %v4458_v35  ;;  %v273_v43 = vld [vmem:[%s4782_s24 + $0xc8] sm:$0xff]  ;;  %v272_v35 = vld [vmem:[%s4782_s24 + $0xc0] sm:$0xff]  ;;  %v1073_v40 = vsel %vm1029_vm3, %v1067_v38, %v1072_v22  ;;  %v1088_v58 = vrot.slane %v4658_v16, 2  ;;  %v1555_v7 = vld [vmem:[#allocation2 + $0x58] sm:$0xfe] }
  0x61   : > { %947 = vmatmul.mubr.f32.gmra.mrb[28].mxu1 %v5179_v49  ;;  %4491 = vmatprep.subr.bf16.mxu0 %v4490_v10  ;;  %v3533_v49 = vld [vmem:[%s6709_s1 + $0x680] sm:$0xff]  ;;  %v356_v36 = vrot.slane %v273_v43, 7  ;;  %v355_v10 = vrot.slane %v272_v35, 7  ;;  %448 = vst [vmem:[#allocation2 + $0x188] sm:$0x1] %v367_v61 }
  0x62   : > { %1262 = vmatmul.mubr.f32.gmra.mrb[28].mxu0 %v1059_v47  ;;  %951 = vmatprep.mubr.f32.mxu1 %v5259_v32  ;;  %v1071_v32 = vsel %vm1029_vm3, %v1069_v57, %v1070_v23  ;;  %v4530_v6 = vpack.c.bf16 %v3534_v20, %v3533_v49  ;;  %v1010_v23 = vld [vmem:[#allocation2 + $0xf8] sm:$0xfc]  ;;  %v1077_v57 = vsel %vm1029_vm3, %v1072_v22, %v1076_v56  ;;  %v278_v49 = vld [vmem:[%s4782_s24 + $0xf0] sm:$0xff]  ;;  %v1012_v43 = vld [vmem:[#allocation2 + $0x138] sm:$0x3] }
  0x63   : > { %1266 = vmatprep.mubr.f32.mxu0 %v1065_v50  ;;  %4461 = vmatpush3.bf16.msra.mxu1 %v4460_v25  ;;  %440 = vst [vmem:[#allocation2 + $0x148] sm:$0xfe] %v356_v36  ;;  %439 = vst [vmem:[#allocation2 + $0x140] sm:$0xfe] %v355_v10  ;;  %v5686_v24 = vsel %vm312_vm1, %v356_v36, %v359_v34  ;;  %v277_v25 = vld [vmem:[%s4782_s24 + $0xe8] sm:$0xff]  ;;  %v276_v50 = vld [vmem:[%s4782_s24 + $0xe0] sm:$0xff] }
  0x64   : > { %4493 = vmatpush3.bf16.msra.mxu0 %v4492_v59  ;;  %4463 = vmatprep.subr.bf16.mxu1 %v4462_v55  ;;  %442 = vst [vmem:[#allocation2 + $0x158] sm:$0xff] %v5686_v24  ;;  %v363_v55 = vrot.slane %v277_v25, 7  ;;  %v361_v14 = vrot.slane %v276_v50, 7  ;;  %v1087_v20 = vrot.slane %v1010_v23, 2  ;;  %v365_v38 = vrot.slane %v278_v49, 7  ;;  %v5721_v22 = vld [vmem:[#allocation2 + $0xf0] sm:$0xff] }
  0x65   : > { %952 = vmatmul.mubr.f32.gmra.mrb[30].mxu1 %v5287_v54  ;;  %4495 = vmatprep.subr.bf16.mxu0 %v4494_v31  ;;  %v1078_v54 = vrot.slane %v4656_v28, 2  ;;  %v1080_v31 = vrot.slane %v1007_v51, 2  ;;  %v1100_v36 = vrot.slane %v1012_v43, 2  ;;  %v3503_v50 = vld [vmem:[%s6709_s1 + $0x590] sm:$0xff]  ;;  %v3505_v49 = vld [vmem:[%s6709_s1 + $0x5a0] sm:$0xff] }
  0x66   : > { %1267 = vmatmul.mubr.f32.gmra.mrb[30].mxu0 %v1063_v26  ;;  %956 = vmatprep.mubr.f32.mxu1 %v5669_v46  ;;  %v1009_v26 = vld [vmem:[#allocation2 + $0xf0] sm:$0xfc]  ;;  %v5700_v17 = vsel %vm312_vm1, %v359_v34, %v363_v55  ;;  %447 = vst [vmem:[#allocation2 + $0x180] sm:$0x1] %v365_v38  ;;  %v5807_v43 = vld [vmem:[#allocation2 + $0x60] sm:$0xff] }
  0x67   : > { %1271 = vmatprep.mubr.f32.mxu0 %v1071_v32  ;;  %4465 = vmatpush3.bf16.msra.mxu1 %v4464_v33  ;;  %v1079_v47 = vsel %vm1029_vm3, %v1074_v13, %v1078_v54  ;;  %v1083_v27 = vsel %vm1029_vm3, %v1078_v54, %v1082_v12  ;;  %444 = vst [vmem:[#allocation2 + $0x168] sm:$0xff] %v5700_v17  ;;  %v5715_v13 = vld [vmem:[#allocation2 + $0xf8] sm:$0xff] }
  0x68   : > { %4497 = vmatpush3.bf16.msra.mxu0 %v4496_v41  ;;  %4499 = vmatprep.subr.bf16.mxu1 %v4498_v52  ;;  %v5708_v33 = vsel %vm312_vm1, %v363_v55, %v367_v61  ;;  %v5712_v32 = vsel %vm312_vm1, %v361_v14, %v365_v38  ;;  %v1084_v41 = vrot.slane %v1009_v26, 2  ;;  %v4659_v52 = vld [vmem:[#allocation2 + $0x100] sm:$0xff]  ;;  %v1101_v34 = vsel %vm1029_vm3, %v1096_v9, %v1100_v36  ;;  %v3535_v55 = vld [vmem:[%s6709_s1 + $0x690] sm:$0xff]  ;;  %v1563_v61 = vld [vmem:[#allocation2 + $0x98] sm:$0x1] }
  0x69   : > { %957 = vmatmul.mubr.f32.gmra.mrb[32].mxu1 %v5674_v45  ;;  %4531 = vmatprep.subr.bf16.mxu0 %v4530_v6  ;;  %446 = vst [vmem:[#allocation2 + $0x178] sm:$0xff] %v5708_v33  ;;  %v1085_v6 = vrot.slane %v4659_v52, 2  ;;  %445 = vst [vmem:[#allocation2 + $0x170] sm:$0xff] %v5712_v32  ;;  %v3537_v26 = vld [vmem:[%s6709_s1 + $0x6a0] sm:$0xff]  ;;  %v5792_v38 = vld [vmem:[#allocation2 + $0x68] sm:$0xff] }
  0x6a   : > { %1272 = vmatmul.mubr.f32.gmra.mrb[32].mxu0 %v1068_v0  ;;  %961 = vmatprep.mubr.f32.mxu1 %v4652_v8  ;;  %v357_v8 = vrot.slane %v274_v39, 7  ;;  %v1089_v0 = vsel %vm1029_vm3, %v1087_v20, %v1088_v58  ;;  %v1637_v39 = vrot.slane %v1555_v7, 1  ;;  %v3506_v20 = vld [vmem:[%s6709_s1 + $0x5a8] sm:$0xff]  ;;  %v5820_v36 = vld [vmem:[#allocation2 + $0x78] sm:$0xff] }
  0x6b   : > { %1276 = vmatprep.mubr.f32.mxu0 %v1075_v19  ;;  %v1086_v19 = vsel %vm1029_vm3, %v1084_v41, %v1085_v6  ;;  %v1562_v41 = vld [vmem:[#allocation2 + $0x90] sm:$0x1]  ;;  %v3540_v7 = vld [vmem:[%s6709_s1 + $0x6b8] sm:$0xff] }
  0x6c   : > { %v5693_v59 = vsel %vm312_vm1, %v355_v10, %v357_v8  ;;  %v1011_v10 = vld [vmem:[#allocation2 + $0x130] sm:$0x3]  ;;  %v1639_v25 = vsel %vm569_vm2, %v1637_v39, %v5246_v29  ;;  %v1564_v39 = vld [vmem:[#allocation2 + $0xa0] sm:$0xfe] }
  0x6d   : > { %962 = vmatmul.mubr.f32.gmra.mrb[34].mxu1 %v4653_v60  ;;  %441 = vst [vmem:[#allocation2 + $0x150] sm:$0xff] %v5693_v59  ;;  %v5703_v60 = vsel %vm312_vm1, %v357_v8, %v361_v14  ;;  %v1098_v12 = vrot.slane %v1011_v10, 2  ;;  %v3486_v8 = vld [vmem:[%s6709_s1 + $0x508] sm:$0xff]  ;;  %v3539_v10 = vld [vmem:[%s6709_s1 + $0x6b0] sm:$0xff] }
  0x6e   : > { %1277 = vmatmul.mubr.f32.gmra.mrb[34].mxu0 %v1073_v40  ;;  %966 = vmatprep.mubr.f32.mxu1 %v4654_v4  ;;  %443 = vst [vmem:[#allocation2 + $0x160] sm:$0xff] %v5703_v60  ;;  %v1081_v4 = vsel %vm1029_vm3, %v1076_v56, %v1080_v31 }
  0x6f   : > { %1281 = vmatprep.mubr.f32.mxu0 %v1079_v47  ;;  %v1554_v47 = vld [vmem:[#allocation2 + $0x50] sm:$0xfe] }
  0x70   : > { %v1634_v23 = vrot.slane %v1554_v47, 1  ;;  %v5832_v47 = vld [vmem:[#allocation2 + $0xc8] sm:$0xff] }
  0x71   : > { %967 = vmatmul.mubr.f32.gmra.mrb[36].mxu1 %v4655_v53  ;;  %v1092_v53 = vrot.slane %v5108_v48, 2 }
  0x72   : > { %1282 = vmatmul.mubr.f32.gmra.mrb[36].mxu0 %v1077_v57  ;;  %971 = vmatprep.mubr.f32.mxu1 %v4656_v28  ;;  %v1090_v28 = vrot.slane %v5139_v2, 2  ;;  %v3504_v57 = vld [vmem:[%s6709_s1 + $0x598] sm:$0xff]  ;;  %v1636_v14 = vsel %vm569_vm2, %v1634_v23, %v5274_v11 }
  0x73   : > { %1286 = vmatprep.mubr.f32.mxu0 %v1083_v27  ;;  %v1093_v54 = vsel %vm1029_vm3, %v1088_v58, %v1092_v53  ;;  %v1097_v56 = vsel %vm1029_vm3, %v1092_v53, %v1096_v9  ;;  %v3487_v27 = vld [vmem:[%s6709_s1 + $0x510] sm:$0xff]  ;;  %v4502_v31 = vpack.c.bf16 %v3504_v57, %v3503_v50  ;;  %v3520_v58 = vld [vmem:[%s6709_s1 + $0x618] sm:$0xff]  ;;  %v1650_v53 = vrot.slane %v1563_v61, 1  ;;  %v3521_v9 = vld [vmem:[%s6709_s1 + $0x620] sm:$0xff] }
  0x74   : > { %v1091_v35 = vsel %vm1029_vm3, %v1085_v6, %v1090_v28  ;;  %v5795_v6 = vld [vmem:[#allocation2 + $0xb8] sm:$0xff]  ;;  %v3509_v57 = vld [vmem:[%s6709_s1 + $0x5c0] sm:$0xff] }
  0x75   : > { %972 = vmatmul.mubr.f32.gmra.mrb[38].mxu1 %v4657_v1  ;;  %v1094_v1 = vrot.slane %v5242_v21, 2  ;;  %v3524_v50 = vld [vmem:[%s6709_s1 + $0x638] sm:$0xff] }
  0x76   : > { %1287 = vmatmul.mubr.f32.gmra.mrb[38].mxu0 %v1081_v4  ;;  %976 = vmatprep.mubr.f32.mxu1 %v5715_v13 }
  0x77   : > { %1291 = vmatprep.mubr.f32.mxu0 %v1089_v0  ;;  %v1095_v40 = vsel %vm1029_vm3, %v1090_v28, %v1094_v1  ;;  %v1099_v51 = vsel %vm1029_vm3, %v1094_v1, %v1098_v12  ;;  %v3489_v28 = vld [vmem:[%s6709_s1 + $0x520] sm:$0xff]  ;;  %v3507_v1 = vld [vmem:[%s6709_s1 + $0x5b0] sm:$0xff] }
  0x79   : > { %977 = vmatmul.mubr.f32.gmra.mrb[40].mxu1 %v5721_v22 }
  0x7a   : > { %1292 = vmatmul.mubr.f32.gmra.mrb[40].mxu0 %v1086_v19  ;;  %981 = vmatprep.mubr.f32.mxu1 %v4658_v16  ;;  %v3519_v16 = vld [vmem:[%s6709_s1 + $0x610] sm:$0xff]  ;;  %v4506_v19 = vpack.c.bf16 %v3506_v20, %v3505_v49  ;;  %v3494_v20 = vld [vmem:[%s6709_s1 + $0x548] sm:$0xff] }
  0x7b   : > { %1296 = vmatprep.mubr.f32.mxu0 %v1093_v54  ;;  %v4536_v0 = vpack.c.bf16 %v3520_v58, %v3519_v16  ;;  %v3490_v54 = vld [vmem:[%s6709_s1 + $0x528] sm:$0xff] }
  0x7d   : > { %982 = vmatmul.mubr.f32.gmra.mrb[42].mxu1 %v4659_v52  ;;  %v1565_v52 = vld [vmem:[#allocation2 + $0xa8] sm:$0xfe] }
  0x7e   : > { %1297 = vmatmul.mubr.f32.gmra.mrb[42].mxu0 %v1091_v35  ;;  %986 = vmatprep.mubr.f32.mxu1 %v5108_v48  ;;  %v3485_v48 = vld [vmem:[%s6709_s1 + $0x500] sm:$0xff]  ;;  %v3522_v35 = vld [vmem:[%s6709_s1 + $0x628] sm:$0xff]  ;;  %v1655_v12 = vrot.slane %v1565_v52, 1  ;;  %v3511_v52 = vld [vmem:[%s6709_s1 + $0x5d0] sm:$0xff] }
  0x7f   : > { %1301 = vmatprep.mubr.f32.mxu0 %v1097_v56  ;;  %v4500_v29 = vpack.c.bf16 %v3486_v8, %v3485_v48  ;;  %v3508_v56 = vld [vmem:[%s6709_s1 + $0x5b8] sm:$0xff]  ;;  %v1656_v48 = vrot.slane %v5795_v6, 1  ;;  %v4540_v8 = vpack.c.bf16 %v3522_v35, %v3521_v9  ;;  %v5907_v9 = vld [vmem:[#allocation2 + $0xd0] sm:$0xff] }
  0x80   : > { %v4510_v23 = vpack.c.bf16 %v3508_v56, %v3507_v1 }
  0x81   : > { %987 = vmatmul.mubr.f32.gmra.mrb[44].mxu1 %v5139_v2  ;;  %v3517_v2 = vld [vmem:[%s6709_s1 + $0x600] sm:$0xff]  ;;  %v1657_v58 = vsel %vm569_vm2, %v1655_v12, %v1656_v48  ;;  %v3527_v12 = vld [vmem:[%s6709_s1 + $0x650] sm:$0xff] }
  0x82   : > { %1302 = vmatmul.mubr.f32.gmra.mrb[44].mxu0 %v1095_v40  ;;  %991 = vmatprep.mubr.f32.mxu1 %v5237_v63  ;;  %v3518_v63 = vld [vmem:[%s6709_s1 + $0x608] sm:$0xff]  ;;  %v1648_v40 = vrot.slane %v1562_v41, 1 }
  0x83   : > { %1306 = vmatprep.mubr.f32.mxu0 %v1101_v34  ;;  %v4532_v18 = vpack.c.bf16 %v3518_v63, %v3517_v2  ;;  %v4508_v34 = vpack.c.bf16 %v3490_v54, %v3489_v28  ;;  %v3523_v2 = vld [vmem:[%s6709_s1 + $0x630] sm:$0xff]  ;;  %v3526_v41 = vld [vmem:[%s6709_s1 + $0x648] sm:$0xff] }
  0x84   : > { %v5846_v63 = vld [vmem:[#allocation2 + $0x70] sm:$0xff]  ;;  %v4544_v61 = vpack.c.bf16 %v3524_v50, %v3523_v2  ;;  %v1572_v2 = vld [vmem:[#allocation2 + $0xe0] sm:$0x1]  ;;  %v5939_v50 = vld [vmem:[#allocation2 + $0x108] sm:$0xff] }
  0x85   : > { %992 = vmatmul.mubr.f32.gmra.mrb[46].mxu1 %v5242_v21  ;;  %v3536_v21 = vld [vmem:[%s6709_s1 + $0x698] sm:$0xff] }
  0x86   : > { %1307 = vmatmul.mubr.f32.gmra.mrb[46].mxu0 %v1099_v51  ;;  %1457 = vmatprep.mubr.f32.mxu1 %v5549_v44  ;;  %v3488_v44 = vld [vmem:[%s6709_s1 + $0x518] sm:$0xff]  ;;  %v4534_v11 = vpack.c.bf16 %v3536_v21, %v3535_v55  ;;  %v1651_v51 = vsel %vm569_vm2, %v5345_v37, %v1650_v53  ;;  %v4542_v37 = vpack.c.bf16 %v3540_v7, %v3539_v10  ;;  %v5859_v55 = vld [vmem:[#allocation2 + $0x88] sm:$0xff]  ;;  %v3541_v21 = vld [vmem:[%s6709_s1 + $0x6c0] sm:$0xff] }
  0x87   : > { %1835 = vmatprep.mubr.f32.mxu0 %v1639_v25  ;;  %v4504_v4 = vpack.c.bf16 %v3488_v44, %v3487_v27  ;;  %v3492_v25 = vld [vmem:[%s6709_s1 + $0x538] sm:$0xff]  ;;  %v1652_v27 = vrot.slane %v1564_v39, 1  ;;  %v3543_v53 = vld [vmem:[%s6709_s1 + $0x6d0] sm:$0xff] }
  0x88   : > { %v5873_v44 = vld [vmem:[#allocation2 + $0xd8] sm:$0xff]  ;;  %v3495_v7 = vld [vmem:[%s6709_s1 + $0x550] sm:$0xff] }
  0x89   : > { %1458 = vmatmul.mubr.f32.vlgmr.msra.gmra.mrb[48].mxu1 %v5573_v3  ;;  %v3538_v3 = vld [vmem:[%s6709_s1 + $0x6a8] sm:$0xff]  ;;  %v1664_v1 = vrot.slane %v5873_v44, 1  ;;  %v3528_v39 = vld [vmem:[%s6709_s1 + $0x658] sm:$0xff] }
  0x8a   : > { %4501 = vmatpush3.bf16.msra.mxu1 %v4500_v29  ;;  %1836 = vmatmul.mubr.f32.vlgmr.msra.gmra.mrb[48].mxu0 %v1636_v14  ;;  %v3510_v29 = vld [vmem:[%s6709_s1 + $0x5c8] sm:$0xff] }
  0x8b   : > { %1462 = vmatprep.mubr.f32.mxu1 %v5792_v38  ;;  %4533 = vmatpush3.bf16.msra.mxu0 %v4532_v18  ;;  %v3542_v14 = vld [vmem:[%s6709_s1 + $0x6c8] sm:$0xff]  ;;  %v1649_v18 = vsel %vm569_vm2, %v5368_v62, %v1648_v40  ;;  %v4514_v49 = vpack.c.bf16 %v3510_v29, %v3509_v57  ;;  %v3493_v62 = vld [vmem:[%s6709_s1 + $0x540] sm:$0xff]  ;;  %v3496_v40 = vld [vmem:[%s6709_s1 + $0x558] sm:$0xff] }
  0x8c   : > { %1840 = vmatprep.mubr.f32.mxu0 %v5342_v30  ;;  %4503 = vmatprep.subr.bf16.mxu1 %v4502_v31  ;;  %v4538_v30 = vpack.c.bf16 %v3538_v3, %v3537_v26  ;;  %v5871_v31 = vld [vmem:[#allocation2 + $0xc0] sm:$0xff]  ;;  %v4516_v35 = vpack.c.bf16 %v3494_v20, %v3493_v62  ;;  %v4520_v57 = vpack.c.bf16 %v3496_v40, %v3495_v7  ;;  %v3548_v62 = vld [vmem:[%s6709_s1 + $0x6f8] sm:$0xff]  ;;  %v3566_v40 = vld [vmem:[%s6709_s1 + $0x788] sm:$0xff] }
  0x8d   : > { %1463 = vmatmul.mubr.f32.gmra.mrb[50].mxu1 %v5807_v43  ;;  %4535 = vmatprep.subr.bf16.mxu0 %v4534_v11  ;;  %v1660_v11 = vrot.slane %v5832_v47, 1  ;;  %v3525_v26 = vld [vmem:[%s6709_s1 + $0x640] sm:$0xff]  ;;  %v1658_v54 = vrot.slane %v5871_v31, 1 }
  0x8e   : > { %1841 = vmatmul.mubr.f32.gmra.mrb[50].mxu0 %v5358_v42  ;;  %1467 = vmatprep.mubr.f32.mxu1 %v5820_v36  ;;  %v5830_v42 = vld [vmem:[#allocation2 + $0xb0] sm:$0xff]  ;;  %v5886_v3 = vld [vmem:[#allocation2 + $0x80] sm:$0xff]  ;;  %v4548_v56 = vpack.c.bf16 %v3526_v41, %v3525_v26 }
  0x8f   : > { %1845 = vmatprep.mubr.f32.mxu0 %v5387_v5  ;;  %4505 = vmatpush3.bf16.msra.mxu1 %v4504_v4  ;;  %v3491_v5 = vld [vmem:[%s6709_s1 + $0x530] sm:$0xff]  ;;  %v4546_v4 = vpack.c.bf16 %v3542_v14, %v3541_v21  ;;  %v1665_v29 = vsel %vm569_vm2, %v1660_v11, %v1664_v1  ;;  %v4552_v21 = vpack.c.bf16 %v3528_v39, %v3527_v12  ;;  %v3565_v7 = vld [vmem:[%s6709_s1 + $0x780] sm:$0xff] }
  0x90   : > { %4537 = vmatpush3.bf16.msra.mxu0 %v4536_v0  ;;  %4507 = vmatprep.subr.bf16.mxu1 %v4506_v19  ;;  %v4512_v16 = vpack.c.bf16 %v3492_v25, %v3491_v5  ;;  %v3512_v0 = vld [vmem:[%s6709_s1 + $0x5d8] sm:$0xff]  ;;  %v1574_v41 = vld [vmem:[#allocation2 + $0xf0] sm:$0xfe]  ;;  %v3597_v12 = vld [vmem:[%s6709_s1 + $0x880] sm:$0xff] }
  0x91   : > { %1468 = vmatmul.mubr.f32.gmra.mrb[52].mxu1 %v5846_v63  ;;  %4539 = vmatprep.subr.bf16.mxu0 %v4538_v30  ;;  %v3544_v19 = vld [vmem:[%s6709_s1 + $0x6d8] sm:$0xff]  ;;  %v1573_v30 = vld [vmem:[#allocation2 + $0xe8] sm:$0x1]  ;;  %v4518_v10 = vpack.c.bf16 %v3512_v0, %v3511_v52  ;;  %v5970_v52 = vld [vmem:[#allocation2 + $0x100] sm:$0xff] }
  0x92   : > { %1846 = vmatmul.mubr.f32.gmra.mrb[52].mxu0 %v5398_v15  ;;  %1472 = vmatprep.mubr.f32.mxu1 %v5859_v55  ;;  %v1653_v15 = vrot.slane %v5830_v42, 1  ;;  %v1668_v25 = vrot.slane %v1573_v30, 1  ;;  %v5972_v0 = vld [vmem:[#allocation2 + $0x118] sm:$0xff] }
  0x93   : > { %1850 = vmatprep.mubr.f32.mxu0 %v1651_v51  ;;  %4509 = vmatpush3.bf16.msra.mxu1 %v4508_v34  ;;  %v4550_v34 = vpack.c.bf16 %v3544_v19, %v3543_v53  ;;  %v3513_v51 = vld [vmem:[%s6709_s1 + $0x5e0] sm:$0xff] }
  0x94   : > { %4541 = vmatpush3.bf16.msra.mxu0 %v4540_v8  ;;  %4511 = vmatprep.subr.bf16.mxu1 %v4510_v23  ;;  %v1654_v28 = vsel %vm569_vm2, %v1652_v27, %v1653_v15  ;;  %v1662_v8 = vrot.slane %v5907_v9, 1  ;;  %v3546_v23 = vld [vmem:[%s6709_s1 + $0x6e8] sm:$0xff]  ;;  %v1659_v5 = vsel %vm569_vm2, %v1653_v15, %v1658_v54  ;;  %v3529_v15 = vld [vmem:[%s6709_s1 + $0x660] sm:$0xff]  ;;  %v1669_v26 = vsel %vm569_vm2, %v1664_v1, %v1668_v25  ;;  %v3531_v1 = vld [vmem:[%s6709_s1 + $0x670] sm:$0xff] }
  0x95   : > { %1473 = vmatmul.mubr.f32.gmra.mrb[54].mxu1 %v5886_v3  ;;  %4543 = vmatprep.subr.bf16.mxu0 %v4542_v37  ;;  %v1575_v37 = vld [vmem:[#allocation2 + $0xf8] sm:$0xfe]  ;;  %v3498_v27 = vld [vmem:[%s6709_s1 + $0x568] sm:$0xff]  ;;  %v6005_v25 = vld [vmem:[#allocation2 + $0x110] sm:$0xff] }
  0x96   : > { %1851 = vmatmul.mubr.f32.gmra.mrb[54].mxu0 %v1649_v18  ;;  %1477 = vmatprep.mubr.f32.mxu1 %v5669_v46  ;;  %v1661_v46 = vsel %vm569_vm2, %v1656_v48, %v1660_v11  ;;  %v3514_v48 = vld [vmem:[%s6709_s1 + $0x5e8] sm:$0xff]  ;;  %v3497_v18 = vld [vmem:[%s6709_s1 + $0x560] sm:$0xff]  ;;  %v3515_v11 = vld [vmem:[%s6709_s1 + $0x5f0] sm:$0xff]  ;;  %v1663_v20 = vsel %vm569_vm2, %v1658_v54, %v1662_v8  ;;  %v1673_v19 = vrot.slane %v1575_v37, 1  ;;  %v4562_v37 = vpack.c.bf16 %v3566_v40, %v3565_v7 }
  0x97   : > { %1855 = vmatprep.mubr.f32.mxu0 %v1657_v58  ;;  %4513 = vmatpush3.bf16.msra.mxu1 %v4512_v16  ;;  %v4522_v14 = vpack.c.bf16 %v3514_v48, %v3513_v51  ;;  %v3530_v58 = vld [vmem:[%s6709_s1 + $0x668] sm:$0xff]  ;;  %v4524_v53 = vpack.c.bf16 %v3498_v27, %v3497_v18  ;;  %v3499_v54 = vld [vmem:[%s6709_s1 + $0x570] sm:$0xff]  ;;  %v1670_v51 = vrot.slane %v1574_v41, 1  ;;  %v1671_v48 = vrot.slane %v5970_v52, 1  ;;  %v6015_v27 = vld [vmem:[#allocation2 + $0x120] sm:$0xff] }
  0x98   : > { %4545 = vmatpush3.bf16.msra.mxu0 %v4544_v61  ;;  %4515 = vmatprep.subr.bf16.mxu1 %v4514_v49  ;;  %v3516_v61 = vld [vmem:[%s6709_s1 + $0x5f8] sm:$0xff]  ;;  %v3547_v49 = vld [vmem:[%s6709_s1 + $0x6f0] sm:$0xff]  ;;  %v4556_v30 = vpack.c.bf16 %v3530_v58, %v3529_v15  ;;  %v1584_v41 = vld [vmem:[#allocation2 + $0x140] sm:$0xfe]  ;;  %v1700_v7 = vrot.slane %v5708_v33, 1 }
  0x99   : > { %1478 = vmatmul.mubr.f32.gmra.mrb[56].mxu1 %v5674_v45  ;;  %4547 = vmatprep.subr.bf16.mxu0 %v4546_v4  ;;  %v3545_v45 = vld [vmem:[%s6709_s1 + $0x6e0] sm:$0xff]  ;;  %v1666_v4 = vrot.slane %v1572_v2, 1  ;;  %v1583_v15 = vld [vmem:[#allocation2 + $0x138] sm:$0x1]  ;;  %v1593_v40 = vld [vmem:[#allocation2 + $0x188] sm:$0x1] }
  0x9a   : > { %1856 = vmatmul.mubr.f32.gmra.mrb[56].mxu0 %v1654_v28  ;;  %1482 = vmatprep.mubr.f32.mxu1 %v5795_v6  ;;  %v4554_v16 = vpack.c.bf16 %v3546_v23, %v3545_v45  ;;  %v1674_v28 = vrot.slane %v5939_v50, 1 }
  0x9b   : > { %1860 = vmatprep.mubr.f32.mxu0 %v1661_v46  ;;  %4517 = vmatpush3.bf16.msra.mxu1 %v4516_v35  ;;  %v4526_v35 = vpack.c.bf16 %v3516_v61, %v3515_v11  ;;  %v3500_v46 = vld [vmem:[%s6709_s1 + $0x578] sm:$0xff]  ;;  %v1667_v39 = vsel %vm569_vm2, %v1662_v8, %v1666_v4  ;;  %v1686_v11 = vrot.slane %v1583_v15, 1  ;;  %v1582_v61 = vld [vmem:[#allocation2 + $0x130] sm:$0x1]  ;;  %v1692_v4 = vrot.slane %v5686_v24, 1 }
  0x9c   : > { %4549 = vmatpush3.bf16.msra.mxu0 %v4548_v56  ;;  %4519 = vmatprep.subr.bf16.mxu1 %v4518_v10  ;;  %v4558_v56 = vpack.c.bf16 %v3548_v62, %v3547_v49  ;;  %v3532_v10 = vld [vmem:[%s6709_s1 + $0x678] sm:$0xff]  ;;  %v4528_v45 = vpack.c.bf16 %v3500_v46, %v3499_v54  ;;  %v1675_v23 = vsel %vm569_vm2, %v1673_v19, %v1674_v28  ;;  %v1585_v49 = vld [vmem:[#allocation2 + $0x148] sm:$0xfe]  ;;  %v1684_v62 = vrot.slane %v1582_v61, 1  ;;  %v6037_v46 = vld [vmem:[#allocation2 + $0x140] sm:$0xff] }
  0x9d   : > { %1483 = vmatmul.mubr.f32.gmra.mrb[58].mxu1 %v5830_v42  ;;  %4551 = vmatprep.subr.bf16.mxu0 %v4550_v34  ;;  %v3598_v34 = vld [vmem:[%s6709_s1 + $0x888] sm:$0xff]  ;;  %v4560_v2 = vpack.c.bf16 %v3532_v10, %v3531_v1  ;;  %v1696_v54 = vrot.slane %v5700_v17, 1  ;;  %v3567_v15 = vld [vmem:[%s6709_s1 + $0x790] sm:$0xff]  ;;  %v2263_v61 = vld [vmem:[#allocation2 + $0xa0] sm:$0xff] }
  0x9e   : > { %1861 = vmatmul.mubr.f32.gmra.mrb[58].mxu0 %v1659_v5  ;;  %1487 = vmatprep.mubr.f32.mxu1 %v5832_v47  ;;  %v1678_v5 = vrot.slane %v5972_v0, 1  ;;  %v4594_v8 = vpack.c.bf16 %v3598_v34, %v3597_v12  ;;  %v6030_v19 = vld [vmem:[#allocation2 + $0x148] sm:$0xff]  ;;  %v1698_v34 = vrot.slane %v5712_v32, 1 }
  0x9f   : > { %1865 = vmatprep.mubr.f32.mxu0 %v1665_v29  ;;  %4521 = vmatpush3.bf16.msra.mxu1 %v4520_v57  ;;  %v6008_v57 = vld [vmem:[#allocation2 + $0x128] sm:$0xff]  ;;  %v1672_v29 = vsel %vm569_vm2, %v1670_v51, %v1671_v48  ;;  %v1697_v10 = vsel %vm569_vm2, %v1692_v4, %v1696_v54  ;;  %v1704_v51 = vrot.slane %v1593_v40, 1 }
  0xa0   : > { %4553 = vmatpush3.bf16.msra.mxu0 %v4552_v21  ;;  %4523 = vmatprep.subr.bf16.mxu1 %v4522_v14  ;;  %v1676_v21 = vrot.slane %v6005_v25, 1  ;;  %v1679_v14 = vsel %vm569_vm2, %v1674_v28, %v1678_v5  ;;  %v1682_v18 = vrot.slane %v6008_v57, 1  ;;  %v1688_v28 = vrot.slane %v1584_v41, 1  ;;  %v3583_v41 = vld [vmem:[%s6709_s1 + $0x810] sm:$0xff] }
  0xa1   : > { %1488 = vmatmul.mubr.f32.gmra.mrb[60].mxu1 %v5871_v31  ;;  %4555 = vmatprep.subr.bf16.mxu0 %v4554_v16  ;;  %v1680_v16 = vrot.slane %v6015_v27, 1 }
  0xa2   : > { %1866 = vmatmul.mubr.f32.gmra.mrb[60].mxu0 %v1663_v20  ;;  %1492 = vmatprep.mubr.f32.mxu1 %v5873_v44  ;;  %v1683_v58 = vsel %vm569_vm2, %v1678_v5, %v1682_v18  ;;  %v1687_v20 = vsel %vm569_vm2, %v1682_v18, %v1686_v11  ;;  %v1972_v18 = vrot.slane %v5820_v36, 2  ;;  %v3599_v11 = vld [vmem:[%s6709_s1 + $0x890] sm:$0xff] }
  0xa3   : > { %1870 = vmatprep.mubr.f32.mxu0 %v1669_v26  ;;  %4525 = vmatpush3.bf16.msra.mxu1 %v4524_v53  ;;  %v1691_v26 = vrot.slane %v1585_v49, 1  ;;  %v1685_v53 = vsel %vm569_vm2, %v1680_v16, %v1684_v62  ;;  %v3551_v62 = vld [vmem:[%s6709_s1 + $0x710] sm:$0xff] }
  0xa4   : > { %4557 = vmatpush3.bf16.msra.mxu0 %v4556_v30  ;;  %4527 = vmatprep.subr.bf16.mxu1 %v4526_v35  ;;  %v1689_v30 = vrot.slane %v5693_v59, 1 }
  0xa5   : > { %1493 = vmatmul.mubr.f32.gmra.mrb[62].mxu1 %v5907_v9  ;;  %4559 = vmatprep.subr.bf16.mxu0 %v4558_v56  ;;  %v1693_v35 = vsel %vm569_vm2, %v1691_v26, %v1692_v4  ;;  %v1694_v56 = vrot.slane %v5703_v60, 1  ;;  %v3552_v26 = vld [vmem:[%s6709_s1 + $0x718] sm:$0xff] }
  0xa6   : > { %1871 = vmatmul.mubr.f32.gmra.mrb[62].mxu0 %v1667_v39  ;;  %1497 = vmatprep.mubr.f32.mxu1 %v5715_v13  ;;  %v1677_v13 = vsel %vm569_vm2, %v1671_v48, %v1676_v21  ;;  %v1690_v1 = vsel %vm569_vm2, %v1688_v28, %v1689_v30  ;;  %v1701_v39 = vsel %vm569_vm2, %v1696_v54, %v1700_v7  ;;  %v1592_v48 = vld [vmem:[#allocation2 + $0x180] sm:$0x1]  ;;  %v1935_v4 = vld [vmem:[#allocation2 + $0x98] sm:$0x3]  ;;  %v1974_v54 = vrot.slane %v5886_v3, 2 }
  0xa7   : > { %1875 = vmatprep.mubr.f32.mxu0 %v1675_v23  ;;  %4529 = vmatpush3.bf16.msra.mxu1 %v4528_v45  ;;  %v1695_v12 = vsel %vm569_vm2, %v1689_v30, %v1694_v56  ;;  %v1933_v45 = vld [vmem:[#allocation2 + $0x58] sm:$0xfc]  ;;  %v1699_v23 = vsel %vm569_vm2, %v1694_v56, %v1698_v34  ;;  %v1702_v5 = vrot.slane %v1592_v48, 1  ;;  %v3569_v28 = vld [vmem:[%s6709_s1 + $0x7a0] sm:$0xff]  ;;  %v3570_v30 = vld [vmem:[%s6709_s1 + $0x7a8] sm:$0xff]  ;;  %v1980_v40 = vrot.slane %v1935_v4, 2 }
  0xa8   : > { %4561 = vmatpush3.bf16.msra.mxu0 %v4560_v2  ;;  %4563 = vmatprep.subr.bf16.mxu1 %v4562_v37  ;;  %v1968_v2 = vrot.slane %v5792_v38, 2  ;;  %v1932_v37 = vld [vmem:[#allocation2 + $0x50] sm:$0xfc]  ;;  %v3549_v38 = vld [vmem:[%s6709_s1 + $0x700] sm:$0xff]  ;;  %v3602_v56 = vld [vmem:[%s6709_s1 + $0x8a8] sm:$0xff] }
  0xa9   : > { %1498 = vmatmul.mubr.f32.gmra.mrb[64].mxu1 %v5721_v22  ;;  %4595 = vmatprep.subr.bf16.mxu0 %v4594_v8  ;;  %v1681_v22 = vsel %vm569_vm2, %v1676_v21, %v1680_v16  ;;  %v1705_v8 = vsel %vm569_vm2, %v1700_v7, %v1704_v51  ;;  %v4568_v7 = vpack.c.bf16 %v3552_v26, %v3551_v62  ;;  %v3553_v51 = vld [vmem:[%s6709_s1 + $0x720] sm:$0xff]  ;;  %v3554_v48 = vld [vmem:[%s6709_s1 + $0x728] sm:$0xff] }
  0xaa   : > { %1876 = vmatmul.mubr.f32.gmra.mrb[64].mxu0 %v1672_v29  ;;  %1502 = vmatprep.mubr.f32.mxu1 %v5939_v50  ;;  %v1964_v29 = vrot.slane %v1932_v37, 2 }
  0xab   : > { %1880 = vmatprep.mubr.f32.mxu0 %v1679_v14  ;;  %v3550_v14 = vld [vmem:[%s6709_s1 + $0x708] sm:$0xff] }
  0xac   : > { %v4564_v16 = vpack.c.bf16 %v3550_v14, %v3549_v38  ;;  %v1986_v38 = vrot.slane %v5795_v6, 2  ;;  %v1936_v14 = vld [vmem:[#allocation2 + $0xa0] sm:$0xfc] }
  0xad   : > { %1503 = vmatmul.mubr.f32.gmra.mrb[66].mxu1 %v5970_v52 }
  0xae   : > { %1881 = vmatmul.mubr.f32.gmra.mrb[66].mxu0 %v1677_v13  ;;  %1507 = vmatprep.mubr.f32.mxu1 %v5972_v0  ;;  %v3568_v13 = vld [vmem:[%s6709_s1 + $0x798] sm:$0xff] }
  0xaf   : > { %1885 = vmatprep.mubr.f32.mxu0 %v1683_v58  ;;  %v1970_v58 = vrot.slane %v5846_v63, 2  ;;  %v4566_v63 = vpack.c.bf16 %v3568_v13, %v3567_v15  ;;  %v3556_v15 = vld [vmem:[%s6709_s1 + $0x738] sm:$0xff]  ;;  %v3587_v13 = vld [vmem:[%s6709_s1 + $0x830] sm:$0xff] }
  0xb1   : > { %1508 = vmatmul.mubr.f32.gmra.mrb[68].mxu1 %v6005_v25  ;;  %v1975_v37 = vsel %vm1029_vm3, %v1970_v58, %v1974_v54 }
  0xb2   : > { %1886 = vmatmul.mubr.f32.gmra.mrb[68].mxu0 %v1681_v22  ;;  %1512 = vmatprep.mubr.f32.mxu1 %v6008_v57  ;;  %v1976_v22 = vrot.slane %v5859_v55, 2  ;;  %v3584_v55 = vld [vmem:[%s6709_s1 + $0x818] sm:$0xff] }
  0xb3   : > { %1890 = vmatprep.mubr.f32.mxu0 %v1687_v20  ;;  %v1973_v20 = vsel %vm1029_vm3, %v1968_v2, %v1972_v18  ;;  %v4600_v3 = vpack.c.bf16 %v3584_v55, %v3583_v41  ;;  %v3557_v41 = vld [vmem:[%s6709_s1 + $0x740] sm:$0xff] }
  0xb4   : > { %v3589_v55 = vld [vmem:[%s6709_s1 + $0x840] sm:$0xff] }
  0xb5   : > { %1513 = vmatmul.mubr.f32.gmra.mrb[70].mxu1 %v6015_v27 }
  0xb6   : > { %1891 = vmatmul.mubr.f32.gmra.mrb[70].mxu0 %v1685_v53  ;;  %1517 = vmatprep.mubr.f32.mxu1 %v6030_v19 }
  0xb7   : > { %1895 = vmatprep.mubr.f32.mxu0 %v1693_v35 }
  0xb9   : > { %1518 = vmatmul.mubr.f32.gmra.mrb[72].mxu1 %v6037_v46 }
  0xba   : > { %1896 = vmatmul.mubr.f32.gmra.mrb[72].mxu0 %v1690_v1  ;;  %1522 = vmatprep.mubr.f32.mxu1 %v5686_v24  ;;  %v1967_v24 = vrot.slane %v1933_v45, 2  ;;  %v3601_v1 = vld [vmem:[%s6709_s1 + $0x8a0] sm:$0xff] }
  0xbb   : > { %1900 = vmatprep.mubr.f32.mxu0 %v1697_v10  ;;  %v1977_v10 = vsel %vm1029_vm3, %v1972_v18, %v1976_v22  ;;  %v3585_v45 = vld [vmem:[%s6709_s1 + $0x820] sm:$0xff] }
  0xbc   : > { %v1969_v21 = vsel %vm1029_vm3, %v1967_v24, %v1968_v2  ;;  %v3571_v24 = vld [vmem:[%s6709_s1 + $0x7b0] sm:$0xff]  ;;  %v3572_v2 = vld [vmem:[%s6709_s1 + $0x7b8] sm:$0xff] }
  0xbd   : > { %1523 = vmatmul.mubr.f32.gmra.mrb[74].mxu1 %v5693_v59  ;;  %v1965_v59 = vrot.slane %v5807_v43, 2  ;;  %v3582_v43 = vld [vmem:[%s6709_s1 + $0x808] sm:$0xff] }
  0xbe   : > { %1901 = vmatmul.mubr.f32.gmra.mrb[74].mxu0 %v1695_v12  ;;  %1527 = vmatprep.mubr.f32.mxu1 %v5700_v17  ;;  %v1703_v17 = vsel %vm569_vm2, %v1698_v34, %v1702_v5  ;;  %v1934_v12 = vld [vmem:[#allocation2 + $0x90] sm:$0x3]  ;;  %v1937_v34 = vld [vmem:[#allocation2 + $0xa8] sm:$0xfc] }
  0xbf   : > { %1905 = vmatprep.mubr.f32.mxu0 %v1701_v39  ;;  %v1966_v36 = vsel %vm1029_vm3, %v1964_v29, %v1965_v59  ;;  %v1971_v35 = vsel %vm1029_vm3, %v1965_v59, %v1970_v58  ;;  %v4570_v39 = vpack.c.bf16 %v3570_v30, %v3569_v28  ;;  %v3586_v5 = vld [vmem:[%s6709_s1 + $0x828] sm:$0xff]  ;;  %v3603_v29 = vld [vmem:[%s6709_s1 + $0x8b0] sm:$0xff]  ;;  %v3604_v59 = vld [vmem:[%s6709_s1 + $0x8b8] sm:$0xff] }
  0xc0   : > { %v4604_v18 = vpack.c.bf16 %v3586_v5, %v3585_v45  ;;  %v3574_v58 = vld [vmem:[%s6709_s1 + $0x7c8] sm:$0xff]  ;;  %v3575_v30 = vld [vmem:[%s6709_s1 + $0x7d0] sm:$0xff]  ;;  %v3577_v5 = vld [vmem:[%s6709_s1 + $0x7e0] sm:$0xff] }
  0xc1   : > { %1528 = vmatmul.mubr.f32.gmra.mrb[76].mxu1 %v5703_v60  ;;  %v2264_v60 = vld [vmem:[#allocation2 + $0xa8] sm:$0xff]  ;;  %v3591_v45 = vld [vmem:[%s6709_s1 + $0x850] sm:$0xff] }
  0xc2   : > { %1906 = vmatmul.mubr.f32.gmra.mrb[76].mxu0 %v1699_v23  ;;  %1532 = vmatprep.mubr.f32.mxu1 %v5708_v33  ;;  %v3581_v33 = vld [vmem:[%s6709_s1 + $0x800] sm:$0xff]  ;;  %v4602_v23 = vpack.c.bf16 %v3602_v56, %v3601_v1  ;;  %v3590_v28 = vld [vmem:[%s6709_s1 + $0x848] sm:$0xff]  ;;  %v1988_v1 = vrot.slane %v5871_v31, 2  ;;  %v3607_v56 = vld [vmem:[%s6709_s1 + $0x8d0] sm:$0xff] }
  0xc3   : > { %1910 = vmatprep.mubr.f32.mxu0 %v1705_v8  ;;  %v4596_v49 = vpack.c.bf16 %v3582_v43, %v3581_v33  ;;  %v1978_v8 = vrot.slane %v1934_v12, 2  ;;  %v4574_v33 = vpack.c.bf16 %v3572_v2, %v3571_v24  ;;  %v3555_v43 = vld [vmem:[%s6709_s1 + $0x730] sm:$0xff]  ;;  %v1994_v12 = vrot.slane %v5873_v44, 2  ;;  %v3578_v24 = vld [vmem:[%s6709_s1 + $0x7e8] sm:$0xff] }
  0xc4   : > { %v4576_v26 = vpack.c.bf16 %v3556_v15, %v3555_v43  ;;  %v3593_v43 = vld [vmem:[%s6709_s1 + $0x860] sm:$0xff] }
  0xc5   : > { %1533 = vmatmul.mubr.f32.gmra.mrb[78].mxu1 %v5712_v32  ;;  %v3600_v32 = vld [vmem:[%s6709_s1 + $0x898] sm:$0xff] }
  0xc6   : > { %1911 = vmatmul.mubr.f32.gmra.mrb[78].mxu0 %v1703_v17  ;;  %2165 = vmatprep.mubr.f32.mxu1 %v1969_v21  ;;  %v4598_v53 = vpack.c.bf16 %v3600_v32, %v3599_v11  ;;  %v1981_v17 = vsel %vm1029_vm3, %v1976_v22, %v1980_v40  ;;  %v1985_v21 = vrot.slane %v1937_v34, 2  ;;  %v1979_v11 = vsel %vm1029_vm3, %v1974_v54, %v1978_v8  ;;  %v3606_v22 = vld [vmem:[%s6709_s1 + $0x8c8] sm:$0xff]  ;;  %v3609_v8 = vld [vmem:[%s6709_s1 + $0x8e0] sm:$0xff] }
  0xc7   : > { %2392 = vmatprep.mubr.f32.mxu0 %v2264_v60  ;;  %v4572_v60 = vpack.c.bf16 %v3554_v48, %v3553_v51  ;;  %v1982_v32 = vrot.slane %v1936_v14, 2  ;;  %v1939_v34 = vld [vmem:[#allocation2 + $0xe8] sm:$0x3]  ;;  %v3559_v51 = vld [vmem:[%s6709_s1 + $0x750] sm:$0xff]  ;;  %v3560_v48 = vld [vmem:[%s6709_s1 + $0x758] sm:$0xff] }
  0xc8   : > { %v1987_v62 = vsel %vm1029_vm3, %v1985_v21, %v1986_v38  ;;  %v1938_v21 = vld [vmem:[#allocation2 + $0xe0] sm:$0x3]  ;;  %v4584_v14 = vpack.c.bf16 %v3560_v48, %v3559_v51 }
  0xc9   : > { %2166 = vmatmul.mubr.f32.vlgmr.msra.gmra.mrb[80].mxu1 %v1966_v36  ;;  %v3588_v36 = vld [vmem:[%s6709_s1 + $0x838] sm:$0xff] }
  0xca   : > { %4565 = vmatpush3.bf16.msra.mxu1 %v4564_v16  ;;  %2393 = vmatmul.mubr.f32.vlgmr.msra.gmra.mrb[80].mxu0 %v2263_v61  ;;  %v3573_v16 = vld [vmem:[%s6709_s1 + $0x7c0] sm:$0xff]  ;;  %v1983_v61 = vrot.slane %v5830_v42, 2 }
  0xcb   : > { %2170 = vmatprep.mubr.f32.mxu1 %v1973_v20  ;;  %4597 = vmatpush3.bf16.msra.mxu0 %v4596_v49  ;;  %v3605_v49 = vld [vmem:[%s6709_s1 + $0x8c0] sm:$0xff]  ;;  %v2272_v20 = vld [vmem:[#allocation2 + $0xf8] sm:$0xff]  ;;  %v4578_v4 = vpack.c.bf16 %v3574_v58, %v3573_v16  ;;  %v1996_v58 = vrot.slane %v1938_v21, 2 }
  0xcc   : > { %2397 = vmatprep.mubr.f32.mxu0 %v5795_v6  ;;  %4567 = vmatprep.subr.bf16.mxu1 %v4566_v63  ;;  %v4606_v6 = vpack.c.bf16 %v3604_v59, %v3603_v29  ;;  %v1990_v63 = vrot.slane %v5832_v47, 2  ;;  %v1984_v54 = vsel %vm1029_vm3, %v1982_v32, %v1983_v61  ;;  %v1989_v2 = vsel %vm1029_vm3, %v1983_v61, %v1988_v1  ;;  %v3610_v29 = vld [vmem:[%s6709_s1 + $0x8e8] sm:$0xff]  ;;  %v3612_v32 = vld [vmem:[%s6709_s1 + $0x8f8] sm:$0xff] }
  0xcd   : > { %2171 = vmatmul.mubr.f32.gmra.mrb[82].mxu1 %v1971_v35  ;;  %4599 = vmatprep.subr.bf16.mxu0 %v4598_v53  ;;  %v3558_v53 = vld [vmem:[%s6709_s1 + $0x748] sm:$0xff]  ;;  %v3576_v35 = vld [vmem:[%s6709_s1 + $0x7d8] sm:$0xff]  ;;  %v4618_v15 = vpack.c.bf16 %v3610_v29, %v3609_v8 }
  0xce   : > { %2398 = vmatmul.mubr.f32.gmra.mrb[82].mxu0 %v5830_v42  ;;  %2175 = vmatprep.mubr.f32.mxu1 %v1977_v10  ;;  %v4608_v42 = vpack.c.bf16 %v3588_v36, %v3587_v13  ;;  %v3608_v10 = vld [vmem:[%s6709_s1 + $0x8d8] sm:$0xff]  ;;  %v1991_v40 = vsel %vm1029_vm3, %v1986_v38, %v1990_v63  ;;  %v1995_v59 = vsel %vm1029_vm3, %v1990_v63, %v1994_v12  ;;  %v3594_v13 = vld [vmem:[%s6709_s1 + $0x868] sm:$0xff] }
  0xcf   : > { %2402 = vmatprep.mubr.f32.mxu0 %v5832_v47  ;;  %4569 = vmatpush3.bf16.msra.mxu1 %v4568_v7  ;;  %v4610_v47 = vpack.c.bf16 %v3606_v22, %v3605_v49  ;;  %v2271_v7 = vld [vmem:[#allocation2 + $0xf0] sm:$0xff]  ;;  %v1941_v38 = vld [vmem:[#allocation2 + $0xf8] sm:$0xfc]  ;;  %v2004_v22 = vrot.slane %v5939_v50, 2  ;;  %v4620_v63 = vpack.c.bf16 %v3594_v13, %v3593_v43  ;;  %v1946_v13 = vld [vmem:[#allocation2 + $0x180] sm:$0x3] }
  0xd0   : > { %4601 = vmatpush3.bf16.msra.mxu0 %v4600_v3  ;;  %4571 = vmatprep.subr.bf16.mxu1 %v4570_v39  ;;  %v4580_v3 = vpack.c.bf16 %v3558_v53, %v3557_v41  ;;  %v4582_v39 = vpack.c.bf16 %v3576_v35, %v3575_v30  ;;  %v3580_v36 = vld [vmem:[%s6709_s1 + $0x7f8] sm:$0xff]  ;;  %v2003_v49 = vrot.slane %v1941_v38, 2  ;;  %v2008_v35 = vrot.slane %v5972_v0, 2  ;;  %v6294_v38 = vld [vmem:[#allocation2 + $0x8] sm:$0xff] }
  0xd1   : > { %2176 = vmatmul.mubr.f32.gmra.mrb[84].mxu1 %v1975_v37  ;;  %4603 = vmatprep.subr.bf16.mxu0 %v4602_v23  ;;  %v3592_v23 = vld [vmem:[%s6709_s1 + $0x858] sm:$0xff]  ;;  %v1992_v37 = vrot.slane %v5907_v9, 2 }
  0xd2   : > { %2403 = vmatmul.mubr.f32.gmra.mrb[84].mxu0 %v5871_v31  ;;  %2180 = vmatprep.mubr.f32.mxu1 %v1981_v17  ;;  %v4612_v31 = vpack.c.bf16 %v3590_v28, %v3589_v55  ;;  %v1998_v17 = vrot.slane %v1939_v34, 2  ;;  %v3596_v53 = vld [vmem:[%s6709_s1 + $0x878] sm:$0xff]  ;;  %v2001_v28 = vrot.slane %v5970_v52, 2  ;;  %v2005_v30 = vsel %vm1029_vm3, %v2003_v49, %v2004_v22 }
  0xd3   : > { %2407 = vmatprep.mubr.f32.mxu0 %v5873_v44  ;;  %4573 = vmatpush3.bf16.msra.mxu1 %v4572_v60  ;;  %v4614_v44 = vpack.c.bf16 %v3608_v10, %v3607_v56  ;;  %v4586_v60 = vpack.c.bf16 %v3578_v24, %v3577_v5  ;;  %v1993_v16 = vsel %vm1029_vm3, %v1988_v1, %v1992_v37  ;;  %v4666_v34 = vld [vmem:[#allocation2 + $0x158] sm:$0xff] }
  0xd4   : > { %4605 = vmatpush3.bf16.msra.mxu0 %v4604_v18  ;;  %4575 = vmatprep.subr.bf16.mxu1 %v4574_v33  ;;  %v3561_v18 = vld [vmem:[%s6709_s1 + $0x760] sm:$0xff]  ;;  %v3562_v33 = vld [vmem:[%s6709_s1 + $0x768] sm:$0xff]  ;;  %v1999_v61 = vsel %vm1029_vm3, %v1994_v12, %v1998_v17  ;;  %v1997_v55 = vsel %vm1029_vm3, %v1992_v37, %v1996_v58  ;;  %v2009_v10 = vsel %vm1029_vm3, %v2004_v22, %v2008_v35  ;;  %v2010_v12 = vrot.slane %v6015_v27, 2  ;;  %v4670_v37 = vld [vmem:[#allocation2 + $0x178] sm:$0xff] }
  0xd5   : > { %2181 = vmatmul.mubr.f32.gmra.mrb[86].mxu1 %v1979_v11  ;;  %4607 = vmatprep.subr.bf16.mxu0 %v4606_v6  ;;  %v3579_v6 = vld [vmem:[%s6709_s1 + $0x7f0] sm:$0xff]  ;;  %v6302_v58 = vld [vmem:[#allocation2 + $0xb8] sm:$0xff] }
  0xd6   : > { %2408 = vmatmul.mubr.f32.gmra.mrb[86].mxu0 %v5907_v9  ;;  %2185 = vmatprep.mubr.f32.mxu1 %v1987_v62  ;;  %v4616_v9 = vpack.c.bf16 %v3592_v23, %v3591_v45  ;;  %v3611_v11 = vld [vmem:[%s6709_s1 + $0x8f0] sm:$0xff]  ;;  %v4669_v23 = vld [vmem:[#allocation2 + $0x160] sm:$0xff] }
  0xd7   : > { %2412 = vmatprep.mubr.f32.mxu0 %v2272_v20  ;;  %4577 = vmatpush3.bf16.msra.mxu1 %v4576_v26  ;;  %v1940_v62 = vld [vmem:[#allocation2 + $0xf0] sm:$0xfc]  ;;  %v4588_v20 = vpack.c.bf16 %v3562_v33, %v3561_v18  ;;  %v4590_v26 = vpack.c.bf16 %v3580_v36, %v3579_v6  ;;  %v4622_v41 = vpack.c.bf16 %v3612_v32, %v3611_v11  ;;  %v2024_v21 = vrot.slane %v4669_v23, 2 }
  0xd8   : > { %4609 = vmatpush3.bf16.msra.mxu0 %v4608_v42  ;;  %4579 = vmatprep.subr.bf16.mxu1 %v4578_v4  ;;  %v3563_v42 = vld [vmem:[%s6709_s1 + $0x770] sm:$0xff]  ;;  %v3564_v4 = vld [vmem:[%s6709_s1 + $0x778] sm:$0xff] }
  0xd9   : > { %2186 = vmatmul.mubr.f32.gmra.mrb[88].mxu1 %v1984_v54  ;;  %4611 = vmatprep.subr.bf16.mxu0 %v4610_v47  ;;  %v2000_v47 = vrot.slane %v1940_v62, 2  ;;  %v4592_v54 = vpack.c.bf16 %v3564_v4, %v3563_v42  ;;  %v2573_v4 = vrot.slane %v6302_v58, 1 }
  0xda   : > { %2413 = vmatmul.mubr.f32.gmra.mrb[88].mxu0 %v2271_v7  ;;  %2190 = vmatprep.mubr.f32.mxu1 %v1991_v40  ;;  %v1943_v7 = vld [vmem:[#allocation2 + $0x138] sm:$0x3] }
  0xdb   : > { %2417 = vmatprep.mubr.f32.mxu0 %v5939_v50  ;;  %4581 = vmatpush3.bf16.msra.mxu1 %v4580_v3  ;;  %v3595_v50 = vld [vmem:[%s6709_s1 + $0x870] sm:$0xff]  ;;  %v2002_v56 = vsel %vm1029_vm3, %v2000_v47, %v2001_v28 }
  0xdc   : > { %4613 = vmatpush3.bf16.msra.mxu0 %v4612_v31  ;;  %4583 = vmatprep.subr.bf16.mxu1 %v4582_v39  ;;  %v4624_v1 = vpack.c.bf16 %v3596_v53, %v3595_v50  ;;  %v1942_v3 = vld [vmem:[#allocation2 + $0x130] sm:$0x3]  ;;  %v1945_v31 = vld [vmem:[#allocation2 + $0x148] sm:$0xfc]  ;;  %v2903_v50 = vrot.slane %v6302_v58, 2 }
  0xdd   : > { %2191 = vmatmul.mubr.f32.gmra.mrb[90].mxu1 %v1989_v2  ;;  %4615 = vmatprep.subr.bf16.mxu0 %v4614_v44  ;;  %v2014_v51 = vrot.slane %v1942_v3, 2  ;;  %v2021_v45 = vrot.slane %v1945_v31, 2  ;;  %v1944_v44 = vld [vmem:[#allocation2 + $0x140] sm:$0xfc] }
  0xde   : > { %2418 = vmatmul.mubr.f32.gmra.mrb[90].mxu0 %v5970_v52  ;;  %2195 = vmatprep.mubr.f32.mxu1 %v1995_v59  ;;  %v2006_v52 = vrot.slane %v6005_v25, 2  ;;  %v2018_v24 = vrot.slane %v1944_v44, 2  ;;  %v4671_v59 = vld [vmem:[#allocation2 + $0x170] sm:$0xff] }
  0xdf   : > { %2422 = vmatprep.mubr.f32.mxu0 %v5972_v0  ;;  %4585 = vmatpush3.bf16.msra.mxu1 %v4584_v14  ;;  %v2012_v0 = vrot.slane %v6008_v57, 2  ;;  %v2015_v5 = vsel %vm1029_vm3, %v2010_v12, %v2014_v51  ;;  %v2028_v33 = vrot.slane %v4671_v59, 2 }
  0xe0   : > { %4617 = vmatpush3.bf16.msra.mxu0 %v4616_v9  ;;  %4587 = vmatprep.subr.bf16.mxu1 %v4586_v60  ;;  %v2007_v40 = vsel %vm1029_vm3, %v2001_v28, %v2006_v52  ;;  %v2011_v39 = vsel %vm1029_vm3, %v2006_v52, %v2010_v12  ;;  %v2030_v9 = vrot.slane %v4670_v37, 2  ;;  %v1947_v60 = vld [vmem:[#allocation2 + $0x188] sm:$0x3]  ;;  %v2867_v28 = vld [vmem:[#allocation2 + $0xa0] sm:$0xfc] }
  0xe1   : > { %2196 = vmatmul.mubr.f32.gmra.mrb[92].mxu1 %v1993_v16  ;;  %4619 = vmatprep.subr.bf16.mxu0 %v4618_v15  ;;  %v2034_v15 = vrot.slane %v1947_v60, 2  ;;  %v2490_v16 = vld [vmem:[#allocation2 + $0xa8] sm:$0xfe]  ;;  %v2029_v62 = vsel %vm1029_vm3, %v2024_v21, %v2028_v33 }
  0xe2   : > { %2423 = vmatmul.mubr.f32.gmra.mrb[92].mxu0 %v6005_v25  ;;  %2200 = vmatprep.mubr.f32.mxu1 %v1999_v61  ;;  %v2013_v25 = vsel %vm1029_vm3, %v2008_v35, %v2012_v0  ;;  %v2868_v61 = vld [vmem:[#allocation2 + $0xa8] sm:$0xfc]  ;;  %v2572_v42 = vrot.slane %v2490_v16, 1  ;;  %v2870_v60 = vld [vmem:[#allocation2 + $0xe8] sm:$0x3] }
  0xe3   : > { %2427 = vmatprep.mubr.f32.mxu0 %v6008_v57  ;;  %4589 = vmatpush3.bf16.msra.mxu1 %v4588_v20  ;;  %v4667_v57 = vld [vmem:[#allocation2 + $0x150] sm:$0xff]  ;;  %v2032_v20 = vrot.slane %v1946_v13, 2  ;;  %v2902_v47 = vrot.slane %v2868_v61, 2  ;;  %v2497_v13 = vld [vmem:[#allocation2 + $0xe0] sm:$0x1] }
  0xe4   : > { %4621 = vmatpush3.bf16.msra.mxu0 %v4620_v63  ;;  %4591 = vmatprep.subr.bf16.mxu1 %v4590_v26  ;;  %v2019_v2 = vrot.slane %v4667_v57, 2  ;;  %v2489_v63 = vld [vmem:[#allocation2 + $0xa0] sm:$0xfe]  ;;  %v2035_v26 = vsel %vm1029_vm3, %v2030_v9, %v2034_v15 }
  0xe5   : > { %2201 = vmatmul.mubr.f32.gmra.mrb[94].mxu1 %v1997_v55  ;;  %4623 = vmatprep.subr.bf16.mxu0 %v4622_v41  ;;  %v6313_v41 = vld [vmem:[#allocation2 + $0xb0] sm:$0xff]  ;;  %v2904_v31 = vsel %vm1029_vm3, %v2902_v47, %v2903_v50 }
  0xe6   : > { %2428 = vmatmul.mubr.f32.gmra.mrb[94].mxu0 %v6015_v27  ;;  %2205 = vmatprep.mubr.f32.mxu1 %v2005_v30  ;;  %v2022_v27 = vrot.slane %v4666_v34, 2  ;;  %v2020_v17 = vsel %vm1029_vm3, %v2018_v24, %v2019_v2  ;;  %v2025_v18 = vsel %vm1029_vm3, %v2019_v2, %v2024_v21  ;;  %v6316_v30 = vld [vmem:[#allocation2 + $0xc8] sm:$0xff]  ;;  %v2900_v12 = vrot.slane %v6313_v41, 2 }
  0xe7   : > { %2432 = vmatprep.mubr.f32.mxu0 %v6030_v19  ;;  %4593 = vmatpush3.bf16.msra.mxu1 %v4592_v54  ;;  %v2016_v19 = vrot.slane %v1943_v7, 2  ;;  %v2574_v7 = vsel %vm569_vm2, %v2572_v42, %v2573_v4  ;;  %v2498_v21 = vld [vmem:[#allocation2 + $0xe8] sm:$0x1] }
  0xe8   : > { %4625 = vmatpush3.bf16.msra.mxu0 %v4624_v1  ;;  %v2023_v8 = vsel %vm1029_vm3, %v2021_v45, %v2022_v27  ;;  %v2569_v1 = vrot.slane %v2489_v63, 1  ;;  %v2500_v63 = vld [vmem:[#allocation2 + $0xf8] sm:$0xfe] }
  0xe9   : > { %2206 = vmatmul.mubr.f32.gmra.mrb[96].mxu1 %v2002_v56  ;;  %v2017_v48 = vsel %vm1029_vm3, %v2012_v0, %v2016_v19  ;;  %v2570_v0 = vrot.slane %v6313_v41, 1  ;;  %v2583_v41 = vrot.slane %v2497_v13, 1 }
  0xea   : > { %2433 = vmatmul.mubr.f32.gmra.mrb[96].mxu0 %v6037_v46  ;;  %2210 = vmatprep.mubr.f32.mxu1 %v2009_v10  ;;  %v4668_v46 = vld [vmem:[#allocation2 + $0x168] sm:$0xff]  ;;  %v2033_v10 = vsel %vm1029_vm3, %v2028_v33, %v2032_v20  ;;  %v2915_v20 = vrot.slane %v2870_v60, 2 }
  0xeb   : > { %2437 = vmatprep.mubr.f32.mxu0 %v4666_v34  ;;  %v2026_v29 = vrot.slane %v4668_v46, 2  ;;  %v2577_v34 = vrot.slane %v6316_v30, 1 }
  0xed   : > { %2211 = vmatmul.mubr.f32.gmra.mrb[98].mxu1 %v2007_v40  ;;  %v2027_v14 = vsel %vm1029_vm3, %v2022_v27, %v2026_v29  ;;  %v2031_v43 = vsel %vm1029_vm3, %v2026_v29, %v2030_v9  ;;  %v2899_v40 = vrot.slane %v2867_v28, 2  ;;  %v2571_v27 = vsel %vm569_vm2, %v2569_v1, %v2570_v0 }
  0xee   : > { %2438 = vmatmul.mubr.f32.gmra.mrb[98].mxu0 %v4667_v57  ;;  %2215 = vmatprep.mubr.f32.mxu1 %v2013_v25  ;;  %v6329_v25 = vld [vmem:[#allocation2 + $0xc0] sm:$0xff]  ;;  %v2907_v57 = vrot.slane %v6316_v30, 2  ;;  %v2590_v1 = vrot.slane %v2500_v63, 1 }
  0xef   : > { %2442 = vmatprep.mubr.f32.mxu0 %v4668_v46  ;;  %v2575_v44 = vrot.slane %v6329_v25, 1  ;;  %v2905_v24 = vrot.slane %v6329_v25, 2  ;;  %v6363_v30 = vld [vmem:[#allocation2 + $0x100] sm:$0xff] }
  0xf1   : > { %2216 = vmatmul.mubr.f32.gmra.mrb[100].mxu1 %v2011_v39  ;;  %v6333_v39 = vld [vmem:[#allocation2 + $0xd8] sm:$0xff] }
  0xf2   : > { %2443 = vmatmul.mubr.f32.gmra.mrb[100].mxu0 %v4669_v23  ;;  %2220 = vmatprep.mubr.f32.mxu1 %v2017_v48  ;;  %v2901_v23 = vsel %vm1029_vm3, %v2899_v40, %v2900_v12  ;;  %v2581_v2 = vrot.slane %v6333_v39, 1 }
  0xf3   : > { %2447 = vmatprep.mubr.f32.mxu0 %v4670_v37  ;;  %v2495_v37 = vld [vmem:[#allocation2 + $0xd0] sm:$0xff] }
  0xf4   : > { %v2579_v15 = vrot.slane %v2495_v37, 1  ;;  %v2582_v16 = vsel %vm569_vm2, %v2577_v34, %v2581_v2  ;;  %v2909_v58 = vrot.slane %v2495_v37, 2  ;;  %v2918_v37 = vrot.slane %v6363_v30, 2 }
  0xf5   : > { %2221 = vmatmul.mubr.f32.gmra.mrb[102].mxu1 %v2015_v5  ;;  %v2578_v5 = vsel %vm569_vm2, %v2573_v4, %v2577_v34 }
  0xf6   : > { %2448 = vmatmul.mubr.f32.gmra.mrb[102].mxu0 %v4671_v59  ;;  %2225 = vmatprep.mubr.f32.mxu1 %v2023_v8  ;;  %v2908_v59 = vsel %vm1029_vm3, %v2903_v50, %v2907_v57  ;;  %v2580_v28 = vsel %vm569_vm2, %v2575_v44, %v2579_v15 }
  0xf7   : > { %2452 = vmatprep.mubr.f32.mxu0 %v6294_v38 }
  0xf9   : > { %2226 = vmatmul.mubr.f32.gmra.mrb[104].mxu1 %v2020_v17  ;;  %v2911_v17 = vrot.slane %v6333_v39, 2  ;;  %v2584_v39 = vsel %vm569_vm2, %v2579_v15, %v2583_v41 }
  0xfa   : > { %2453 = vmatmul.mubr.f32.gmra.mrb[104].mxu0 %v6294_v38  ;;  %2230 = vmatprep.mubr.f32.mxu1 %v2027_v14 }
  0xfb   : > { %2457 = vmatprep.mubr.f32.mxu0 %v6294_v38  ;;  %v2916_v34 = vsel %vm1029_vm3, %v2911_v17, %v2915_v20 }
  0xfc   : > { %v3674_v6 = vpop.f32.mrb[0].mxu1  ;;  %v3650_v36 = vpop.f32.mrb[0].mxu0 }
  0xfd   : > { %v3675_v11 = vpop.f32.mrb[1].mxu1  ;;  %2231 = vmatmul.mubr.f32.gmra.mrb[106].mxu1 %v2025_v18  ;;  %v3651_v32 = vpop.f32.mrb[1].mxu0 }
  0xfe   : > { %v6304_v49 = vadd.f32 %v3675_v11, %v3674_v6  ;;  %v6306_v22 = vadd.f32 %v3651_v32, %v3650_v36  ;;  %2458 = vmatmul.mubr.f32.gmra.mrb[106].mxu0 %v6294_v38  ;;  %2235 = vmatprep.mubr.f32.mxu1 %v2031_v43  ;;  %v2576_v43 = vsel %vm569_vm2, %v2570_v0, %v2575_v44  ;;  %v2869_v6 = vld [vmem:[#allocation2 + $0xe0] sm:$0x3]  ;;  %v2585_v11 = vrot.slane %v2498_v21, 1  ;;  %v2499_v0 = vld [vmem:[#allocation2 + $0xf0] sm:$0xfe] }
  0xff   : > { %2462 = vmatprep.mubr.f32.mxu0 %v6294_v38  ;;  %v2906_v36 = vsel %vm1029_vm3, %v2900_v12, %v2905_v24  ;;  %v2913_v50 = vrot.slane %v2869_v6, 2  ;;  %v2587_v44 = vrot.slane %v2499_v0, 1 }
 0x100   : > { %v3677_v53 = vpop.f32.mrb[2].mxu1  ;;  %v3653_v55 = vpop.f32.mrb[2].mxu0 }
 0x101   : > { %v3678_v35 = vpop.f32.mrb[3].mxu1  ;;  %2236 = vmatmul.mubr.f32.gmra.mrb[108].mxu1 %v2029_v62  ;;  %v3654_v54 = vpop.f32.mrb[3].mxu0  ;;  %v2912_v62 = vsel %vm1029_vm3, %v2907_v57, %v2911_v17 }
 0x102   : > { %v6318_v56 = vadd.f32 %v3678_v35, %v3677_v53  ;;  %v6320_v52 = vadd.f32 %v3654_v54, %v3653_v55  ;;  %2463 = vmatmul.mubr.f32.gmra.mrb[108].mxu0 %v6294_v38  ;;  %2240 = vmatprep.mubr.f32.mxu1 %v2035_v26  ;;  %v6356_v26 = vld [vmem:[#allocation2 + $0x108] sm:$0xff]  ;;  %v2872_v53 = vld [vmem:[#allocation2 + $0xf8] sm:$0xfc]  ;;  %v2910_v35 = vsel %vm1029_vm3, %v2905_v24, %v2909_v58 }
 0x103   : > { %2467 = vmatprep.mubr.f32.mxu0 %v6294_v38  ;;  %v2586_v54 = vsel %vm569_vm2, %v2581_v2, %v2585_v11  ;;  %v2920_v25 = vrot.slane %v2872_v53, 2 }
 0x104   : > { %v3680_v19 = vpop.f32.mrb[4].mxu1  ;;  %v3656_v3 = vpop.f32.mrb[4].mxu0 }
 0x105   : > { %v3681_v51 = vpop.f32.mrb[5].mxu1  ;;  %2241 = vmatmul.mubr.f32.gmra.mrb[110].mxu1 %v2033_v10  ;;  %v3657_v46 = vpop.f32.mrb[5].mxu0  ;;  %v2591_v10 = vrot.slane %v6356_v26, 1 }
 0x106   : > { %v6335_v48 = vadd.f32 %v3681_v51, %v3680_v19  ;;  %v6337_v45 = vadd.f32 %v3657_v46, %v3656_v3  ;;  %2468 = vmatmul.mubr.f32.gmra.mrb[110].mxu0 %v6294_v38  ;;  %2770 = vmatprep.mubr.f32.mxu1 %v2574_v7  ;;  %v2871_v7 = vld [vmem:[#allocation2 + $0xf0] sm:$0xfc]  ;;  %v2921_v19 = vrot.slane %v6356_v26, 2  ;;  %v6370_v3 = vld [vmem:[#allocation2 + $0x118] sm:$0xff]  ;;  %v2914_v51 = vsel %vm1029_vm3, %v2909_v58, %v2913_v50 }
 0x107   : > { %3100 = vmatprep.mubr.f32.mxu0 %v2904_v31  ;;  %v2592_v24 = vsel %vm569_vm2, %v2590_v1, %v2591_v10  ;;  %v2917_v2 = vrot.slane %v2871_v7, 2  ;;  %v2925_v21 = vrot.slane %v6370_v3, 2  ;;  %v2507_v1 = vld [vmem:[#allocation2 + $0x130] sm:$0x1] }
 0x108   : > { %v3683_v8 = vpop.f32.mrb[6].mxu1  ;;  %v3659_v29 = vpop.f32.mrb[6].mxu0  ;;  %v2922_v17 = vsel %vm1029_vm3, %v2920_v25, %v2921_v19  ;;  %v2510_v25 = vld [vmem:[#allocation2 + $0x148] sm:$0xfe] }
 0x109   : > { %v3684_v14 = vpop.f32.mrb[7].mxu1  ;;  %2771 = vmatmul.mubr.f32.vlgmr.msra.gmra.mrb[112].mxu1 %v2571_v27  ;;  %v3660_v9 = vpop.f32.mrb[7].mxu0  ;;  %v2926_v63 = vsel %vm1029_vm3, %v2921_v19, %v2925_v21  ;;  %v6412_v19 = vld [vmem:[#allocation2 + $0x158] sm:$0xff] }
 0x10a   : > { %v6348_v18 = vadd.f32 %v3684_v14, %v3683_v8  ;;  %v6350_v33 = vadd.f32 %v3660_v9, %v3659_v29  ;;  %3101 = vmatmul.mubr.f32.vlgmr.msra.gmra.mrb[112].mxu0 %v2901_v23  ;;  %2775 = vmatprep.mubr.f32.mxu1 %v2578_v5  ;;  %v2588_v23 = vrot.slane %v6363_v30, 1  ;;  %v6379_v5 = vld [vmem:[#allocation2 + $0x110] sm:$0xff]  ;;  %v2595_v8 = vrot.slane %v6370_v3, 1  ;;  %v6386_v14 = vld [vmem:[#allocation2 + $0x128] sm:$0xff] }
 0x10b   : > { %3105 = vmatprep.mubr.f32.mxu0 %v2908_v59  ;;  %v2923_v11 = vrot.slane %v6379_v5, 2  ;;  %v2929_v26 = vrot.slane %v6386_v14, 2 }
 0x10c   : > { %v3686_v32 = vpop.f32.mrb[8].mxu1  ;;  %v3662_v61 = vpop.f32.mrb[8].mxu0  ;;  %v2589_v6 = vsel %vm569_vm2, %v2587_v44, %v2588_v23  ;;  %v2596_v58 = vsel %vm569_vm2, %v2591_v10, %v2595_v8 }
 0x10d   : > { %v3687_v42 = vpop.f32.mrb[9].mxu1  ;;  %2776 = vmatmul.mubr.f32.gmra.mrb[114].mxu1 %v2576_v43  ;;  %v3663_v4 = vpop.f32.mrb[9].mxu0  ;;  %v2593_v43 = vrot.slane %v6379_v5, 1  ;;  %v2924_v10 = vsel %vm1029_vm3, %v2918_v37, %v2923_v11 }
 0x10e   : > { %v6358_v55 = vadd.f32 %v3687_v42, %v3686_v32  ;;  %v6360_v47 = vadd.f32 %v3663_v4, %v3662_v61  ;;  %3106 = vmatmul.mubr.f32.gmra.mrb[114].mxu0 %v2906_v36  ;;  %2780 = vmatprep.mubr.f32.mxu1 %v2582_v16  ;;  %v6394_v36 = vld [vmem:[#allocation2 + $0x120] sm:$0xff]  ;;  %v2919_v16 = vsel %vm1029_vm3, %v2917_v2, %v2918_v37  ;;  %v2599_v32 = vrot.slane %v6386_v14, 1  ;;  %v2508_v61 = vld [vmem:[#allocation2 + $0x138] sm:$0x1]  ;;  %v6417_v37 = vld [vmem:[#allocation2 + $0x150] sm:$0xff] }
 0x10f   : > { %3110 = vmatprep.mubr.f32.mxu0 %v2912_v62  ;;  %v2874_v42 = vld [vmem:[#allocation2 + $0x138] sm:$0x3]  ;;  %v2594_v50 = vsel %vm569_vm2, %v2588_v23, %v2593_v43  ;;  %v2597_v53 = vrot.slane %v6394_v36, 1  ;;  %v2509_v2 = vld [vmem:[#allocation2 + $0x140] sm:$0xfe] }
 0x110   : > { %v3689_v40 = vpop.f32.mrb[10].mxu1  ;;  %v3665_v12 = vpop.f32.mrb[10].mxu0  ;;  %v2600_v0 = vsel %vm569_vm2, %v2595_v8, %v2599_v32  ;;  %v2933_v7 = vrot.slane %v2874_v42, 2 }
 0x111   : > { %v3690_v31 = vpop.f32.mrb[11].mxu1  ;;  %2781 = vmatmul.mubr.f32.gmra.mrb[116].mxu1 %v2580_v28  ;;  %v3666_v57 = vpop.f32.mrb[11].mxu0 }
 0x112   : > { %v6374_v46 = vadd.f32 %v3690_v31, %v3689_v40  ;;  %v6376_v27 = vadd.f32 %v3666_v57, %v3665_v12  ;;  %3111 = vmatmul.mubr.f32.gmra.mrb[116].mxu0 %v2910_v35  ;;  %2785 = vmatprep.mubr.f32.mxu1 %v2586_v54  ;;  %v2927_v35 = vrot.slane %v6394_v36, 2  ;;  %v2603_v54 = vrot.slane %v2508_v61, 1  ;;  %v6423_v36 = vld [vmem:[#allocation2 + $0x168] sm:$0xff] }
 0x113   : > { %3115 = vmatprep.mubr.f32.mxu0 %v2916_v34  ;;  %v2930_v12 = vsel %vm1029_vm3, %v2925_v21, %v2929_v26  ;;  %v2873_v34 = vld [vmem:[#allocation2 + $0x130] sm:$0x3]  ;;  %v2598_v57 = vsel %vm569_vm2, %v2593_v43, %v2597_v53  ;;  %v2875_v21 = vld [vmem:[#allocation2 + $0x140] sm:$0xfc]  ;;  %v2606_v61 = vrot.slane %v6417_v37, 1 }
 0x114   : > { %v3692_v29 = vpop.f32.mrb[12].mxu1  ;;  %v3668_v59 = vpop.f32.mrb[12].mxu0  ;;  %v2928_v5 = vsel %vm1029_vm3, %v2923_v11, %v2927_v35 }
 0x115   : > { %v3693_v9 = vpop.f32.mrb[13].mxu1  ;;  %2786 = vmatmul.mubr.f32.gmra.mrb[118].mxu1 %v2584_v39  ;;  %v3669_v60 = vpop.f32.mrb[13].mxu0  ;;  %v2601_v39 = vrot.slane %v2507_v1, 1 }
 0x116   : > { %v6389_v15 = vadd.f32 %v3693_v9, %v3692_v29  ;;  %v6391_v13 = vadd.f32 %v3669_v60, %v3668_v59  ;;  %3116 = vmatmul.mubr.f32.gmra.mrb[118].mxu0 %v2914_v51  ;;  %2790 = vmatprep.mubr.f32.mxu1 %v2592_v24  ;;  %v2876_v51 = vld [vmem:[#allocation2 + $0x148] sm:$0xfc]  ;;  %v2604_v24 = vsel %vm569_vm2, %v2599_v32, %v2603_v54  ;;  %v2931_v29 = vrot.slane %v2873_v34, 2 }
 0x117   : > { %3120 = vmatprep.mubr.f32.mxu0 %v2922_v17  ;;  %v2608_v59 = vrot.slane %v2510_v25, 1  ;;  %v2609_v17 = vrot.slane %v6412_v19, 1  ;;  %v2934_v60 = vsel %vm1029_vm3, %v2929_v26, %v2933_v7  ;;  %v2938_v43 = vrot.slane %v2876_v51, 2  ;;  %v6436_v7 = vld [vmem:[#allocation2 + $0x178] sm:$0xff] }
 0x118   : > { %v3695_v62 = vpop.f32.mrb[14].mxu1  ;;  %v3671_v20 = vpop.f32.mrb[14].mxu0  ;;  %v2602_v11 = vsel %vm569_vm2, %v2597_v53, %v2601_v39  ;;  %v2605_v32 = vrot.slane %v2509_v2, 1  ;;  %v2936_v26 = vrot.slane %v6417_v37, 2  ;;  %v2513_v53 = vld [vmem:[#allocation2 + $0x160] sm:$0xff]  ;;  %v2947_v37 = vrot.slane %v6436_v7, 2 }
 0x119   : > { %v3696_v4 = vpop.f32.mrb[15].mxu1  ;;  %2791 = vmatmul.mubr.f32.gmra.mrb[120].mxu1 %v2589_v6  ;;  %v3672_v41 = vpop.f32.mrb[15].mxu0  ;;  %v2939_v6 = vrot.slane %v6412_v19, 2  ;;  %v2941_v51 = vrot.slane %v2513_v53, 2 }
 0x11a   : > { %v6404_v28 = vadd.f32 %v3696_v4, %v3695_v62  ;;  %v6406_v30 = vadd.f32 %v3672_v41, %v3671_v20  ;;  %3121 = vmatmul.mubr.f32.gmra.mrb[120].mxu0 %v2919_v16  ;;  %2795 = vmatprep.mubr.f32.mxu1 %v2596_v58  ;;  %v2932_v4 = vsel %vm1029_vm3, %v2927_v35, %v2931_v29 }
 0x11b   : > { %3125 = vmatprep.mubr.f32.mxu0 %v2926_v63  ;;  %v2935_v63 = vrot.slane %v2875_v21, 2  ;;  %v2610_v41 = vsel %vm569_vm2, %v2608_v59, %v2609_v17  ;;  %v2607_v34 = vsel %vm569_vm2, %v2605_v32, %v2606_v61 }
 0x11c   : > { %v3730_v40 = vpop.f32.mrb[16].mxu1 }
 0x11d   : > { %v3731_v3 = vpop.f32.mrb[17].mxu1  ;;  %2796 = vmatmul.mubr.f32.gmra.mrb[122].mxu1 %v2594_v50  ;;  %v3810_v31 = vpop.f32.mrb[16].mxu0  ;;  %v2613_v50 = vrot.slane %v6423_v36, 1 }
 0x11e   : > { %v3732_v44 = vadd.f32 %v3731_v3, %v3730_v40  ;;  %v3811_v23 = vpop.f32.mrb[17].mxu0  ;;  %3126 = vmatmul.mubr.f32.gmra.mrb[122].mxu0 %v2924_v10  ;;  %2800 = vmatprep.mubr.f32.mxu1 %v2600_v0  ;;  %v2940_v10 = vsel %vm1029_vm3, %v2938_v43, %v2939_v6  ;;  %v2943_v0 = vrot.slane %v6423_v36, 2  ;;  %v2611_v3 = vrot.slane %v2513_v53, 1 }
 0x11f   : > { %v3812_v8 = vadd.f32 %v3811_v23, %v3810_v31  ;;  %3130 = vmatprep.mubr.f32.mxu0 %v2930_v12  ;;  %v6442_v31 = vld [vmem:[#allocation2 + $0x170] sm:$0xff]  ;;  %v2614_v39 = vsel %vm569_vm2, %v2609_v17, %v2613_v50  ;;  %v2518_v23 = vld [vmem:[#allocation2 + $0x188] sm:$0x1]  ;;  %v2942_v36 = vsel %vm1029_vm3, %v2936_v26, %v2941_v51 }
 0x120   : > { %v919_v14 = vadd.f32 %v3732_v44, %v6306_v22  ;;  %v3733_v9 = vpop.f32.mrb[18].mxu1  ;;  %v2617_v44 = vrot.slane %v6436_v7, 1  ;;  %v2944_v2 = vsel %vm1029_vm3, %v2939_v6, %v2943_v0  ;;  %v2615_v59 = vrot.slane %v6442_v31, 1 }
 0x121   : > { %v3734_v16 = vpop.f32.mrb[19].mxu1  ;;  %2801 = vmatmul.mubr.f32.gmra.mrb[124].mxu1 %v2598_v57  ;;  %v3813_v58 = vpop.f32.mrb[18].mxu0  ;;  %v2945_v21 = vrot.slane %v6442_v31, 2  ;;  %v2621_v43 = vrot.slane %v2518_v23, 1  ;;  %v6469_v31 = vrot.slane %v6294_v38, 2 }
 0x122   : > { %v6427_v62 = vadd.f32 %v3812_v8, %v919_v14  ;;  %v3735_v20 = vadd.f32 %v3734_v16, %v3733_v9  ;;  %v3814_v22 = vpop.f32.mrb[19].mxu0  ;;  %3131 = vmatmul.mubr.f32.gmra.mrb[124].mxu0 %v2928_v5  ;;  %2805 = vmatprep.mubr.f32.mxu1 %v2604_v24  ;;  %v2878_v14 = vld [vmem:[#allocation2 + $0x188] sm:$0x3]  ;;  %v2618_v16 = vsel %vm569_vm2, %v2613_v50, %v2617_v44 }
 0x123   : > { %v3815_v42 = vadd.f32 %v3814_v22, %v3813_v58  ;;  %3135 = vmatprep.mubr.f32.mxu0 %v2934_v60  ;;  %v2517_v58 = vld [vmem:[#allocation2 + $0x180] sm:$0x1]  ;;  %v2951_v22 = vrot.slane %v2878_v14, 2  ;;  %v2946_v53 = vsel %vm1029_vm3, %v2941_v51, %v2945_v21 }
 0x124   : > { %v924_v54 = vadd.f32 %v3735_v20, %v6320_v52  ;;  %v3736_v1 = vpop.f32.mrb[20].mxu1  ;;  %v2937_v52 = vsel %vm1029_vm3, %v2935_v63, %v2936_v26  ;;  %v2948_v20 = vsel %vm1029_vm3, %v2943_v0, %v2947_v37  ;;  %v2877_v63 = vld [vmem:[#allocation2 + $0x180] sm:$0x3] }
 0x125   : > { %v3737_v40 = vpop.f32.mrb[21].mxu1  ;;  %2806 = vmatmul.mubr.f32.gmra.mrb[126].mxu1 %v2602_v11  ;;  %v3816_v12 = vpop.f32.mrb[20].mxu0  ;;  %v2949_v7 = vrot.slane %v2877_v63, 2 }
 0x126   : > { %v6439_v35 = vadd.f32 %v3815_v42, %v924_v54  ;;  %v3738_v25 = vadd.f32 %v3737_v40, %v3736_v1  ;;  %v3817_v19 = vpop.f32.mrb[21].mxu0  ;;  %3136 = vmatmul.mubr.f32.gmra.mrb[126].mxu0 %v2932_v4  ;;  %2810 = vmatprep.mubr.f32.mxu1 %v2610_v41  ;;  %v2520_v42 = vld [vmem:[#allocation2 + $0x198] sm:$0xfe] }
 0x127   : > { %v3818_v57 = vadd.f32 %v3817_v19, %v3816_v12  ;;  %3140 = vmatprep.mubr.f32.mxu0 %v2940_v10  ;;  %v2880_v54 = vld [vmem:[#allocation2 + $0x198] sm:$0xfc]  ;;  %v2619_v10 = vrot.slane %v2517_v58, 1  ;;  %v2626_v40 = vrot.slane %v2520_v42, 1  ;;  %v6464_v12 = vrot.slane %v6294_v38, 1 }
 0x128   : > { %v929_v5 = vadd.f32 %v3738_v25, %v6337_v45  ;;  %v3739_v24 = vpop.f32.mrb[22].mxu1  ;;  %v2612_v45 = vsel %vm569_vm2, %v2606_v61, %v2611_v3  ;;  %v2616_v61 = vsel %vm569_vm2, %v2611_v3, %v2615_v59  ;;  %v2956_v3 = vrot.slane %v2880_v54, 2 }
 0x129   : > { %v3740_v8 = vpop.f32.mrb[23].mxu1  ;;  %2811 = vmatmul.mubr.f32.gmra.mrb[128].mxu1 %v2607_v34  ;;  %v3819_v29 = vpop.f32.mrb[22].mxu0  ;;  %v2519_v34 = vld [vmem:[#allocation2 + $0x190] sm:$0xfe]  ;;  %v2628_v38 = vsel %vm569_vm2, %v2626_v40, %v6464_v12 }
 0x12a   : > { %v6451_v17 = vadd.f32 %v3818_v57, %v929_v5  ;;  %v3741_v9 = vadd.f32 %v3740_v8, %v3739_v24  ;;  %v3820_v60 = vpop.f32.mrb[23].mxu0  ;;  %3141 = vmatmul.mubr.f32.gmra.mrb[128].mxu0 %v2937_v52  ;;  %2815 = vmatprep.mubr.f32.mxu1 %v2614_v39  ;;  %v2952_v52 = vsel %vm1029_vm3, %v2947_v37, %v2951_v22  ;;  %v2879_v57 = vld [vmem:[#allocation2 + $0x190] sm:$0xfc]  ;;  %v2882_v22 = vld [vmem:[#allocation2 + $0x1d8] sm:$0x3] }
 0x12b   : > { %v3821_v6 = vadd.f32 %v3820_v60, %v3819_v29  ;;  %3145 = vmatprep.mubr.f32.mxu0 %v2944_v2  ;;  %v2620_v24 = vsel %vm569_vm2, %v2615_v59, %v2619_v10  ;;  %v2950_v37 = vsel %vm1029_vm3, %v2945_v21, %v2949_v7  ;;  %v2953_v8 = vrot.slane %v2879_v57, 2 }
 0x12c   : > { %v934_v11 = vadd.f32 %v3741_v9, %v6350_v33  ;;  %v3742_v32 = vpop.f32.mrb[24].mxu1  ;;  %v2622_v33 = vsel %vm569_vm2, %v2617_v44, %v2621_v43  ;;  %v2958_v9 = vsel %vm1029_vm3, %v2956_v3, %v6469_v31 }
 0x12d   : > { %v3743_v4 = vpop.f32.mrb[25].mxu1  ;;  %2816 = vmatmul.mubr.f32.gmra.mrb[130].mxu1 %v2612_v45  ;;  %v3822_v41 = vpop.f32.mrb[24].mxu0 }
 0x12e   : > { %v6460_v26 = vadd.f32 %v3821_v6, %v934_v11  ;;  %v3744_v50 = vadd.f32 %v3743_v4, %v3742_v32  ;;  %v3823_v1 = vpop.f32.mrb[25].mxu0  ;;  %3146 = vmatmul.mubr.f32.gmra.mrb[130].mxu0 %v2942_v36  ;;  %2820 = vmatprep.mubr.f32.mxu1 %v2618_v16  ;;  %v2528_v11 = vld [vmem:[#allocation2 + $0x1d8] sm:$0x1] }
 0x12f   : > { %v3824_v0 = vadd.f32 %v3823_v1, %v3822_v41  ;;  %3150 = vmatprep.mubr.f32.mxu0 %v2948_v20  ;;  %v2881_v1 = vld [vmem:[#allocation2 + $0x1d0] sm:$0x3] }
 0x130   : > { %v939_v25 = vadd.f32 %v3744_v50, %v6360_v47  ;;  %v3745_v19 = vpop.f32.mrb[26].mxu1  ;;  %v2623_v47 = vrot.slane %v2519_v34, 1  ;;  %v2969_v50 = vrot.slane %v2882_v22, 2 }
 0x131   : > { %v3746_v39 = vpop.f32.mrb[27].mxu1  ;;  %2821 = vmatmul.mubr.f32.gmra.mrb[132].mxu1 %v2616_v61  ;;  %v3825_v51 = vpop.f32.mrb[26].mxu0  ;;  %v2639_v61 = vrot.slane %v2528_v11, 1 }
 0x132   : > { %v6471_v44 = vadd.f32 %v3824_v0, %v939_v25  ;;  %v3747_v23 = vadd.f32 %v3746_v39, %v3745_v19  ;;  %v3826_v5 = vpop.f32.mrb[27].mxu0  ;;  %3151 = vmatmul.mubr.f32.gmra.mrb[132].mxu0 %v2946_v53  ;;  %2825 = vmatprep.mubr.f32.mxu1 %v2622_v33  ;;  %v2625_v21 = vsel %vm569_vm2, %v2623_v47, %v6464_v12  ;;  %v2527_v53 = vld [vmem:[#allocation2 + $0x1d0] sm:$0x1]  ;;  %v2967_v19 = vrot.slane %v2881_v1, 2 }
 0x133   : > { %v3827_v2 = vadd.f32 %v3826_v5, %v3825_v51  ;;  %3155 = vmatprep.mubr.f32.mxu0 %v2952_v52  ;;  %v2637_v34 = vrot.slane %v2527_v53, 1  ;;  %v2970_v57 = vsel %vm1029_vm3, %v6469_v31, %v2969_v50 }
 0x134   : > { %v944_v29 = vadd.f32 %v3747_v23, %v6376_v27  ;;  %v3748_v14 = vpop.f32.mrb[28].mxu1  ;;  %v2955_v27 = vsel %vm1029_vm3, %v2953_v8, %v6469_v31 }
 0x135   : > { %v3749_v60 = vpop.f32.mrb[29].mxu1  ;;  %2826 = vmatmul.mubr.f32.gmra.mrb[134].mxu1 %v2620_v24  ;;  %v3828_v45 = vpop.f32.mrb[28].mxu0  ;;  %v2638_v47 = vsel %vm569_vm2, %v6464_v12, %v2637_v34 }
 0x136   : > { %v6480_v43 = vadd.f32 %v3827_v2, %v944_v29  ;;  %v3750_v59 = vadd.f32 %v3749_v60, %v3748_v14  ;;  %v3829_v6 = vpop.f32.mrb[29].mxu0  ;;  %3156 = vmatmul.mubr.f32.gmra.mrb[134].mxu0 %v2950_v37  ;;  %2830 = vmatprep.mubr.f32.mxu1 %v2628_v38 }
 0x137   : > { %v3830_v36 = vadd.f32 %v3829_v6, %v3828_v45  ;;  %3160 = vmatprep.mubr.f32.mxu0 %v2958_v9 }
 0x138   : > { %v949_v16 = vadd.f32 %v3750_v59, %v6391_v13  ;;  %v3751_v58 = vpop.f32.mrb[30].mxu1 }
 0x139   : > { %v3752_v32 = vpop.f32.mrb[31].mxu1  ;;  %2831 = vmatmul.mubr.f32.gmra.mrb[136].mxu1 %v2625_v21  ;;  %v3831_v20 = vpop.f32.mrb[30].mxu0 }
 0x13a   : > { %v6487_v63 = vadd.f32 %v3830_v36, %v949_v16  ;;  %v3753_v42 = vadd.f32 %v3752_v32, %v3751_v58  ;;  %v3832_v4 = vpop.f32.mrb[31].mxu0  ;;  %3161 = vmatmul.mubr.f32.gmra.mrb[136].mxu0 %v2955_v27  ;;  %2835 = vmatprep.mubr.f32.mxu1 %v6464_v12 }
 0x13b   : > { %v3833_v41 = vadd.f32 %v3832_v4, %v3831_v20  ;;  %3165 = vmatprep.mubr.f32.mxu0 %v6469_v31 }
 0x13c   : > { %v954_v13 = vadd.f32 %v3753_v42, %v6406_v30  ;;  %v3754_v54 = vpop.f32.mrb[32].mxu1  ;;  %v2640_v30 = vsel %vm569_vm2, %v6464_v12, %v2639_v61 }
 0x13d   : > { %v3755_v33 = vpop.f32.mrb[33].mxu1  ;;  %2836 = vmatmul.mubr.f32.gmra.mrb[138].mxu1 %v6464_v12  ;;  %v3834_v10 = vpop.f32.mrb[32].mxu0 }
 0x13e   : > { %v6493_v0 = vadd.f32 %v3833_v41, %v954_v13  ;;  %v3756_v7 = vadd.f32 %v3755_v33, %v3754_v54  ;;  %v3835_v40 = vpop.f32.mrb[33].mxu0  ;;  %3166 = vmatmul.mubr.f32.gmra.mrb[138].mxu0 %v6469_v31  ;;  %2840 = vmatprep.mubr.f32.mxu1 %v6464_v12 }
 0x13f   : > { %v3836_v25 = vadd.f32 %v3835_v40, %v3834_v10  ;;  %3170 = vmatprep.mubr.f32.mxu0 %v6469_v31 }
 0x140   : > { %v959_v52 = vadd.f32 %v3756_v7, %v6304_v49  ;;  %v3757_v3 = vpop.f32.mrb[34].mxu1  ;;  %v2968_v49 = vsel %vm1029_vm3, %v6469_v31, %v2967_v19 }
 0x141   : > { %v3758_v39 = vpop.f32.mrb[35].mxu1  ;;  %2841 = vmatmul.mubr.f32.gmra.mrb[140].mxu1 %v6464_v12  ;;  %v3837_v51 = vpop.f32.mrb[34].mxu0 }
 0x142   : > { %v6504_v23 = vadd.f32 %v3836_v25, %v959_v52  ;;  %v3759_v5 = vadd.f32 %v3758_v39, %v3757_v3  ;;  %v3838_v24 = vpop.f32.mrb[35].mxu0  ;;  %3171 = vmatmul.mubr.f32.gmra.mrb[140].mxu0 %v6469_v31  ;;  %2845 = vmatprep.mubr.f32.mxu1 %v2640_v30 }
 0x143   : > { %v3839_v2 = vadd.f32 %v3838_v24, %v3837_v51  ;;  %3175 = vmatprep.mubr.f32.mxu0 %v2970_v57 }
 0x144   : > { %v964_v37 = vadd.f32 %v3759_v5, %v6318_v56  ;;  %v3760_v38 = vpop.f32.mrb[36].mxu1 }
 0x145   : > { %v3761_v8 = vpop.f32.mrb[37].mxu1  ;;  %2846 = vmatmul.mubr.f32.gmra.mrb[142].mxu1 %v2638_v47  ;;  %v3840_v29 = vpop.f32.mrb[36].mxu0 }
 0x146   : > { %v6512_v14 = vadd.f32 %v3839_v2, %v964_v37  ;;  %v3762_v9 = vadd.f32 %v3761_v8, %v3760_v38  ;;  %v3841_v60 = vpop.f32.mrb[37].mxu0  ;;  %3176 = vmatmul.mubr.f32.gmra.mrb[142].mxu0 %v2968_v49 }
 0x147   : > { %v3842_v45 = vadd.f32 %v3841_v60, %v3840_v29 }
 0x148   : > { %v969_v59 = vadd.f32 %v3762_v9, %v6335_v48  ;;  %v3763_v12 = vpop.f32.mrb[38].mxu1 }
 0x149   : > { %v3764_v6 = vpop.f32.mrb[39].mxu1  ;;  %v3843_v21 = vpop.f32.mrb[38].mxu0 }
 0x14a   : > { %v6515_v36 = vadd.f32 %v3842_v45, %v969_v59  ;;  %v3765_v31 = vadd.f32 %v3764_v6, %v3763_v12  ;;  %v3844_v27 = vpop.f32.mrb[39].mxu0 }
 0x14b   : > { %v3845_v56 = vadd.f32 %v3844_v27, %v3843_v21 }
 0x14c   : > { %v974_v16 = vadd.f32 %v3765_v31, %v6348_v18  ;;  %v3766_v58 = vpop.f32.mrb[40].mxu1 }
 0x14d   : > { %v3767_v11 = vpop.f32.mrb[41].mxu1  ;;  %v3846_v32 = vpop.f32.mrb[40].mxu0 }
 0x14e   : > { %v6518_v20 = vadd.f32 %v3845_v56, %v974_v16  ;;  %v3768_v22 = vadd.f32 %v3767_v11, %v3766_v58  ;;  %v3847_v42 = vpop.f32.mrb[41].mxu0 }
 0x14f   : > { %v3848_v4 = vadd.f32 %v3847_v42, %v3846_v32 }
 0x150   : > { %v979_v48 = vadd.f32 %v3768_v22, %v6358_v55  ;;  %v3769_v41 = vpop.f32.mrb[42].mxu1 }
 0x151   : > { %v3770_v61 = vpop.f32.mrb[43].mxu1  ;;  %v3849_v53 = vpop.f32.mrb[42].mxu0 }
 0x152   : > { %v6521_v13 = vadd.f32 %v3848_v4, %v979_v48  ;;  %v3771_v54 = vadd.f32 %v3770_v61, %v3769_v41  ;;  %v3850_v50 = vpop.f32.mrb[43].mxu0 }
 0x153   : > { %v3851_v1 = vadd.f32 %v3850_v50, %v3849_v53 }
 0x154   : > { %v984_v18 = vadd.f32 %v3771_v54, %v6374_v46  ;;  %v3772_v33 = vpop.f32.mrb[44].mxu1 }
 0x155   : > { %v3773_v10 = vpop.f32.mrb[45].mxu1  ;;  %v3852_v7 = vpop.f32.mrb[44].mxu0 }
 0x156   : > { %v6524_v40 = vadd.f32 %v3851_v1, %v984_v18  ;;  %v3774_v34 = vadd.f32 %v3773_v10, %v3772_v33  ;;  %v3853_v25 = vpop.f32.mrb[45].mxu0 }
 0x157   : > { %v3854_v30 = vadd.f32 %v3853_v25, %v3852_v7 }
 0x158   : > { %v989_v55 = vadd.f32 %v3774_v34, %v6389_v15  ;;  %v3775_v19 = vpop.f32.mrb[46].mxu1 }
 0x159   : > { %v3776_v52 = vpop.f32.mrb[47].mxu1  ;;  %v3855_v3 = vpop.f32.mrb[46].mxu0 }
 0x15a   : > { %v6527_v57 = vadd.f32 %v3854_v30, %v989_v55  ;;  %v3777_v39 = vadd.f32 %v3776_v52, %v3775_v19  ;;  %v3856_v51 = vpop.f32.mrb[47].mxu0 }
 0x15b   : > { %v3857_v5 = vadd.f32 %v3856_v51, %v3855_v3 }
 0x15c   : > { %v994_v46 = vadd.f32 %v3777_v39, %v6404_v28  ;;  %v3890_v24 = vpop.f32.mrb[48].mxu1 }
 0x15d   : > { %v3891_v47 = vpop.f32.mrb[49].mxu1  ;;  %v3970_v2 = vpop.f32.mrb[48].mxu0 }
 0x15e   : > { %v6530_v49 = vadd.f32 %v3857_v5, %v994_v46  ;;  %v3892_v37 = vadd.f32 %v3891_v47, %v3890_v24  ;;  %v3971_v38 = vpop.f32.mrb[49].mxu0 }
 0x15f   : > { %v3972_v8 = vadd.f32 %v3971_v38, %v3970_v2 }
 0x160   : > { %v1538_v15 = vadd.f32 %v3892_v37, %v6427_v62  ;;  %v3893_v29 = vpop.f32.mrb[50].mxu1 }
 0x161   : > { %v3894_v9 = vpop.f32.mrb[51].mxu1  ;;  %v3973_v60 = vpop.f32.mrb[50].mxu0 }
 0x162   : > { %v6533_v45 = vadd.f32 %v3972_v8, %v1538_v15  ;;  %v3895_v59 = vadd.f32 %v3894_v9, %v3893_v29  ;;  %v3974_v12 = vpop.f32.mrb[51].mxu0 }
 0x163   : > { %v3975_v6 = vadd.f32 %v3974_v12, %v3973_v60 }
 0x164   : > { %v1539_v28 = vadd.f32 %v3895_v59, %v6439_v35  ;;  %v3896_v21 = vpop.f32.mrb[52].mxu1 }
 0x165   : > { %v3897_v31 = vpop.f32.mrb[53].mxu1  ;;  %v3976_v27 = vpop.f32.mrb[52].mxu0 }
 0x166   : > { %v6536_v56 = vadd.f32 %v3975_v6, %v1539_v28  ;;  %v3898_v16 = vadd.f32 %v3897_v31, %v3896_v21  ;;  %v3977_v58 = vpop.f32.mrb[53].mxu0 }
 0x167   : > { %v3978_v11 = vadd.f32 %v3977_v58, %v3976_v27 }
 0x168   : > { %v1540_v62 = vadd.f32 %v3898_v16, %v6451_v17  ;;  %v3899_v32 = vpop.f32.mrb[54].mxu1 }
 0x169   : > { %v3900_v22 = vpop.f32.mrb[55].mxu1  ;;  %v3979_v42 = vpop.f32.mrb[54].mxu0 }
 0x16a   : > { %v6539_v4 = vadd.f32 %v3978_v11, %v1540_v62  ;;  %v3901_v48 = vadd.f32 %v3900_v22, %v3899_v32  ;;  %v3980_v41 = vpop.f32.mrb[55].mxu0 }
 0x16b   : > { %v3981_v61 = vadd.f32 %v3980_v41, %v3979_v42 }
 0x16c   : > { %v1541_v35 = vadd.f32 %v3901_v48, %v6460_v26  ;;  %v3902_v53 = vpop.f32.mrb[56].mxu1 }
 0x16d   : > { %v3903_v54 = vpop.f32.mrb[57].mxu1  ;;  %v3982_v50 = vpop.f32.mrb[56].mxu0 }
 0x16e   : > { %v6542_v1 = vadd.f32 %v3981_v61, %v1541_v35  ;;  %v3904_v18 = vadd.f32 %v3903_v54, %v3902_v53  ;;  %v3983_v33 = vpop.f32.mrb[57].mxu0 }
 0x16f   : > { %v3984_v10 = vadd.f32 %v3983_v33, %v3982_v50 }
 0x170   : > { %v1542_v17 = vadd.f32 %v3904_v18, %v6471_v44  ;;  %v3905_v7 = vpop.f32.mrb[58].mxu1 }
 0x171   : > { %v3906_v34 = vpop.f32.mrb[59].mxu1  ;;  %v3985_v25 = vpop.f32.mrb[58].mxu0 }
 0x172   : > { %v6545_v30 = vadd.f32 %v3984_v10, %v1542_v17  ;;  %v3907_v55 = vadd.f32 %v3906_v34, %v3905_v7  ;;  %v3986_v19 = vpop.f32.mrb[59].mxu0 }
 0x173   : > { %v3987_v52 = vadd.f32 %v3986_v19, %v3985_v25 }
 0x174   : > { %v1543_v26 = vadd.f32 %v3907_v55, %v6480_v43  ;;  %v3908_v3 = vpop.f32.mrb[60].mxu1 }
 0x175   : > { %v3909_v39 = vpop.f32.mrb[61].mxu1  ;;  %v3988_v51 = vpop.f32.mrb[60].mxu0 }
 0x176   : > { %v6548_v5 = vadd.f32 %v3987_v52, %v1543_v26  ;;  %v3910_v46 = vadd.f32 %v3909_v39, %v3908_v3  ;;  %v3989_v24 = vpop.f32.mrb[61].mxu0 }
 0x177   : > { %v3990_v47 = vadd.f32 %v3989_v24, %v3988_v51 }
 0x178   : > { %v1544_v44 = vadd.f32 %v3910_v46, %v6487_v63  ;;  %v3911_v2 = vpop.f32.mrb[62].mxu1 }
 0x179   : > { %v3912_v37 = vpop.f32.mrb[63].mxu1  ;;  %v3991_v38 = vpop.f32.mrb[62].mxu0 }
 0x17a   : > { %v6551_v8 = vadd.f32 %v3990_v47, %v1544_v44  ;;  %v3913_v15 = vadd.f32 %v3912_v37, %v3911_v2  ;;  %v3992_v29 = vpop.f32.mrb[63].mxu0 }
 0x17b   : > { %v3993_v9 = vadd.f32 %v3992_v29, %v3991_v38 }
 0x17c   : > { %v1545_v43 = vadd.f32 %v3913_v15, %v6493_v0  ;;  %v3914_v60 = vpop.f32.mrb[64].mxu1 }
 0x17d   : > { %v3915_v59 = vpop.f32.mrb[65].mxu1  ;;  %v3994_v12 = vpop.f32.mrb[64].mxu0 }
 0x17e   : > { %v6554_v6 = vadd.f32 %v3993_v9, %v1545_v43  ;;  %v3916_v28 = vadd.f32 %v3915_v59, %v3914_v60  ;;  %v3995_v21 = vpop.f32.mrb[65].mxu0 }
 0x17f   : > { %v3996_v31 = vadd.f32 %v3995_v21, %v3994_v12 }
 0x180   : > { %v1546_v63 = vadd.f32 %v3916_v28, %v6504_v23  ;;  %v3917_v27 = vpop.f32.mrb[66].mxu1 }
 0x181   : > { %v3918_v16 = vpop.f32.mrb[67].mxu1  ;;  %v3997_v58 = vpop.f32.mrb[66].mxu0 }
 0x182   : > { %v6557_v11 = vadd.f32 %v3996_v31, %v1546_v63  ;;  %v3919_v62 = vadd.f32 %v3918_v16, %v3917_v27  ;;  %v3998_v32 = vpop.f32.mrb[67].mxu0 }
 0x183   : > { %v3999_v22 = vadd.f32 %v3998_v32, %v3997_v58 }
 0x184   : > { %v1547_v0 = vadd.f32 %v3919_v62, %v6512_v14  ;;  %v3920_v42 = vpop.f32.mrb[68].mxu1 }
 0x185   : > { %v3921_v48 = vpop.f32.mrb[69].mxu1  ;;  %v4000_v41 = vpop.f32.mrb[68].mxu0 }
 0x186   : > { %v6560_v61 = vadd.f32 %v3999_v22, %v1547_v0  ;;  %v3922_v35 = vadd.f32 %v3921_v48, %v3920_v42  ;;  %v4001_v53 = vpop.f32.mrb[69].mxu0 }
 0x187   : > { %v4002_v54 = vadd.f32 %v4001_v53, %v4000_v41 }
 0x188   : > { %v1548_v23 = vadd.f32 %v3922_v35, %v6515_v36  ;;  %v3923_v50 = vpop.f32.mrb[70].mxu1 }
 0x189   : > { %v3924_v18 = vpop.f32.mrb[71].mxu1  ;;  %v4003_v33 = vpop.f32.mrb[70].mxu0 }
 0x18a   : > { %v6563_v10 = vadd.f32 %v4002_v54, %v1548_v23  ;;  %v3925_v17 = vadd.f32 %v3924_v18, %v3923_v50  ;;  %v4004_v7 = vpop.f32.mrb[71].mxu0 }
 0x18b   : > { %v4005_v34 = vadd.f32 %v4004_v7, %v4003_v33 }
 0x18c   : > { %v1549_v14 = vadd.f32 %v3925_v17, %v6518_v20  ;;  %v3926_v25 = vpop.f32.mrb[72].mxu1 }
 0x18d   : > { %v3927_v55 = vpop.f32.mrb[73].mxu1  ;;  %v4006_v19 = vpop.f32.mrb[72].mxu0 }
 0x18e   : > { %v6566_v52 = vadd.f32 %v4005_v34, %v1549_v14  ;;  %v3928_v26 = vadd.f32 %v3927_v55, %v3926_v25  ;;  %v4007_v3 = vpop.f32.mrb[73].mxu0 }
 0x18f   : > { %v4008_v39 = vadd.f32 %v4007_v3, %v4006_v19 }
 0x190   : > { %v1550_v36 = vadd.f32 %v3928_v26, %v6521_v13  ;;  %v3929_v51 = vpop.f32.mrb[74].mxu1 }
 0x191   : > { %v3930_v46 = vpop.f32.mrb[75].mxu1  ;;  %v4009_v24 = vpop.f32.mrb[74].mxu0 }
 0x192   : > { %v6569_v47 = vadd.f32 %v4008_v39, %v1550_v36  ;;  %v3931_v44 = vadd.f32 %v3930_v46, %v3929_v51  ;;  %v4010_v2 = vpop.f32.mrb[75].mxu0 }
 0x193   : > { %v4011_v37 = vadd.f32 %v4010_v2, %v4009_v24 }
 0x194   : > { %v1551_v20 = vadd.f32 %v3931_v44, %v6524_v40  ;;  %v3932_v38 = vpop.f32.mrb[76].mxu1 }
 0x195   : > { %v3933_v15 = vpop.f32.mrb[77].mxu1  ;;  %v4012_v29 = vpop.f32.mrb[76].mxu0 }
 0x196   : > { %v6572_v9 = vadd.f32 %v4011_v37, %v1551_v20  ;;  %v3934_v43 = vadd.f32 %v3933_v15, %v3932_v38  ;;  %v4013_v60 = vpop.f32.mrb[77].mxu0 }
 0x197   : > { %v4014_v59 = vadd.f32 %v4013_v60, %v4012_v29 }
 0x198   : > { %v1552_v13 = vadd.f32 %v3934_v43, %v6527_v57  ;;  %v3935_v12 = vpop.f32.mrb[78].mxu1 }
 0x199   : > { %v3936_v28 = vpop.f32.mrb[79].mxu1  ;;  %v4015_v21 = vpop.f32.mrb[78].mxu0 }
 0x19a   : > { %v6575_v31 = vadd.f32 %v4014_v59, %v1552_v13  ;;  %v3937_v63 = vadd.f32 %v3936_v28, %v3935_v12  ;;  %v4016_v27 = vpop.f32.mrb[79].mxu0 }
 0x19b   : > { %v4017_v16 = vadd.f32 %v4016_v27, %v4015_v21 }
 0x19c   : > { %v1553_v40 = vadd.f32 %v3937_v63, %v6530_v49  ;;  %v4050_v58 = vpop.f32.mrb[80].mxu1 }
 0x19d   : > { %v4051_v62 = vpop.f32.mrb[81].mxu1  ;;  %v4130_v32 = vpop.f32.mrb[80].mxu0 }
 0x19e   : > { %v6578_v22 = vadd.f32 %v4017_v16, %v1553_v40  ;;  %v4052_v0 = vadd.f32 %v4051_v62, %v4050_v58  ;;  %v4131_v42 = vpop.f32.mrb[81].mxu0 }
 0x19f   : > { %v4132_v48 = vadd.f32 %v4131_v42, %v4130_v32 }
 0x1a0   : > { %v2246_v57 = vadd.f32 %v4052_v0, %v6533_v45  ;;  %v4053_v41 = vpop.f32.mrb[82].mxu1 }
 0x1a1   : > { %v4054_v35 = vpop.f32.mrb[83].mxu1  ;;  %v4133_v53 = vpop.f32.mrb[82].mxu0 }
 0x1a2   : > { %v6581_v54 = vadd.f32 %v4132_v48, %v2246_v57  ;;  %v4055_v23 = vadd.f32 %v4054_v35, %v4053_v41  ;;  %v4134_v50 = vpop.f32.mrb[83].mxu0 }
 0x1a3   : > { %v4135_v18 = vadd.f32 %v4134_v50, %v4133_v53 }
 0x1a4   : > { %v2247_v49 = vadd.f32 %v4055_v23, %v6536_v56  ;;  %v4056_v33 = vpop.f32.mrb[84].mxu1 }
 0x1a5   : > { %v4057_v17 = vpop.f32.mrb[85].mxu1  ;;  %v4136_v7 = vpop.f32.mrb[84].mxu0 }
 0x1a6   : > { %v6584_v34 = vadd.f32 %v4135_v18, %v2247_v49  ;;  %v4058_v14 = vadd.f32 %v4057_v17, %v4056_v33  ;;  %v4137_v25 = vpop.f32.mrb[85].mxu0 }
 0x1a7   : > { %v4138_v55 = vadd.f32 %v4137_v25, %v4136_v7 }
 0x1a8   : > { %v2248_v45 = vadd.f32 %v4058_v14, %v6539_v4  ;;  %v4059_v19 = vpop.f32.mrb[86].mxu1 }
 0x1a9   : > { %v4060_v26 = vpop.f32.mrb[87].mxu1  ;;  %v4139_v3 = vpop.f32.mrb[86].mxu0 }
 0x1aa   : > { %v6587_v39 = vadd.f32 %v4138_v55, %v2248_v45  ;;  %v4061_v36 = vadd.f32 %v4060_v26, %v4059_v19  ;;  %v4140_v51 = vpop.f32.mrb[87].mxu0 }
 0x1ab   : > { %v4141_v46 = vadd.f32 %v4140_v51, %v4139_v3 }
 0x1ac   : > { %v2249_v56 = vadd.f32 %v4061_v36, %v6542_v1  ;;  %v4062_v24 = vpop.f32.mrb[88].mxu1 }
 0x1ad   : > { %v4063_v44 = vpop.f32.mrb[89].mxu1  ;;  %v4142_v2 = vpop.f32.mrb[88].mxu0 }
 0x1ae   : > { %v6590_v37 = vadd.f32 %v4141_v46, %v2249_v56  ;;  %v4064_v20 = vadd.f32 %v4063_v44, %v4062_v24  ;;  %v4143_v38 = vpop.f32.mrb[89].mxu0 }
 0x1af   : > { %v4144_v15 = vadd.f32 %v4143_v38, %v4142_v2 }
 0x1b0   : > { %v2250_v4 = vadd.f32 %v4064_v20, %v6545_v30  ;;  %v4065_v29 = vpop.f32.mrb[90].mxu1 }
 0x1b1   : > { %v4066_v43 = vpop.f32.mrb[91].mxu1  ;;  %v4145_v60 = vpop.f32.mrb[90].mxu0 }
 0x1b2   : > { %v6593_v59 = vadd.f32 %v4144_v15, %v2250_v4  ;;  %v4067_v13 = vadd.f32 %v4066_v43, %v4065_v29  ;;  %v4146_v12 = vpop.f32.mrb[91].mxu0 }
 0x1b3   : > { %v4147_v28 = vadd.f32 %v4146_v12, %v4145_v60 }
 0x1b4   : > { %v2251_v1 = vadd.f32 %v4067_v13, %v6548_v5  ;;  %v4068_v21 = vpop.f32.mrb[92].mxu1 }
 0x1b5   : > { %v4069_v63 = vpop.f32.mrb[93].mxu1  ;;  %v4148_v27 = vpop.f32.mrb[92].mxu0 }
 0x1b6   : > { %v6596_v16 = vadd.f32 %v4147_v28, %v2251_v1  ;;  %v4070_v40 = vadd.f32 %v4069_v63, %v4068_v21  ;;  %v4149_v58 = vpop.f32.mrb[93].mxu0 }
 0x1b7   : > { %v4150_v62 = vadd.f32 %v4149_v58, %v4148_v27 }
 0x1b8   : > { %v2252_v30 = vadd.f32 %v4070_v40, %v6551_v8  ;;  %v4071_v32 = vpop.f32.mrb[94].mxu1 }
 0x1b9   : > { %v4072_v0 = vpop.f32.mrb[95].mxu1  ;;  %v4151_v42 = vpop.f32.mrb[94].mxu0 }
 0x1ba   : > { %v6599_v48 = vadd.f32 %v4150_v62, %v2252_v30  ;;  %v4073_v57 = vadd.f32 %v4072_v0, %v4071_v32  ;;  %v4152_v41 = vpop.f32.mrb[95].mxu0 }
 0x1bb   : > { %v4153_v35 = vadd.f32 %v4152_v41, %v4151_v42 }
 0x1bc   : > { %v2253_v5 = vadd.f32 %v4073_v57, %v6554_v6  ;;  %v4074_v53 = vpop.f32.mrb[96].mxu1 }
 0x1bd   : > { %v4075_v23 = vpop.f32.mrb[97].mxu1  ;;  %v4154_v50 = vpop.f32.mrb[96].mxu0 }
 0x1be   : > { %v6602_v18 = vadd.f32 %v4153_v35, %v2253_v5  ;;  %v4076_v49 = vadd.f32 %v4075_v23, %v4074_v53  ;;  %v4155_v33 = vpop.f32.mrb[97].mxu0 }
 0x1bf   : > { %v4156_v17 = vadd.f32 %v4155_v33, %v4154_v50 }
 0x1c0   : > { %v2254_v8 = vadd.f32 %v4076_v49, %v6557_v11  ;;  %v4077_v7 = vpop.f32.mrb[98].mxu1 }
 0x1c1   : > { %v4078_v14 = vpop.f32.mrb[99].mxu1  ;;  %v4157_v25 = vpop.f32.mrb[98].mxu0 }
 0x1c2   : > { %v6605_v55 = vadd.f32 %v4156_v17, %v2254_v8  ;;  %v4079_v45 = vadd.f32 %v4078_v14, %v4077_v7  ;;  %v4158_v19 = vpop.f32.mrb[99].mxu0 }
 0x1c3   : > { %v4159_v26 = vadd.f32 %v4158_v19, %v4157_v25 }
 0x1c4   : > { %v2255_v6 = vadd.f32 %v4079_v45, %v6560_v61  ;;  %v4080_v3 = vpop.f32.mrb[100].mxu1 }
 0x1c5   : > { %v4081_v36 = vpop.f32.mrb[101].mxu1  ;;  %v4160_v51 = vpop.f32.mrb[100].mxu0 }
 0x1c6   : > { %v6608_v46 = vadd.f32 %v4159_v26, %v2255_v6  ;;  %v4082_v56 = vadd.f32 %v4081_v36, %v4080_v3  ;;  %v4161_v24 = vpop.f32.mrb[101].mxu0 }
 0x1c7   : > { %v4162_v44 = vadd.f32 %v4161_v24, %v4160_v51 }
 0x1c8   : > { %v2256_v11 = vadd.f32 %v4082_v56, %v6563_v10  ;;  %v4083_v2 = vpop.f32.mrb[102].mxu1  ;;  %v6632_v56 = vld [vmem:[%s6710_s2] ss:$0 sm:$0xff] }
 0x1c9   : > { %v4084_v20 = vpop.f32.mrb[103].mxu1  ;;  %v4163_v38 = vpop.f32.mrb[102].mxu0 }
 0x1ca   : > { %v6611_v15 = vadd.f32 %v4162_v44, %v2256_v11  ;;  %v4085_v4 = vadd.f32 %v4084_v20, %v4083_v2  ;;  %v4164_v29 = vpop.f32.mrb[103].mxu0  ;;  %v6635_v20 = vstv %s3220_s9 }
 0x1cb   : > { %v4165_v43 = vadd.f32 %v4164_v29, %v4163_v38 }
 0x1cc   : > { %v2257_v61 = vadd.f32 %v4085_v4, %v6566_v52  ;;  %v4086_v60 = vpop.f32.mrb[104].mxu1 }
 0x1cd   : > { %v4087_v13 = vpop.f32.mrb[105].mxu1  ;;  %v4166_v12 = vpop.f32.mrb[104].mxu0 }
 0x1ce   : > { %v6614_v28 = vadd.f32 %v4165_v43, %v2257_v61  ;;  %v4088_v1 = vadd.f32 %v4087_v13, %v4086_v60  ;;  %v4167_v21 = vpop.f32.mrb[105].mxu0 }
 0x1cf   : > { %v4168_v63 = vadd.f32 %v4167_v21, %v4166_v12 }
 0x1d0   : > { %v2258_v10 = vadd.f32 %v4088_v1, %v6569_v47  ;;  %v4089_v27 = vpop.f32.mrb[106].mxu1 }
 0x1d1   : > { %v4090_v40 = vpop.f32.mrb[107].mxu1  ;;  %v4169_v58 = vpop.f32.mrb[106].mxu0 }
 0x1d2   : > { %v6617_v62 = vadd.f32 %v4168_v63, %v2258_v10  ;;  %v4091_v30 = vadd.f32 %v4090_v40, %v4089_v27  ;;  %v4170_v32 = vpop.f32.mrb[107].mxu0 }
 0x1d3   : > { %v4171_v0 = vadd.f32 %v4170_v32, %v4169_v58 }
 0x1d4   : > { %v2259_v52 = vadd.f32 %v4091_v30, %v6572_v9  ;;  %v4092_v42 = vpop.f32.mrb[108].mxu1 }
 0x1d5   : > { %v4093_v57 = vpop.f32.mrb[109].mxu1  ;;  %v4172_v41 = vpop.f32.mrb[108].mxu0 }
 0x1d6   : > { %v6620_v35 = vadd.f32 %v4171_v0, %v2259_v52  ;;  %v4094_v5 = vadd.f32 %v4093_v57, %v4092_v42  ;;  %v4173_v53 = vpop.f32.mrb[109].mxu0 }
 0x1d7   : > { %v4174_v23 = vadd.f32 %v4173_v53, %v4172_v41 }
 0x1d8   : > { %v2260_v47 = vadd.f32 %v4094_v5, %v6575_v31  ;;  %v4095_v50 = vpop.f32.mrb[110].mxu1 }
 0x1d9   : > { %v4096_v49 = vpop.f32.mrb[111].mxu1  ;;  %v4175_v33 = vpop.f32.mrb[110].mxu0 }
 0x1da   : > { %v6623_v17 = vadd.f32 %v4174_v23, %v2260_v47  ;;  %v4097_v8 = vadd.f32 %v4096_v49, %v4095_v50  ;;  %v4176_v7 = vpop.f32.mrb[111].mxu0 }
 0x1db   : > { %v4177_v14 = vadd.f32 %v4176_v7, %v4175_v33 }
 0x1dc   : > { %v2261_v9 = vadd.f32 %v4097_v8, %v6578_v22  ;;  %v4210_v25 = vpop.f32.mrb[112].mxu1 }
 0x1dd   : > { %v4211_v45 = vpop.f32.mrb[113].mxu1  ;;  %v4290_v19 = vpop.f32.mrb[112].mxu0 }
 0x1de   : > { %v6626_v26 = vadd.f32 %v4177_v14, %v2261_v9  ;;  %v4212_v6 = vadd.f32 %v4211_v45, %v4210_v25  ;;  %v4291_v3 = vpop.f32.mrb[113].mxu0 }
 0x1df   : > { %v4292_v31 = vadd.f32 %v4291_v3, %v4290_v19 }
 0x1e0   : > { %v2851_v36 = vadd.f32 %v4212_v6, %v6581_v54  ;;  %v4213_v51 = vpop.f32.mrb[114].mxu1 }
 0x1e1   : > { %v4214_v24 = vpop.f32.mrb[115].mxu1  ;;  %v4293_v44 = vpop.f32.mrb[114].mxu0 }
 0x1e2   : > { %v3181_v22 = vadd.f32 %v4292_v31, %v2851_v36  ;;  %v4215_v11 = vadd.f32 %v4214_v24, %v4213_v51  ;;  %v4294_v2 = vpop.f32.mrb[115].mxu0 }
 0x1e3   : > { %v4295_v38 = vadd.f32 %v4294_v2, %v4293_v44 }
 0x1e4   : > { %v3204_v4 = vadd.f32 %v6632_v56, %v3181_v22  ;;  %v2852_v29 = vadd.f32 %v4215_v11, %v6584_v34  ;;  %v4216_v54 = vpop.f32.mrb[116].mxu1 }
 0x1e5   : > { %v4217_v43 = vpop.f32.mrb[117].mxu1  ;;  %v4296_v61 = vpop.f32.mrb[116].mxu0 }
 0x1e6   : > { %vm3221_vm4 = vcmp.ge.f32.partialorder %v3204_v4, 0.0  ;;  %v3238_v60 = vmul.f32 %v6635_v20, %v3204_v4  ;;  %v3182_v13 = vadd.f32 %v4295_v38, %v2852_v29  ;;  %v4218_v12 = vadd.f32 %v4217_v43, %v4216_v54  ;;  %v4297_v1 = vpop.f32.mrb[117].mxu0 }
 0x1e7   : > { %v4298_v21 = vadd.f32 %v4297_v1, %v4296_v61 }
 0x1e8   : > { %v3254_v63 = vsel %vm3221_vm4, %v3204_v4, %v3238_v60  ;;  %v3205_v10 = vadd.f32 %v6632_v56, %v3182_v13  ;;  %v2853_v34 = vadd.f32 %v4218_v12, %v6587_v39  ;;  %v4219_v27 = vpop.f32.mrb[118].mxu1 }
 0x1e9   : > { %3270 = vst [vmem:[%s6642_s14] sm:$0xff] %v3254_v63  ;;  %v4220_v40 = vpop.f32.mrb[119].mxu1  ;;  %v4299_v58 = vpop.f32.mrb[118].mxu0 }
 0x1ea   : > { %vm3222_vm5 = vcmp.ge.f32.partialorder %v3205_v10, 0.0  ;;  %v3239_v30 = vmul.f32 %v6635_v20, %v3205_v10  ;;  %v3183_v32 = vadd.f32 %v4298_v21, %v2853_v34  ;;  %v4221_v0 = vadd.f32 %v4220_v40, %v4219_v27  ;;  %v4300_v52 = vpop.f32.mrb[119].mxu0 }
 0x1eb   : > { %v4301_v42 = vadd.f32 %v4300_v52, %v4299_v58 }
 0x1ec   : > { %v3255_v57 = vsel %vm3222_vm5, %v3205_v10, %v3239_v30  ;;  %v3206_v41 = vadd.f32 %v6632_v56, %v3183_v32  ;;  %v2854_v5 = vadd.f32 %v4221_v0, %v6590_v37  ;;  %v4222_v53 = vpop.f32.mrb[120].mxu1 }
 0x1ed   : > { %3271 = vst [vmem:[%s6642_s14 + $0x8] sm:$0xff] %v3255_v57  ;;  %v4223_v39 = vpop.f32.mrb[121].mxu1  ;;  %v4302_v23 = vpop.f32.mrb[120].mxu0 }
 0x1ee   : > { %vm3223_vm6 = vcmp.ge.f32.partialorder %v3206_v41, 0.0  ;;  %v3240_v47 = vmul.f32 %v6635_v20, %v3206_v41  ;;  %v3184_v50 = vadd.f32 %v4301_v42, %v2854_v5  ;;  %v4224_v49 = vadd.f32 %v4223_v39, %v4222_v53  ;;  %v4303_v33 = vpop.f32.mrb[121].mxu0 }
 0x1ef   : > { %v4304_v8 = vadd.f32 %v4303_v33, %v4302_v23 }
 0x1f0   : > { %v3256_v7 = vsel %vm3223_vm6, %v3206_v41, %v3240_v47  ;;  %v3207_v14 = vadd.f32 %v6632_v56, %v3184_v50  ;;  %v2855_v9 = vadd.f32 %v4224_v49, %v6593_v59  ;;  %v4225_v25 = vpop.f32.mrb[122].mxu1 }
 0x1f1   : > { %3272 = vst [vmem:[%s6642_s14 + $0x10] sm:$0xff] %v3256_v7  ;;  %v4226_v37 = vpop.f32.mrb[123].mxu1  ;;  %v4305_v45 = vpop.f32.mrb[122].mxu0 }
 0x1f2   : > { %vm3224_vm7 = vcmp.ge.f32.partialorder %v3207_v14, 0.0  ;;  %v3241_v19 = vmul.f32 %v6635_v20, %v3207_v14  ;;  %v3185_v6 = vadd.f32 %v4304_v8, %v2855_v9  ;;  %v4227_v3 = vadd.f32 %v4226_v37, %v4225_v25  ;;  %v4306_v31 = vpop.f32.mrb[123].mxu0 }
 0x1f3   : > { %v4307_v36 = vadd.f32 %v4306_v31, %v4305_v45 }
 0x1f4   : > { %v3257_v51 = vsel %vm3224_vm7, %v3207_v14, %v3241_v19  ;;  %v3208_v24 = vadd.f32 %v6632_v56, %v3185_v6  ;;  %v2856_v44 = vadd.f32 %v4227_v3, %v6596_v16  ;;  %v4228_v22 = vpop.f32.mrb[124].mxu1 }
 0x1f5   : > { %3273 = vst [vmem:[%s6642_s14 + $0x18] sm:$0xff] %v3257_v51  ;;  %v4229_v59 = vpop.f32.mrb[125].mxu1  ;;  %v4308_v11 = vpop.f32.mrb[124].mxu0 }
 0x1f6   : > { %vm3225_vm8 = vcmp.ge.f32.partialorder %v3208_v24, 0.0  ;;  %v3242_v2 = vmul.f32 %v6635_v20, %v3208_v24  ;;  %v3186_v38 = vadd.f32 %v4307_v36, %v2856_v44  ;;  %v4230_v4 = vadd.f32 %v4229_v59, %v4228_v22  ;;  %v4309_v29 = vpop.f32.mrb[125].mxu0 }
 0x1f7   : > { %v4310_v54 = vadd.f32 %v4309_v29, %v4308_v11 }
 0x1f8   : > { %v3258_v43 = vsel %vm3225_vm8, %v3208_v24, %v3242_v2  ;;  %v3209_v61 = vadd.f32 %v6632_v56, %v3186_v38  ;;  %v2857_v60 = vadd.f32 %v4230_v4, %v6599_v48  ;;  %v4231_v13 = vpop.f32.mrb[126].mxu1 }
 0x1f9   : > { %3274 = vst [vmem:[%s6642_s14 + $0x20] sm:$0xff] %v3258_v43  ;;  %v4232_v16 = vpop.f32.mrb[127].mxu1  ;;  %v4311_v12 = vpop.f32.mrb[126].mxu0 }
 0x1fa   : > { %vm3226_vm9 = vcmp.ge.f32.partialorder %v3209_v61, 0.0  ;;  %v3243_v1 = vmul.f32 %v6635_v20, %v3209_v61  ;;  %v3187_v21 = vadd.f32 %v4310_v54, %v2857_v60  ;;  %v4233_v63 = vadd.f32 %v4232_v16, %v4231_v13  ;;  %v4312_v10 = vpop.f32.mrb[127].mxu0 }
 0x1fb   : > { %v4313_v34 = vadd.f32 %v4312_v10, %v4311_v12 }
 0x1fc   : > { %v3259_v27 = vsel %vm3226_vm9, %v3209_v61, %v3243_v1  ;;  %v3210_v40 = vadd.f32 %v6632_v56, %v3187_v21  ;;  %v2858_v58 = vadd.f32 %v4233_v63, %v6602_v18  ;;  %v4234_v30 = vpop.f32.mrb[128].mxu1 }
 0x1fd   : > { %3275 = vst [vmem:[%s6642_s14 + $0x28] sm:$0xff] %v3259_v27  ;;  %v4235_v48 = vpop.f32.mrb[129].mxu1  ;;  %v4314_v32 = vpop.f32.mrb[128].mxu0 }
 0x1fe   : > { %vm3227_vm10 = vcmp.ge.f32.partialorder %v3210_v40, 0.0  ;;  %v3244_v0 = vmul.f32 %v6635_v20, %v3210_v40  ;;  %v3188_v52 = vadd.f32 %v4313_v34, %v2858_v58  ;;  %v4236_v42 = vadd.f32 %v4235_v48, %v4234_v30  ;;  %v4315_v57 = vpop.f32.mrb[129].mxu0 }
 0x1ff   : > { %v4316_v41 = vadd.f32 %v4315_v57, %v4314_v32 }
 0x200   : > { %v3260_v5 = vsel %vm3227_vm10, %v3210_v40, %v3244_v0  ;;  %v3211_v53 = vadd.f32 %v6632_v56, %v3188_v52  ;;  %v2859_v39 = vadd.f32 %v4236_v42, %v6605_v55  ;;  %v4237_v23 = vpop.f32.mrb[130].mxu1 }
 0x201   : > { %3276 = vst [vmem:[%s6642_s14 + $0x30] sm:$0xff] %v3260_v5  ;;  %v4238_v18 = vpop.f32.mrb[131].mxu1  ;;  %v4317_v47 = vpop.f32.mrb[130].mxu0 }
 0x202   : > { %vm3228_vm11 = vcmp.ge.f32.partialorder %v3211_v53, 0.0  ;;  %v3245_v50 = vmul.f32 %v6635_v20, %v3211_v53  ;;  %v3189_v49 = vadd.f32 %v4316_v41, %v2859_v39  ;;  %v4239_v33 = vadd.f32 %v4238_v18, %v4237_v23  ;;  %v4318_v8 = vpop.f32.mrb[131].mxu0 }
 0x203   : > { %v4319_v7 = vadd.f32 %v4318_v8, %v4317_v47 }
 0x204   : > { %v3261_v14 = vsel %vm3228_vm11, %v3211_v53, %v3245_v50  ;;  %v3212_v9 = vadd.f32 %v6632_v56, %v3189_v49  ;;  %v2860_v25 = vadd.f32 %v4239_v33, %v6608_v46  ;;  %v4240_v37 = vpop.f32.mrb[132].mxu1 }
 0x205   : > { %3277 = vst [vmem:[%s6642_s14 + $0x38] sm:$0xff] %v3261_v14  ;;  %v4241_v55 = vpop.f32.mrb[133].mxu1  ;;  %v4320_v45 = vpop.f32.mrb[132].mxu0 }
 0x206   : > { %vm3229_vm12 = vcmp.ge.f32.partialorder %v3212_v9, 0.0  ;;  %v3246_v19 = vmul.f32 %v6635_v20, %v3212_v9  ;;  %v3190_v6 = vadd.f32 %v4319_v7, %v2860_v25  ;;  %v4242_v3 = vadd.f32 %v4241_v55, %v4240_v37  ;;  %v4321_v31 = vpop.f32.mrb[133].mxu0 }
 0x207   : > { %v4322_v36 = vadd.f32 %v4321_v31, %v4320_v45 }
 0x208   : > { %v3262_v51 = vsel %vm3229_vm12, %v3212_v9, %v3246_v19  ;;  %v3213_v24 = vadd.f32 %v6632_v56, %v3190_v6  ;;  %v2861_v44 = vadd.f32 %v4242_v3, %v6611_v15  ;;  %v4243_v22 = vpop.f32.mrb[134].mxu1 }
 0x209   : > { %3278 = vst [vmem:[%s6642_s14 + $0x40] sm:$0xff] %v3262_v51  ;;  %v4244_v46 = vpop.f32.mrb[135].mxu1  ;;  %v4323_v59 = vpop.f32.mrb[134].mxu0 }
 0x20a   : > { %vm3230_vm13 = vcmp.ge.f32.partialorder %v3213_v24, 0.0  ;;  %v3247_v11 = vmul.f32 %v6635_v20, %v3213_v24  ;;  %v3191_v2 = vadd.f32 %v4322_v36, %v2861_v44  ;;  %v4245_v38 = vadd.f32 %v4244_v46, %v4243_v22  ;;  %v4324_v4 = vpop.f32.mrb[135].mxu0 }
 0x20b   : > { %v4325_v29 = vadd.f32 %v4324_v4, %v4323_v59 }
 0x20c   : > { %v3263_v54 = vsel %vm3230_vm13, %v3213_v24, %v3247_v11  ;;  %v3214_v43 = vadd.f32 %v6632_v56, %v3191_v2  ;;  %v2862_v61 = vadd.f32 %v4245_v38, %v6614_v28  ;;  %v4246_v60 = vpop.f32.mrb[136].mxu1 }
 0x20d   : > { %3279 = vst [vmem:[%s6642_s14 + $0x48] sm:$0xff] %v3263_v54  ;;  %v4247_v15 = vpop.f32.mrb[137].mxu1  ;;  %v4326_v13 = vpop.f32.mrb[136].mxu0 }
 0x20e   : > { %vm3231_vm14 = vcmp.ge.f32.partialorder %v3214_v43, 0.0  ;;  %v3248_v16 = vmul.f32 %v6635_v20, %v3214_v43  ;;  %v3192_v12 = vadd.f32 %v4325_v29, %v2862_v61  ;;  %v4248_v1 = vadd.f32 %v4247_v15, %v4246_v60  ;;  %v4327_v21 = vpop.f32.mrb[137].mxu0 }
 0x20f   : > { %v4328_v63 = vadd.f32 %v4327_v21, %v4326_v13 }
 0x210   : > { %v3264_v10 = vsel %vm3231_vm14, %v3214_v43, %v3248_v16  ;;  %v3215_v34 = vadd.f32 %v6632_v56, %v3192_v12  ;;  %v2863_v27 = vadd.f32 %v4248_v1, %v6617_v62  ;;  %v4249_v40 = vpop.f32.mrb[138].mxu1 }
 0x211   : > { %3280 = vst [vmem:[%s6642_s14 + $0x50] sm:$0xff] %v3264_v10  ;;  %v4250_v28 = vpop.f32.mrb[139].mxu1  ;;  %v4329_v58 = vpop.f32.mrb[138].mxu0 }
 0x212   : > { %vm3232_vm15 = vcmp.ge.f32.partialorder %v3215_v34, 0.0  ;;  %v3249_v30 = vmul.f32 %v6635_v20, %v3215_v34  ;;  %v3193_v48 = vadd.f32 %v4328_v63, %v2863_v27  ;;  %v4251_v32 = vadd.f32 %v4250_v28, %v4249_v40  ;;  %v4330_v0 = vpop.f32.mrb[139].mxu0 }
 0x213   : > { %v4331_v52 = vadd.f32 %v4330_v0, %v4329_v58 }
 0x214   : > { %v3265_v42 = vsel %vm3232_vm15, %v3215_v34, %v3249_v30  ;;  %v3216_v57 = vadd.f32 %v6632_v56, %v3193_v48  ;;  %v2864_v41 = vadd.f32 %v4251_v32, %v6620_v35  ;;  %v4252_v5 = vpop.f32.mrb[140].mxu1 }
 0x215   : > { %3281 = vst [vmem:[%s6642_s14 + $0x58] sm:$0xff] %v3265_v42  ;;  %v4253_v62 = vpop.f32.mrb[141].mxu1  ;;  %v4332_v53 = vpop.f32.mrb[140].mxu0 }
 0x216   : > { %vm3233_vm0 = vcmp.ge.f32.partialorder %v3216_v57, 0.0  ;;  %v3250_v39 = vmul.f32 %v6635_v20, %v3216_v57  ;;  %v3194_v23 = vadd.f32 %v4331_v52, %v2864_v41  ;;  %v4254_v18 = vadd.f32 %v4253_v62, %v4252_v5  ;;  %v4333_v47 = vpop.f32.mrb[141].mxu0 }
 0x217   : > { %v4334_v50 = vadd.f32 %v4333_v47, %v4332_v53 }
 0x218   : > { %v3266_v49 = vsel %vm3233_vm0, %v3216_v57, %v3250_v39  ;;  %v3217_v33 = vadd.f32 %v6632_v56, %v3194_v23  ;;  %v2865_v8 = vadd.f32 %v4254_v18, %v6623_v17  ;;  %v4255_v7 = vpop.f32.mrb[142].mxu1 }
 0x219   : > { %3282 = vst [vmem:[%s6642_s14 + $0x60] sm:$0xff] %v3266_v49  ;;  %v4256_v35 = vpop.f32.mrb[143].mxu1  ;;  %v4335_v14 = vpop.f32.mrb[142].mxu0 }
 0x21a   : > { %vm3234_vm1 = vcmp.ge.f32.partialorder %v3217_v33, 0.0  ;;  %v3251_v9 = vmul.f32 %v6635_v20, %v3217_v33  ;;  %v3195_v25 = vadd.f32 %v4334_v50, %v2865_v8  ;;  %v4257_v37 = vadd.f32 %v4256_v35, %v4255_v7  ;;  %v4336_v55 = vpop.f32.mrb[143].mxu0 }
 0x21b   : > { %v4337_v45 = vadd.f32 %v4336_v55, %v4335_v14 }
 0x21c   : > { %v3267_v19 = vsel %vm3234_vm1, %v3217_v33, %v3251_v9  ;;  %v3218_v6 = vadd.f32 %v6632_v56, %v3195_v25  ;;  %v2866_v3 = vadd.f32 %v4257_v37, %v6626_v26 }
 0x21d   : > { %3283 = vst [vmem:[%s6642_s14 + $0x68] sm:$0xff] %v3267_v19 }
 0x21e   : > { %vm3235_vm2 = vcmp.ge.f32.partialorder %v3218_v6, 0.0  ;;  %v3252_v17 = vmul.f32 %v6635_v20, %v3218_v6  ;;  %v3196_v31 = vadd.f32 %v4337_v45, %v2866_v3 }
 0x220   : > { %v3268_v36 = vsel %vm3235_vm2, %v3218_v6, %v3252_v17  ;;  %v3219_v51 = vadd.f32 %v6632_v56, %v3196_v31 }
 0x221   : > { %3284 = vst [vmem:[%s6642_s14 + $0x70] sm:$0xff] %v3268_v36 }
 0x222   : > { %vm3236_vm3 = vcmp.ge.f32.partialorder %v3219_v51, 0.0  ;;  %v3253_v24 = vmul.f32 %v6635_v20, %v3219_v51 }
 0x224   : > { %v3269_v44 = vsel %vm3236_vm3, %v3219_v51, %v3253_v24 }
 0x225   : > { %3285 = vst [vmem:[%s6642_s14 + $0x78] sm:$0xff] %v3269_v44 }
 0x226 PF: > { %s15_s17 = sadd.s32 1, %s4679_s17  }
 0x227   : > { %p12_p4 = scmp.ge.s32.totalorder %s15_s17, 4  }
 0x229   :  { %14 = sbr.rel (!%p12_p4) target bundleno = 2 (0x2), region = 84 }

</bundles_post_ra>
